<compile_context>
chip_gen: v5e
topology: v5e:2x2
jax: 0.10.0
libtpu: 0.0.40
codegen_flags: <defaults>
</compile_context>

<pallas_src>
import functools

import jax
import jax.numpy as jnp
from jax.experimental import pallas as pl
from jax.experimental.pallas import tpu as pltpu

BN_EPS = 1e-5  # torch.nn.BatchNorm2d default


def _conv_stack_kernel(xw_ref, w1_ref, sh1_ref, w2_ref, sh2_ref, w3_ref, sh3_ref,
                       wf_ref, bf_ref, o_ref, pad2_ref, pad3_ref,
                       *, T, F, Tt, c1, c2):
    """Fused ConvStack forward for one (batch, time-tile) grid step (eval mode)."""
    F2, F4 = F // 2, F // 4
    Wa, Wp = Tt + 4, Tt + 2                 # a1 / p2 time-window widths (halo recompute)
    Dout = wf_ref.shape[2]
    t0 = pl.program_id(1) * Tt              # first output frame of this tile

    def time_mask(vals, start_off):
        # Zero columns whose global frame falls outside [0, T): those frames are
        # the NEXT conv's SAME zero padding (not conv applied to a zero input).
        width = vals.shape[1]
        g = jax.lax.broadcasted_iota(jnp.int32, (1, width, 1), 1) + (t0 + start_off)
        return jnp.where(jnp.logical_and(g >= 0, g < T), vals, 0.0)

    # ---- conv1 (Cin=1, BN scale folded into w1) + shift + ReLU ----------------
    # 9 VPU broadcast-MACs; negligible next to conv2/conv3 (c1x fewer MACs).
    xw = xw_ref[...]                                          # (F+2, Tt+6) f32
    a1 = jnp.zeros((F, Wa, c1), jnp.float32)
    for ky in range(3):                                       # frequency tap
        for kx in range(3):                                   # time tap
            a1 = a1 + xw[ky:ky + F, kx:kx + Wa][:, :, None] * w1_ref[kx, ky]
    a1 = jnp.maximum(a1 + sh1_ref[...], 0.0)
    a1 = time_mask(a1, -2)                                    # frames [t0-2, t0+Tt+2)

    # stream into conv2's padded scratch; only the 2 freq-halo rows are zeroed
    pad2_ref[0:1, :, :] = jnp.zeros((1, Wa, c1), jnp.float32)
    pad2_ref[F + 1:F + 2, :, :] = jnp.zeros((1, Wa, c1), jnp.float32)
    pad2_ref[1:F + 1, :, :] = a1

    # ---- conv2 + shift + ReLU + MaxPool(1,2): 9 accumulating bf16 MXU dots ----
    m2 = F * Wp
    acc2 = jnp.zeros((m2, c1), jnp.float32)
    for ky in range(3):
        for kx in range(3):
            lhs = pad2_ref[ky:ky + F, kx:kx + Wp, :].reshape(m2, c1)
            acc2 = acc2 + jnp.dot(lhs.astype(jnp.bfloat16), w2_ref[ky * 3 + kx],
                                  preferred_element_type=jnp.float32)
    a2 = jnp.maximum(acc2 + sh2_ref[...], 0.0)
    # Rows are strictly freq-major with stride Wp, so the (F2, 2*Wp) split below
    # pools adjacent frequency pairs. Do NOT change the row order above.
    a2 = a2.reshape(F2, 2 * Wp, c1)
    p2 = jnp.maximum(a2[:, :Wp, :], a2[:, Wp:, :])            # (F2, Wp, c1)
    p2 = time_mask(p2, -1)                                    # frames [t0-1, t0+Tt+1)

    pad3_ref[0:1, :, :] = jnp.zeros((1, Wp, c1), jnp.float32)
    pad3_ref[F2 + 1:F2 + 2, :, :] = jnp.zeros((1, Wp, c1), jnp.float32)
    pad3_ref[1:F2 + 1, :, :] = p2

    # ---- conv3 + shift + ReLU + MaxPool(1,2) ----------------------------------
    m3 = F2 * Tt
    acc3 = jnp.zeros((m3, c2), jnp.float32)
    for ky in range(3):
        for kx in range(3):
            lhs = pad3_ref[ky:ky + F2, kx:kx + Tt, :].reshape(m3, c1)
            acc3 = acc3 + jnp.dot(lhs.astype(jnp.bfloat16), w3_ref[ky * 3 + kx],
                                  preferred_element_type=jnp.float32)
    a3 = jnp.maximum(acc3 + sh3_ref[...], 0.0)
    a3 = a3.reshape(F4, 2 * Tt, c2)
    p3 = jnp.maximum(a3[:, :Tt, :], a3[:, Tt:, :])            # (F4, Tt, c2)

    # ---- Linear: accumulation of F4 dots (fc rows permuted at pack time) ------
    p3b = p3.astype(jnp.bfloat16)
    y = jnp.zeros((Tt, Dout), jnp.float32)
    for f in range(F4):
        y = y + jnp.dot(p3b[f], wf_ref[f], preferred_element_type=jnp.float32)
    o_ref[...] = (y + bf_ref[...]).astype(o_ref.dtype)
    # TODO(synk): nn.Dropout layers are identity in eval mode; training-mode
    # stochastic dropout (0.25 / 0.25 / 0.5) is not implemented.


def conv_stack_forward(mel, kp, *, t_tile=256):
    """Pallas equivalent of ConvStack.forward (inference mode), fully fused."""
    B, T, F = mel.shape
    c1 = kp["sh1"].shape[-1]
    c2 = kp["sh3"].shape[-1]
    Dout = kp["bf"].shape[-1]
    assert F % 4 == 0, "input_features must be divisible by 4"
    F2, F4 = F // 2, F // 4
    Din = F4 * c2

    # ---- time tile: multiple of 8 (sublane) that divides T; bounds VMEM -------
    Tt = min(t_tile, T)
    if T % Tt != 0 or (Tt % 8 != 0 and Tt != T):
        Tt = T                                  # fallback: single tile
    nT = T // Tt
    Wa, Wp, Wx = Tt + 4, Tt + 2, Tt + 6

    # ---- host-side prep (tiny, 1-channel input): freq-major layout, zero halo,
    #      overlapping per-tile windows so every in-kernel slice is static and
    #      each grid step DMAs exactly its own window. -------------------------
    x = jnp.swapaxes(mel, 1, 2).astype(jnp.float32)           # (B, F, T)
    xp = jnp.pad(x, ((0, 0), (1, 1), (3, 3)))                 # (B, F+2, T+6)
    win = jnp.arange(nT)[:, None] * Tt + jnp.arange(Wx)[None, :]
    xw = jnp.transpose(xp[:, :, win], (0, 2, 1, 3))           # (B, nT, F+2, Wx)

    kernel = functools.partial(_conv_stack_kernel, T=T, F=F, Tt=Tt, c1=c1, c2=c2)

    flops = int(2 * B * T * F * 9 * 1 * c1
                + 2 * B * T * F * 9 * c1 * c1
                + 2 * B * T * F2 * 9 * c1 * c2
                + 2 * B * T * Din * Dout)
    weight_bytes = sum(int(v.size) * v.dtype.itemsize for v in kp.values())
    bytes_accessed = int(4 * (int(mel.size) + B * T * Dout) + weight_bytes)

    # Explicit VMEM budget: scratches + double-buffered blocks + weights, clamped
    # to 48 MiB so it also fits v7x (v5e/v6e default scoped limits are 16/32 MiB).
    scratch_bytes = 4 * ((F + 2) * Wa * c1 + (F2 + 2) * Wp * c1)
    block_bytes = 4 * ((F + 2) * Wx + Tt * Dout) * 2
    vmem_limit = int(min(48 * 2 ** 20,
                         max(8 * 2 ** 20,
                             4 * (scratch_bytes + block_bytes + 2 * weight_bytes))))

    return pl.pallas_call(
        kernel,
        out_shape=jax.ShapeDtypeStruct((B, T, Dout), jnp.float32),
        grid=(B, nT),
        in_specs=[
            pl.BlockSpec((None, None, F + 2, Wx), lambda b, t: (b, t, 0, 0)),  # input window
            pl.BlockSpec((3, 3, c1), lambda b, t: (0, 0, 0)),      # conv1 w * bn1 scale (f32)
            pl.BlockSpec((1, c1), lambda b, t: (0, 0)),            # bn1 shift (+conv bias)
            pl.BlockSpec((9, c1, c1), lambda b, t: (0, 0, 0)),     # conv2 per-tap w (bf16)
            pl.BlockSpec((1, c1), lambda b, t: (0, 0)),            # bn2 shift
            pl.BlockSpec((9, c1, c2), lambda b, t: (0, 0, 0)),     # conv3 per-tap w (bf16)
            pl.BlockSpec((1, c2), lambda b, t: (0, 0)),            # bn3 shift
            pl.BlockSpec((F4, c2, Dout), lambda b, t: (0, 0, 0)),  # fc w, rows permuted (bf16)
            pl.BlockSpec((1, Dout), lambda b, t: (0, 0)),          # fc bias
        ],
        out_specs=pl.BlockSpec((None, Tt, Dout), lambda b, t: (b, t, 0)),
        scratch_shapes=[
            pltpu.VMEM((F + 2, Wa, c1), jnp.float32),    # conv2 padded input (a1)
            pltpu.VMEM((F2 + 2, Wp, c1), jnp.float32),   # conv3 padded input (p2)
        ],
        compiler_params=pltpu.CompilerParams(
            dimension_semantics=("parallel", "parallel"),
            vmem_limit_bytes=vmem_limit),
        cost_estimate=pl.CostEstimate(flops=flops, transcendentals=0,
                                      bytes_accessed=bytes_accessed),
    )(xw, kp["w1f"], kp["sh1"], kp["w2t"], kp["sh2"], kp["w3t"], kp["sh3"],
      kp["wfp"], kp["bf"])


def init_params(key, input_features, output_features):
    """Torch-equivalent parameters (HWIO conv weights, folded BN, torch-order fc)."""
    c1 = output_features // 16
    c2 = output_features // 8
    din = c2 * (input_features // 4)
    keys = jax.random.split(key, 11)

    def fold_bn(kk, c, conv_bias):
        kg, kb, km, kv = jax.random.split(kk, 4)
        gamma = 1.0 + 0.1 * jax.random.normal(kg, (c,), jnp.float32)
        beta = 0.1 * jax.random.normal(kb, (c,), jnp.float32)
        mean = 0.1 * jax.random.normal(km, (c,), jnp.float32)
        var = 0.5 + jax.random.uniform(kv, (c,), jnp.float32)
        scale = gamma / jnp.sqrt(var + BN_EPS)
        shift = beta - mean * scale + conv_bias * scale
        return scale.reshape(1, c), shift.reshape(1, c)

    def conv_layer(kw, kb, kbn, cin, cout):
        w = 0.3 * jax.random.normal(kw, (3, 3, cin, cout), jnp.float32)
        b = 0.1 * jax.random.normal(kb, (cout,), jnp.float32)
        s, sh = fold_bn(kbn, cout, b)
        return w, s, sh

    w1, s1, sh1 = conv_layer(keys[0], keys[1], keys[2], 1, c1)
    w2, s2, sh2 = conv_layer(keys[3], keys[4], keys[5], c1, c1)
    w3, s3, sh3 = conv_layer(keys[6], keys[7], keys[8], c1, c2)
    wf = 0.2 * jax.random.normal(keys[9], (din, output_features), jnp.float32)
    bf = 0.1 * jax.random.normal(keys[10], (1, output_features), jnp.float32)
    return dict(w1=w1, s1=s1, sh1=sh1, w2=w2, s2=s2, sh2=sh2,
                w3=w3, s3=s3, sh3=sh3, wf=wf, bf=bf)


def pack_params(p, input_features, output_features):
    """One-time repack: fold BN scales into weights, per-tap bf16 slabs, fc rows permuted."""
    c2 = output_features // 8
    f4 = input_features // 4
    dout = output_features

    def taps(w, scale):
        ws = w * scale[0]                     # fold BN scale into output columns
        # tap index = ky*3 + kx  (ky = freq tap, kx = time tap), matching the kernel loops
        return jnp.stack([ws[kx, ky] for ky in range(3) for kx in range(3)]
                         ).astype(jnp.bfloat16)

    w1f = (p["w1"] * p["s1"][0])[:, :, 0, :]  # (3, 3, c1) f32 (conv1 stays on the VPU)
    # torch flatten order is (channel * F4 + freq); the kernel accumulates one dot
    # per frequency bin, so regroup fc rows to (freq, channel, out) once here.
    wfp = jnp.transpose(p["wf"].reshape(c2, f4, dout), (1, 0, 2)).astype(jnp.bfloat16)
    return dict(w1f=w1f, sh1=p["sh1"],
                w2t=taps(p["w2"], p["s2"]), sh2=p["sh2"],
                w3t=taps(p["w3"], p["s3"]), sh3=p["sh3"],
                wfp=wfp, bf=p["bf"])


def reference_forward(mel, p):
    """Pure-JAX f32 reference mirroring the PyTorch module (eval mode)."""
    def conv(x, w, s, sh, pool):
        y = jax.lax.conv_general_dilated(
            x, w, window_strides=(1, 1), padding="SAME",
            dimension_numbers=("NHWC", "HWIO", "NHWC"))
        y = jnp.maximum(y * s + sh, 0.0)
        if pool:
            B, H, W, C = y.shape
            y = jnp.max(y.reshape(B, H, W // 2, 2, C), axis=3)
        return y

    x = mel[..., None]
    x = conv(x, p["w1"], p["s1"], p["sh1"], False)
    x = conv(x, p["w2"], p["s2"], p["sh2"], True)
    x = conv(x, p["w3"], p["s3"], p["sh3"], True)
    B, T, Fq, C2 = x.shape
    x = jnp.transpose(x, (0, 1, 3, 2)).reshape(B, T, C2 * Fq)
    return x @ p["wf"] + p["bf"]


if __name__ == "__main__":
    key = jax.random.PRNGKey(0)
    kparam, kdata = jax.random.split(key)
    B, T, F_in, F_out = 2, 16, 16, 32          # batch, seq, input_features, output_features
    raw = init_params(kparam, F_in, F_out)
    packed = pack_params(raw, F_in, F_out)
    mel = jax.random.normal(kdata, (B, T, F_in), dtype=jnp.float32)

    # t_tile=8 -> 2 time tiles per sample: exercises the halo-recompute + edge-mask path.
    out = jax.block_until_ready(conv_stack_forward(mel, packed, t_tile=8))
    ref = jax.block_until_ready(reference_forward(mel, raw))

    assert out.shape == (B, T, F_out), out.shape
    err = float(jnp.max(jnp.abs(out - ref)))
    scale = float(jnp.max(jnp.abs(ref))) + 1e-6
    # bf16 MXU operands (f32 accumulation) through 3 matmul layers -> a few % tolerance.
    assert err / scale < 8e-2, f"rel error vs f32 reference: {err / scale:.4f} (abs {err:.4f})"
    print("KERNEL_OK")
</pallas_src>

<mosaic_0001>
module attributes {stable_mosaic.version = 11 : i64} {
  func.func @_conv_stack_kernel(%arg0: i32, %arg1: i32, %arg2: memref<1x1x18x14xf32, #tpu.memory_space<vmem>>, %arg3: memref<3x3x2xf32, #tpu.memory_space<vmem>>, %arg4: memref<1x2xf32, #tpu.memory_space<vmem>>, %arg5: memref<9x2x2xbf16, #tpu.memory_space<vmem>>, %arg6: memref<1x2xf32, #tpu.memory_space<vmem>>, %arg7: memref<9x2x4xbf16, #tpu.memory_space<vmem>>, %arg8: memref<1x4xf32, #tpu.memory_space<vmem>>, %arg9: memref<4x4x32xbf16, #tpu.memory_space<vmem>>, %arg10: memref<1x32xf32, #tpu.memory_space<vmem>>, %arg11: memref<1x8x32xf32, #tpu.memory_space<vmem>>, %arg12: memref<18x12x2xf32, #tpu.memory_space<vmem>>, %arg13: memref<10x10x2xf32, #tpu.memory_space<vmem>>) attributes {dimension_semantics = [#tpu.dimension_semantics<parallel>, #tpu.dimension_semantics<parallel>], iteration_bounds = array<i64: 2, 2>, scalar_prefetch = 0 : i64, scratch_operands = 2 : i64, tpu.core_type = #tpu.core_type<tc>, window_params = [{transform_indices = @transform_0, window_bounds = array<i64: 1, 1, 18, 14>}, {pipeline_mode = #tpu.pipeline_mode<synchronous>, transform_indices = @transform_1, window_bounds = array<i64: 3, 3, 2>}, {pipeline_mode = #tpu.pipeline_mode<synchronous>, transform_indices = @transform_2, window_bounds = array<i64: 1, 2>}, {pipeline_mode = #tpu.pipeline_mode<synchronous>, transform_indices = @transform_3, window_bounds = array<i64: 9, 2, 2>}, {pipeline_mode = #tpu.pipeline_mode<synchronous>, transform_indices = @transform_4, window_bounds = array<i64: 1, 2>}, {pipeline_mode = #tpu.pipeline_mode<synchronous>, transform_indices = @transform_5, window_bounds = array<i64: 9, 2, 4>}, {pipeline_mode = #tpu.pipeline_mode<synchronous>, transform_indices = @transform_6, window_bounds = array<i64: 1, 4>}, {pipeline_mode = #tpu.pipeline_mode<synchronous>, transform_indices = @transform_7, window_bounds = array<i64: 4, 4, 32>}, {pipeline_mode = #tpu.pipeline_mode<synchronous>, transform_indices = @transform_8, window_bounds = array<i64: 1, 32>}, {transform_indices = @transform_9, window_bounds = array<i64: 1, 8, 32>}]} {
    %c8_i32 = arith.constant 8 : i32
    %0 = arith.muli %arg1, %c8_i32 : i32
    %c0 = arith.constant 0 : index
    %c0_0 = arith.constant 0 : index
    %c0_1 = arith.constant 0 : index
    %c0_2 = arith.constant 0 : index
    %1 = vector.load %arg2[%c0, %c0_0, %c0_1, %c0_2] : memref<1x1x18x14xf32, #tpu.memory_space<vmem>>, vector<1x1x18x14xf32>
    %2 = vector.shape_cast %1 : vector<1x1x18x14xf32> to vector<18x14xf32>
    %cst = arith.constant 0.000000e+00 : f32
    %3 = vector.broadcast %cst : f32 to vector<16x12x2xf32>
    %4 = vector.extract_strided_slice %2 {offsets = [0, 0], sizes = [16, 12], strides = [1, 1]} : vector<18x14xf32> to vector<16x12xf32>
    %5 = vector.shape_cast %4 : vector<16x12xf32> to vector<16x12x1xf32>
    %c0_3 = arith.constant 0 : index
    %c0_4 = arith.constant 0 : index
    %c0_5 = arith.constant 0 : index
    %6 = vector.load %arg3[%c0_3, %c0_4, %c0_5] : memref<3x3x2xf32, #tpu.memory_space<vmem>>, vector<1x1x2xf32>
    %7 = vector.shape_cast %6 : vector<1x1x2xf32> to vector<2xf32>
    %8 = vector.shape_cast %7 : vector<2xf32> to vector<1x1x2xf32>
    %9 = vector.broadcast %5 : vector<16x12x1xf32> to vector<16x12x2xf32>
    %10 = vector.broadcast %8 : vector<1x1x2xf32> to vector<16x12x2xf32>
    %11 = arith.mulf %9, %10 : vector<16x12x2xf32>
    %12 = arith.addf %3, %11 : vector<16x12x2xf32>
    %13 = vector.extract_strided_slice %2 {offsets = [0, 1], sizes = [16, 12], strides = [1, 1]} : vector<18x14xf32> to vector<16x12xf32>
    %14 = vector.shape_cast %13 : vector<16x12xf32> to vector<16x12x1xf32>
    %c1 = arith.constant 1 : index
    %c0_6 = arith.constant 0 : index
    %c0_7 = arith.constant 0 : index
    %15 = vector.load %arg3[%c1, %c0_6, %c0_7] : memref<3x3x2xf32, #tpu.memory_space<vmem>>, vector<1x1x2xf32>
    %16 = vector.shape_cast %15 : vector<1x1x2xf32> to vector<2xf32>
    %17 = vector.shape_cast %16 : vector<2xf32> to vector<1x1x2xf32>
    %18 = vector.broadcast %14 : vector<16x12x1xf32> to vector<16x12x2xf32>
    %19 = vector.broadcast %17 : vector<1x1x2xf32> to vector<16x12x2xf32>
    %20 = arith.mulf %18, %19 : vector<16x12x2xf32>
    %21 = arith.addf %12, %20 : vector<16x12x2xf32>
    %22 = vector.extract_strided_slice %2 {offsets = [0, 2], sizes = [16, 12], strides = [1, 1]} : vector<18x14xf32> to vector<16x12xf32>
    %23 = vector.shape_cast %22 : vector<16x12xf32> to vector<16x12x1xf32>
    %c2 = arith.constant 2 : index
    %c0_8 = arith.constant 0 : index
    %c0_9 = arith.constant 0 : index
    %24 = vector.load %arg3[%c2, %c0_8, %c0_9] : memref<3x3x2xf32, #tpu.memory_space<vmem>>, vector<1x1x2xf32>
    %25 = vector.shape_cast %24 : vector<1x1x2xf32> to vector<2xf32>
    %26 = vector.shape_cast %25 : vector<2xf32> to vector<1x1x2xf32>
    %27 = vector.broadcast %23 : vector<16x12x1xf32> to vector<16x12x2xf32>
    %28 = vector.broadcast %26 : vector<1x1x2xf32> to vector<16x12x2xf32>
    %29 = arith.mulf %27, %28 : vector<16x12x2xf32>
    %30 = arith.addf %21, %29 : vector<16x12x2xf32>
    %31 = vector.extract_strided_slice %2 {offsets = [1, 0], sizes = [16, 12], strides = [1, 1]} : vector<18x14xf32> to vector<16x12xf32>
    %32 = vector.shape_cast %31 : vector<16x12xf32> to vector<16x12x1xf32>
    %c0_10 = arith.constant 0 : index
    %c1_11 = arith.constant 1 : index
    %c0_12 = arith.constant 0 : index
    %33 = vector.load %arg3[%c0_10, %c1_11, %c0_12] : memref<3x3x2xf32, #tpu.memory_space<vmem>>, vector<1x1x2xf32>
    %34 = vector.shape_cast %33 : vector<1x1x2xf32> to vector<2xf32>
    %35 = vector.shape_cast %34 : vector<2xf32> to vector<1x1x2xf32>
    %36 = vector.broadcast %32 : vector<16x12x1xf32> to vector<16x12x2xf32>
    %37 = vector.broadcast %35 : vector<1x1x2xf32> to vector<16x12x2xf32>
    %38 = arith.mulf %36, %37 : vector<16x12x2xf32>
    %39 = arith.addf %30, %38 : vector<16x12x2xf32>
    %40 = vector.extract_strided_slice %2 {offsets = [1, 1], sizes = [16, 12], strides = [1, 1]} : vector<18x14xf32> to vector<16x12xf32>
    %41 = vector.shape_cast %40 : vector<16x12xf32> to vector<16x12x1xf32>
    %c1_13 = arith.constant 1 : index
    %c1_14 = arith.constant 1 : index
    %c0_15 = arith.constant 0 : index
    %42 = vector.load %arg3[%c1_13, %c1_14, %c0_15] : memref<3x3x2xf32, #tpu.memory_space<vmem>>, vector<1x1x2xf32>
    %43 = vector.shape_cast %42 : vector<1x1x2xf32> to vector<2xf32>
    %44 = vector.shape_cast %43 : vector<2xf32> to vector<1x1x2xf32>
    %45 = vector.broadcast %41 : vector<16x12x1xf32> to vector<16x12x2xf32>
    %46 = vector.broadcast %44 : vector<1x1x2xf32> to vector<16x12x2xf32>
    %47 = arith.mulf %45, %46 : vector<16x12x2xf32>
    %48 = arith.addf %39, %47 : vector<16x12x2xf32>
    %49 = vector.extract_strided_slice %2 {offsets = [1, 2], sizes = [16, 12], strides = [1, 1]} : vector<18x14xf32> to vector<16x12xf32>
    %50 = vector.shape_cast %49 : vector<16x12xf32> to vector<16x12x1xf32>
    %c2_16 = arith.constant 2 : index
    %c1_17 = arith.constant 1 : index
    %c0_18 = arith.constant 0 : index
    %51 = vector.load %arg3[%c2_16, %c1_17, %c0_18] : memref<3x3x2xf32, #tpu.memory_space<vmem>>, vector<1x1x2xf32>
    %52 = vector.shape_cast %51 : vector<1x1x2xf32> to vector<2xf32>
    %53 = vector.shape_cast %52 : vector<2xf32> to vector<1x1x2xf32>
    %54 = vector.broadcast %50 : vector<16x12x1xf32> to vector<16x12x2xf32>
    %55 = vector.broadcast %53 : vector<1x1x2xf32> to vector<16x12x2xf32>
    %56 = arith.mulf %54, %55 : vector<16x12x2xf32>
    %57 = arith.addf %48, %56 : vector<16x12x2xf32>
    %58 = vector.extract_strided_slice %2 {offsets = [2, 0], sizes = [16, 12], strides = [1, 1]} : vector<18x14xf32> to vector<16x12xf32>
    %59 = vector.shape_cast %58 : vector<16x12xf32> to vector<16x12x1xf32>
    %c0_19 = arith.constant 0 : index
    %c2_20 = arith.constant 2 : index
    %c0_21 = arith.constant 0 : index
    %60 = vector.load %arg3[%c0_19, %c2_20, %c0_21] : memref<3x3x2xf32, #tpu.memory_space<vmem>>, vector<1x1x2xf32>
    %61 = vector.shape_cast %60 : vector<1x1x2xf32> to vector<2xf32>
    %62 = vector.shape_cast %61 : vector<2xf32> to vector<1x1x2xf32>
    %63 = vector.broadcast %59 : vector<16x12x1xf32> to vector<16x12x2xf32>
    %64 = vector.broadcast %62 : vector<1x1x2xf32> to vector<16x12x2xf32>
    %65 = arith.mulf %63, %64 : vector<16x12x2xf32>
    %66 = arith.addf %57, %65 : vector<16x12x2xf32>
    %67 = vector.extract_strided_slice %2 {offsets = [2, 1], sizes = [16, 12], strides = [1, 1]} : vector<18x14xf32> to vector<16x12xf32>
    %68 = vector.shape_cast %67 : vector<16x12xf32> to vector<16x12x1xf32>
    %c1_22 = arith.constant 1 : index
    %c2_23 = arith.constant 2 : index
    %c0_24 = arith.constant 0 : index
    %69 = vector.load %arg3[%c1_22, %c2_23, %c0_24] : memref<3x3x2xf32, #tpu.memory_space<vmem>>, vector<1x1x2xf32>
    %70 = vector.shape_cast %69 : vector<1x1x2xf32> to vector<2xf32>
    %71 = vector.shape_cast %70 : vector<2xf32> to vector<1x1x2xf32>
    %72 = vector.broadcast %68 : vector<16x12x1xf32> to vector<16x12x2xf32>
    %73 = vector.broadcast %71 : vector<1x1x2xf32> to vector<16x12x2xf32>
    %74 = arith.mulf %72, %73 : vector<16x12x2xf32>
    %75 = arith.addf %66, %74 : vector<16x12x2xf32>
    %76 = vector.extract_strided_slice %2 {offsets = [2, 2], sizes = [16, 12], strides = [1, 1]} : vector<18x14xf32> to vector<16x12xf32>
    %77 = vector.shape_cast %76 : vector<16x12xf32> to vector<16x12x1xf32>
    %c2_25 = arith.constant 2 : index
    %c2_26 = arith.constant 2 : index
    %c0_27 = arith.constant 0 : index
    %78 = vector.load %arg3[%c2_25, %c2_26, %c0_27] : memref<3x3x2xf32, #tpu.memory_space<vmem>>, vector<1x1x2xf32>
    %79 = vector.shape_cast %78 : vector<1x1x2xf32> to vector<2xf32>
    %80 = vector.shape_cast %79 : vector<2xf32> to vector<1x1x2xf32>
    %81 = vector.broadcast %77 : vector<16x12x1xf32> to vector<16x12x2xf32>
    %82 = vector.broadcast %80 : vector<1x1x2xf32> to vector<16x12x2xf32>
    %83 = arith.mulf %81, %82 : vector<16x12x2xf32>
    %84 = arith.addf %75, %83 : vector<16x12x2xf32>
    %c0_28 = arith.constant 0 : index
    %c0_29 = arith.constant 0 : index
    %85 = vector.load %arg4[%c0_28, %c0_29] : memref<1x2xf32, #tpu.memory_space<vmem>>, vector<1x2xf32>
    %86 = vector.shape_cast %85 : vector<1x2xf32> to vector<1x1x2xf32>
    %87 = vector.broadcast %86 : vector<1x1x2xf32> to vector<16x12x2xf32>
    %88 = arith.addf %84, %87 : vector<16x12x2xf32>
    %cst_30 = arith.constant 0.000000e+00 : f32
    %89 = vector.broadcast %cst_30 : f32 to vector<16x12x2xf32>
    %90 = arith.maximumf %88, %89 : vector<16x12x2xf32>
    %91 = tpu.iota {dimensions = array<i32: 1>} : vector<1x12x1xi32>
    %c-2_i32 = arith.constant -2 : i32
    %92 = arith.addi %0, %c-2_i32 : i32
    %93 = vector.broadcast %92 : i32 to vector<1x12x1xi32>
    %94 = arith.addi %91, %93 : vector<1x12x1xi32>
    %c0_i32 = arith.constant 0 : i32
    %95 = vector.broadcast %c0_i32 : i32 to vector<1x12x1xi32>
    %96 = arith.cmpi sge, %94, %95 : vector<1x12x1xi32>
    %c16_i32 = arith.constant 16 : i32
    %97 = vector.broadcast %c16_i32 : i32 to vector<1x12x1xi32>
    %98 = arith.cmpi slt, %94, %97 : vector<1x12x1xi32>
    %99 = arith.andi %96, %98 : vector<1x12x1xi1>
    %cst_31 = arith.constant 0.000000e+00 : f32
    %100 = vector.shape_cast %99 : vector<1x12x1xi1> to vector<1x12x1xi1>
    %101 = vector.broadcast %100 : vector<1x12x1xi1> to vector<16x12x2xi1>
    %102 = vector.broadcast %cst_31 : f32 to vector<16x12x2xf32>
    %103 = arith.select %101, %90, %102 : vector<16x12x2xi1>, vector<16x12x2xf32>
    %cst_32 = arith.constant 0.000000e+00 : f32
    %104 = vector.broadcast %cst_32 : f32 to vector<1x12x2xf32>
    %c0_33 = arith.constant 0 : index
    %c0_34 = arith.constant 0 : index
    %c0_35 = arith.constant 0 : index
    %105 = vector.load %arg12[%c0_33, %c0_34, %c0_35] : memref<18x12x2xf32, #tpu.memory_space<vmem>>, vector<1x12x2xf32>
    tpu.vector_store %arg12[%c0_33, %c0_34, %c0_35], %104 {strides = array<i32>} : memref<18x12x2xf32, #tpu.memory_space<vmem>>, vector<1x12x2xf32>,
    %cst_36 = arith.constant 0.000000e+00 : f32
    %106 = vector.broadcast %cst_36 : f32 to vector<1x12x2xf32>
    %c17 = arith.constant 17 : index
    %c0_37 = arith.constant 0 : index
    %c0_38 = arith.constant 0 : index
    %107 = vector.load %arg12[%c17, %c0_37, %c0_38] : memref<18x12x2xf32, #tpu.memory_space<vmem>>, vector<1x12x2xf32>
    tpu.vector_store %arg12[%c17, %c0_37, %c0_38], %106 {strides = array<i32>} : memref<18x12x2xf32, #tpu.memory_space<vmem>>, vector<1x12x2xf32>,
    %c1_39 = arith.constant 1 : index
    %c0_40 = arith.constant 0 : index
    %c0_41 = arith.constant 0 : index
    %108 = vector.load %arg12[%c1_39, %c0_40, %c0_41] : memref<18x12x2xf32, #tpu.memory_space<vmem>>, vector<16x12x2xf32>
    tpu.vector_store %arg12[%c1_39, %c0_40, %c0_41], %103 {strides = array<i32>} : memref<18x12x2xf32, #tpu.memory_space<vmem>>, vector<16x12x2xf32>,
    %cst_42 = arith.constant 0.000000e+00 : f32
    %109 = vector.broadcast %cst_42 : f32 to vector<160x2xf32>
    %c0_43 = arith.constant 0 : index
    %c0_44 = arith.constant 0 : index
    %c0_45 = arith.constant 0 : index
    %110 = vector.load %arg12[%c0_43, %c0_44, %c0_45] : memref<18x12x2xf32, #tpu.memory_space<vmem>>, vector<16x10x2xf32>
    %111 = vector.shape_cast %110 : vector<16x10x2xf32> to vector<160x2xf32>
    %112 = arith.truncf %111 : vector<160x2xf32> to vector<160x2xbf16>
    %c0_46 = arith.constant 0 : index
    %c0_47 = arith.constant 0 : index
    %c0_48 = arith.constant 0 : index
    %113 = vector.load %arg5[%c0_46, %c0_47, %c0_48] : memref<9x2x2xbf16, #tpu.memory_space<vmem>>, vector<1x2x2xbf16>
    %114 = vector.shape_cast %113 : vector<1x2x2xbf16> to vector<2x2xbf16>
    %cst_49 = arith.constant dense<0.000000e+00> : vector<160x2xf32>
    %115 = tpu.matmul %112, %114, %cst_49 {dimension_numbers = #tpu.dot_dimension_numbers<[1], [0], [0], [1], [0, 0, 1, 1], [], []>} : vector<160x2xbf16>, vector<2x2xbf16>, vector<160x2xf32> -> vector<160x2xf32>
    %116 = arith.addf %109, %115 : vector<160x2xf32>
    %c0_50 = arith.constant 0 : index
    %c1_51 = arith.constant 1 : index
    %c0_52 = arith.constant 0 : index
    %117 = vector.load %arg12[%c0_50, %c1_51, %c0_52] : memref<18x12x2xf32, #tpu.memory_space<vmem>>, vector<16x10x2xf32>
    %118 = vector.shape_cast %117 : vector<16x10x2xf32> to vector<160x2xf32>
    %119 = arith.truncf %118 : vector<160x2xf32> to vector<160x2xbf16>
    %c1_53 = arith.constant 1 : index
    %c0_54 = arith.constant 0 : index
    %c0_55 = arith.constant 0 : index
    %120 = vector.load %arg5[%c1_53, %c0_54, %c0_55] : memref<9x2x2xbf16, #tpu.memory_space<vmem>>, vector<1x2x2xbf16>
    %121 = vector.shape_cast %120 : vector<1x2x2xbf16> to vector<2x2xbf16>
    %cst_56 = arith.constant dense<0.000000e+00> : vector<160x2xf32>
    %122 = tpu.matmul %119, %121, %cst_56 {dimension_numbers = #tpu.dot_dimension_numbers<[1], [0], [0], [1], [0, 0, 1, 1], [], []>} : vector<160x2xbf16>, vector<2x2xbf16>, vector<160x2xf32> -> vector<160x2xf32>
    %123 = arith.addf %116, %122 : vector<160x2xf32>
    %c0_57 = arith.constant 0 : index
    %c2_58 = arith.constant 2 : index
    %c0_59 = arith.constant 0 : index
    %124 = vector.load %arg12[%c0_57, %c2_58, %c0_59] : memref<18x12x2xf32, #tpu.memory_space<vmem>>, vector<16x10x2xf32>
    %125 = vector.shape_cast %124 : vector<16x10x2xf32> to vector<160x2xf32>
    %126 = arith.truncf %125 : vector<160x2xf32> to vector<160x2xbf16>
    %c2_60 = arith.constant 2 : index
    %c0_61 = arith.constant 0 : index
    %c0_62 = arith.constant 0 : index
    %127 = vector.load %arg5[%c2_60, %c0_61, %c0_62] : memref<9x2x2xbf16, #tpu.memory_space<vmem>>, vector<1x2x2xbf16>
    %128 = vector.shape_cast %127 : vector<1x2x2xbf16> to vector<2x2xbf16>
    %cst_63 = arith.constant dense<0.000000e+00> : vector<160x2xf32>
    %129 = tpu.matmul %126, %128, %cst_63 {dimension_numbers = #tpu.dot_dimension_numbers<[1], [0], [0], [1], [0, 0, 1, 1], [], []>} : vector<160x2xbf16>, vector<2x2xbf16>, vector<160x2xf32> -> vector<160x2xf32>
    %130 = arith.addf %123, %129 : vector<160x2xf32>
    %c1_64 = arith.constant 1 : index
    %c0_65 = arith.constant 0 : index
    %c0_66 = arith.constant 0 : index
    %131 = vector.load %arg12[%c1_64, %c0_65, %c0_66] : memref<18x12x2xf32, #tpu.memory_space<vmem>>, vector<16x10x2xf32>
    %132 = vector.shape_cast %131 : vector<16x10x2xf32> to vector<160x2xf32>
    %133 = arith.truncf %132 : vector<160x2xf32> to vector<160x2xbf16>
    %c3 = arith.constant 3 : index
    %c0_67 = arith.constant 0 : index
    %c0_68 = arith.constant 0 : index
    %134 = vector.load %arg5[%c3, %c0_67, %c0_68] : memref<9x2x2xbf16, #tpu.memory_space<vmem>>, vector<1x2x2xbf16>
    %135 = vector.shape_cast %134 : vector<1x2x2xbf16> to vector<2x2xbf16>
    %cst_69 = arith.constant dense<0.000000e+00> : vector<160x2xf32>
    %136 = tpu.matmul %133, %135, %cst_69 {dimension_numbers = #tpu.dot_dimension_numbers<[1], [0], [0], [1], [0, 0, 1, 1], [], []>} : vector<160x2xbf16>, vector<2x2xbf16>, vector<160x2xf32> -> vector<160x2xf32>
    %137 = arith.addf %130, %136 : vector<160x2xf32>
    %c1_70 = arith.constant 1 : index
    %c1_71 = arith.constant 1 : index
    %c0_72 = arith.constant 0 : index
    %138 = vector.load %arg12[%c1_70, %c1_71, %c0_72] : memref<18x12x2xf32, #tpu.memory_space<vmem>>, vector<16x10x2xf32>
    %139 = vector.shape_cast %138 : vector<16x10x2xf32> to vector<160x2xf32>
    %140 = arith.truncf %139 : vector<160x2xf32> to vector<160x2xbf16>
    %c4 = arith.constant 4 : index
    %c0_73 = arith.constant 0 : index
    %c0_74 = arith.constant 0 : index
    %141 = vector.load %arg5[%c4, %c0_73, %c0_74] : memref<9x2x2xbf16, #tpu.memory_space<vmem>>, vector<1x2x2xbf16>
    %142 = vector.shape_cast %141 : vector<1x2x2xbf16> to vector<2x2xbf16>
    %cst_75 = arith.constant dense<0.000000e+00> : vector<160x2xf32>
    %143 = tpu.matmul %140, %142, %cst_75 {dimension_numbers = #tpu.dot_dimension_numbers<[1], [0], [0], [1], [0, 0, 1, 1], [], []>} : vector<160x2xbf16>, vector<2x2xbf16>, vector<160x2xf32> -> vector<160x2xf32>
    %144 = arith.addf %137, %143 : vector<160x2xf32>
    %c1_76 = arith.constant 1 : index
    %c2_77 = arith.constant 2 : index
    %c0_78 = arith.constant 0 : index
    %145 = vector.load %arg12[%c1_76, %c2_77, %c0_78] : memref<18x12x2xf32, #tpu.memory_space<vmem>>, vector<16x10x2xf32>
    %146 = vector.shape_cast %145 : vector<16x10x2xf32> to vector<160x2xf32>
    %147 = arith.truncf %146 : vector<160x2xf32> to vector<160x2xbf16>
    %c5 = arith.constant 5 : index
    %c0_79 = arith.constant 0 : index
    %c0_80 = arith.constant 0 : index
    %148 = vector.load %arg5[%c5, %c0_79, %c0_80] : memref<9x2x2xbf16, #tpu.memory_space<vmem>>, vector<1x2x2xbf16>
    %149 = vector.shape_cast %148 : vector<1x2x2xbf16> to vector<2x2xbf16>
    %cst_81 = arith.constant dense<0.000000e+00> : vector<160x2xf32>
    %150 = tpu.matmul %147, %149, %cst_81 {dimension_numbers = #tpu.dot_dimension_numbers<[1], [0], [0], [1], [0, 0, 1, 1], [], []>} : vector<160x2xbf16>, vector<2x2xbf16>, vector<160x2xf32> -> vector<160x2xf32>
    %151 = arith.addf %144, %150 : vector<160x2xf32>
    %c2_82 = arith.constant 2 : index
    %c0_83 = arith.constant 0 : index
    %c0_84 = arith.constant 0 : index
    %152 = vector.load %arg12[%c2_82, %c0_83, %c0_84] : memref<18x12x2xf32, #tpu.memory_space<vmem>>, vector<16x10x2xf32>
    %153 = vector.shape_cast %152 : vector<16x10x2xf32> to vector<160x2xf32>
    %154 = arith.truncf %153 : vector<160x2xf32> to vector<160x2xbf16>
    %c6 = arith.constant 6 : index
    %c0_85 = arith.constant 0 : index
    %c0_86 = arith.constant 0 : index
    %155 = vector.load %arg5[%c6, %c0_85, %c0_86] : memref<9x2x2xbf16, #tpu.memory_space<vmem>>, vector<1x2x2xbf16>
    %156 = vector.shape_cast %155 : vector<1x2x2xbf16> to vector<2x2xbf16>
    %cst_87 = arith.constant dense<0.000000e+00> : vector<160x2xf32>
    %157 = tpu.matmul %154, %156, %cst_87 {dimension_numbers = #tpu.dot_dimension_numbers<[1], [0], [0], [1], [0, 0, 1, 1], [], []>} : vector<160x2xbf16>, vector<2x2xbf16>, vector<160x2xf32> -> vector<160x2xf32>
    %158 = arith.addf %151, %157 : vector<160x2xf32>
    %c2_88 = arith.constant 2 : index
    %c1_89 = arith.constant 1 : index
    %c0_90 = arith.constant 0 : index
    %159 = vector.load %arg12[%c2_88, %c1_89, %c0_90] : memref<18x12x2xf32, #tpu.memory_space<vmem>>, vector<16x10x2xf32>
    %160 = vector.shape_cast %159 : vector<16x10x2xf32> to vector<160x2xf32>
    %161 = arith.truncf %160 : vector<160x2xf32> to vector<160x2xbf16>
    %c7 = arith.constant 7 : index
    %c0_91 = arith.constant 0 : index
    %c0_92 = arith.constant 0 : index
    %162 = vector.load %arg5[%c7, %c0_91, %c0_92] : memref<9x2x2xbf16, #tpu.memory_space<vmem>>, vector<1x2x2xbf16>
    %163 = vector.shape_cast %162 : vector<1x2x2xbf16> to vector<2x2xbf16>
    %cst_93 = arith.constant dense<0.000000e+00> : vector<160x2xf32>
    %164 = tpu.matmul %161, %163, %cst_93 {dimension_numbers = #tpu.dot_dimension_numbers<[1], [0], [0], [1], [0, 0, 1, 1], [], []>} : vector<160x2xbf16>, vector<2x2xbf16>, vector<160x2xf32> -> vector<160x2xf32>
    %165 = arith.addf %158, %164 : vector<160x2xf32>
    %c2_94 = arith.constant 2 : index
    %c2_95 = arith.constant 2 : index
    %c0_96 = arith.constant 0 : index
    %166 = vector.load %arg12[%c2_94, %c2_95, %c0_96] : memref<18x12x2xf32, #tpu.memory_space<vmem>>, vector<16x10x2xf32>
    %167 = vector.shape_cast %166 : vector<16x10x2xf32> to vector<160x2xf32>
    %168 = arith.truncf %167 : vector<160x2xf32> to vector<160x2xbf16>
    %c8 = arith.constant 8 : index
    %c0_97 = arith.constant 0 : index
    %c0_98 = arith.constant 0 : index
    %169 = vector.load %arg5[%c8, %c0_97, %c0_98] : memref<9x2x2xbf16, #tpu.memory_space<vmem>>, vector<1x2x2xbf16>
    %170 = vector.shape_cast %169 : vector<1x2x2xbf16> to vector<2x2xbf16>
    %cst_99 = arith.constant dense<0.000000e+00> : vector<160x2xf32>
    %171 = tpu.matmul %168, %170, %cst_99 {dimension_numbers = #tpu.dot_dimension_numbers<[1], [0], [0], [1], [0, 0, 1, 1], [], []>} : vector<160x2xbf16>, vector<2x2xbf16>, vector<160x2xf32> -> vector<160x2xf32>
    %172 = arith.addf %165, %171 : vector<160x2xf32>
    %c0_100 = arith.constant 0 : index
    %c0_101 = arith.constant 0 : index
    %173 = vector.load %arg6[%c0_100, %c0_101] : memref<1x2xf32, #tpu.memory_space<vmem>>, vector<1x2xf32>
    %174 = vector.broadcast %173 : vector<1x2xf32> to vector<160x2xf32>
    %175 = arith.addf %172, %174 : vector<160x2xf32>
    %cst_102 = arith.constant 0.000000e+00 : f32
    %176 = vector.broadcast %cst_102 : f32 to vector<160x2xf32>
    %177 = arith.maximumf %175, %176 : vector<160x2xf32>
    %178 = vector.shape_cast %177 : vector<160x2xf32> to vector<8x20x2xf32>
    %179 = vector.extract_strided_slice %178 {offsets = [0, 0, 0], sizes = [8, 10, 2], strides = [1, 1, 1]} : vector<8x20x2xf32> to vector<8x10x2xf32>
    %180 = vector.extract_strided_slice %178 {offsets = [0, 10, 0], sizes = [8, 10, 2], strides = [1, 1, 1]} : vector<8x20x2xf32> to vector<8x10x2xf32>
    %181 = arith.maximumf %179, %180 : vector<8x10x2xf32>
    %182 = tpu.iota {dimensions = array<i32: 1>} : vector<1x10x1xi32>
    %c-1_i32 = arith.constant -1 : i32
    %183 = arith.addi %0, %c-1_i32 : i32
    %184 = vector.broadcast %183 : i32 to vector<1x10x1xi32>
    %185 = arith.addi %182, %184 : vector<1x10x1xi32>
    %c0_i32_103 = arith.constant 0 : i32
    %186 = vector.broadcast %c0_i32_103 : i32 to vector<1x10x1xi32>
    %187 = arith.cmpi sge, %185, %186 : vector<1x10x1xi32>
    %c16_i32_104 = arith.constant 16 : i32
    %188 = vector.broadcast %c16_i32_104 : i32 to vector<1x10x1xi32>
    %189 = arith.cmpi slt, %185, %188 : vector<1x10x1xi32>
    %190 = arith.andi %187, %189 : vector<1x10x1xi1>
    %cst_105 = arith.constant 0.000000e+00 : f32
    %191 = vector.shape_cast %190 : vector<1x10x1xi1> to vector<1x10x1xi1>
    %192 = vector.broadcast %191 : vector<1x10x1xi1> to vector<8x10x2xi1>
    %193 = vector.broadcast %cst_105 : f32 to vector<8x10x2xf32>
    %194 = arith.select %192, %181, %193 : vector<8x10x2xi1>, vector<8x10x2xf32>
    %cst_106 = arith.constant 0.000000e+00 : f32
    %195 = vector.broadcast %cst_106 : f32 to vector<1x10x2xf32>
    %c0_107 = arith.constant 0 : index
    %c0_108 = arith.constant 0 : index
    %c0_109 = arith.constant 0 : index
    %196 = vector.load %arg13[%c0_107, %c0_108, %c0_109] : memref<10x10x2xf32, #tpu.memory_space<vmem>>, vector<1x10x2xf32>
    tpu.vector_store %arg13[%c0_107, %c0_108, %c0_109], %195 {strides = array<i32>} : memref<10x10x2xf32, #tpu.memory_space<vmem>>, vector<1x10x2xf32>,
    %cst_110 = arith.constant 0.000000e+00 : f32
    %197 = vector.broadcast %cst_110 : f32 to vector<1x10x2xf32>
    %c9 = arith.constant 9 : index
    %c0_111 = arith.constant 0 : index
    %c0_112 = arith.constant 0 : index
    %198 = vector.load %arg13[%c9, %c0_111, %c0_112] : memref<10x10x2xf32, #tpu.memory_space<vmem>>, vector<1x10x2xf32>
    tpu.vector_store %arg13[%c9, %c0_111, %c0_112], %197 {strides = array<i32>} : memref<10x10x2xf32, #tpu.memory_space<vmem>>, vector<1x10x2xf32>,
    %c1_113 = arith.constant 1 : index
    %c0_114 = arith.constant 0 : index
    %c0_115 = arith.constant 0 : index
    %199 = vector.load %arg13[%c1_113, %c0_114, %c0_115] : memref<10x10x2xf32, #tpu.memory_space<vmem>>, vector<8x10x2xf32>
    tpu.vector_store %arg13[%c1_113, %c0_114, %c0_115], %194 {strides = array<i32>} : memref<10x10x2xf32, #tpu.memory_space<vmem>>, vector<8x10x2xf32>,
    %cst_116 = arith.constant 0.000000e+00 : f32
    %200 = vector.broadcast %cst_116 : f32 to vector<64x4xf32>
    %c0_117 = arith.constant 0 : index
    %c0_118 = arith.constant 0 : index
    %c0_119 = arith.constant 0 : index
    %201 = vector.load %arg13[%c0_117, %c0_118, %c0_119] : memref<10x10x2xf32, #tpu.memory_space<vmem>>, vector<8x8x2xf32>
    %202 = vector.shape_cast %201 : vector<8x8x2xf32> to vector<64x2xf32>
    %203 = arith.truncf %202 : vector<64x2xf32> to vector<64x2xbf16>
    %c0_120 = arith.constant 0 : index
    %c0_121 = arith.constant 0 : index
    %c0_122 = arith.constant 0 : index
    %204 = vector.load %arg7[%c0_120, %c0_121, %c0_122] : memref<9x2x4xbf16, #tpu.memory_space<vmem>>, vector<1x2x4xbf16>
    %205 = vector.shape_cast %204 : vector<1x2x4xbf16> to vector<2x4xbf16>
    %cst_123 = arith.constant dense<0.000000e+00> : vector<64x4xf32>
    %206 = tpu.matmul %203, %205, %cst_123 {dimension_numbers = #tpu.dot_dimension_numbers<[1], [0], [0], [1], [0, 0, 1, 1], [], []>} : vector<64x2xbf16>, vector<2x4xbf16>, vector<64x4xf32> -> vector<64x4xf32>
    %207 = arith.addf %200, %206 : vector<64x4xf32>
    %c0_124 = arith.constant 0 : index
    %c1_125 = arith.constant 1 : index
    %c0_126 = arith.constant 0 : index
    %208 = vector.load %arg13[%c0_124, %c1_125, %c0_126] : memref<10x10x2xf32, #tpu.memory_space<vmem>>, vector<8x8x2xf32>
    %209 = vector.shape_cast %208 : vector<8x8x2xf32> to vector<64x2xf32>
    %210 = arith.truncf %209 : vector<64x2xf32> to vector<64x2xbf16>
    %c1_127 = arith.constant 1 : index
    %c0_128 = arith.constant 0 : index
    %c0_129 = arith.constant 0 : index
    %211 = vector.load %arg7[%c1_127, %c0_128, %c0_129] : memref<9x2x4xbf16, #tpu.memory_space<vmem>>, vector<1x2x4xbf16>
    %212 = vector.shape_cast %211 : vector<1x2x4xbf16> to vector<2x4xbf16>
    %cst_130 = arith.constant dense<0.000000e+00> : vector<64x4xf32>
    %213 = tpu.matmul %210, %212, %cst_130 {dimension_numbers = #tpu.dot_dimension_numbers<[1], [0], [0], [1], [0, 0, 1, 1], [], []>} : vector<64x2xbf16>, vector<2x4xbf16>, vector<64x4xf32> -> vector<64x4xf32>
    %214 = arith.addf %207, %213 : vector<64x4xf32>
    %c0_131 = arith.constant 0 : index
    %c2_132 = arith.constant 2 : index
    %c0_133 = arith.constant 0 : index
    %215 = vector.load %arg13[%c0_131, %c2_132, %c0_133] : memref<10x10x2xf32, #tpu.memory_space<vmem>>, vector<8x8x2xf32>
    %216 = vector.shape_cast %215 : vector<8x8x2xf32> to vector<64x2xf32>
    %217 = arith.truncf %216 : vector<64x2xf32> to vector<64x2xbf16>
    %c2_134 = arith.constant 2 : index
    %c0_135 = arith.constant 0 : index
    %c0_136 = arith.constant 0 : index
    %218 = vector.load %arg7[%c2_134, %c0_135, %c0_136] : memref<9x2x4xbf16, #tpu.memory_space<vmem>>, vector<1x2x4xbf16>
    %219 = vector.shape_cast %218 : vector<1x2x4xbf16> to vector<2x4xbf16>
    %cst_137 = arith.constant dense<0.000000e+00> : vector<64x4xf32>
    %220 = tpu.matmul %217, %219, %cst_137 {dimension_numbers = #tpu.dot_dimension_numbers<[1], [0], [0], [1], [0, 0, 1, 1], [], []>} : vector<64x2xbf16>, vector<2x4xbf16>, vector<64x4xf32> -> vector<64x4xf32>
    %221 = arith.addf %214, %220 : vector<64x4xf32>
    %c1_138 = arith.constant 1 : index
    %c0_139 = arith.constant 0 : index
    %c0_140 = arith.constant 0 : index
    %222 = vector.load %arg13[%c1_138, %c0_139, %c0_140] : memref<10x10x2xf32, #tpu.memory_space<vmem>>, vector<8x8x2xf32>
    %223 = vector.shape_cast %222 : vector<8x8x2xf32> to vector<64x2xf32>
    %224 = arith.truncf %223 : vector<64x2xf32> to vector<64x2xbf16>
    %c3_141 = arith.constant 3 : index
    %c0_142 = arith.constant 0 : index
    %c0_143 = arith.constant 0 : index
    %225 = vector.load %arg7[%c3_141, %c0_142, %c0_143] : memref<9x2x4xbf16, #tpu.memory_space<vmem>>, vector<1x2x4xbf16>
    %226 = vector.shape_cast %225 : vector<1x2x4xbf16> to vector<2x4xbf16>
    %cst_144 = arith.constant dense<0.000000e+00> : vector<64x4xf32>
    %227 = tpu.matmul %224, %226, %cst_144 {dimension_numbers = #tpu.dot_dimension_numbers<[1], [0], [0], [1], [0, 0, 1, 1], [], []>} : vector<64x2xbf16>, vector<2x4xbf16>, vector<64x4xf32> -> vector<64x4xf32>
    %228 = arith.addf %221, %227 : vector<64x4xf32>
    %c1_145 = arith.constant 1 : index
    %c1_146 = arith.constant 1 : index
    %c0_147 = arith.constant 0 : index
    %229 = vector.load %arg13[%c1_145, %c1_146, %c0_147] : memref<10x10x2xf32, #tpu.memory_space<vmem>>, vector<8x8x2xf32>
    %230 = vector.shape_cast %229 : vector<8x8x2xf32> to vector<64x2xf32>
    %231 = arith.truncf %230 : vector<64x2xf32> to vector<64x2xbf16>
    %c4_148 = arith.constant 4 : index
    %c0_149 = arith.constant 0 : index
    %c0_150 = arith.constant 0 : index
    %232 = vector.load %arg7[%c4_148, %c0_149, %c0_150] : memref<9x2x4xbf16, #tpu.memory_space<vmem>>, vector<1x2x4xbf16>
    %233 = vector.shape_cast %232 : vector<1x2x4xbf16> to vector<2x4xbf16>
    %cst_151 = arith.constant dense<0.000000e+00> : vector<64x4xf32>
    %234 = tpu.matmul %231, %233, %cst_151 {dimension_numbers = #tpu.dot_dimension_numbers<[1], [0], [0], [1], [0, 0, 1, 1], [], []>} : vector<64x2xbf16>, vector<2x4xbf16>, vector<64x4xf32> -> vector<64x4xf32>
    %235 = arith.addf %228, %234 : vector<64x4xf32>
    %c1_152 = arith.constant 1 : index
    %c2_153 = arith.constant 2 : index
    %c0_154 = arith.constant 0 : index
    %236 = vector.load %arg13[%c1_152, %c2_153, %c0_154] : memref<10x10x2xf32, #tpu.memory_space<vmem>>, vector<8x8x2xf32>
    %237 = vector.shape_cast %236 : vector<8x8x2xf32> to vector<64x2xf32>
    %238 = arith.truncf %237 : vector<64x2xf32> to vector<64x2xbf16>
    %c5_155 = arith.constant 5 : index
    %c0_156 = arith.constant 0 : index
    %c0_157 = arith.constant 0 : index
    %239 = vector.load %arg7[%c5_155, %c0_156, %c0_157] : memref<9x2x4xbf16, #tpu.memory_space<vmem>>, vector<1x2x4xbf16>
    %240 = vector.shape_cast %239 : vector<1x2x4xbf16> to vector<2x4xbf16>
    %cst_158 = arith.constant dense<0.000000e+00> : vector<64x4xf32>
    %241 = tpu.matmul %238, %240, %cst_158 {dimension_numbers = #tpu.dot_dimension_numbers<[1], [0], [0], [1], [0, 0, 1, 1], [], []>} : vector<64x2xbf16>, vector<2x4xbf16>, vector<64x4xf32> -> vector<64x4xf32>
    %242 = arith.addf %235, %241 : vector<64x4xf32>
    %c2_159 = arith.constant 2 : index
    %c0_160 = arith.constant 0 : index
    %c0_161 = arith.constant 0 : index
    %243 = vector.load %arg13[%c2_159, %c0_160, %c0_161] : memref<10x10x2xf32, #tpu.memory_space<vmem>>, vector<8x8x2xf32>
    %244 = vector.shape_cast %243 : vector<8x8x2xf32> to vector<64x2xf32>
    %245 = arith.truncf %244 : vector<64x2xf32> to vector<64x2xbf16>
    %c6_162 = arith.constant 6 : index
    %c0_163 = arith.constant 0 : index
    %c0_164 = arith.constant 0 : index
    %246 = vector.load %arg7[%c6_162, %c0_163, %c0_164] : memref<9x2x4xbf16, #tpu.memory_space<vmem>>, vector<1x2x4xbf16>
    %247 = vector.shape_cast %246 : vector<1x2x4xbf16> to vector<2x4xbf16>
    %cst_165 = arith.constant dense<0.000000e+00> : vector<64x4xf32>
    %248 = tpu.matmul %245, %247, %cst_165 {dimension_numbers = #tpu.dot_dimension_numbers<[1], [0], [0], [1], [0, 0, 1, 1], [], []>} : vector<64x2xbf16>, vector<2x4xbf16>, vector<64x4xf32> -> vector<64x4xf32>
    %249 = arith.addf %242, %248 : vector<64x4xf32>
    %c2_166 = arith.constant 2 : index
    %c1_167 = arith.constant 1 : index
    %c0_168 = arith.constant 0 : index
    %250 = vector.load %arg13[%c2_166, %c1_167, %c0_168] : memref<10x10x2xf32, #tpu.memory_space<vmem>>, vector<8x8x2xf32>
    %251 = vector.shape_cast %250 : vector<8x8x2xf32> to vector<64x2xf32>
    %252 = arith.truncf %251 : vector<64x2xf32> to vector<64x2xbf16>
    %c7_169 = arith.constant 7 : index
    %c0_170 = arith.constant 0 : index
    %c0_171 = arith.constant 0 : index
    %253 = vector.load %arg7[%c7_169, %c0_170, %c0_171] : memref<9x2x4xbf16, #tpu.memory_space<vmem>>, vector<1x2x4xbf16>
    %254 = vector.shape_cast %253 : vector<1x2x4xbf16> to vector<2x4xbf16>
    %cst_172 = arith.constant dense<0.000000e+00> : vector<64x4xf32>
    %255 = tpu.matmul %252, %254, %cst_172 {dimension_numbers = #tpu.dot_dimension_numbers<[1], [0], [0], [1], [0, 0, 1, 1], [], []>} : vector<64x2xbf16>, vector<2x4xbf16>, vector<64x4xf32> -> vector<64x4xf32>
    %256 = arith.addf %249, %255 : vector<64x4xf32>
    %c2_173 = arith.constant 2 : index
    %c2_174 = arith.constant 2 : index
    %c0_175 = arith.constant 0 : index
    %257 = vector.load %arg13[%c2_173, %c2_174, %c0_175] : memref<10x10x2xf32, #tpu.memory_space<vmem>>, vector<8x8x2xf32>
    %258 = vector.shape_cast %257 : vector<8x8x2xf32> to vector<64x2xf32>
    %259 = arith.truncf %258 : vector<64x2xf32> to vector<64x2xbf16>
    %c8_176 = arith.constant 8 : index
    %c0_177 = arith.constant 0 : index
    %c0_178 = arith.constant 0 : index
    %260 = vector.load %arg7[%c8_176, %c0_177, %c0_178] : memref<9x2x4xbf16, #tpu.memory_space<vmem>>, vector<1x2x4xbf16>
    %261 = vector.shape_cast %260 : vector<1x2x4xbf16> to vector<2x4xbf16>
    %cst_179 = arith.constant dense<0.000000e+00> : vector<64x4xf32>
    %262 = tpu.matmul %259, %261, %cst_179 {dimension_numbers = #tpu.dot_dimension_numbers<[1], [0], [0], [1], [0, 0, 1, 1], [], []>} : vector<64x2xbf16>, vector<2x4xbf16>, vector<64x4xf32> -> vector<64x4xf32>
    %263 = arith.addf %256, %262 : vector<64x4xf32>
    %c0_180 = arith.constant 0 : index
    %c0_181 = arith.constant 0 : index
    %264 = vector.load %arg8[%c0_180, %c0_181] : memref<1x4xf32, #tpu.memory_space<vmem>>, vector<1x4xf32>
    %265 = vector.broadcast %264 : vector<1x4xf32> to vector<64x4xf32>
    %266 = arith.addf %263, %265 : vector<64x4xf32>
    %cst_182 = arith.constant 0.000000e+00 : f32
    %267 = vector.broadcast %cst_182 : f32 to vector<64x4xf32>
    %268 = arith.maximumf %266, %267 : vector<64x4xf32>
    %269 = vector.shape_cast %268 : vector<64x4xf32> to vector<4x16x4xf32>
    %270 = vector.extract_strided_slice %269 {offsets = [0, 0, 0], sizes = [4, 8, 4], strides = [1, 1, 1]} : vector<4x16x4xf32> to vector<4x8x4xf32>
    %271 = vector.extract_strided_slice %269 {offsets = [0, 8, 0], sizes = [4, 8, 4], strides = [1, 1, 1]} : vector<4x16x4xf32> to vector<4x8x4xf32>
    %272 = arith.maximumf %270, %271 : vector<4x8x4xf32>
    %273 = arith.truncf %272 : vector<4x8x4xf32> to vector<4x8x4xbf16>
    %cst_183 = arith.constant 0.000000e+00 : f32
    %274 = vector.broadcast %cst_183 : f32 to vector<8x32xf32>
    %275 = vector.extract_strided_slice %273 {offsets = [0, 0, 0], sizes = [1, 8, 4], strides = [1, 1, 1]} : vector<4x8x4xbf16> to vector<1x8x4xbf16>
    %276 = vector.shape_cast %275 : vector<1x8x4xbf16> to vector<8x4xbf16>
    %c0_184 = arith.constant 0 : index
    %c0_185 = arith.constant 0 : index
    %c0_186 = arith.constant 0 : index
    %277 = vector.load %arg9[%c0_184, %c0_185, %c0_186] : memref<4x4x32xbf16, #tpu.memory_space<vmem>>, vector<1x4x32xbf16>
    %278 = vector.shape_cast %277 : vector<1x4x32xbf16> to vector<4x32xbf16>
    %cst_187 = arith.constant dense<0.000000e+00> : vector<8x32xf32>
    %279 = tpu.matmul %276, %278, %cst_187 {dimension_numbers = #tpu.dot_dimension_numbers<[1], [0], [0], [1], [0, 0, 1, 1], [], []>} : vector<8x4xbf16>, vector<4x32xbf16>, vector<8x32xf32> -> vector<8x32xf32>
    %280 = arith.addf %274, %279 : vector<8x32xf32>
    %281 = vector.extract_strided_slice %273 {offsets = [1, 0, 0], sizes = [1, 8, 4], strides = [1, 1, 1]} : vector<4x8x4xbf16> to vector<1x8x4xbf16>
    %282 = vector.shape_cast %281 : vector<1x8x4xbf16> to vector<8x4xbf16>
    %c1_188 = arith.constant 1 : index
    %c0_189 = arith.constant 0 : index
    %c0_190 = arith.constant 0 : index
    %283 = vector.load %arg9[%c1_188, %c0_189, %c0_190] : memref<4x4x32xbf16, #tpu.memory_space<vmem>>, vector<1x4x32xbf16>
    %284 = vector.shape_cast %283 : vector<1x4x32xbf16> to vector<4x32xbf16>
    %cst_191 = arith.constant dense<0.000000e+00> : vector<8x32xf32>
    %285 = tpu.matmul %282, %284, %cst_191 {dimension_numbers = #tpu.dot_dimension_numbers<[1], [0], [0], [1], [0, 0, 1, 1], [], []>} : vector<8x4xbf16>, vector<4x32xbf16>, vector<8x32xf32> -> vector<8x32xf32>
    %286 = arith.addf %280, %285 : vector<8x32xf32>
    %287 = vector.extract_strided_slice %273 {offsets = [2, 0, 0], sizes = [1, 8, 4], strides = [1, 1, 1]} : vector<4x8x4xbf16> to vector<1x8x4xbf16>
    %288 = vector.shape_cast %287 : vector<1x8x4xbf16> to vector<8x4xbf16>
    %c2_192 = arith.constant 2 : index
    %c0_193 = arith.constant 0 : index
    %c0_194 = arith.constant 0 : index
    %289 = vector.load %arg9[%c2_192, %c0_193, %c0_194] : memref<4x4x32xbf16, #tpu.memory_space<vmem>>, vector<1x4x32xbf16>
    %290 = vector.shape_cast %289 : vector<1x4x32xbf16> to vector<4x32xbf16>
    %cst_195 = arith.constant dense<0.000000e+00> : vector<8x32xf32>
    %291 = tpu.matmul %288, %290, %cst_195 {dimension_numbers = #tpu.dot_dimension_numbers<[1], [0], [0], [1], [0, 0, 1, 1], [], []>} : vector<8x4xbf16>, vector<4x32xbf16>, vector<8x32xf32> -> vector<8x32xf32>
    %292 = arith.addf %286, %291 : vector<8x32xf32>
    %293 = vector.extract_strided_slice %273 {offsets = [3, 0, 0], sizes = [1, 8, 4], strides = [1, 1, 1]} : vector<4x8x4xbf16> to vector<1x8x4xbf16>
    %294 = vector.shape_cast %293 : vector<1x8x4xbf16> to vector<8x4xbf16>
    %c3_196 = arith.constant 3 : index
    %c0_197 = arith.constant 0 : index
    %c0_198 = arith.constant 0 : index
    %295 = vector.load %arg9[%c3_196, %c0_197, %c0_198] : memref<4x4x32xbf16, #tpu.memory_space<vmem>>, vector<1x4x32xbf16>
    %296 = vector.shape_cast %295 : vector<1x4x32xbf16> to vector<4x32xbf16>
    %cst_199 = arith.constant dense<0.000000e+00> : vector<8x32xf32>
    %297 = tpu.matmul %294, %296, %cst_199 {dimension_numbers = #tpu.dot_dimension_numbers<[1], [0], [0], [1], [0, 0, 1, 1], [], []>} : vector<8x4xbf16>, vector<4x32xbf16>, vector<8x32xf32> -> vector<8x32xf32>
    %298 = arith.addf %292, %297 : vector<8x32xf32>
    %c0_200 = arith.constant 0 : index
    %c0_201 = arith.constant 0 : index
    %299 = vector.load %arg10[%c0_200, %c0_201] : memref<1x32xf32, #tpu.memory_space<vmem>>, vector<1x32xf32>
    %300 = vector.broadcast %299 : vector<1x32xf32> to vector<8x32xf32>
    %301 = arith.addf %298, %300 : vector<8x32xf32>
    %c0_202 = arith.constant 0 : index
    %c0_203 = arith.constant 0 : index
    %c0_204 = arith.constant 0 : index
    %302 = vector.load %arg11[%c0_202, %c0_203, %c0_204] : memref<1x8x32xf32, #tpu.memory_space<vmem>>, vector<1x8x32xf32>
    %303 = vector.shape_cast %302 : vector<1x8x32xf32> to vector<8x32xf32>
    %304 = vector.shape_cast %301 : vector<8x32xf32> to vector<1x8x32xf32>
    tpu.vector_store %arg11[%c0_202, %c0_203, %c0_204], %304 {strides = array<i32>} : memref<1x8x32xf32, #tpu.memory_space<vmem>>, vector<1x8x32xf32>,
    return
  }
  func.func @transform_0(%arg0: i32, %arg1: i32) -> (i32, i32, i32, i32) {
    %c0_i32 = arith.constant 0 : i32
    %c0_i32_0 = arith.constant 0 : i32
    %c0_i32_1 = arith.constant 0 : i32
    return %arg0, %arg1, %c0_i32, %c0_i32_0 : i32, i32, i32, i32
  }
  func.func @transform_1(%arg0: i32, %arg1: i32) -> (i32, i32, i32) {
    %c0_i32 = arith.constant 0 : i32
    %c0_i32_0 = arith.constant 0 : i32
    %c0_i32_1 = arith.constant 0 : i32
    %c0_i32_2 = arith.constant 0 : i32
    return %c0_i32, %c0_i32_0, %c0_i32_1 : i32, i32, i32
  }
  func.func @transform_2(%arg0: i32, %arg1: i32) -> (i32, i32) {
    %c0_i32 = arith.constant 0 : i32
    %c0_i32_0 = arith.constant 0 : i32
    %c0_i32_1 = arith.constant 0 : i32
    return %c0_i32, %c0_i32_0 : i32, i32
  }
  func.func @transform_3(%arg0: i32, %arg1: i32) -> (i32, i32, i32) {
    %c0_i32 = arith.constant 0 : i32
    %c0_i32_0 = arith.constant 0 : i32
    %c0_i32_1 = arith.constant 0 : i32
    %c0_i32_2 = arith.constant 0 : i32
    return %c0_i32, %c0_i32_0, %c0_i32_1 : i32, i32, i32
  }
  func.func @transform_4(%arg0: i32, %arg1: i32) -> (i32, i32) {
    %c0_i32 = arith.constant 0 : i32
    %c0_i32_0 = arith.constant 0 : i32
    %c0_i32_1 = arith.constant 0 : i32
    return %c0_i32, %c0_i32_0 : i32, i32
  }
  func.func @transform_5(%arg0: i32, %arg1: i32) -> (i32, i32, i32) {
    %c0_i32 = arith.constant 0 : i32
    %c0_i32_0 = arith.constant 0 : i32
    %c0_i32_1 = arith.constant 0 : i32
    %c0_i32_2 = arith.constant 0 : i32
    return %c0_i32, %c0_i32_0, %c0_i32_1 : i32, i32, i32
  }
  func.func @transform_6(%arg0: i32, %arg1: i32) -> (i32, i32) {
    %c0_i32 = arith.constant 0 : i32
    %c0_i32_0 = arith.constant 0 : i32
    %c0_i32_1 = arith.constant 0 : i32
    return %c0_i32, %c0_i32_0 : i32, i32
  }
  func.func @transform_7(%arg0: i32, %arg1: i32) -> (i32, i32, i32) {
    %c0_i32 = arith.constant 0 : i32
    %c0_i32_0 = arith.constant 0 : i32
    %c0_i32_1 = arith.constant 0 : i32
    %c0_i32_2 = arith.constant 0 : i32
    return %c0_i32, %c0_i32_0, %c0_i32_1 : i32, i32, i32
  }
  func.func @transform_8(%arg0: i32, %arg1: i32) -> (i32, i32) {
    %c0_i32 = arith.constant 0 : i32
    %c0_i32_0 = arith.constant 0 : i32
    %c0_i32_1 = arith.constant 0 : i32
    return %c0_i32, %c0_i32_0 : i32, i32
  }
  func.func @transform_9(%arg0: i32, %arg1: i32) -> (i32, i32, i32) {
    %c0_i32 = arith.constant 0 : i32
    %c0_i32_0 = arith.constant 0 : i32
    return %arg0, %arg1, %c0_i32 : i32, i32, i32
  }
}

</mosaic_0001>

<bundles_post_ra>
// kernel: tpu_custom_call.1
= control target key start
LH: loop header
LB: loop body
LE: loop exit
PB: predicated region body
PF: predicated region fallthrough
CT: control target
= control target key end

     0   :  { %s10307_s0 = inlined_call_operand.vmem [shape: f32[2,2,18,14], index: 0, kind: input, shape index: {}]   ;;  %s10308_s1 = inlined_call_operand.vmem [shape: f32[3,3,2], index: 1, kind: input, shape index: {}]   ;;  %s10309_s2 = inlined_call_operand.vmem [shape: f32[1,2], index: 2, kind: input, shape index: {}]   ;;  %s10310_s3 = inlined_call_operand.vmem [shape: bf16[9,2,2], index: 3, kind: input, shape index: {}]   ;;  %s10311_s4 = inlined_call_operand.vmem [shape: f32[1,2], index: 4, kind: input, shape index: {}]   ;;  %s10312_s5 = inlined_call_operand.vmem [shape: bf16[9,2,4], index: 5, kind: input, shape index: {}]   ;;  %s10313_s6 = inlined_call_operand.vmem [shape: f32[1,4], index: 6, kind: input, shape index: {}]   ;;  %s10314_s7 = inlined_call_operand.vmem [shape: bf16[4,4,32], index: 7, kind: input, shape index: {}]   ;;  %s10315_s8 = inlined_call_operand.vmem [shape: f32[1,32], index: 8, kind: input, shape index: {}]   ;;  %s10316_s9 = inlined_call_operand.hbm [shape: f32[2,16,32], index: 9, kind: output, shape index: {}]  }
   0x1   :  { %10656 = sst [smem:[#allocation183_spill]] %s10307_s0 }
   0x2   :  { %10657 = sst [smem:[#allocation184_spill]] %s10308_s1 }
   0x3   :  { %10658 = sst [smem:[#allocation185_spill]] %s10309_s2 }
   0x4   :  { %14 = vsyncpa [#allocation5], 0 }
   0x5   :  { %16 = vsyncpa [#allocation5 + $0x1], 0  ;;  %s6679_s30 = smov 0   ;;  %s6681_s10 = smov 0  }
   0x6   :  { %s6683_s11 = smov 0   ;;  %s6685_s12 = smov 0  }
   0x7   :  { %s6687_s13 = smov 0   ;;  %s6689_s14 = smov 0  }
   0x8   :  { %s6691_s15 = smov 0   ;;  %s6693_s16 = smov 0  }
   0x9 LB: > { %s6158_s17 = sadd.s32 4294967295, %s6626_s16   ;;  %s6159_s18 = sadd.s32 4294967294, %s6626_s16   ;;  %s6626_s16 = sphi %s6693_s16, %s22_s16   ;;  %s6622_s15 = sphi %s6691_s15, %s11236_s15   ;;  %s6618_s14 = sphi %s6689_s14, %s11235_s14   ;;  %s6614_s13 = sphi %s6687_s13, %s11234_s13   ;;  %s6610_s12 = sphi %s6685_s12, %s11233_s12   ;;  %s6606_s11 = sphi %s6683_s11, %s11232_s11   ;;  %s6602_s10 = sphi %s6681_s10, %s11231_s10   ;;  %s6598_s30 = sphi %s6679_s30, %s11230_s30  }
   0xa   : > { %s31_s19 = sadd.s32 1, %s6618_s14  ;;  %s34_s20 = sadd.s32 1, %s6622_s15 }
   0xb   : > { %p32_p0 = scmp.ge.s32.totalorder %s31_s19, 2  ;;  %p249_p1 = scmp.ne.s32.totalorder %s6606_s11, %s6602_s10 }
   0xc   : > { %p250_p2 = scmp.eq.s32.totalorder %s6158_s17, 3  ;;  %p255_p5 = scmp.ne.s32.totalorder %s6602_s10, %s6598_s30 }
   0xd   : > { %s11238_s19 = smov (%p32_p0, %s31_s19), 0  ;;  %s11240_s20 = smov (!%p32_p0, %s34_s20), %s6622_s15 }
   0xe   : > { %s235_s21 = ssub.s32 %s6618_s14, %s11238_s19  ;;  %p6730_p3 = por %p250_p2, %p249_p1 }
   0xf   : > { %p36_p4 = scmp.ge.s32.totalorder %s11240_s20, 2  ;;  %p256_p6 = scmp.eq.s32.totalorder %s6159_s18, 3 }
  0x10   : > { %p6162_p7 = scmp.ge.s32.totalorder %s6626_s16, 1  ;;  %p310_p9 = scmp.lt.s32.totalorder %s6626_s16, 5 }
  0x11   : > { %s11242_s20 = smov (%p36_p4, %s11240_s20), 0  ;;  %p6739_p8 = por %p256_p6, %p255_p5 }
  0x12   : > { %10660 = sst [smem:[#allocation7_spill]] %s11242_s20  ;;  %s234_s24 = ssub.s32 %s6622_s15, %s11242_s20 }
  0x13   : > { %s239_s25 = sadd.s32 1, %s6606_s11  ;;  %s236_s26 = sor.u32 %s235_s21, %s234_s24 }
  0x14   : > { %p311_p10 = pnand %p6162_p7, %p310_p9  ;;  %p237_p11 = scmp.eq.s32.totalorder %s236_s26, 0 }
  0x16   : > { %s6748_s27 = scalar_select %p237_p11, %s6606_s11, %s239_s25  }
  0x17   : > { %314 = sbr.rel (%p311_p10) target bundleno = 2338 (0x922), region = 56 }
  0x1c   : > { %v365_v0 = vlaneseq  ;;  %p350_p12 = scmp.lt.s32.totalorder %s6614_s13, 1  ;;  %p352_p13 = scmp.lt.s32.totalorder %s6610_s12, 1  ;;  %vm1743_vm0 = vcmask 15360   ;;  %v10318_v43 = vmov 0.0   ;;  %vm1745_vm1 = vcmask 11264  }
  0x1d   : > { %s10663_s0 = sld [smem:[#allocation183_spill]]  ;;  %1744 = vst.msk [vmem:[#allocation2] sm:$0xff] %vm1743_vm0, %v10318_v43  ;;  %vm2314_vm8 = vcmask 1040384   ;;  %vm5107_vm9 = vcmask 1041408   ;;  %vm5108_vm10 = vcmask 1045508   ;;  %vm5338_vm14 = vcmask 9216  }
  0x1e   : > { %v6752_v1 = vshrl.u32 %v365_v0, 7  ;;  %s351_s28 = scalar_select %p350_p12, %s6614_s13, 1  ;;  %1746 = vst.msk [vmem:[#allocation2 + $0x8] sm:$0xf] %vm1745_vm1, %v10318_v43  ;;  %vm9802_vm11 = vmor %vm5107_vm9, %vm5108_vm10 }
  0x1f   : > { %s353_s29 = scalar_select %p352_p13, %s6610_s12, 1  ;;  %1748 = vst.msk [vmem:[#allocation2 + $0x110] sm:$0xff] %vm1743_vm0, %v10318_v43 }
  0x20   : > { %10662 = vst [vmem:[#allocation8_spill] sm:$0xff] %v6752_v1  ;;  %6408 = vset.pattern.permute.xlu1 %v6752_v1  ;;  %v6758_v2 = vadd.s32 9, %v6752_v1  ;;  %v6761_v3 = vadd.s32 1, %v6752_v1  ;;  %s6335_s17 = smul.u32 6, %s351_s28  ;;  %v6779_v7 = vadd.s32 2, %v6752_v1  ;;  %v6782_v8 = vadd.s32 10, %v6752_v1 }
  0x21   : > { %s6334_s18 = smul.u32 3, %s353_s29  ;;  %v6792_v10 = vadd.s32 8, %v6752_v1  ;;  %s10666_s1 = sld [smem:[#allocation184_spill]]  ;;  %1749 = vst.msk [vmem:[#allocation2 + $0x118] sm:$0xf] %vm1745_vm1, %v10318_v43 }
  0x22   : > { %6426 = vset.pattern.permute.xlu0 %v6758_v2  ;;  %6410 = vset.pattern.permute.xlu2 %v6761_v3  ;;  %5337 = vst.msk [vmem:[#allocation3] sm:$0xff] %vm1743_vm0, %v10318_v43  ;;  %s10670_s2 = sld [smem:[#allocation185_spill]]  ;;  %s6330_s29 = sshll.u32 %s6614_s13, 1 }
  0x23   : > { %s356_s21 = sadd.s32 %s6335_s17, %s6334_s18  ;;  %10664 = vst [vmem:[#allocation9_spill] sm:$0xff] %v6792_v10  ;;  %s347_s17 = sand.u32 1, %s6602_s10  }
  0x24   : > { %s6164_s24 = sshll.u32 %s356_s21, 3  ;;  %5341 = vst.msk [vmem:[#allocation3 + $0x90] sm:$0xff] %vm1743_vm0, %v10318_v43  ;;  %v1783_v46 = vld [vmem:[#allocation2] sm:$0xff]  ;;  %s6165_s21 = sshll.u32 %s6610_s12, 3 }
  0x25   : > { %s6768_s20 = scalar_lea.vmem %s10663_s0, %s6164_s24  ;;  %v1847_v48 = vrot.slane %v1783_v46, 2  ;;  %v1848_v49 = vrot.slane %v1783_v46, 4  ;;  %v1849_v50 = vrot.slane %v1783_v46, 6  ;;  %1895 = vst [vmem:[#allocation1] ss:$4 sm:$0xff] %v1783_v46  ;;  %s6981_s26 = sadd.s32 4294967294, %s6165_s21 }
  0x26   : > { %v6771_v4 = vld [vmem:[%s6768_s20] sm:$0xff]  ;;  %v6811_v13 = vld [vmem:[%s6768_s20 + $0x8] sm:$0xff]  ;;  %v1784_v53 = vld [vmem:[#allocation2 + $0x8] sm:$0x3]  ;;  %s5222_s25 = sadd.s32 4294967295, %s6165_s21  ;;  %s6070_s18 = sadd.s32 %s6610_s12, %s6330_s29 }
  0x27   : > { %v377_v5 = vperm.slane %v6771_v4, 1  ;;  %v6775_v6 = vperm.slane %v6771_v4, 3  ;;  %v6788_v9 = vperm.slane %v6771_v4, 0  ;;  %v6795_v11 = vperm.slane %v6771_v4, 4  ;;  %v6841_v18 = vld [vmem:[%s10666_s1 + $0x4] ss:$0 sm:$0xff] }
  0x28   : > { %v6801_v12 = vperm.slane %v6771_v4, 6  ;;  %v6814_v14 = vperm.slane %v6811_v13, 2  ;;  %v390_v15 = vperm.slane %v6771_v4, 2  ;;  %v6826_v16 = vperm.slane %v6811_v13, 3  ;;  %v6846_v19 = vld [vmem:[%s10666_s1] ss:$0 sm:$0xff] }
  0x29   : > { %382 = vperm.xlu1 %6408, %v377_v5   ;;  %v6851_v20 = vld [vmem:[%s10666_s1 + $0x8] ss:$0 sm:$0xff]  ;;  %v6866_v27 = vperm.slane %v6811_v13, 5  ;;  %v6877_v29 = vperm.slane %v6771_v4, 5  ;;  %1897 = vst [vmem:[#allocation1 + $0x1] ss:$4 sm:$0xff] %v1847_v48 }
  0x2a   : > { %684 = vperm.xlu0 %6426, %v6775_v6   ;;  %654 = vperm.xlu2 %6410, %v377_v5   ;;  %10665 = vst [vmem:[#allocation10_spill] sm:$0xff] %v6826_v16  ;;  %v6944_v57 = vld [vmem:[%s10666_s1 + $0x1] ss:$0 sm:$0xff]  ;;  %v6954_v61 = vld [vmem:[%s10666_s1 + $0x5] ss:$0 sm:$0xff]  ;;  %s6163_s24 = sshll.u32 %s347_s17, 3 }
  0x2b   : > { %10667 = vst [vmem:[#allocation11_spill] sm:$0xff] %v6866_v27  ;;  %v7000_v46 = vld [vmem:[%s10666_s1 + $0xa] ss:$0 sm:$0xff]  ;;  %s6060_s12 = scalar_lea.sflag [#allocation5], %s347_s17 }
  0x2c   : > { %1899 = vst [vmem:[#allocation1 + $0x2] ss:$4 sm:$0xff] %v1848_v49 }
  0x2d   : > { %1901 = vst [vmem:[#allocation1 + $0x3] ss:$4 sm:$0xff] %v1849_v50 }
  0x2e   : > { %1903 = vst [vmem:[#allocation1 + $0x20] ss:$4 sm:$0xff] %v1784_v53  ;;  %v7009_v53 = vld [vmem:[%s10670_s2] ss:$0 sm:$0xff] }
  0x31   : > { %6409 = vset.pattern.permute.xlu1 %v6779_v7 }
  0x32   : > { %6427 = vset.pattern.permute.xlu0 %v6782_v8  ;;  %6411 = vset.pattern.permute.xlu2 %v6779_v7 }
  0x39   : > { %901 = vperm.xlu1 %6409, %v6788_v9  }
  0x3a   : > { %919 = vperm.xlu0 %6427, %v377_v5   ;;  %913 = vperm.xlu2 %6411, %v377_v5  }
  0x41   : > { %6412 = vset.pattern.permute.xlu1 %v6792_v10 }
  0x42   : > { %955 = vperm.xlu0 %6427, %v6795_v11   ;;  %6413 = vset.pattern.permute.xlu2 %v6792_v10 }
  0x49   : > { %375 = vperm.xlu1 %6412, %v6788_v9  }
  0x4a   : > { %979 = vperm.xlu0 %6427, %v6801_v12   ;;  %388 = vperm.xlu2 %6413, %v377_v5  }
  0x51   : > { %6414 = vset.pattern.permute.xlu1 %v6758_v2 }
  0x52   : > { %6442 = vset.pattern.permute.xlu0 %v6792_v10  ;;  %6415 = vset.pattern.permute.xlu2 %v6758_v2 }
  0x59   : > { %648 = vperm.xlu1 %6414, %v6788_v9  }
  0x5a   : > { %453 = vperm.xlu0 %6442, %v6801_v12   ;;  %660 = vperm.xlu2 %6415, %v377_v5   ;;  %v6963_v5 = vld [vmem:[%s10666_s1 + $0x9] ss:$0 sm:$0xff] }
  0x61   : > { %6416 = vset.pattern.permute.xlu1 %v6761_v3 }
  0x62   : > { %505 = vperm.xlu0 %6442, %v6814_v14   ;;  %6417 = vset.pattern.permute.xlu2 %v6782_v8 }
  0x69   : > { %666 = vperm.xlu1 %6416, %v390_v15  }
  0x6a   : > { %6459 = vset.pattern.permute.xlu0 %v6779_v7  ;;  %907 = vperm.xlu2 %6417, %v6788_v9  }
  0x71   : > { %6418 = vset.pattern.permute.xlu1 %v6779_v7 }
  0x72   : > { %949 = vperm.xlu0 %6459, %v6795_v11   ;;  %6419 = vset.pattern.permute.xlu2 %v6792_v10 }
  0x79   : > { %925 = vperm.xlu1 %6418, %v390_v15  }
  0x7a   : > { %1033 = vperm.xlu0 %6459, %v6826_v16   ;;  %401 = vperm.xlu2 %6419, %v390_v15  }
  0x81   : > { %6420 = vset.pattern.permute.xlu1 %v6752_v1 }
  0x82   : > { %6464 = vset.pattern.permute.xlu0 %v6752_v1  ;;  %6421 = vset.pattern.permute.xlu2 %v6758_v2 }
  0x84   : > { %v6834_v17 = vpop.permute.xlu2 %654 }
  0x85   : > { %v835_v23 = vmul.f32 %v6841_v18, %v6834_v17 }
  0x89   : > { %408 = vperm.xlu1 %6420, %v6775_v6  }
  0x8a   : > { %369 = vperm.xlu0 %6464, %v6788_v9   ;;  %672 = vperm.xlu2 %6421, %v390_v15  }
  0x91   : > { %6422 = vset.pattern.permute.xlu1 %v6782_v8 }
  0x92   : > { %395 = vperm.xlu0 %6464, %v390_v15   ;;  %6423 = vset.pattern.permute.xlu2 %v6779_v7 }
  0x94   : > { %v6853_v21 = vpop.permute.xlu2 %913 }
  0x95   : > { %v1094_v25 = vmul.f32 %v6851_v20, %v6853_v21 }
  0x99   : > { %931 = vperm.xlu1 %6422, %v390_v15   ;;  %v6974_v15 = vld [vmem:[%s10666_s1 + $0x2] ss:$0 sm:$0xff] }
  0x9a   : > { %499 = vperm.xlu0 %6464, %v6814_v14   ;;  %937 = vperm.xlu2 %6423, %v6775_v6  }
  0x9b   : > { %v6857_v22 = vpop.permute.xlu1 %382 }
  0x9c   : > { %v576_v24 = vmul.f32 %v6846_v19, %v6857_v22  ;;  %v6879_v30 = vpop.permute.xlu0 %684 }
  0x9e   : > { %v867_v26 = vadd.f32 %v835_v23, %v576_v24  ;;  %v6986_v24 = vld [vmem:[%s10666_s1 + $0x6] ss:$0 sm:$0xff] }
  0xa0   : > { %v6868_v28 = vadd.f32 %v1094_v25, %v867_v26 }
  0xa1   : > { %6424 = vset.pattern.permute.xlu1 %v6792_v10 }
  0xa2   : > { %538 = vperm.xlu0 %6464, %v6866_v27   ;;  %6425 = vset.pattern.permute.xlu2 %v6752_v1 }
  0xa4   : > { %v6898_v34 = vpop.permute.xlu2 %388 }
  0xa5   : > { %v1172_v60 = vmul.f32 %v6944_v57, %v6898_v34 }
  0xa9   : > { %414 = vperm.xlu1 %6424, %v6775_v6  }
  0xaa   : > { %6469 = vset.pattern.permute.xlu0 %v6761_v3  ;;  %421 = vperm.xlu2 %6425, %v6795_v11  }
  0xab   : > { %v6905_v36 = vpop.permute.xlu1 %901 }
  0xac   : > { %v6885_v31 = vpop.permute.xlu0 %919 }
  0xb1   : > { %6428 = vset.pattern.permute.xlu1 %v6761_v3 }
  0xb2   : > { %642 = vperm.xlu0 %6469, %v6788_v9   ;;  %434 = vperm.xlu2 %6425, %v6877_v29   ;;  %v1328_v9 = vmul.f32 %v6963_v5, %v6885_v31 }
  0xb4   : > { %v6891_v32 = vpop.permute.xlu0 %955  ;;  %v6907_v37 = vpop.permute.xlu2 %660 }
  0xb9   : > { %690 = vperm.xlu1 %6428, %v6795_v11  }
  0xba   : > { %678 = vperm.xlu0 %6469, %v6775_v6   ;;  %6429 = vset.pattern.permute.xlu2 %v6782_v8 }
  0xbb   : > { %v376_v39 = vpop.permute.xlu1 %375 }
  0xbc   : > { %v6895_v33 = vpop.permute.xlu0 %979  ;;  %v575_v51 = vmul.f32 %v6846_v19, %v376_v39  ;;  %v10320_v39 = vstv %s6981_s26 }
  0xbd   : > { %v1700_v49 = vadd.s32 %v10320_v39, %v6792_v10 }
  0xbf   : > { %vm1702_vm2 = vcmp.ge.s32.totalorder %v1700_v49, 0  ;;  %vm1704_vm3 = vcmp.lt.s32.totalorder %v1700_v49, 16 }
  0xc0   : > { %vm7022_vm4 = vmand %vm1702_vm2, %vm1704_vm3 }
  0xc1   : > { %702 = vperm.xlu1 %6428, %v6877_v29  }
  0xc2   : > { %943 = vperm.xlu2 %6429, %v6775_v6   ;;  %v1250_v6 = vmul.f32 %v6954_v61, %v6907_v37 }
  0xc4   : > { %v908_v40 = vpop.permute.xlu2 %907 }
  0xc5   : > { %v1093_v55 = vmul.f32 %v6851_v20, %v908_v40 }
  0xc9   : > { %6430 = vset.pattern.permute.xlu1 %v6792_v10 }
  0xca   : > { %6431 = vset.pattern.permute.xlu2 %v6758_v2 }
  0xcb   : > { %v649_v42 = vpop.permute.xlu1 %648 }
  0xcc   : > { %v6901_v35 = vpop.permute.xlu0 %453  ;;  %v834_v45 = vmul.f32 %v6841_v18, %v649_v42 }
  0xce   : > { %v866_v54 = vadd.f32 %v834_v45, %v575_v51 }
  0xd0   : > { %v1125_v58 = vadd.f32 %v1093_v55, %v866_v54  ;;  %v577_v55 = vmul.f32 %v6846_v19, %v6898_v34 }
  0xd1   : > { %427 = vperm.xlu1 %6430, %v6795_v11  }
  0xd2   : > { %696 = vperm.xlu2 %6431, %v6795_v11   ;;  %v1204_v62 = vadd.f32 %v1172_v60, %v1125_v58  ;;  %v7015_v58 = vperm.slane %v6771_v4, 7  ;;  %v836_v60 = vmul.f32 %v6841_v18, %v6907_v37  ;;  %v1095_v4 = vmul.f32 %v6851_v20, %v6885_v31 }
  0xd4   : > { %v6909_v38 = vpop.permute.xlu0 %505  ;;  %v6923_v44 = vpop.permute.xlu2 %401  ;;  %v1282_v11 = vadd.f32 %v1250_v6, %v1204_v62  ;;  %v868_v34 = vadd.f32 %v836_v60, %v577_v55 }
  0xd5   : > { %10668 = vst [vmem:[#allocation12_spill] sm:$0xff] %v6909_v38  ;;  %v1407_v26 = vmul.f32 %v6974_v15, %v6923_v44 }
  0xd6   : > { %v1360_v25 = vadd.f32 %v1328_v9, %v1282_v11 }
  0xd8   : > { %v1439_v48 = vadd.f32 %v1407_v26, %v1360_v25  ;;  %v1174_v26 = vmul.f32 %v6944_v57, %v6923_v44 }
  0xd9   : > { %6432 = vset.pattern.permute.xlu1 %v6779_v7 }
  0xda   : > { %6433 = vset.pattern.permute.xlu2 %v6752_v1 }
  0xdb   : > { %v6934_v47 = vpop.permute.xlu1 %666 }
  0xe1   : > { %961 = vperm.xlu1 %6432, %v6877_v29  }
  0xe2   : > { %447 = vperm.xlu2 %6433, %v6801_v12  }
  0xe4   : > { %v6915_v41 = vpop.permute.xlu0 %949  ;;  %v673_v56 = vpop.permute.xlu2 %672 }
  0xe5   : > { %v1485_v40 = vmul.f32 %v6986_v24, %v673_v56  ;;  %v838_v49 = vmul.f32 %v6841_v18, %v673_v56  ;;  %v1252_v31 = vmul.f32 %v6954_v61, %v673_v56  ;;  %v1254_v56 = vmul.f32 %v6954_v61, %v6879_v30 }
  0xe7   : > { %v1517_v51 = vadd.f32 %v1485_v40, %v1439_v48  ;;  %v579_v48 = vmul.f32 %v6846_v19, %v6923_v44  ;;  %v7046_v44 = vld.sshfl [vmem:[#allocation1] sm:$0xff pattern:$0x73625140] }
  0xe9   : > { %6434 = vset.pattern.permute.xlu1 %v6792_v10  ;;  %v870_v60 = vadd.f32 %v838_v49, %v579_v48 }
  0xea   : > { %6435 = vset.pattern.permute.xlu2 %v6761_v3 }
  0xeb   : > { %v6947_v59 = vpop.permute.xlu1 %925 }
  0xec   : > { %v6937_v52 = vpop.permute.xlu0 %1033 }
  0xed   : > { %10669 = vst [vmem:[#allocation13_spill] sm:$0xff] %v6937_v52 }
  0xf1   : > { %440 = vperm.xlu1 %6434, %v6877_v29  }
  0xf2   : > { %714 = vperm.xlu2 %6435, %v6801_v12  }
  0xf4   : > { %v6958_v0 = vpop.permute.xlu2 %937 }
  0xf9   : > { %6436 = vset.pattern.permute.xlu1 %v6758_v2 }
  0xfa   : > { %6437 = vset.pattern.permute.xlu2 %v6779_v7 }
  0xfb   : > { %v6977_v23 = vpop.permute.xlu1 %408 }
  0xfc   : > { %v6956_v63 = vpop.permute.xlu0 %369 }
 0x101   : > { %708 = vperm.xlu1 %6436, %v6877_v29  }
 0x102   : > { %973 = vperm.xlu2 %6437, %v6801_v12  }
 0x104   : > { %v6992_v42 = vpop.permute.xlu0 %395  ;;  %v6994_v45 = vpop.permute.xlu2 %421 }
 0x109   : > { %6438 = vset.pattern.permute.xlu1 %v6752_v1 }
 0x10a   : > { %6439 = vset.pattern.permute.xlu2 %v6758_v2 }
 0x10b   : > { %v932_v50 = vpop.permute.xlu1 %931 }
 0x10c   : > { %v1563_v54 = vmul.f32 %v7000_v46, %v932_v50  ;;  %v7020_v9 = vpop.permute.xlu0 %499  ;;  %v7030_v37 = vpop.permute.xlu2 %434  ;;  %v1330_v55 = vmul.f32 %v6963_v5, %v932_v50 }
 0x10d   : > { %10671 = vst [vmem:[#allocation14_spill] sm:$0xff] %v7020_v9 }
 0x10e   : > { %v1595_v62 = vadd.f32 %v1563_v54, %v1517_v51  ;;  %v1127_v51 = vadd.f32 %v1095_v4, %v868_v34  ;;  %v1487_v34 = vmul.f32 %v6986_v24, %v6879_v30 }
 0x110   : > { %v1631_v6 = vadd.f32 %v7009_v53, %v1595_v62  ;;  %v1206_v54 = vadd.f32 %v1174_v26, %v1127_v51  ;;  %v840_v62 = vmul.f32 %v6841_v18, %v6879_v30 }
 0x111   : > { %460 = vperm.xlu1 %6438, %v7015_v58  }
 0x112   : > { %v1663_v25 = vmax.f32 %v1631_v6, 0.0  ;;  %720 = vperm.xlu2 %6439, %v6801_v12   ;;  %v1097_v12 = vmul.f32 %v6851_v20, %v932_v50  ;;  %v1284_v6 = vadd.f32 %v1252_v31, %v1206_v54  ;;  %v1173_v50 = vmul.f32 %v6944_v57, %v6992_v42 }
 0x114   : > { %v1712_v40 = vsel %vm7022_vm4, %v1663_v25, 0.0  ;;  %v7049_v25 = vpop.permute.xlu0 %538  ;;  %v1129_v4 = vadd.f32 %v1097_v12, %v870_v60  ;;  %v1205_v60 = vadd.f32 %v1173_v50, %v6868_v28 }
 0x115   : > { %1752 = vst.msk [vmem:[#allocation2 + $0x18] sm:$0xf] %vm1745_vm1, %v1712_v40  ;;  %v1362_v40 = vadd.f32 %v1330_v55, %v1284_v6  ;;  %v578_v55 = vmul.f32 %v6846_v19, %v6992_v42 }
 0x116   : > { %10674 = vst [vmem:[#allocation15_spill] sm:$0xff] %v7049_v25 }
 0x119   : > { %6440 = vset.pattern.permute.xlu1 %v6782_v8 }
 0x11a   : > { %6441 = vset.pattern.permute.xlu2 %v6761_v3 }
 0x11b   : > { %v415_v26 = vpop.permute.xlu1 %414 }
 0x11c   : > { %v1786_v48 = vld [vmem:[#allocation2 + $0x18] sm:$0x3]  ;;  %v581_v49 = vmul.f32 %v6846_v19, %v415_v26  ;;  %v1176_v51 = vmul.f32 %v6944_v57, %v415_v26  ;;  %v1409_v31 = vmul.f32 %v6974_v15, %v415_v26  ;;  %v7060_v54 = vpop.permute.xlu2 %943 }
 0x11d   : > { %1913 = vst [vmem:[#allocation1 + $0x1] ss:$4 sm:$0xff] %v1786_v48  ;;  %v1099_v43 = vmul.f32 %v6851_v20, %v7060_v54  ;;  %v1565_v12 = vmul.f32 %v7000_v46, %v7060_v54  ;;  %v574_v48 = vmul.f32 %v6846_v19, %v6956_v63  ;;  %v1249_v63 = vmul.f32 %v6954_v61, %v6834_v17 }
 0x11e   : > { %v872_v30 = vadd.f32 %v840_v62, %v581_v49  ;;  %v1208_v39 = vadd.f32 %v1176_v51, %v1129_v4  ;;  %v1441_v25 = vadd.f32 %v1409_v31, %v1362_v40  ;;  %v837_v62 = vmul.f32 %v6841_v18, %v6934_v47 }
 0x11f   : > { %v1251_v4 = vmul.f32 %v6954_v61, %v6934_v47  ;;  %v1327_v49 = vmul.f32 %v6963_v5, %v6853_v21  ;;  %v1092_v51 = vmul.f32 %v6851_v20, %v6905_v36  ;;  %v1484_v17 = vmul.f32 %v6986_v24, %v6934_v47 }
 0x120   : > { %v7069_v6 = vadd.f32 %v1099_v43, %v872_v30  ;;  %v7071_v26 = vadd.f32 %v1254_v56, %v1208_v39  ;;  %v1519_v52 = vadd.f32 %v1487_v34, %v1441_v25  ;;  %v869_v28 = vadd.f32 %v837_v62, %v578_v55 }
 0x121   : > { %967 = vperm.xlu1 %6440, %v6877_v29   ;;  %v1283_v43 = vadd.f32 %v1251_v4, %v1205_v60  ;;  %v7084_v29 = vperm.slane %v6811_v13, 0  ;;  %v1096_v34 = vmul.f32 %v6851_v20, %v6947_v59  ;;  %v1171_v30 = vmul.f32 %v6944_v57, %v6857_v22 }
 0x122   : > { %v1597_v40 = vadd.f32 %v1565_v12, %v1519_v52  ;;  %726 = vperm.xlu2 %6441, %v7015_v58   ;;  %v1329_v52 = vmul.f32 %v6963_v5, %v6947_v59  ;;  %v1100_v21 = vmul.f32 %v6851_v20, %v6915_v41  ;;  %v1333_v62 = vmul.f32 %v6963_v5, %v6915_v41 }
 0x123   : > { %738 = vperm.xlu0 %6469, %v7084_v29   ;;  %v1128_v12 = vadd.f32 %v1096_v34, %v869_v28  ;;  %v1175_v22 = vmul.f32 %v6944_v57, %v6977_v23  ;;  %v1408_v4 = vmul.f32 %v6974_v15, %v6977_v23  ;;  %v1406_v28 = vmul.f32 %v6974_v15, %v6992_v42 }
 0x124   : > { %v1633_v39 = vadd.f32 %v7009_v53, %v1597_v40  ;;  %v643_v56 = vpop.permute.xlu0 %642  ;;  %v1361_v60 = vadd.f32 %v1329_v52, %v1283_v43  ;;  %v10675_v40 = vstv %s6981_s26  ;;  %v1098_v43 = vmul.f32 %v6851_v20, %v6958_v0 }
 0x125   : > { %v833_v25 = vmul.f32 %v6841_v18, %v643_v56  ;;  %v1699_v47 = vadd.s32 %v10675_v40, %v6752_v1  ;;  %v1331_v40 = vmul.f32 %v6963_v5, %v6958_v0 }
 0x126   : > { %v1665_v50 = vmax.f32 %v1633_v39, 0.0 }
 0x127   : > { %v865_v31 = vadd.f32 %v833_v25, %v574_v48  ;;  %v580_v48 = vmul.f32 %v6846_v19, %v6977_v23  ;;  %v582_v25 = vmul.f32 %v6846_v19, %v6994_v45  ;;  %vm1701_vm5 = vcmp.ge.s32.totalorder %v1699_v47, 0 }
 0x128   : > { %v1714_v55 = vsel %vm7022_vm4, %v1665_v50, 0.0  ;;  %v1207_v50 = vadd.f32 %v1175_v22, %v1128_v12  ;;  %v1410_v22 = vmul.f32 %v6974_v15, %v6994_v45  ;;  %vm1703_vm6 = vcmp.lt.s32.totalorder %v1699_v47, 16 }
 0x129   : > { %1754 = vst.msk [vmem:[#allocation2 + $0x28] sm:$0xf] %vm1745_vm1, %v1714_v55  ;;  %v1124_v36 = vadd.f32 %v1092_v51, %v865_v31  ;;  %6443 = vset.pattern.permute.xlu1 %v6792_v10  ;;  %v1440_v51 = vadd.f32 %v1408_v4, %v1361_v60  ;;  %vm7150_vm7 = vmand %vm1701_vm5, %vm1703_vm6 }
 0x12a   : > { %6444 = vset.pattern.permute.xlu2 %v6779_v7 }
 0x12b   : > { %v1203_v39 = vadd.f32 %v1171_v30, %v1124_v36  ;;  %v691_v56 = vpop.permute.xlu1 %690  ;;  %v1564_v30 = vmul.f32 %v7000_v46, %v6958_v0  ;;  %v1177_v36 = vmul.f32 %v6944_v57, %v6994_v45  ;;  %v1562_v0 = vmul.f32 %v7000_v46, %v6947_v59 }
 0x12c   : > { %v841_v34 = vmul.f32 %v6841_v18, %v691_v56  ;;  %v679_v52 = vpop.permute.xlu0 %678  ;;  %v1488_v45 = vmul.f32 %v6986_v24, %v691_v56 }
 0x12d   : > { %v1281_v31 = vadd.f32 %v1249_v63, %v1203_v39  ;;  %v839_v55 = vmul.f32 %v6841_v18, %v679_v52  ;;  %v1253_v23 = vmul.f32 %v6954_v61, %v679_v52  ;;  %v1486_v42 = vmul.f32 %v6986_v24, %v679_v52 }
 0x12e   : > { %v873_v38 = vadd.f32 %v841_v34, %v582_v25 }
 0x12f   : > { %v1359_v27 = vadd.f32 %v1327_v49, %v1281_v31  ;;  %v871_v12 = vadd.f32 %v839_v55, %v580_v48  ;;  %v1285_v60 = vadd.f32 %v1253_v23, %v1207_v50  ;;  %v1518_v63 = vadd.f32 %v1486_v42, %v1440_v51  ;;  %v697_v50 = vpop.permute.xlu2 %696 }
 0x130   : > { %v7137_v4 = vadd.f32 %v1100_v21, %v873_v38  ;;  %v1566_v49 = vmul.f32 %v7000_v46, %v6915_v41  ;;  %v1255_v48 = vmul.f32 %v6954_v61, %v691_v56  ;;  %v2032_v56 = vld [vmem:[%s10310_s3] sm:$0x1]  ;;  %v7165_v31 = vperm.slane %v6811_v13, 6 }
 0x131   : > { %v1438_v39 = vadd.f32 %v1406_v28, %v1359_v27  ;;  %v1130_v52 = vadd.f32 %v1098_v43, %v871_v12  ;;  %v1363_v9 = vadd.f32 %v1331_v40, %v1285_v60  ;;  %v1596_v16 = vadd.f32 %v1564_v30, %v1518_v63  ;;  %466 = vperm.xlu1 %6443, %v7015_v58  }
 0x132   : > { %985 = vperm.xlu2 %6444, %v7015_v58   ;;  %v2408_v51 = vsel %vm2314_vm8, %v2032_v56, 0  ;;  %810 = vperm.xlu0 %6469, %v7165_v31   ;;  %v1332_v60 = vmul.f32 %v6963_v5, %v7060_v54  ;;  %v1101_v54 = vmul.f32 %v6851_v20, %v6891_v32  ;;  %v1334_v56 = vmul.f32 %v6963_v5, %v6891_v32 }
 0x133   : > { %v1516_v38 = vadd.f32 %v1484_v17, %v1438_v39  ;;  %v1209_v21 = vadd.f32 %v1177_v36, %v1130_v52  ;;  %v1442_v27 = vadd.f32 %v1410_v22, %v1363_v9  ;;  %v1632_v28 = vadd.f32 %v7009_v53, %v1596_v16  ;;  %2417 = vmatpush.bf16.msra.mxu1 %v2408_v51  ;;  %v7174_v40 = vpop.permute.xlu1 %702 }
 0x135   : > { %v1594_v59 = vadd.f32 %v1562_v0, %v1516_v38  ;;  %v1520_v25 = vadd.f32 %v1488_v45, %v1442_v27  ;;  %v1664_v41 = vmax.f32 %v1632_v28, 0.0  ;;  %v1287_v34 = vadd.f32 %v1255_v48, %v1209_v21 }
 0x136   : > { %v842_v45 = vmul.f32 %v6841_v18, %v697_v50  ;;  %v1567_v28 = vmul.f32 %v7000_v46, %v6891_v32 }
 0x137   : > { %v1630_v17 = vadd.f32 %v7009_v53, %v1594_v59  ;;  %v1598_v9 = vadd.f32 %v1566_v49, %v1520_v25  ;;  %v1713_v16 = vsel %vm7150_vm7, %v1664_v41, 0.0  ;;  %v7160_v47 = vadd.f32 %v1333_v62, %v1287_v34 }
 0x138   : > { %1753 = vst.msk [vmem:[#allocation2 + $0x20] sm:$0xff] %vm1743_vm0, %v1713_v16  ;;  %v1364_v49 = vadd.f32 %v1332_v60, %v7071_v26  ;;  %v1256_v26 = vmul.f32 %v6954_v61, %v697_v50  ;;  %v1489_v59 = vmul.f32 %v6986_v24, %v697_v50 }
 0x139   : > { %v1662_v55 = vmax.f32 %v1630_v17, 0.0  ;;  %v1634_v23 = vadd.f32 %v7009_v53, %v1598_v9  ;;  %6445 = vset.pattern.permute.xlu1 %v6752_v1 }
 0x13a   : > { %6446 = vset.pattern.permute.xlu2 %v6758_v2  ;;  %6477 = vset.pattern.permute.xlu0 %v6758_v2 }
 0x13b   : > { %v1711_v62 = vsel %vm7150_vm7, %v1662_v55, 0.0  ;;  %v1666_v42 = vmax.f32 %v1634_v23, 0.0 }
 0x13c   : > { %1751 = vst.msk [vmem:[#allocation2 + $0x10] sm:$0xff] %vm1743_vm0, %v1711_v62  ;;  %v7190_v63 = vpop.permute.xlu2 %447  ;;  %v1412_v62 = vmul.f32 %v6974_v15, %v7030_v37 }
 0x13d   : > { %v1715_v30 = vsel %vm7150_vm7, %v1666_v42, 0.0  ;;  %v586_v50 = vmul.f32 %v6846_v19, %v7190_v63 }
 0x13e   : > { %1755 = vst.msk [vmem:[#allocation2 + $0x30] sm:$0xff] %vm1743_vm0, %v1715_v30 }
 0x13f   : > { %v7179_v36 = vld [vmem:[#allocation2 + $0x20] sm:$0xff] }
 0x140   : > { %v7182_v12 = vrot.slane %v7179_v36, 2  ;;  %1914 = vst [vmem:[#allocation1 + $0x2] ss:$4 sm:$0xff] %v7179_v36  ;;  %v7238_v42 = vrot.slane %v7179_v36, 6 }
 0x141   : > { %473 = vperm.xlu1 %6445, %v7084_v29  }
 0x142   : > { %1915 = vst [vmem:[#allocation1 + $0x3] ss:$4 sm:$0xff] %v7182_v12  ;;  %732 = vperm.xlu2 %6446, %v7015_v58   ;;  %744 = vperm.xlu0 %6477, %v7084_v29  }
 0x143   : > { %v7193_v22 = vld [vmem:[#allocation2 + $0x10] sm:$0xff]  ;;  %v428_v0 = vpop.permute.xlu1 %427 }
 0x144   : > { %v10331_v39 = vrot.slane %v7193_v22, 2  ;;  %v10329_v52 = vrot.slane %v7193_v22, 6  ;;  %1905 = vst [vmem:[#allocation1 + $0x21] ss:$4 sm:$0xff] %v7193_v22  ;;  %v10330_v48 = vrot.slane %v7193_v22, 4  ;;  %v583_v38 = vmul.f32 %v6846_v19, %v428_v0 }
 0x145   : > { %v1178_v21 = vmul.f32 %v6944_v57, %v428_v0  ;;  %v1411_v27 = vmul.f32 %v6974_v15, %v428_v0  ;;  %v7220_v17 = vld [vmem:[#allocation2 + $0x30] sm:$0xff]  ;;  %v1179_v0 = vmul.f32 %v6944_v57, %v7030_v37 }
 0x146   : > { %1907 = vst [vmem:[#allocation1 + $0x22] ss:$4 sm:$0xff] %v10331_v39  ;;  %v874_v25 = vadd.f32 %v842_v45, %v583_v38  ;;  %v7231_v55 = vrot.slane %v7220_v17, 2  ;;  %v7247_v38 = vrot.slane %v7220_v17, 6 }
 0x147   : > { %1912 = vst [vmem:[#allocation1] ss:$4 sm:$0xff] %v10329_v52  ;;  %v1210_v41 = vadd.f32 %v1178_v21, %v7069_v6  ;;  %v1443_v34 = vadd.f32 %v1411_v27, %v1364_v49  ;;  %v1444_v21 = vadd.f32 %v1412_v62, %v7160_v47  ;;  %v1257_v27 = vmul.f32 %v6954_v61, %v7174_v40 }
 0x148   : > { %1909 = vst [vmem:[#allocation1 + $0x23] ss:$4 sm:$0xff] %v10330_v48  ;;  %v7226_v51 = vadd.f32 %v1101_v54, %v874_v25  ;;  %v1211_v25 = vadd.f32 %v1179_v0, %v7137_v4  ;;  %v1490_v47 = vmul.f32 %v6986_v24, %v7174_v40 }
 0x149   : > { %6447 = vset.pattern.permute.xlu1 %v6782_v8  ;;  %10678 = vst [vmem:[#allocation16_spill] sm:$0xff] %v7220_v17  ;;  %v1288_v9 = vadd.f32 %v1256_v26, %v1210_v41  ;;  %v1521_v16 = vadd.f32 %v1489_v59, %v1443_v34  ;;  %v7255_v26 = vrot.slane %v7179_v36, 4  ;;  %v7266_v41 = vrot.slane %v7220_v17, 4 }
 0x14a   : > { %6448 = vset.pattern.permute.xlu2 %v6779_v7  ;;  %10679 = vst [vmem:[#allocation17_spill] sm:$0xff] %v7231_v55  ;;  %v1289_v4 = vadd.f32 %v1257_v27, %v1211_v25 }
 0x14b   : > { %v1599_v23 = vadd.f32 %v1567_v28, %v1521_v16  ;;  %v7240_v60 = vadd.f32 %v1334_v56, %v1288_v9  ;;  %10680 = vst [vmem:[#allocation18_spill] sm:$0xff] %v7247_v38  ;;  %v1522_v56 = vadd.f32 %v1490_v47, %v1444_v21 }
 0x14c   : > { %v7228_v6 = vpop.permute.xlu2 %714  ;;  %10681 = vst [vmem:[#allocation19_spill] sm:$0xff] %v7266_v41 }
 0x14d   : > { %v845_v32 = vmul.f32 %v6841_v18, %v7228_v6  ;;  %v1635_v49 = vadd.f32 %v7009_v53, %v1599_v23  ;;  %v1492_v0 = vmul.f32 %v6986_v24, %v7228_v6 }
 0x14e   : > { %v1920_v30 = vld.sshfl [vmem:[#allocation1] sm:$0xff pattern:$0x73625140] }
 0x14f   : > { %v1911_v54 = vld.sshfl [vmem:[#allocation1 + $0x20] sm:$0xff pattern:$0x73625140]  ;;  %1922 = vst [vmem:[#allocation1] ss:$4 sm:$0xff] %v7231_v55  ;;  %v877_v45 = vadd.f32 %v845_v32, %v586_v50  ;;  %v1667_v59 = vmax.f32 %v1635_v49, 0.0  ;;  %v1414_v32 = vmul.f32 %v6974_v15, %v7190_v63 }
 0x150   : > { %1917 = vst [vmem:[#allocation1 + $0x21] ss:$4 sm:$0xff] %v7238_v42  ;;  %v2022_v28 = vpack.c.bf16 %v1911_v54, %v7046_v44  ;;  %v1788_v44 = vld [vmem:[#allocation2 + $0x28] sm:$0x3] }
 0x151   : > { %1919 = vst [vmem:[#allocation1 + $0x23] ss:$4 sm:$0xff] %v7220_v17  ;;  %991 = vperm.xlu1 %6447, %v7015_v58   ;;  %v1716_v58 = vsel %vm7022_vm4, %v1667_v59, 0.0 }
 0x152   : > { %1924 = vst [vmem:[#allocation1 + $0x2] ss:$4 sm:$0xff] %v7247_v38  ;;  %6183 = vmatmul.msk.bf16.vlgmr.msra.gmra.mxu1 %vm1743_vm0, %v2022_v28  ;;  %997 = vperm.xlu2 %6448, %v7084_v29  }
 0x153   : > { %1916 = vst [vmem:[#allocation1 + $0x20] ss:$4 sm:$0xff] %v7255_v26  ;;  %v7271_v34 = vpop.permute.xlu1 %961 }
 0x154   : > { %1918 = vst [vmem:[#allocation1 + $0x22] ss:$4 sm:$0xff] %v1788_v44  ;;  %v1335_v9 = vmul.f32 %v6963_v5, %v7271_v34  ;;  %v1568_v16 = vmul.f32 %v7000_v46, %v7271_v34 }
 0x155   : > { %1923 = vst [vmem:[#allocation1 + $0x1] ss:$4 sm:$0xff] %v7266_v41 }
 0x156   : > { %1756 = vst.msk [vmem:[#allocation2 + $0x38] sm:$0xf] %vm1745_vm1, %v1716_v58  ;;  %v1367_v50 = vadd.f32 %v1335_v9, %v1289_v4  ;;  %v1600_v23 = vadd.f32 %v1568_v16, %v1522_v56  ;;  %v7296_v58 = vperm.slane %v6811_v13, 1 }
 0x158   : > { %v1636_v62 = vadd.f32 %v7009_v53, %v1600_v23  ;;  %v1446_v54 = vadd.f32 %v1414_v32, %v1367_v50 }
 0x159   : > { %6449 = vset.pattern.permute.xlu1 %v6792_v10 }
 0x15a   : > { %v1668_v49 = vmax.f32 %v1636_v62, 0.0  ;;  %6450 = vset.pattern.permute.xlu2 %v6752_v1  ;;  %v1524_v44 = vadd.f32 %v1492_v0, %v1446_v54  ;;  %v587_v62 = vmul.f32 %v6846_v19, %v6901_v35  ;;  %v1105_v54 = vmul.f32 %v6851_v20, %v6895_v33 }
 0x15b   : > { %v1921_v59 = vld.sshfl [vmem:[#allocation1 + $0x20] sm:$0xff pattern:$0x73625140] }
 0x15c   : > { %v1717_v21 = vsel %vm7150_vm7, %v1668_v49, 0.0  ;;  %v7288_v27 = vpop.permute.xlu2 %973  ;;  %v2023_v9 = vpack.c.bf16 %v1921_v59, %v1920_v30 }
 0x15d   : > { %v1790_v28 = vld [vmem:[#allocation2 + $0x38] sm:$0x3]  ;;  %1757 = vst.msk [vmem:[#allocation2 + $0x40] sm:$0xff] %vm1743_vm0, %v1717_v21  ;;  %v1104_v25 = vmul.f32 %v6851_v20, %v7288_v27  ;;  %v1570_v47 = vmul.f32 %v7000_v46, %v7288_v27 }
 0x15e   : > { %1925 = vst [vmem:[#allocation1 + $0x3] ss:$4 sm:$0xff] %v1790_v28 }
 0x15f   : > { %v7298_v4 = vadd.f32 %v1104_v25, %v877_v45  ;;  %v1602_v56 = vadd.f32 %v1570_v47, %v1524_v44 }
 0x161   : > { %479 = vperm.xlu1 %6449, %v7084_v29   ;;  %v1638_v16 = vadd.f32 %v7009_v53, %v1602_v56 }
 0x162   : > { %6184 = vmatmul.msk.bf16.gmra.mxu1 %vm1743_vm0, %v2023_v9  ;;  %486 = vperm.xlu2 %6450, %v7296_v58  }
 0x163   : > { %v1670_v23 = vmax.f32 %v1638_v16, 0.0 }
 0x164   : > { %v7304_v50 = vld [vmem:[#allocation2 + $0x40] sm:$0xff] }
 0x165   : > { %10682 = vst [vmem:[#allocation20_spill] sm:$0xff] %v7304_v50  ;;  %v7307_v32 = vrot.slane %v7304_v50, 2  ;;  %v7310_v13 = vrot.slane %v7304_v50, 4  ;;  %v7313_v45 = vrot.slane %v7304_v50, 6  ;;  %v1719_v30 = vsel %vm7150_vm7, %v1670_v23, 0.0  ;;  %v441_v23 = vpop.permute.xlu1 %440 }
 0x166   : > { %1926 = vst [vmem:[#allocation1 + $0x20] ss:$4 sm:$0xff] %v7304_v50  ;;  %v1930_v59 = vld.sshfl [vmem:[#allocation1] sm:$0xff pattern:$0x73625140]  ;;  %v1180_v52 = vmul.f32 %v6944_v57, %v441_v23  ;;  %v585_v39 = vmul.f32 %v6846_v19, %v441_v23 }
 0x167   : > { %10683 = vst [vmem:[#allocation21_spill] sm:$0xff] %v7307_v32 }
 0x168   : > { %10684 = vst [vmem:[#allocation22_spill] sm:$0xff] %v7310_v13 }
 0x169   : > { %10685 = vst [vmem:[#allocation23_spill] sm:$0xff] %v7313_v45  ;;  %6451 = vset.pattern.permute.xlu1 %v6761_v3 }
 0x16a   : > { %1927 = vst [vmem:[#allocation1 + $0x21] ss:$4 sm:$0xff] %v7307_v32  ;;  %6452 = vset.pattern.permute.xlu2 %v6782_v8 }
 0x16b   : > { %1928 = vst [vmem:[#allocation1 + $0x22] ss:$4 sm:$0xff] %v7310_v13 }
 0x16c   : > { %1929 = vst [vmem:[#allocation1 + $0x23] ss:$4 sm:$0xff] %v7313_v45  ;;  %v7326_v0 = vpop.permute.xlu2 %720 }
 0x16d   : > { %1759 = vst.msk [vmem:[#allocation2 + $0x50] sm:$0xff] %vm1743_vm0, %v1719_v30  ;;  %v846_v49 = vmul.f32 %v6841_v18, %v7326_v0  ;;  %v843_v30 = vmul.f32 %v6841_v18, %v7174_v40  ;;  %v1259_v40 = vmul.f32 %v6954_v61, %v7228_v6 }
 0x16f   : > { %v878_v21 = vadd.f32 %v846_v49, %v587_v62  ;;  %v584_v62 = vmul.f32 %v6846_v19, %v7030_v37 }
 0x171   : > { %750 = vperm.xlu1 %6451, %v7296_v58   ;;  %v7335_v44 = vadd.f32 %v1105_v54, %v878_v21  ;;  %v1102_v54 = vmul.f32 %v6851_v20, %v7271_v34  ;;  %v1337_v34 = vmul.f32 %v6963_v5, %v7288_v27 }
 0x172   : > { %1003 = vperm.xlu2 %6452, %v7084_v29   ;;  %v875_v29 = vadd.f32 %v843_v30, %v584_v62 }
 0x173   : > { %v1931_v28 = vld.sshfl [vmem:[#allocation1 + $0x20] sm:$0xff pattern:$0x73625140]  ;;  %v709_v49 = vpop.permute.xlu1 %708 }
 0x174   : > { %v7332_v25 = vld [vmem:[#allocation2 + $0x50] sm:$0xff]  ;;  %v2024_v47 = vpack.c.bf16 %v1931_v28, %v1930_v59  ;;  %v1134_v21 = vadd.f32 %v1102_v54, %v875_v29  ;;  %v1181_v28 = vmul.f32 %v6944_v57, %v7190_v63  ;;  %v1491_v48 = vmul.f32 %v6986_v24, %v709_v49 }
 0x175   : > { %10686 = vst [vmem:[#allocation24_spill] sm:$0xff] %v7332_v25  ;;  %v7338_v56 = vrot.slane %v7332_v25, 2  ;;  %v7341_v9 = vrot.slane %v7332_v25, 4  ;;  %v7344_v16 = vrot.slane %v7332_v25, 6 }
 0x176   : > { %1933 = vst [vmem:[#allocation1 + $0x1] ss:$4 sm:$0xff] %v7332_v25  ;;  %6185 = vmatmul.msk.bf16.gmra.mxu1 %vm1743_vm0, %v2024_v47  ;;  %v1213_v47 = vadd.f32 %v1181_v28, %v1134_v21 }
 0x177   : > { %10687 = vst [vmem:[#allocation25_spill] sm:$0xff] %v7338_v56 }
 0x178   : > { %10688 = vst [vmem:[#allocation26_spill] sm:$0xff] %v7341_v9  ;;  %v1291_v62 = vadd.f32 %v1259_v40, %v1213_v47 }
 0x179   : > { %10689 = vst [vmem:[#allocation27_spill] sm:$0xff] %v7344_v16  ;;  %6453 = vset.pattern.permute.xlu1 %v6779_v7 }
 0x17a   : > { %1934 = vst [vmem:[#allocation1 + $0x2] ss:$4 sm:$0xff] %v7338_v56  ;;  %6454 = vset.pattern.permute.xlu2 %v6792_v10  ;;  %v1369_v29 = vadd.f32 %v1337_v34, %v1291_v62  ;;  %v1413_v34 = vmul.f32 %v6974_v15, %v441_v23  ;;  %v1258_v62 = vmul.f32 %v6954_v61, %v709_v49 }
 0x17b   : > { %1935 = vst [vmem:[#allocation1 + $0x3] ss:$4 sm:$0xff] %v7341_v9 }
 0x17c   : > { %1936 = vst [vmem:[#allocation1 + $0x20] ss:$4 sm:$0xff] %v7344_v16  ;;  %v7362_v59 = vpop.permute.xlu2 %726  ;;  %v1212_v16 = vadd.f32 %v1180_v52, %v7226_v51  ;;  %v1445_v9 = vadd.f32 %v1413_v34, %v7240_v60 }
 0x17d   : > { %v847_v37 = vmul.f32 %v6841_v18, %v7362_v59  ;;  %v1494_v21 = vmul.f32 %v6986_v24, %v7362_v59 }
 0x181   : > { %1009 = vperm.xlu1 %6453, %v7296_v58  }
 0x182   : > { %492 = vperm.xlu2 %6454, %v7296_v58  }
 0x183   : > { %v7372_v30 = vpop.permute.xlu1 %460 }
 0x184   : > { %v588_v63 = vmul.f32 %v6846_v19, %v7372_v30  ;;  %v1416_v6 = vmul.f32 %v6974_v15, %v7372_v30 }
 0x186   : > { %v879_v54 = vadd.f32 %v847_v37, %v588_v63  ;;  %v1448_v28 = vadd.f32 %v1416_v6, %v1369_v29  ;;  %v844_v63 = vmul.f32 %v6841_v18, %v709_v49  ;;  %v1290_v49 = vadd.f32 %v1258_v62, %v1212_v16 }
 0x188   : > { %v1526_v47 = vadd.f32 %v1494_v21, %v1448_v28  ;;  %v1182_v28 = vmul.f32 %v6944_v57, %v6901_v35 }
 0x189   : > { %6455 = vset.pattern.permute.xlu1 %v6758_v2 }
 0x18a   : > { %6456 = vset.pattern.permute.xlu2 %v6761_v3 }
 0x18c   : > { %v7382_v27 = vpop.permute.xlu2 %985 }
 0x18d   : > { %v1106_v40 = vmul.f32 %v6851_v20, %v7382_v27  ;;  %v1572_v37 = vmul.f32 %v7000_v46, %v7382_v27 }
 0x18f   : > { %v7392_v6 = vadd.f32 %v1106_v40, %v879_v54  ;;  %v1604_v29 = vadd.f32 %v1572_v37, %v1526_v47  ;;  %v1415_v54 = vmul.f32 %v6974_v15, %v6901_v35  ;;  %v876_v40 = vadd.f32 %v844_v63, %v585_v39 }
 0x190   : > { %v1523_v37 = vadd.f32 %v1491_v48, %v1445_v9  ;;  %v1338_v35 = vmul.f32 %v6963_v5, %v6895_v33  ;;  %v1571_v39 = vmul.f32 %v7000_v46, %v6895_v33  ;;  %v1493_v48 = vmul.f32 %v6986_v24, %v7326_v0 }
 0x191   : > { %v1640_v21 = vadd.f32 %v7009_v53, %v1604_v29  ;;  %756 = vperm.xlu1 %6455, %v7296_v58  }
 0x192   : > { %762 = vperm.xlu2 %6456, %v6814_v14  }
 0x193   : > { %v1672_v47 = vmax.f32 %v1640_v21, 0.0  ;;  %v968_v23 = vpop.permute.xlu1 %967 }
 0x194   : > { %v1103_v52 = vmul.f32 %v6851_v20, %v968_v23  ;;  %v1336_v51 = vmul.f32 %v6963_v5, %v968_v23  ;;  %v1569_v29 = vmul.f32 %v7000_v46, %v968_v23  ;;  %v1260_v20 = vmul.f32 %v6954_v61, %v7326_v0 }
 0x195   : > { %v1721_v56 = vsel %vm7150_vm7, %v1672_v47, 0.0 }
 0x196   : > { %1761 = vst.msk [vmem:[#allocation2 + $0x60] sm:$0xff] %vm1743_vm0, %v1721_v56  ;;  %v1135_v60 = vadd.f32 %v1103_v52, %v876_v40  ;;  %v1368_v34 = vadd.f32 %v1336_v51, %v1290_v49  ;;  %v1601_v25 = vadd.f32 %v1569_v29, %v1523_v37 }
 0x198   : > { %v1214_v9 = vadd.f32 %v1182_v28, %v1135_v60  ;;  %v1447_v16 = vadd.f32 %v1415_v54, %v1368_v34  ;;  %v1637_v63 = vadd.f32 %v7009_v53, %v1601_v25 }
 0x199   : > { %6457 = vset.pattern.permute.xlu1 %v6782_v8 }
 0x19a   : > { %v1525_v56 = vadd.f32 %v1493_v48, %v1447_v16  ;;  %v1669_v62 = vmax.f32 %v1637_v63, 0.0  ;;  %6458 = vset.pattern.permute.xlu2 %v6779_v7  ;;  %v1292_v21 = vadd.f32 %v1260_v20, %v1214_v9  ;;  %v10694_v48 = vld [vmem:[#allocation10_spill] sm:$0xff]  ;;  %v7465_v63 = vpop.permute.xlu0 %738 }
 0x19c   : > { %v1603_v40 = vadd.f32 %v1571_v39, %v1525_v56  ;;  %v1718_v33 = vsel %vm7022_vm4, %v1669_v62, 0.0  ;;  %v1370_v49 = vadd.f32 %v1338_v35, %v1292_v21  ;;  %v7432_v28 = vpop.permute.xlu2 %732 }
 0x19d   : > { %v7424_v47 = vld [vmem:[#allocation2 + $0x60] sm:$0xff]  ;;  %1758 = vst.msk [vmem:[#allocation2 + $0x48] sm:$0xf] %vm1745_vm1, %v1718_v33  ;;  %v848_v37 = vmul.f32 %v6841_v18, %v7432_v28 }
 0x19e   : > { %10690 = vst [vmem:[#allocation28_spill] sm:$0xff] %v7424_v47  ;;  %v7428_v0 = vrot.slane %v7424_v47, 2  ;;  %v1639_v25 = vadd.f32 %v7009_v53, %v1603_v40  ;;  %v7451_v18 = vrot.slane %v7424_v47, 4  ;;  %v7454_v39 = vrot.slane %v7424_v47, 6 }
 0x19f   : > { %1938 = vst [vmem:[#allocation1 + $0x22] ss:$4 sm:$0xff] %v7424_v47 }
 0x1a0   : > { %10691 = vst [vmem:[#allocation29_spill] sm:$0xff] %v7428_v0  ;;  %v1671_v54 = vmax.f32 %v1639_v25, 0.0 }
 0x1a1   : > { %1939 = vst [vmem:[#allocation1 + $0x23] ss:$4 sm:$0xff] %v7428_v0  ;;  %1015 = vperm.xlu1 %6457, %v7296_v58   ;;  %v1183_v58 = vmul.f32 %v6944_v57, %v7372_v30  ;;  %v1339_v30 = vmul.f32 %v6963_v5, %v7382_v27 }
 0x1a2   : > { %v1720_v23 = vsel %vm7022_vm4, %v1671_v54, 0.0  ;;  %1021 = vperm.xlu2 %6458, %v6814_v14   ;;  %10692 = vst [vmem:[#allocation30_spill] sm:$0xff] %v7451_v18 }
 0x1a3   : > { %1760 = vst.msk [vmem:[#allocation2 + $0x58] sm:$0xf] %vm1745_vm1, %v1720_v23  ;;  %v7442_v52 = vpop.permute.xlu1 %466  ;;  %v1215_v20 = vadd.f32 %v1183_v58, %v7298_v4  ;;  %v1496_v4 = vmul.f32 %v6986_v24, %v7465_v63  ;;  %v7481_v23 = vld [vmem:[%s6768_s20 + $0x8] sm:$0xff] }
 0x1a4   : > { %v1792_v51 = vld [vmem:[#allocation2 + $0x48] sm:$0x3]  ;;  %v589_v29 = vmul.f32 %v6846_v19, %v7442_v52  ;;  %10693 = vst [vmem:[#allocation31_spill] sm:$0xff] %v7454_v39  ;;  %v1261_v19 = vmul.f32 %v6954_v61, %v7362_v59 }
 0x1a5   : > { %1932 = vst [vmem:[#allocation1] ss:$4 sm:$0xff] %v1792_v51  ;;  %v1417_v51 = vmul.f32 %v6974_v15, %v7442_v52 }
 0x1a6   : > { %v880_v60 = vadd.f32 %v848_v37, %v589_v29  ;;  %v1293_v9 = vadd.f32 %v1261_v19, %v1215_v20  ;;  %v7484_v37 = vperm.slane %v7481_v23, 4 }
 0x1a8   : > { %v1371_v59 = vadd.f32 %v1339_v30, %v1293_v9  ;;  %792 = vperm.xlu0 %6477, %v7484_v37   ;;  %v7500_v9 = vld [vmem:[%s10666_s1 + $0x8] ss:$0 sm:$0xff] }
 0x1a9   : > { %6460 = vset.pattern.permute.xlu1 %v6752_v1 }
 0x1aa   : > { %v1794_v34 = vld [vmem:[#allocation2 + $0x58] sm:$0x3]  ;;  %6461 = vset.pattern.permute.xlu2 %v6758_v2 }
 0x1ab   : > { %1937 = vst [vmem:[#allocation1 + $0x21] ss:$4 sm:$0xff] %v1794_v34  ;;  %v1495_v34 = vmul.f32 %v6986_v24, %v7432_v28 }
 0x1ac   : > { %v1940_v35 = vld.sshfl [vmem:[#allocation1] sm:$0xff pattern:$0x73625140]  ;;  %v7473_v27 = vpop.permute.xlu2 %997 }
 0x1ad   : > { %1942 = vst [vmem:[#allocation1] ss:$4 sm:$0xff] %v7451_v18  ;;  %v1574_v33 = vmul.f32 %v7000_v46, %v7473_v27 }
 0x1ae   : > { %1943 = vst [vmem:[#allocation1 + $0x1] ss:$4 sm:$0xff] %v7454_v39 }
 0x1b0   : > { %816 = vperm.xlu0 %6477, %v7165_v31  }
 0x1b1   : > { %512 = vperm.xlu1 %6460, %v10694_v48  }
 0x1b2   : > { %v1941_v16 = vld.sshfl [vmem:[#allocation1 + $0x20] sm:$0xff pattern:$0x73625140]  ;;  %768 = vperm.xlu2 %6461, %v6814_v14  }
 0x1b3   : > { %v7467_v56 = vpop.permute.xlu1 %473  ;;  %v2025_v62 = vpack.c.bf16 %v1941_v16, %v1940_v35  ;;  %v1449_v35 = vadd.f32 %v1417_v51, %v1370_v49 }
 0x1b4   : > { %v1418_v21 = vmul.f32 %v6974_v15, %v7467_v56 }
 0x1b5   : > { %6186 = vmatmul.msk.bf16.gmra.mxu1 %vm1743_vm0, %v2025_v62  ;;  %v1527_v30 = vadd.f32 %v1495_v34, %v1449_v35 }
 0x1b6   : > { %v1450_v40 = vadd.f32 %v1418_v21, %v1371_v59 }
 0x1b8   : > { %v1528_v25 = vadd.f32 %v1496_v4, %v1450_v40  ;;  %6485 = vset.pattern.permute.xlu0 %v6779_v7 }
 0x1b9   : > { %6462 = vset.pattern.permute.xlu1 %v6761_v3 }
 0x1ba   : > { %v1606_v54 = vadd.f32 %v1574_v33, %v1528_v25  ;;  %6463 = vset.pattern.permute.xlu2 %v6782_v8  ;;  %v7523_v25 = vpop.permute.xlu0 %810 }
 0x1bc   : > { %v1642_v29 = vadd.f32 %v7009_v53, %v1606_v54  ;;  %v1184_v54 = vmul.f32 %v6944_v57, %v7442_v52 }
 0x1be   : > { %v1674_v58 = vmax.f32 %v1642_v29, 0.0  ;;  %v487_v29 = vpop.permute.xlu2 %486  ;;  %v1216_v34 = vadd.f32 %v1184_v54, %v7335_v44 }
 0x1c0   : > { %v1723_v19 = vsel %vm7150_vm7, %v1674_v58, 0.0  ;;  %v1262_v58 = vmul.f32 %v6954_v61, %v7432_v28 }
 0x1c1   : > { %1763 = vst.msk [vmem:[#allocation2 + $0x70] sm:$0xff] %vm1743_vm0, %v1723_v19  ;;  %774 = vperm.xlu1 %6462, %v10694_v48  }
 0x1c2   : > { %1027 = vperm.xlu2 %6463, %v6814_v14   ;;  %v1294_v35 = vadd.f32 %v1262_v58, %v1216_v34  ;;  %v7578_v34 = vld [vmem:[%s10666_s1] ss:$0 sm:$0xff] }
 0x1c3   : > { %v992_v20 = vpop.permute.xlu1 %991 }
 0x1c4   : > { %v1107_v16 = vmul.f32 %v7500_v9, %v992_v20  ;;  %v1573_v49 = vmul.f32 %v7000_v46, %v992_v20  ;;  %v1340_v57 = vmul.f32 %v6963_v5, %v992_v20 }
 0x1c6   : > { %v7505_v62 = vadd.f32 %v1107_v16, %v880_v60  ;;  %v1605_v59 = vadd.f32 %v1573_v49, %v1527_v30  ;;  %v7543_v16 = vpop.permute.xlu0 %744  ;;  %v1372_v49 = vadd.f32 %v1340_v57, %v1294_v35  ;;  %v590_v57 = vmul.f32 %v7578_v34, %v7467_v56 }
 0x1c7   : > { %v1497_v44 = vmul.f32 %v6986_v24, %v7543_v16  ;;  %v1263_v35 = vmul.f32 %v6954_v61, %v7465_v63  ;;  %v7594_v61 = vld [vmem:[%s10666_s1 + $0x9] ss:$0 sm:$0xff] }
 0x1c8   : > { %v7507_v4 = vld [vmem:[#allocation2 + $0x70] sm:$0xff]  ;;  %v1641_v14 = vadd.f32 %v7009_v53, %v1605_v59 }
 0x1c9   : > { %10695 = vst [vmem:[#allocation10_spill] sm:$0xff] %v7507_v4  ;;  %v7511_v21 = vrot.slane %v7507_v4, 2  ;;  %v7514_v40 = vrot.slane %v7507_v4, 4  ;;  %v7517_v33 = vrot.slane %v7507_v4, 6  ;;  %6465 = vset.pattern.permute.xlu1 %v6792_v10 }
 0x1ca   : > { %1945 = vst [vmem:[#allocation1 + $0x3] ss:$4 sm:$0xff] %v7507_v4  ;;  %v1673_v60 = vmax.f32 %v1641_v14, 0.0  ;;  %6466 = vset.pattern.permute.xlu2 %v6752_v1  ;;  %v10700_v4 = vld [vmem:[#allocation11_spill] sm:$0xff] }
 0x1cb   : > { %10696 = vst [vmem:[#allocation32_spill] sm:$0xff] %v7511_v21 }
 0x1cc   : > { %10697 = vst [vmem:[#allocation33_spill] sm:$0xff] %v7514_v40  ;;  %v1722_v51 = vsel %vm7022_vm4, %v1673_v60, 0.0  ;;  %v7547_v28 = vpop.permute.xlu2 %1003 }
 0x1cd   : > { %10698 = vst [vmem:[#allocation34_spill] sm:$0xff] %v7517_v33  ;;  %v1575_v5 = vmul.f32 %v7000_v46, %v7547_v28  ;;  %v7562_v46 = vld [vmem:[%s10666_s1 + $0x1] ss:$0 sm:$0xff] }
 0x1ce   : > { %1946 = vst [vmem:[#allocation1 + $0x20] ss:$4 sm:$0xff] %v7511_v21  ;;  %v1185_v54 = vmul.f32 %v7562_v46, %v7467_v56 }
 0x1cf   : > { %1947 = vst [vmem:[#allocation1 + $0x21] ss:$4 sm:$0xff] %v7514_v40 }
 0x1d0   : > { %1948 = vst [vmem:[#allocation1 + $0x22] ss:$4 sm:$0xff] %v7517_v33 }
 0x1d1   : > { %1762 = vst.msk [vmem:[#allocation2 + $0x68] sm:$0xf] %vm1745_vm1, %v1722_v51  ;;  %518 = vperm.xlu1 %6465, %v10694_v48  }
 0x1d2   : > { %525 = vperm.xlu2 %6466, %v7484_v37  }
 0x1d3   : > { %v7539_v52 = vpop.permute.xlu1 %479 }
 0x1d4   : > { %v1419_v19 = vmul.f32 %v6974_v15, %v7539_v52 }
 0x1d6   : > { %v1451_v59 = vadd.f32 %v1419_v19, %v1372_v49  ;;  %v1217_v19 = vadd.f32 %v1185_v54, %v7392_v6  ;;  %v10699_v49 = vld [vmem:[#allocation14_spill] sm:$0xff]  ;;  %v1341_v6 = vmul.f32 %v7594_v61, %v7473_v27 }
 0x1d8   : > { %v1796_v30 = vld [vmem:[#allocation2 + $0x68] sm:$0x3]  ;;  %v1529_v20 = vadd.f32 %v1497_v44, %v1451_v59  ;;  %v594_v44 = vmul.f32 %v7578_v34, %v10699_v49  ;;  %v1295_v56 = vadd.f32 %v1263_v35, %v1217_v19 }
 0x1d9   : > { %1944 = vst [vmem:[#allocation1 + $0x2] ss:$4 sm:$0xff] %v1796_v30  ;;  %6467 = vset.pattern.permute.xlu1 %v6758_v2 }
 0x1da   : > { %6468 = vset.pattern.permute.xlu2 %v6761_v3  ;;  %v1607_v15 = vadd.f32 %v1575_v5, %v1529_v20  ;;  %v1108_v5 = vmul.f32 %v7500_v9, %v7473_v27  ;;  %v7613_v27 = vld [vmem:[%s10666_s1 + $0x5] ss:$0 sm:$0xff]  ;;  %v1373_v19 = vadd.f32 %v1341_v6, %v1295_v56 }
 0x1dc   : > { %v1643_v14 = vadd.f32 %v7009_v53, %v1607_v15  ;;  %v7566_v51 = vpop.permute.xlu2 %492  ;;  %v7571_v53 = vld [vmem:[%s10666_s1 + $0x4] ss:$0 sm:$0xff]  ;;  %v1187_v15 = vmul.f32 %v7562_v46, %v487_v29 }
 0x1dd   : > { %v849_v58 = vmul.f32 %v7571_v53, %v7465_v63 }
 0x1de   : > { %v1675_v60 = vmax.f32 %v1643_v14, 0.0 }
 0x1df   : > { %v881_v59 = vadd.f32 %v849_v58, %v590_v57 }
 0x1e0   : > { %v1724_v24 = vsel %vm7022_vm4, %v1675_v60, 0.0  ;;  %v7606_v60 = vld [vmem:[%s10666_s1 + $0x2] ss:$0 sm:$0xff] }
 0x1e1   : > { %780 = vperm.xlu1 %6467, %v10694_v48   ;;  %1764 = vst.msk [vmem:[#allocation2 + $0x78] sm:$0xf] %vm1745_vm1, %v1724_v24  ;;  %v1420_v24 = vmul.f32 %v7606_v60, %v487_v29  ;;  %v1140_v54 = vadd.f32 %v1108_v5, %v881_v59  ;;  %v592_v59 = vmul.f32 %v7578_v34, %v487_v29  ;;  %v1950_v33 = vld.sshfl [vmem:[#allocation1] sm:$0xff pattern:$0x73625140] }
 0x1e2   : > { %786 = vperm.xlu2 %6468, %v7484_v37  }
 0x1e3   : > { %v751_v20 = vpop.permute.xlu1 %750  ;;  %v1219_v5 = vadd.f32 %v1187_v15, %v1140_v54  ;;  %v1452_v39 = vadd.f32 %v1420_v24, %v1373_v19  ;;  %v7632_v15 = vld [vmem:[%s10666_s1 + $0xa] ss:$0 sm:$0xff] }
 0x1e4   : > { %v851_v58 = vmul.f32 %v7571_v53, %v751_v20  ;;  %v1265_v57 = vmul.f32 %v7613_v27, %v751_v20 }
 0x1e6   : > { %v883_v56 = vadd.f32 %v851_v58, %v592_v59  ;;  %v1297_v6 = vadd.f32 %v1265_v57, %v1219_v5 }
 0x1e8   : > { %v1798_v30 = vld [vmem:[#allocation2 + $0x78] sm:$0x3] }
 0x1e9   : > { %6470 = vset.pattern.permute.xlu1 %v6761_v3  ;;  %1949 = vst [vmem:[#allocation1 + $0x23] ss:$4 sm:$0xff] %v1798_v30  ;;  %v7619_v30 = vld [vmem:[%s10666_s1 + $0x6] ss:$0 sm:$0xff] }
 0x1ea   : > { %6471 = vset.pattern.permute.xlu2 %v6782_v8  ;;  %v1498_v21 = vmul.f32 %v7619_v30, %v751_v20 }
 0x1ec   : > { %v7598_v63 = vpop.permute.xlu2 %762  ;;  %v1530_v38 = vadd.f32 %v1498_v21, %v1452_v39  ;;  %v7641_v39 = vld [vmem:[%s10670_s2] ss:$0 sm:$0xff] }
 0x1ed   : > { %v853_v14 = vmul.f32 %v7571_v53, %v7598_v63 }
 0x1ef   : > { %v885_v35 = vadd.f32 %v853_v14, %v594_v44  ;;  %v1189_v44 = vmul.f32 %v7562_v46, %v10699_v49 }
 0x1f0   : > { %v1951_v40 = vld.sshfl [vmem:[#allocation1 + $0x20] sm:$0xff pattern:$0x73625140] }
 0x1f1   : > { %798 = vperm.xlu1 %6470, %v10700_v4   ;;  %v2026_v14 = vpack.c.bf16 %v1951_v40, %v1950_v33 }
 0x1f2   : > { %1039 = vperm.xlu2 %6471, %v10694_v48   ;;  %v1422_v48 = vmul.f32 %v7606_v60, %v10699_v49 }
 0x1f3   : > { %v1010_v50 = vpop.permute.xlu1 %1009  ;;  %6187 = vmatmul.msk.bf16.gmra.mxu1 %vm1743_vm0, %v2026_v14 }
 0x1f4   : > { %v1110_v20 = vmul.f32 %v7500_v9, %v1010_v50  ;;  %v1343_v29 = vmul.f32 %v7594_v61, %v1010_v50  ;;  %v1576_v24 = vmul.f32 %v7632_v15, %v1010_v50  ;;  %v1500_v50 = vmul.f32 %v7619_v30, %v7598_v63 }
 0x1f6   : > { %v1142_v54 = vadd.f32 %v1110_v20, %v883_v56  ;;  %v1375_v40 = vadd.f32 %v1343_v29, %v1297_v6  ;;  %v1608_v33 = vadd.f32 %v1576_v24, %v1530_v38  ;;  %v1186_v29 = vmul.f32 %v7562_v46, %v7539_v52 }
 0x1f8   : > { %v1644_v21 = vadd.f32 %v7641_v39, %v1608_v33  ;;  %v7644_v58 = vadd.f32 %v1189_v44, %v1142_v54  ;;  %v1454_v57 = vadd.f32 %v1422_v48, %v1375_v40  ;;  %v850_v33 = vmul.f32 %v7571_v53, %v7543_v16 }
 0x1f9   : > { %6472 = vset.pattern.permute.xlu1 %v6779_v7 }
 0x1fa   : > { %v1676_v49 = vmax.f32 %v1644_v21, 0.0  ;;  %6473 = vset.pattern.permute.xlu2 %v6792_v10  ;;  %v1532_v59 = vadd.f32 %v1500_v50, %v1454_v57  ;;  %v591_v21 = vmul.f32 %v7578_v34, %v7539_v52  ;;  %v1264_v57 = vmul.f32 %v7613_v27, %v7543_v16 }
 0x1fb   : > { %v1218_v50 = vadd.f32 %v1186_v29, %v7505_v62  ;;  %v1109_v52 = vmul.f32 %v7500_v9, %v7547_v28  ;;  %v1342_v62 = vmul.f32 %v7594_v61, %v7547_v28  ;;  %v1421_v29 = vmul.f32 %v7606_v60, %v7566_v51 }
 0x1fc   : > { %v1725_v38 = vsel %vm7150_vm7, %v1676_v49, 0.0  ;;  %v7652_v19 = vpop.permute.xlu2 %1021  ;;  %v10705_v49 = vld [vmem:[#allocation12_spill] sm:$0xff] }
 0x1fd   : > { %1765 = vst.msk [vmem:[#allocation2 + $0x80] sm:$0xff] %vm1743_vm0, %v1725_v38  ;;  %v1112_v5 = vmul.f32 %v7500_v9, %v7652_v19  ;;  %v1578_v44 = vmul.f32 %v7632_v15, %v7652_v19  ;;  %v595_v38 = vmul.f32 %v7578_v34, %v10705_v49 }
 0x1ff   : > { %v7659_v56 = vadd.f32 %v1112_v5, %v885_v35  ;;  %v1610_v6 = vadd.f32 %v1578_v44, %v1532_v59  ;;  %v882_v59 = vadd.f32 %v850_v33, %v591_v21  ;;  %v1296_v44 = vadd.f32 %v1264_v57, %v1218_v50 }
 0x201   : > { %v1646_v14 = vadd.f32 %v7641_v39, %v1610_v6  ;;  %1045 = vperm.xlu1 %6472, %v7484_v37   ;;  %v1188_v6 = vmul.f32 %v7562_v46, %v7566_v51  ;;  %v1141_v21 = vadd.f32 %v1109_v52, %v882_v59 }
 0x202   : > { %531 = vperm.xlu2 %6473, %v7484_v37  }
 0x203   : > { %v1678_v20 = vmax.f32 %v1646_v14, 0.0  ;;  %v757_v5 = vpop.permute.xlu1 %756  ;;  %v1220_v41 = vadd.f32 %v1188_v6, %v1141_v21 }
 0x204   : > { %v7666_v24 = vld [vmem:[#allocation2 + $0x80] sm:$0xff]  ;;  %v852_v57 = vmul.f32 %v7571_v53, %v757_v5  ;;  %v1266_v50 = vmul.f32 %v7613_v27, %v757_v5 }
 0x205   : > { %10701 = vst [vmem:[#allocation14_spill] sm:$0xff] %v7666_v24  ;;  %v7669_v48 = vrot.slane %v7666_v24, 2  ;;  %v7672_v54 = vrot.slane %v7666_v24, 4  ;;  %v7675_v35 = vrot.slane %v7666_v24, 6  ;;  %v1727_v40 = vsel %vm7150_vm7, %v1678_v20, 0.0 }
 0x206   : > { %1952 = vst [vmem:[#allocation1] ss:$4 sm:$0xff] %v7666_v24  ;;  %v593_v24 = vmul.f32 %v7578_v34, %v7566_v51 }
 0x207   : > { %10702 = vst [vmem:[#allocation11_spill] sm:$0xff] %v7669_v48 }
 0x208   : > { %10703 = vst [vmem:[#allocation35_spill] sm:$0xff] %v7672_v54  ;;  %v884_v52 = vadd.f32 %v852_v57, %v593_v24 }
 0x209   : > { %10704 = vst [vmem:[#allocation36_spill] sm:$0xff] %v7675_v35  ;;  %1057 = vperm.xlu1 %6472, %v10700_v4  }
 0x20a   : > { %1767 = vst.msk [vmem:[#allocation2 + $0x90] sm:$0xff] %vm1743_vm0, %v1727_v40  ;;  %6474 = vset.pattern.permute.xlu2 %v6752_v1 }
 0x20b   : > { %1953 = vst [vmem:[#allocation1 + $0x1] ss:$4 sm:$0xff] %v7669_v48  ;;  %v1499_v48 = vmul.f32 %v7619_v30, %v757_v5 }
 0x20c   : > { %1954 = vst [vmem:[#allocation1 + $0x2] ss:$4 sm:$0xff] %v7672_v54  ;;  %v7699_v16 = vpop.permute.xlu2 %768  ;;  %v1374_v54 = vadd.f32 %v1342_v62, %v1296_v44  ;;  %v1298_v44 = vadd.f32 %v1266_v50, %v1220_v41 }
 0x20d   : > { %1955 = vst [vmem:[#allocation1 + $0x3] ss:$4 sm:$0xff] %v7675_v35  ;;  %v854_v20 = vmul.f32 %v7571_v53, %v7699_v16  ;;  %v1501_v41 = vmul.f32 %v7619_v30, %v7699_v16 }
 0x20e   : > { %v1453_v59 = vadd.f32 %v1421_v29, %v1374_v54  ;;  %v1423_v54 = vmul.f32 %v7606_v60, %v10705_v49 }
 0x20f   : > { %v886_v35 = vadd.f32 %v854_v20, %v595_v38  ;;  %v1190_v38 = vmul.f32 %v7562_v46, %v10705_v49 }
 0x210   : > { %v1531_v62 = vadd.f32 %v1499_v48, %v1453_v59 }
 0x211   : > { %v7703_v14 = vld [vmem:[#allocation2 + $0x90] sm:$0xff]  ;;  %6475 = vset.pattern.permute.xlu1 %v6782_v8 }
 0x212   : > { %10706 = vst [vmem:[#allocation12_spill] sm:$0xff] %v7703_v14  ;;  %v7710_v40 = vrot.slane %v7703_v14, 2  ;;  %v7713_v33 = vrot.slane %v7703_v14, 4  ;;  %v7716_v28 = vrot.slane %v7703_v14, 6  ;;  %551 = vperm.xlu2 %6474, %v7165_v31  }
 0x213   : > { %1957 = vst [vmem:[#allocation1 + $0x21] ss:$4 sm:$0xff] %v7703_v14  ;;  %v1016_v5 = vpop.permute.xlu1 %1015 }
 0x214   : > { %10707 = vst [vmem:[#allocation37_spill] sm:$0xff] %v7710_v40  ;;  %v1960_v18 = vld.sshfl [vmem:[#allocation1] sm:$0xff pattern:$0x73625140]  ;;  %v1111_v51 = vmul.f32 %v7500_v9, %v1016_v5  ;;  %v1344_v6 = vmul.f32 %v7594_v61, %v1016_v5  ;;  %v1577_v20 = vmul.f32 %v7632_v15, %v1016_v5  ;;  %v7758_v5 = vperm.slane %v7481_v23, 7 }
 0x215   : > { %10708 = vst [vmem:[#allocation38_spill] sm:$0xff] %v7713_v33  ;;  %v1345_v23 = vmul.f32 %v7594_v61, %v7652_v19 }
 0x216   : > { %10709 = vst [vmem:[#allocation39_spill] sm:$0xff] %v7716_v28  ;;  %v1143_v29 = vadd.f32 %v1111_v51, %v884_v52  ;;  %v1376_v21 = vadd.f32 %v1344_v6, %v1298_v44  ;;  %1081 = vperm.xlu0 %6485, %v7758_v5   ;;  %v1267_v51 = vmul.f32 %v7613_v27, %v7598_v63  ;;  %v10710_v63 = vld [vmem:[#allocation13_spill] sm:$0xff] }
 0x217   : > { %1958 = vst [vmem:[#allocation1 + $0x22] ss:$4 sm:$0xff] %v7710_v40  ;;  %v1347_v19 = vmul.f32 %v7594_v61, %v10710_v63 }
 0x218   : > { %1959 = vst [vmem:[#allocation1 + $0x23] ss:$4 sm:$0xff] %v7713_v33  ;;  %v7737_v40 = vadd.f32 %v1190_v38, %v1143_v29  ;;  %v1455_v24 = vadd.f32 %v1423_v54, %v1376_v21  ;;  %v1299_v29 = vadd.f32 %v1267_v51, %v7644_v58 }
 0x219   : > { %1962 = vst [vmem:[#allocation1] ss:$4 sm:$0xff] %v7716_v28  ;;  %v1609_v28 = vadd.f32 %v1577_v20, %v1531_v62  ;;  %1051 = vperm.xlu1 %6475, %v7484_v37  }
 0x21a   : > { %6476 = vset.pattern.permute.xlu2 %v6792_v10  ;;  %v1533_v50 = vadd.f32 %v1501_v41, %v1455_v24  ;;  %v1377_v41 = vadd.f32 %v1345_v23, %v1299_v29 }
 0x21b   : > { %v1645_v33 = vadd.f32 %v7641_v39, %v1609_v28 }
 0x21c   : > { %v7745_v49 = vpop.permute.xlu2 %1027 }
 0x21d   : > { %v1677_v48 = vmax.f32 %v1645_v33, 0.0  ;;  %v1113_v28 = vmul.f32 %v7500_v9, %v7745_v49  ;;  %v1579_v59 = vmul.f32 %v7632_v15, %v7745_v49 }
 0x21e   : > { %6490 = vset.pattern.permute.xlu0 %v6761_v3 }
 0x21f   : > { %v1726_v57 = vsel %vm7022_vm4, %v1677_v48, 0.0  ;;  %v7752_v38 = vadd.f32 %v1113_v28, %v886_v35  ;;  %v1611_v37 = vadd.f32 %v1579_v59, %v1533_v50  ;;  %v1580_v48 = vmul.f32 %v7632_v15, %v10710_v63 }
 0x220   : > { %1766 = vst.msk [vmem:[#allocation2 + $0x88] sm:$0xf] %vm1745_vm1, %v1726_v57 }
 0x221   : > { %v1647_v33 = vadd.f32 %v7641_v39, %v1611_v37  ;;  %6478 = vset.pattern.permute.xlu1 %v6758_v2 }
 0x222   : > { %544 = vperm.xlu2 %6476, %v10700_v4  }
 0x223   : > { %v1679_v52 = vmax.f32 %v1647_v33, 0.0  ;;  %v513_v35 = vpop.permute.xlu1 %512 }
 0x224   : > { %v1191_v54 = vmul.f32 %v7562_v46, %v513_v35  ;;  %v1424_v24 = vmul.f32 %v7606_v60, %v513_v35  ;;  %v596_v58 = vmul.f32 %v7578_v34, %v513_v35 }
 0x225   : > { %v1728_v62 = vsel %vm7022_vm4, %v1679_v52, 0.0 }
 0x226   : > { %1768 = vst.msk [vmem:[#allocation2 + $0x98] sm:$0xf] %vm1745_vm1, %v1728_v62  ;;  %v1223_v57 = vadd.f32 %v1191_v54, %v7659_v56  ;;  %v1456_v28 = vadd.f32 %v1424_v24, %v1377_v41  ;;  %v1268_v41 = vmul.f32 %v7613_v27, %v7699_v16  ;;  %v7831_v16 = vld [vmem:[%s6768_s20 + $0x10] sm:$0x3] }
 0x227   : > { %v1800_v44 = vld [vmem:[#allocation2 + $0x88] sm:$0x3] }
 0x228   : > { %1956 = vst [vmem:[#allocation1 + $0x20] ss:$4 sm:$0xff] %v1800_v44 }
 0x229   : > { %804 = vperm.xlu1 %6478, %v10700_v4  }
 0x22a   : > { %6479 = vset.pattern.permute.xlu2 %v6779_v7 }
 0x22c   : > { %v526_v54 = vpop.permute.xlu2 %525 }
 0x22d   : > { %v1802_v21 = vld [vmem:[#allocation2 + $0x98] sm:$0x3] }
 0x22e   : > { %1963 = vst [vmem:[#allocation1 + $0x1] ss:$4 sm:$0xff] %v1802_v21 }
 0x22f   : > { %v1961_v6 = vld.sshfl [vmem:[#allocation1 + $0x20] sm:$0xff pattern:$0x73625140] }
 0x230   : > { %v2027_v20 = vpack.c.bf16 %v1961_v6, %v1960_v18  ;;  %v1114_v18 = vmul.f32 %v7500_v9, %v10710_v63 }
 0x231   : > { %6480 = vset.pattern.permute.xlu1 %v6792_v10 }
 0x232   : > { %6188 = vmatmul.msk.bf16.gmra.mxu1 %vm1743_vm0, %v2027_v20  ;;  %1069 = vperm.xlu2 %6479, %v7165_v31  }
 0x233   : > { %v775_v50 = vpop.permute.xlu1 %774 }
 0x234   : > { %v855_v59 = vmul.f32 %v7571_v53, %v775_v50  ;;  %v1269_v37 = vmul.f32 %v7613_v27, %v775_v50  ;;  %v1502_v33 = vmul.f32 %v7619_v30, %v775_v50 }
 0x236   : > { %v887_v52 = vadd.f32 %v855_v59, %v596_v58  ;;  %v1301_v44 = vadd.f32 %v1269_v37, %v1223_v57  ;;  %v1534_v62 = vadd.f32 %v1502_v33, %v1456_v28  ;;  %v1300_v58 = vadd.f32 %v1268_v41, %v7737_v40 }
 0x237   : > { %v7838_v40 = vperm.slane %v7831_v16, 0 }
 0x238   : > { %v1612_v51 = vadd.f32 %v1580_v48, %v1534_v62  ;;  %v7788_v6 = vadd.f32 %v1114_v18, %v887_v52  ;;  %v7790_v20 = vadd.f32 %v1347_v19, %v1301_v44  ;;  %v1346_v48 = vmul.f32 %v7594_v61, %v7745_v49 }
 0x239   : > { %557 = vperm.xlu1 %6480, %v7165_v31   ;;  %1239 = vperm.xlu0 %6490, %v7838_v40  }
 0x23a   : > { %v1648_v56 = vadd.f32 %v7641_v39, %v1612_v51  ;;  %6481 = vset.pattern.permute.xlu2 %v6752_v1 }
 0x23c   : > { %v1680_v35 = vmax.f32 %v1648_v56, 0.0  ;;  %v787_v18 = vpop.permute.xlu2 %786 }
 0x23e   : > { %v1729_v23 = vsel %vm7150_vm7, %v1680_v35, 0.0 }
 0x23f   : > { %1769 = vst.msk [vmem:[#allocation2 + $0xa0] sm:$0xff] %vm1743_vm0, %v1729_v23 }
 0x241   : > { %6482 = vset.pattern.permute.xlu1 %v6782_v8  ;;  %6495 = vset.pattern.permute.xlu0 %v6792_v10 }
 0x242   : > { %564 = vperm.xlu2 %6481, %v7758_v5  }
 0x243   : > { %v7819_v19 = vpop.permute.xlu1 %518 }
 0x244   : > { %v1425_v57 = vmul.f32 %v7606_v60, %v7819_v19  ;;  %v597_v28 = vmul.f32 %v7578_v34, %v7819_v19 }
 0x246   : > { %v7800_v29 = vld [vmem:[#allocation2 + $0xa0] sm:$0xff] }
 0x247   : > { %10711 = vst [vmem:[#allocation13_spill] sm:$0xff] %v7800_v29  ;;  %v7803_v21 = vrot.slane %v7800_v29, 2  ;;  %v7806_v24 = vrot.slane %v7800_v29, 4  ;;  %v7809_v63 = vrot.slane %v7800_v29, 6 }
 0x248   : > { %1964 = vst [vmem:[#allocation1 + $0x2] ss:$4 sm:$0xff] %v7800_v29 }
 0x249   : > { %10712 = vst [vmem:[#allocation40_spill] sm:$0xff] %v7803_v21  ;;  %1063 = vperm.xlu1 %6482, %v10700_v4   ;;  %v1378_v4 = vadd.f32 %v1346_v48, %v1300_v58 }
 0x24a   : > { %10713 = vst [vmem:[#allocation41_spill] sm:$0xff] %v7806_v24  ;;  %6483 = vset.pattern.permute.xlu2 %v6761_v3 }
 0x24b   : > { %10714 = vst [vmem:[#allocation42_spill] sm:$0xff] %v7809_v63  ;;  %v1457_v59 = vadd.f32 %v1425_v57, %v1378_v4  ;;  %v861_v57 = vmul.f32 %v7571_v53, %v7523_v25 }
 0x24c   : > { %1965 = vst [vmem:[#allocation1 + $0x3] ss:$4 sm:$0xff] %v7803_v21  ;;  %v7827_v50 = vpop.permute.xlu2 %1039 }
 0x24d   : > { %1966 = vst [vmem:[#allocation1 + $0x20] ss:$4 sm:$0xff] %v7806_v24  ;;  %v1115_v33 = vmul.f32 %v7500_v9, %v7827_v50  ;;  %v1581_v52 = vmul.f32 %v7632_v15, %v7827_v50 }
 0x24e   : > { %1967 = vst [vmem:[#allocation1 + $0x21] ss:$4 sm:$0xff] %v7809_v63 }
 0x251   : > { %1075 = vperm.xlu1 %6482, %v7165_v31  }
 0x252   : > { %822 = vperm.xlu2 %6483, %v7758_v5  }
 0x253   : > { %v7835_v37 = vpop.permute.xlu1 %780 }
 0x254   : > { %v856_v49 = vmul.f32 %v7571_v53, %v7835_v37  ;;  %v1503_v31 = vmul.f32 %v7619_v30, %v7835_v37 }
 0x256   : > { %v888_v44 = vadd.f32 %v856_v49, %v597_v28  ;;  %v1535_v62 = vadd.f32 %v1503_v31, %v1457_v59  ;;  %v1193_v59 = vmul.f32 %v7562_v46, %v526_v54  ;;  %v1426_v31 = vmul.f32 %v7606_v60, %v526_v54 }
 0x258   : > { %v7849_v51 = vadd.f32 %v1115_v33, %v888_v44  ;;  %v1613_v56 = vadd.f32 %v1581_v52, %v1535_v62  ;;  %v598_v33 = vmul.f32 %v7578_v34, %v526_v54  ;;  %v857_v52 = vmul.f32 %v7571_v53, %v787_v18 }
 0x259   : > { %6486 = vset.pattern.permute.xlu1 %v6758_v2  ;;  %v1271_v44 = vmul.f32 %v7613_v27, %v787_v18 }
 0x25a   : > { %v1649_v35 = vadd.f32 %v7641_v39, %v1613_v56  ;;  %6484 = vset.pattern.permute.xlu2 %v6792_v10  ;;  %v1504_v56 = vmul.f32 %v7619_v30, %v787_v18  ;;  %v889_v24 = vadd.f32 %v857_v52, %v598_v33 }
 0x25c   : > { %v1681_v23 = vmax.f32 %v1649_v35, 0.0  ;;  %v7860_v48 = vpop.permute.xlu2 %531  ;;  %v1225_v35 = vadd.f32 %v1193_v59, %v7788_v6 }
 0x25e   : > { %v1730_v41 = vsel %vm7022_vm4, %v1681_v23, 0.0  ;;  %v1458_v23 = vadd.f32 %v1426_v31, %v7790_v20  ;;  %v1303_v21 = vadd.f32 %v1271_v44, %v1225_v35 }
 0x25f   : > { %1770 = vst.msk [vmem:[#allocation2 + $0xa8] sm:$0xf] %vm1745_vm1, %v1730_v41  ;;  %v10715_v41 = vld [vmem:[#allocation15_spill] sm:$0xff] }
 0x260   : > { %v1428_v54 = vmul.f32 %v7606_v60, %v10715_v41  ;;  %v600_v20 = vmul.f32 %v7578_v34, %v10715_v41 }
 0x261   : > { %828 = vperm.xlu1 %6486, %v7758_v5  }
 0x262   : > { %570 = vperm.xlu2 %6484, %v7758_v5  }
 0x263   : > { %v799_v4 = vpop.permute.xlu1 %798 }
 0x264   : > { %v1273_v52 = vmul.f32 %v7613_v27, %v799_v4  ;;  %v1506_v44 = vmul.f32 %v7619_v30, %v799_v4 }
 0x266   : > { %v1804_v58 = vld [vmem:[#allocation2 + $0xa8] sm:$0x3] }
 0x267   : > { %1968 = vst [vmem:[#allocation1 + $0x22] ss:$4 sm:$0xff] %v1804_v58  ;;  %v1195_v58 = vmul.f32 %v7562_v46, %v10715_v41 }
 0x269   : > { %6488 = vset.pattern.permute.xlu1 %v6752_v1 }
 0x26a   : > { %6487 = vset.pattern.permute.xlu2 %v6782_v8 }
 0x26c   : > { %v552_v28 = vpop.permute.xlu2 %551 }
 0x26d   : > { %v602_v49 = vmul.f32 %v7578_v34, %v552_v28 }
 0x26f   : > { %v7872_v62 = vadd.f32 %v861_v57, %v602_v49  ;;  %v1536_v49 = vadd.f32 %v1504_v56, %v1458_v23  ;;  %v7895_v23 = vperm.slane %v7831_v16, 1  ;;  %v1508_v16 = vmul.f32 %v7619_v30, %v7523_v25 }
 0x271   : > { %1161 = vperm.xlu1 %6488, %v7838_v40   ;;  %1402 = vperm.xlu0 %6495, %v7895_v23  }
 0x272   : > { %1087 = vperm.xlu2 %6487, %v7758_v5   ;;  %v859_v5 = vmul.f32 %v7571_v53, %v799_v4 }
 0x273   : > { %v1046_v57 = vpop.permute.xlu1 %1045 }
 0x274   : > { %v1116_v18 = vmul.f32 %v7500_v9, %v1046_v57  ;;  %v1349_v6 = vmul.f32 %v7594_v61, %v1046_v57  ;;  %v1582_v59 = vmul.f32 %v7632_v15, %v1046_v57  ;;  %v891_v56 = vadd.f32 %v859_v5, %v600_v20 }
 0x276   : > { %v1148_v31 = vadd.f32 %v1116_v18, %v889_v24  ;;  %v1381_v29 = vadd.f32 %v1349_v6, %v1303_v21  ;;  %v1614_v63 = vadd.f32 %v1582_v59, %v1536_v49  ;;  %v1270_v6 = vmul.f32 %v7613_v27, %v7835_v37 }
 0x277   : > { %v1348_v37 = vmul.f32 %v7594_v61, %v7827_v50  ;;  %v1970_v50 = vld.sshfl [vmem:[#allocation1] sm:$0xff pattern:$0x73625140] }
 0x278   : > { %v1227_v14 = vadd.f32 %v1195_v58, %v1148_v31  ;;  %v1460_v0 = vadd.f32 %v1428_v54, %v1381_v29  ;;  %v1650_v33 = vadd.f32 %v7641_v39, %v1614_v63  ;;  %v1197_v29 = vmul.f32 %v7562_v46, %v552_v28 }
 0x279   : > { %6491 = vset.pattern.permute.xlu1 %v6758_v2  ;;  %v1430_v63 = vmul.f32 %v7606_v60, %v552_v28  ;;  %6500 = vset.pattern.permute.xlu0 %v6782_v8 }
 0x27a   : > { %v1682_v35 = vmax.f32 %v1650_v33, 0.0  ;;  %6489 = vset.pattern.permute.xlu2 %v6792_v10  ;;  %v1305_v24 = vadd.f32 %v1273_v52, %v1227_v14  ;;  %v1538_v21 = vadd.f32 %v1506_v44, %v1460_v0  ;;  %v1275_v14 = vmul.f32 %v7613_v27, %v7523_v25 }
 0x27b   : > { %v1058_v41 = vpop.permute.xlu1 %1057  ;;  %v1192_v0 = vmul.f32 %v7562_v46, %v7819_v19 }
 0x27c   : > { %v1731_v58 = vsel %vm7150_vm7, %v1682_v35, 0.0  ;;  %v1118_v4 = vmul.f32 %v7500_v9, %v1058_v41  ;;  %v1351_v54 = vmul.f32 %v7594_v61, %v1058_v41  ;;  %v1584_v57 = vmul.f32 %v7632_v15, %v1058_v41  ;;  %v7918_v33 = vpop.permute.xlu2 %544 }
 0x27d   : > { %1771 = vst.msk [vmem:[#allocation2 + $0xb0] sm:$0xff] %vm1743_vm0, %v1731_v58  ;;  %v1224_v31 = vadd.f32 %v1192_v0, %v7752_v38  ;;  %v1427_v38 = vmul.f32 %v7606_v60, %v7860_v48 }
 0x27e   : > { %v1150_v28 = vadd.f32 %v1118_v4, %v891_v56  ;;  %v1383_v49 = vadd.f32 %v1351_v54, %v1305_v24  ;;  %v1616_v18 = vadd.f32 %v1584_v57, %v1538_v21 }
 0x27f   : > { %v1302_v44 = vadd.f32 %v1270_v6, %v1224_v31 }
 0x280   : > { %v1652_v59 = vadd.f32 %v7641_v39, %v1616_v18  ;;  %v1229_v20 = vadd.f32 %v1197_v29, %v1150_v28  ;;  %v1462_v5 = vadd.f32 %v1430_v63, %v1383_v49  ;;  %v7941_v29 = vpop.permute.xlu0 %792 }
 0x281   : > { %1245 = vperm.xlu1 %6491, %v7838_v40   ;;  %v1380_v63 = vadd.f32 %v1348_v37, %v1302_v44  ;;  %v1505_v4 = vmul.f32 %v7619_v30, %v7941_v29 }
 0x282   : > { %v1684_v19 = vmax.f32 %v1652_v59, 0.0  ;;  %1167 = vperm.xlu2 %6489, %v7838_v40   ;;  %v7920_v25 = vadd.f32 %v1275_v14, %v1229_v20  ;;  %v1540_v52 = vadd.f32 %v1508_v16, %v1462_v5 }
 0x283   : > { %v1459_v58 = vadd.f32 %v1427_v38, %v1380_v63 }
 0x284   : > { %v7924_v56 = vld [vmem:[#allocation2 + $0xb0] sm:$0xff]  ;;  %v1733_v35 = vsel %vm7150_vm7, %v1684_v19, 0.0 }
 0x285   : > { %10716 = vst [vmem:[#allocation15_spill] sm:$0xff] %v7924_v56  ;;  %v7932_v24 = vrot.slane %v7924_v56, 2  ;;  %v7935_v21 = vrot.slane %v7924_v56, 4  ;;  %v7938_v41 = vrot.slane %v7924_v56, 6  ;;  %v1537_v16 = vadd.f32 %v1505_v4, %v1459_v58 }
 0x286   : > { %1969 = vst [vmem:[#allocation1 + $0x23] ss:$4 sm:$0xff] %v7924_v56 }
 0x287   : > { %10717 = vst [vmem:[#allocation43_spill] sm:$0xff] %v7932_v24 }
 0x288   : > { %10718 = vst [vmem:[#allocation44_spill] sm:$0xff] %v7935_v21 }
 0x289   : > { %1773 = vst.msk [vmem:[#allocation2 + $0xc0] sm:$0xff] %vm1743_vm0, %v1733_v35  ;;  %6493 = vset.pattern.permute.xlu1 %v6782_v8 }
 0x28a   : > { %1972 = vst [vmem:[#allocation1] ss:$4 sm:$0xff] %v7932_v24  ;;  %6492 = vset.pattern.permute.xlu2 %v6779_v7 }
 0x28b   : > { %1973 = vst [vmem:[#allocation1 + $0x1] ss:$4 sm:$0xff] %v7935_v21  ;;  %v7951_v54 = vpop.permute.xlu1 %1051 }
 0x28c   : > { %1974 = vst [vmem:[#allocation1 + $0x2] ss:$4 sm:$0xff] %v7938_v41  ;;  %v1583_v14 = vmul.f32 %v7632_v15, %v7951_v54  ;;  %v1070_v0 = vpop.permute.xlu2 %1069 }
 0x28d   : > { %v1971_v57 = vld.sshfl [vmem:[#allocation1 + $0x20] sm:$0xff pattern:$0x73625140]  ;;  %v1120_v49 = vmul.f32 %v7500_v9, %v1070_v0  ;;  %v1586_v18 = vmul.f32 %v7632_v15, %v1070_v0 }
 0x28e   : > { %v2028_v6 = vpack.c.bf16 %v1971_v57, %v1970_v50  ;;  %v1615_v31 = vadd.f32 %v1583_v14, %v1537_v16 }
 0x28f   : > { %v7970_v19 = vadd.f32 %v1120_v49, %v7872_v62  ;;  %v1618_v44 = vadd.f32 %v1586_v18, %v1540_v52 }
 0x290   : > { %v7955_v28 = vld [vmem:[#allocation2 + $0xc0] sm:$0xff]  ;;  %6189 = vmatmul.msk.bf16.gmra.mxu1 %vm1743_vm0, %v2028_v6  ;;  %v1651_v37 = vadd.f32 %v7641_v39, %v1615_v31  ;;  %v1353_v31 = vmul.f32 %v7594_v61, %v1070_v0 }
 0x291   : > { %v7960_v59 = vrot.slane %v7955_v28, 2  ;;  %v7963_v20 = vrot.slane %v7955_v28, 4  ;;  %v7966_v5 = vrot.slane %v7955_v28, 6  ;;  %1976 = vst [vmem:[#allocation1 + $0x20] ss:$4 sm:$0xff] %v7955_v28  ;;  %1323 = vperm.xlu1 %6493, %v7838_v40   ;;  %v1654_v35 = vadd.f32 %v7641_v39, %v1618_v44 }
 0x292   : > { %1317 = vperm.xlu2 %6492, %v7838_v40   ;;  %v1683_v38 = vmax.f32 %v1651_v37, 0.0  ;;  %v7990_v40 = vpop.permute.xlu0 %816  ;;  %v1385_v0 = vadd.f32 %v1353_v31, %v7920_v25 }
 0x293   : > { %10719 = vst [vmem:[#allocation45_spill] sm:$0xff] %v7960_v59  ;;  %v1686_v62 = vmax.f32 %v1654_v35, 0.0  ;;  %v862_v37 = vmul.f32 %v7571_v53, %v7990_v40 }
 0x294   : > { %10720 = vst [vmem:[#allocation46_spill] sm:$0xff] %v7963_v20  ;;  %v1732_v50 = vsel %vm7022_vm4, %v1683_v38, 0.0 }
 0x295   : > { %10721 = vst [vmem:[#allocation47_spill] sm:$0xff] %v7966_v5  ;;  %v1735_v52 = vsel %vm7150_vm7, %v1686_v62, 0.0 }
 0x296   : > { %1977 = vst [vmem:[#allocation1 + $0x21] ss:$4 sm:$0xff] %v7960_v59 }
 0x297   : > { %1978 = vst [vmem:[#allocation1 + $0x22] ss:$4 sm:$0xff] %v7963_v20 }
 0x298   : > { %1979 = vst [vmem:[#allocation1 + $0x23] ss:$4 sm:$0xff] %v7966_v5 }
 0x299   : > { %1772 = vst.msk [vmem:[#allocation2 + $0xb8] sm:$0xf] %vm1745_vm1, %v1732_v50  ;;  %6496 = vset.pattern.permute.xlu1 %v6761_v3  ;;  %v1194_v50 = vmul.f32 %v7562_v46, %v7860_v48 }
 0x29a   : > { %1775 = vst.msk [vmem:[#allocation2 + $0xd0] sm:$0xff] %vm1743_vm0, %v1735_v52  ;;  %6494 = vset.pattern.permute.xlu2 %v6752_v1  ;;  %v8019_v35 = vpop.permute.xlu0 %1081  ;;  %v599_v1 = vmul.f32 %v7578_v34, %v7860_v48 }
 0x29b   : > { %v7997_v14 = vpop.permute.xlu1 %804 }
 0x29c   : > { %v8000_v3 = vpop.permute.xlu2 %564 }
 0x29d   : > { %v1432_v44 = vmul.f32 %v7606_v60, %v8000_v3  ;;  %v604_v38 = vmul.f32 %v7578_v34, %v8000_v3 }
 0x29f   : > { %v1981_v57 = vld.sshfl [vmem:[#allocation1 + $0x20] sm:$0xff pattern:$0x73625140] }
 0x2a0   : > { %v1806_v63 = vld [vmem:[#allocation2 + $0xb8] sm:$0x3] }
 0x2a1   : > { %1975 = vst [vmem:[#allocation1 + $0x3] ss:$4 sm:$0xff] %v1806_v63  ;;  %v7988_v58 = vld [vmem:[#allocation2 + $0xd0] sm:$0xff]  ;;  %1474 = vperm.xlu1 %6496, %v7895_v23   ;;  %v1464_v63 = vadd.f32 %v1432_v44, %v1385_v0  ;;  %v858_v44 = vmul.f32 %v7571_v53, %v7941_v29  ;;  %v1272_v0 = vmul.f32 %v7613_v27, %v7941_v29 }
 0x2a2   : > { %10722 = vst [vmem:[#allocation48_spill] sm:$0xff] %v7988_v58  ;;  %v7994_v4 = vrot.slane %v7988_v58, 6  ;;  %1396 = vperm.xlu2 %6494, %v7895_v23   ;;  %v8003_v49 = vrot.slane %v7988_v58, 2  ;;  %v8006_v18 = vrot.slane %v7988_v58, 4  ;;  %v1196_v29 = vmul.f32 %v7562_v46, %v7918_v33 }
 0x2a3   : > { %v890_v48 = vadd.f32 %v858_v44, %v599_v1 }
 0x2a4   : > { %10723 = vst [vmem:[#allocation49_spill] sm:$0xff] %v7994_v4 }
 0x2a5   : > { %1986 = vst [vmem:[#allocation1 + $0x20] ss:$4 sm:$0xff] %v7994_v4  ;;  %v1226_v4 = vadd.f32 %v1194_v50, %v7849_v51 }
 0x2a6   : > { %10724 = vst [vmem:[#allocation50_spill] sm:$0xff] %v8003_v49 }
 0x2a7   : > { %10725 = vst [vmem:[#allocation51_spill] sm:$0xff] %v8006_v18  ;;  %v1304_v50 = vadd.f32 %v1272_v0, %v1226_v4 }
 0x2a8   : > { %v1980_v16 = vld.sshfl [vmem:[#allocation1] sm:$0xff pattern:$0x73625140] }
 0x2a9   : > { %1983 = vst [vmem:[#allocation1 + $0x1] ss:$4 sm:$0xff] %v7988_v58  ;;  %v2029_v6 = vpack.c.bf16 %v1981_v57, %v1980_v16  ;;  %6498 = vset.pattern.permute.xlu1 %v6779_v7  ;;  %v1588_v16 = vmul.f32 %v7632_v15, %v8019_v35 }
 0x2aa   : > { %1984 = vst [vmem:[#allocation1 + $0x2] ss:$4 sm:$0xff] %v8003_v49  ;;  %6497 = vset.pattern.permute.xlu2 %v6758_v2  ;;  %v1122_v2 = vmul.f32 %v7500_v9, %v8019_v35 }
 0x2ab   : > { %1985 = vst [vmem:[#allocation1 + $0x3] ss:$4 sm:$0xff] %v8006_v18  ;;  %6190 = vmatmul.msk.bf16.gmra.mxu1 %vm1743_vm0, %v2029_v6  ;;  %v8024_v62 = vpop.permute.xlu1 %557 }
 0x2ac   : > { %v603_v7 = vmul.f32 %v7578_v34, %v8024_v62  ;;  %v8030_v52 = vpop.permute.xlu2 %822 }
 0x2ad   : > { %v863_v25 = vmul.f32 %v7571_v53, %v8030_v52  ;;  %v1510_v57 = vmul.f32 %v7619_v30, %v8030_v52 }
 0x2ae   : > { %v8040_v6 = vadd.f32 %v862_v37, %v603_v7  ;;  %v1117_v37 = vmul.f32 %v7500_v9, %v7951_v54 }
 0x2af   : > { %v895_v31 = vadd.f32 %v863_v25, %v604_v38  ;;  %v1542_v10 = vadd.f32 %v1510_v57, %v1464_v63  ;;  %v1350_v38 = vmul.f32 %v7594_v61, %v7951_v54  ;;  %v1274_v54 = vmul.f32 %v7613_v27, %v7997_v14 }
 0x2b1   : > { %v8049_v18 = vadd.f32 %v1122_v2, %v895_v31  ;;  %v1620_v49 = vadd.f32 %v1588_v16, %v1542_v10  ;;  %1552 = vperm.xlu1 %6498, %v7895_v23   ;;  %v1429_v10 = vmul.f32 %v7606_v60, %v7918_v33  ;;  %v1149_v2 = vadd.f32 %v1117_v37, %v890_v48 }
 0x2b2   : > { %1480 = vperm.xlu2 %6497, %v7895_v23   ;;  %v1382_v63 = vadd.f32 %v1350_v38, %v1304_v50  ;;  %v1431_v48 = vmul.f32 %v7606_v60, %v8024_v62 }
 0x2b3   : > { %v1656_v51 = vadd.f32 %v7641_v39, %v1620_v49  ;;  %v1507_v49 = vmul.f32 %v7619_v30, %v7997_v14  ;;  %v1228_v1 = vadd.f32 %v1196_v29, %v1149_v2  ;;  %v601_v29 = vmul.f32 %v7578_v34, %v7918_v33 }
 0x2b4   : > { %v1461_v4 = vadd.f32 %v1429_v10, %v1382_v63 }
 0x2b5   : > { %v1688_v7 = vmax.f32 %v1656_v51, 0.0  ;;  %v1306_v16 = vadd.f32 %v1274_v54, %v1228_v1  ;;  %v860_v51 = vmul.f32 %v7571_v53, %v7997_v14 }
 0x2b6   : > { %v1539_v31 = vadd.f32 %v1507_v49, %v1461_v4 }
 0x2b7   : > { %v1737_v25 = vsel %vm7150_vm7, %v1688_v7, 0.0  ;;  %v892_v63 = vadd.f32 %v860_v51, %v601_v29 }
 0x2b8   : > { %1777 = vst.msk [vmem:[#allocation2 + $0xe0] sm:$0xff] %vm1743_vm0, %v1737_v25 }
 0x2ba   : > { %6499 = vset.pattern.permute.xlu2 %v6782_v8  ;;  %v1509_v8 = vmul.f32 %v7619_v30, %v7990_v40 }
 0x2bb   : > { %v1064_v57 = vpop.permute.xlu1 %1063 }
 0x2bc   : > { %v1352_v44 = vmul.f32 %v7594_v61, %v1064_v57  ;;  %v1585_v0 = vmul.f32 %v7632_v15, %v1064_v57  ;;  %v1119_v10 = vmul.f32 %v7500_v9, %v1064_v57  ;;  %v1198_v57 = vmul.f32 %v7562_v46, %v8024_v62 }
 0x2be   : > { %v1384_v37 = vadd.f32 %v1352_v44, %v1306_v16  ;;  %v1617_v38 = vadd.f32 %v1585_v0, %v1539_v31  ;;  %v1151_v4 = vadd.f32 %v1119_v10, %v892_v63  ;;  %v1276_v16 = vmul.f32 %v7613_v27, %v7990_v40  ;;  %v8102_v44 = vpop.permute.xlu2 %570 }
 0x2bf   : > { %v8076_v50 = vld [vmem:[#allocation2 + $0xe0] sm:$0xff]  ;;  %v1433_v62 = vmul.f32 %v7606_v60, %v8102_v44  ;;  %v605_v10 = vmul.f32 %v7578_v34, %v8102_v44 }
 0x2c0   : > { %10726 = vst [vmem:[#allocation52_spill] sm:$0xff] %v8076_v50  ;;  %v8081_v7 = vrot.slane %v8076_v50, 2  ;;  %v1463_v2 = vadd.f32 %v1431_v48, %v1384_v37  ;;  %v1653_v14 = vadd.f32 %v7641_v39, %v1617_v38  ;;  %v1230_v31 = vadd.f32 %v1198_v57, %v1151_v4 }
 0x2c1   : > { %1988 = vst [vmem:[#allocation1 + $0x22] ss:$4 sm:$0xff] %v8076_v50  ;;  %v8114_v40 = vrot.slane %v8076_v50, 4 }
 0x2c2   : > { %10727 = vst [vmem:[#allocation53_spill] sm:$0xff] %v8081_v7  ;;  %1558 = vperm.xlu2 %6499, %v7895_v23   ;;  %v1685_v25 = vmax.f32 %v1653_v14, 0.0  ;;  %v1541_v49 = vadd.f32 %v1509_v8, %v1463_v2  ;;  %v1308_v51 = vadd.f32 %v1276_v16, %v1230_v31 }
 0x2c3   : > { %1989 = vst [vmem:[#allocation1 + $0x23] ss:$4 sm:$0xff] %v8081_v7  ;;  %v8090_v54 = vpop.permute.xlu1 %1075 }
 0x2c4   : > { %v1587_v1 = vmul.f32 %v7632_v15, %v8090_v54  ;;  %v1734_v33 = vsel %vm7022_vm4, %v1685_v25, 0.0  ;;  %v1354_v0 = vmul.f32 %v7594_v61, %v8090_v54  ;;  %10728 = vst [vmem:[#allocation54_spill] sm:$0xff] %v8114_v40 }
 0x2c5   : > { %1774 = vst.msk [vmem:[#allocation2 + $0xc8] sm:$0xf] %vm1745_vm1, %v1734_v33  ;;  %v8127_v33 = vrot.slane %v8076_v50, 6 }
 0x2c6   : > { %v1619_v9 = vadd.f32 %v1587_v1, %v1541_v49  ;;  %v1386_v48 = vadd.f32 %v1354_v0, %v1308_v51  ;;  %v6525_v49 = vld [vmem:[%s10666_s1 + $0x8] ss:$0 sm:$0xff] }
 0x2c7   : > { %10729 = vst [vmem:[#allocation55_spill] sm:$0xff] %v8127_v33 }
 0x2c8   : > { %v1655_v23 = vadd.f32 %v7641_v39, %v1619_v9  ;;  %v1465_v2 = vadd.f32 %v1433_v62, %v1386_v48  ;;  %v1277_v48 = vmul.f32 %v7613_v27, %v8030_v52 }
 0x2ca   : > { %v1687_v37 = vmax.f32 %v1655_v23, 0.0 }
 0x2cc   : > { %v1808_v38 = vld [vmem:[#allocation2 + $0xc8] sm:$0x3]  ;;  %v1736_v8 = vsel %vm7022_vm4, %v1687_v37, 0.0  ;;  %v8110_v29 = vpop.permute.xlu2 %1087  ;;  %v1199_v37 = vmul.f32 %v7562_v46, %v8000_v3  ;;  %v1355_v3 = vmul.f32 %v7594_v61, %v8019_v35 }
 0x2cd   : > { %1982 = vst [vmem:[#allocation1] ss:$4 sm:$0xff] %v1808_v38  ;;  %v1123_v1 = vmul.f32 %v6525_v49, %v8110_v29  ;;  %v1589_v4 = vmul.f32 %v7632_v15, %v8110_v29 }
 0x2ce   : > { %1776 = vst.msk [vmem:[#allocation2 + $0xd8] sm:$0xf] %vm1745_vm1, %v1736_v8 }
 0x2d3   : > { %v829_v14 = vpop.permute.xlu1 %828 }
 0x2d4   : > { %v864_v63 = vmul.f32 %v7571_v53, %v829_v14  ;;  %v1511_v25 = vmul.f32 %v7619_v30, %v829_v14  ;;  %v1990_v9 = vld.sshfl [vmem:[#allocation1] sm:$0xff pattern:$0x73625140] }
 0x2d5   : > { %1992 = vst [vmem:[#allocation1] ss:$4 sm:$0xff] %v8114_v40  ;;  %v1810_v16 = vld [vmem:[#allocation2 + $0xd8] sm:$0x3] }
 0x2d6   : > { %v896_v34 = vadd.f32 %v864_v63, %v605_v10  ;;  %v1543_v57 = vadd.f32 %v1511_v25, %v1465_v2  ;;  %1993 = vst [vmem:[#allocation1 + $0x1] ss:$4 sm:$0xff] %v8127_v33  ;;  %v1231_v10 = vadd.f32 %v1199_v37, %v7970_v19 }
 0x2d7   : > { %1987 = vst [vmem:[#allocation1 + $0x21] ss:$4 sm:$0xff] %v1810_v16 }
 0x2d8   : > { %v1155_v53 = vadd.f32 %v1123_v1, %v896_v34  ;;  %v1621_v23 = vadd.f32 %v1589_v4, %v1543_v57  ;;  %v1309_v25 = vadd.f32 %v1277_v48, %v1231_v10  ;;  %v1240_v57 = vpop.permute.xlu0 %1239  ;;  %v1121_v48 = vmul.f32 %v6525_v49, %v8090_v54 }
 0x2d9   : > { %v1512_v16 = vmul.f32 %v7619_v30, %v1240_v57  ;;  %v1278_v54 = vmul.f32 %v7613_v27, %v829_v14 }
 0x2da   : > { %v1657_v31 = vadd.f32 %v7641_v39, %v1621_v23 }
 0x2dc   : > { %v1168_v0 = vpop.permute.xlu2 %1167  ;;  %v1689_v51 = vmax.f32 %v1657_v31, 0.0 }
 0x2dd   : > { %v1202_v38 = vmul.f32 %v7562_v46, %v1168_v0 }
 0x2de   : > { %v1738_v62 = vsel %vm7022_vm4, %v1689_v51, 0.0  ;;  %v1991_v2 = vld.sshfl [vmem:[#allocation1 + $0x20] sm:$0xff pattern:$0x73625140] }
 0x2df   : > { %v1234_v8 = vadd.f32 %v1202_v38, %v1155_v53  ;;  %1778 = vst.msk [vmem:[#allocation2 + $0xe8] sm:$0xf] %vm1745_vm1, %v1738_v62  ;;  %v2030_v63 = vpack.c.bf16 %v1991_v2, %v1990_v9  ;;  %v1387_v53 = vadd.f32 %v1355_v3, %v1309_v25  ;;  %v1279_v9 = vmul.f32 %v7613_v27, %v1240_v57 }
 0x2e1   : > { %6191 = vmatmul.msk.bf16.gmra.mxu1 %vm1743_vm0, %v2030_v63  ;;  %v1153_v63 = vadd.f32 %v1121_v48, %v8040_v6  ;;  %v8208_v48 = vld [vmem:[#allocation2 + $0x11] sm:$0xff] }
 0x2e2   : > { %10734 = vst [vmem:[#allocation60_spill] sm:$0xff] %v8208_v48 }
 0x2e3   : > { %v1162_v1 = vpop.permute.xlu1 %1161 }
 0x2e4   : > { %v1201_v4 = vmul.f32 %v7562_v46, %v1162_v1  ;;  %v1434_v52 = vmul.f32 %v7606_v60, %v1162_v1 }
 0x2e6   : > { %v1233_v34 = vadd.f32 %v1201_v4, %v8049_v18  ;;  %v1812_v19 = vld [vmem:[#allocation2 + $0xe8] sm:$0x3]  ;;  %v1466_v23 = vadd.f32 %v1434_v52, %v1387_v53  ;;  %v8170_v4 = vld [vmem:[%s10666_s1 + $0x9] ss:$0 sm:$0xff]  ;;  %v8196_v53 = vld [vmem:[%s10666_s1 + $0x6] ss:$0 sm:$0xff] }
 0x2e7   : > { %1994 = vst [vmem:[#allocation1 + $0x2] ss:$4 sm:$0xff] %v1812_v19  ;;  %v1356_v6 = vmul.f32 %v8170_v4, %v8110_v29  ;;  %v2033_v29 = vld [vmem:[#allocation2 + $0x1] sm:$0xff] }
 0x2e8   : > { %v1311_v35 = vadd.f32 %v1279_v9, %v1233_v34  ;;  %v1544_v37 = vadd.f32 %v1512_v16, %v1466_v23  ;;  %v2097_v23 = vrot.slane %v2033_v29, 2  ;;  %v2098_v16 = vrot.slane %v2033_v29, 4 }
 0x2ec   : > { %v1318_v31 = vpop.permute.xlu2 %1317 }
 0x2ed   : > { %v1357_v38 = vmul.f32 %v7594_v61, %v1318_v31  ;;  %v1590_v46 = vmul.f32 %v7632_v15, %v1318_v31  ;;  %v6526_v61 = vld [vmem:[%s10666_s1 + $0x1] ss:$0 sm:$0xff] }
 0x2ee   : > { %v1200_v25 = vmul.f32 %v6526_v61, %v8102_v44  ;;  %v8179_v44 = vld [vmem:[%s10666_s1 + $0x2] ss:$0 sm:$0xff]  ;;  %v8225_v61 = vld [vmem:[#allocation2 + $0x31] sm:$0xff] }
 0x2ef   : > { %v8151_v51 = vadd.f32 %v1357_v38, %v1311_v35  ;;  %v1622_v60 = vadd.f32 %v1590_v46, %v1544_v37  ;;  %v2099_v37 = vrot.slane %v2033_v29, 6  ;;  %10737 = vst [vmem:[#allocation63_spill] sm:$0xff] %v8225_v61 }
 0x2f0   : > { %v1232_v49 = vadd.f32 %v1200_v25, %v1153_v63  ;;  %v8228_v25 = vrot.slane %v8225_v61, 2 }
 0x2f1   : > { %v1658_v18 = vadd.f32 %v7641_v39, %v1622_v60 }
 0x2f2   : > { %v1310_v1 = vadd.f32 %v1278_v54, %v1232_v49  ;;  %10738 = vst [vmem:[#allocation64_spill] sm:$0xff] %v8228_v25  ;;  %v8231_v54 = vrot.slane %v8225_v61, 4 }
 0x2f3   : > { %v1690_v62 = vmax.f32 %v1658_v18, 0.0  ;;  %v1246_v10 = vpop.permute.xlu1 %1245 }
 0x2f4   : > { %v1280_v2 = vmul.f32 %v7613_v27, %v1246_v10  ;;  %v1388_v57 = vadd.f32 %v1356_v6, %v1310_v1  ;;  %10739 = vst [vmem:[#allocation65_spill] sm:$0xff] %v8231_v54  ;;  %v2034_v1 = vld [vmem:[#allocation2 + $0x9] sm:$0x3]  ;;  %v8236_v6 = vrot.slane %v8225_v61, 6 }
 0x2f5   : > { %v1739_v30 = vsel %vm7150_vm7, %v1690_v62, 0.0 }
 0x2f6   : > { %1779 = vst.msk [vmem:[#allocation2 + $0xf0] sm:$0xff] %vm1743_vm0, %v1739_v30  ;;  %v8164_v3 = vadd.f32 %v1280_v2, %v1234_v8  ;;  %v1435_v8 = vmul.f32 %v8179_v44, %v1168_v0  ;;  %v1513_v0 = vmul.f32 %v8196_v53, %v1246_v10  ;;  %v8214_v10 = vld [vmem:[#allocation2 + $0x21] sm:$0xff]  ;;  %v2036_v30 = vld [vmem:[#allocation2 + $0x19] sm:$0x3] }
 0x2f7   : > { %10735 = vst [vmem:[#allocation61_spill] sm:$0xff] %v8214_v10 }
 0x2f8   : > { %v1467_v19 = vadd.f32 %v1435_v8, %v1388_v57  ;;  %10740 = vst [vmem:[#allocation66_spill] sm:$0xff] %v8236_v6  ;;  %v10394_v57 = vrot.slane %v8208_v48, 2 }
 0x2fa   : > { %v1545_v31 = vadd.f32 %v1513_v0, %v1467_v19  ;;  %v10393_v0 = vrot.slane %v8208_v48, 4  ;;  %v8250_v19 = vld [vmem:[#allocation2 + $0x51] sm:$0xff] }
 0x2fb   : > { %10741 = vst [vmem:[#allocation67_spill] sm:$0xff] %v8250_v19 }
 0x2fd   : > { %v8174_v52 = vld [vmem:[#allocation2 + $0xf0] sm:$0xff] }
 0x2fe   : > { %10730 = vst [vmem:[#allocation56_spill] sm:$0xff] %v8174_v52  ;;  %v8183_v27 = vrot.slane %v8174_v52, 2  ;;  %v8186_v14 = vrot.slane %v8174_v52, 4  ;;  %v8189_v34 = vrot.slane %v8174_v52, 6 }
 0x2ff   : > { %1995 = vst [vmem:[#allocation1 + $0x3] ss:$4 sm:$0xff] %v8174_v52 }
 0x300   : > { %10731 = vst [vmem:[#allocation57_spill] sm:$0xff] %v8183_v27 }
 0x301   : > { %10732 = vst [vmem:[#allocation58_spill] sm:$0xff] %v8186_v14 }
 0x302   : > { %10733 = vst [vmem:[#allocation59_spill] sm:$0xff] %v8189_v34 }
 0x303   : > { %1996 = vst [vmem:[#allocation1 + $0x20] ss:$4 sm:$0xff] %v8183_v27  ;;  %v8201_v9 = vpop.permute.xlu1 %1323 }
 0x304   : > { %1997 = vst [vmem:[#allocation1 + $0x21] ss:$4 sm:$0xff] %v8186_v14  ;;  %v1591_v35 = vmul.f32 %v7632_v15, %v8201_v9  ;;  %v10392_v15 = vrot.slane %v8208_v48, 6 }
 0x305   : > { %1998 = vst [vmem:[#allocation1 + $0x22] ss:$4 sm:$0xff] %v8189_v34 }
 0x306   : > { %v8205_v38 = vld.sshfl [vmem:[#allocation1] sm:$0xff pattern:$0x73625140]  ;;  %v1623_v46 = vadd.f32 %v1591_v35, %v1545_v31  ;;  %v8255_v31 = vrot.slane %v8250_v19, 2  ;;  %v8258_v35 = vrot.slane %v8250_v19, 4 }
 0x307   : > { %2145 = vst [vmem:[#allocation1] ss:$4 sm:$0xff] %v2033_v29  ;;  %v2040_v29 = vld [vmem:[#allocation2 + $0x39] sm:$0x3] }
 0x308   : > { %2147 = vst [vmem:[#allocation1 + $0x1] ss:$4 sm:$0xff] %v2097_v23  ;;  %v1659_v60 = vadd.f32 %v7641_v39, %v1623_v46  ;;  %v8221_v39 = vrot.slane %v8214_v10, 2  ;;  %v2042_v23 = vld [vmem:[#allocation2 + $0x49] sm:$0x3]  ;;  %v8266_v46 = vrot.slane %v8214_v10, 6 }
 0x309   : > { %2149 = vst [vmem:[#allocation1 + $0x2] ss:$4 sm:$0xff] %v2098_v16 }
 0x30a   : > { %2151 = vst [vmem:[#allocation1 + $0x3] ss:$4 sm:$0xff] %v2099_v37  ;;  %v1691_v18 = vmax.f32 %v1659_v60, 0.0  ;;  %v8262_v37 = vrot.slane %v8214_v10, 4 }
 0x30b   : > { %10736 = vst [vmem:[#allocation62_spill] sm:$0xff] %v8221_v39 }
 0x30c   : > { %v1740_v62 = vsel %vm7022_vm4, %v1691_v18, 0.0  ;;  %10742 = vst [vmem:[#allocation68_spill] sm:$0xff] %v8255_v31  ;;  %v2038_v18 = vld [vmem:[#allocation2 + $0x29] sm:$0x3] }
 0x30d   : > { %1780 = vst.msk [vmem:[#allocation2 + $0xf8] sm:$0xf] %vm1745_vm1, %v1740_v62  ;;  %v8273_v62 = vld [vmem:[#allocation2 + $0x61] sm:$0xff] }
 0x30e   : > { %10743 = vst [vmem:[#allocation69_spill] sm:$0xff] %v8258_v35 }
 0x30f   : > { %10744 = vst [vmem:[#allocation70_spill] sm:$0xff] %v8262_v37 }
 0x310   : > { %10745 = vst [vmem:[#allocation71_spill] sm:$0xff] %v8266_v46 }
 0x311   : > { %v8216_v2 = vld.sshfl [vmem:[#allocation1] sm:$0xff pattern:$0x73625140]  ;;  %10746 = vst [vmem:[#allocation72_spill] sm:$0xff] %v8273_v62 }
 0x312   : > { %2162 = vst [vmem:[#allocation1] ss:$4 sm:$0xff] %v10392_v15  ;;  %v8288_v15 = vld [vmem:[#allocation2 + $0x71] sm:$0xff] }
 0x313   : > { %2163 = vst [vmem:[#allocation1 + $0x1] ss:$4 sm:$0xff] %v2036_v30  ;;  %v8277_v30 = vrot.slane %v8273_v62, 4 }
 0x314   : > { %2164 = vst [vmem:[#allocation1 + $0x2] ss:$4 sm:$0xff] %v8214_v10  ;;  %v1814_v63 = vld [vmem:[#allocation2 + $0xf8] sm:$0x3] }
 0x315   : > { %2165 = vst [vmem:[#allocation1 + $0x3] ss:$4 sm:$0xff] %v8221_v39  ;;  %v8330_v39 = vrot.slane %v8273_v62, 2  ;;  %v2052_v10 = vld [vmem:[#allocation2 + $0x99] sm:$0x3]  ;;  %v8451_v43 = vld [vmem:[#allocation2 + $0xf1] sm:$0xff] }
 0x316   : > { %1999 = vst [vmem:[#allocation1 + $0x23] ss:$4 sm:$0xff] %v1814_v63  ;;  %v8280_v63 = vrot.slane %v8273_v62, 6 }
 0x317   : > { %10747 = vst [vmem:[#allocation73_spill] sm:$0xff] %v8277_v30 }
 0x318   : > { %10748 = vst [vmem:[#allocation74_spill] sm:$0xff] %v8280_v63 }
 0x319   : > { %10750 = vst [vmem:[#allocation76_spill] sm:$0xff] %v8288_v15 }
 0x31a   : > { %10759 = vst [vmem:[#allocation85_spill] sm:$0xff] %v8330_v39 }
 0x31b   : > { %10782 = vst [vmem:[#allocation108_spill] sm:$0xff] %v8451_v43 }
 0x31c   : > { %v8233_v49 = vld.sshfl [vmem:[#allocation1] sm:$0xff pattern:$0x73625140] }
 0x31d   : > { %2172 = vst [vmem:[#allocation1] ss:$4 sm:$0xff] %v8228_v25  ;;  %v8240_v8 = vld.sshfl [vmem:[#allocation1 + $0x20] sm:$0xff pattern:$0x73625140] }
 0x31e   : > { %2173 = vst [vmem:[#allocation1 + $0x1] ss:$4 sm:$0xff] %v8231_v54  ;;  %v8322_v54 = vrot.slane %v8250_v19, 6  ;;  %v8364_v25 = vld [vmem:[#allocation2 + $0xb1] sm:$0xff] }
 0x31f   : > { %2174 = vst [vmem:[#allocation1 + $0x2] ss:$4 sm:$0xff] %v8236_v6 }
 0x320   : > { %2175 = vst [vmem:[#allocation1 + $0x3] ss:$4 sm:$0xff] %v2040_v29  ;;  %v8284_v29 = vld [vmem:[#allocation2 + $0x41] sm:$0xff] }
 0x321   : > { %2153 = vst [vmem:[#allocation1 + $0x20] ss:$4 sm:$0xff] %v2034_v1 }
 0x322   : > { %2155 = vst [vmem:[#allocation1 + $0x21] ss:$4 sm:$0xff] %v8208_v48  ;;  %v6172_v48 = vld [vmem:[%s10310_s3 + $0x1] sm:$0x1] }
 0x323   : > { %2157 = vst [vmem:[#allocation1 + $0x22] ss:$4 sm:$0xff] %v10394_v57  ;;  %v8297_v57 = vrot.slane %v8284_v29, 4 }
 0x324   : > { %2159 = vst [vmem:[#allocation1 + $0x23] ss:$4 sm:$0xff] %v10393_v0 }
 0x325   : > { %10749 = vst [vmem:[#allocation75_spill] sm:$0xff] %v8284_v29 }
 0x326   : > { %10752 = vst [vmem:[#allocation78_spill] sm:$0xff] %v8297_v57 }
 0x327   : > { %v8252_v16 = vld.sshfl [vmem:[#allocation1] sm:$0xff pattern:$0x73625140]  ;;  %10758 = vst [vmem:[#allocation84_spill] sm:$0xff] %v8322_v54 }
 0x328   : > { %2182 = vst [vmem:[#allocation1] ss:$4 sm:$0xff] %v2042_v23  ;;  %v2046_v23 = vld [vmem:[#allocation2 + $0x69] sm:$0x3] }
 0x329   : > { %2183 = vst [vmem:[#allocation1 + $0x1] ss:$4 sm:$0xff] %v8250_v19 }
 0x32a   : > { %2184 = vst [vmem:[#allocation1 + $0x2] ss:$4 sm:$0xff] %v8255_v31 }
 0x32b   : > { %2185 = vst [vmem:[#allocation1 + $0x3] ss:$4 sm:$0xff] %v8258_v35  ;;  %v8269_v60 = vld.sshfl [vmem:[#allocation1 + $0x20] sm:$0xff pattern:$0x73625140]  ;;  %v8301_v35 = vrot.slane %v8284_v29, 6 }
 0x32c   : > { %2166 = vst [vmem:[#allocation1 + $0x20] ss:$4 sm:$0xff] %v8262_v37  ;;  %v2044_v37 = vld [vmem:[#allocation2 + $0x59] sm:$0x3] }
 0x32d   : > { %2167 = vst [vmem:[#allocation1 + $0x21] ss:$4 sm:$0xff] %v8266_v46 }
 0x32e   : > { %2168 = vst [vmem:[#allocation1 + $0x22] ss:$4 sm:$0xff] %v2038_v18  ;;  %v8291_v18 = vrot.slane %v8284_v29, 2 }
 0x32f   : > { %2169 = vst [vmem:[#allocation1 + $0x23] ss:$4 sm:$0xff] %v8225_v61  ;;  %v8370_v61 = vrot.slane %v8364_v25, 2 }
 0x330   : > { %10751 = vst [vmem:[#allocation77_spill] sm:$0xff] %v8291_v18 }
 0x331   : > { %10753 = vst [vmem:[#allocation79_spill] sm:$0xff] %v8301_v35 }
 0x332   : > { %v8282_v1 = vld.sshfl [vmem:[#allocation1] sm:$0xff pattern:$0x73625140]  ;;  %10767 = vst [vmem:[#allocation93_spill] sm:$0xff] %v8364_v25 }
 0x333   : > { %2192 = vst [vmem:[#allocation1] ss:$4 sm:$0xff] %v8277_v30 }
 0x334   : > { %2193 = vst [vmem:[#allocation1 + $0x1] ss:$4 sm:$0xff] %v8280_v63 }
 0x335   : > { %2194 = vst [vmem:[#allocation1 + $0x2] ss:$4 sm:$0xff] %v2046_v23  ;;  %v8305_v23 = vld [vmem:[#allocation2 + $0x81] sm:$0xff] }
 0x336   : > { %2195 = vst [vmem:[#allocation1 + $0x3] ss:$4 sm:$0xff] %v8288_v15  ;;  %v8294_v0 = vld.sshfl [vmem:[#allocation1 + $0x20] sm:$0xff pattern:$0x73625140]  ;;  %v8309_v63 = vrot.slane %v8305_v23, 2 }
 0x337   : > { %2176 = vst [vmem:[#allocation1 + $0x20] ss:$4 sm:$0xff] %v8284_v29  ;;  %v8314_v6 = vrot.slane %v8305_v23, 4  ;;  %v8318_v29 = vrot.slane %v8305_v23, 6 }
 0x338   : > { %2177 = vst [vmem:[#allocation1 + $0x21] ss:$4 sm:$0xff] %v8291_v18  ;;  %v2048_v18 = vld [vmem:[#allocation2 + $0x79] sm:$0x3] }
 0x339   : > { %2178 = vst [vmem:[#allocation1 + $0x22] ss:$4 sm:$0xff] %v8297_v57 }
 0x33a   : > { %10754 = vst [vmem:[#allocation80_spill] sm:$0xff] %v8305_v23 }
 0x33b   : > { %2179 = vst [vmem:[#allocation1 + $0x23] ss:$4 sm:$0xff] %v8301_v35  ;;  %v8358_v35 = vrot.slane %v8288_v15, 6 }
 0x33c   : > { %10755 = vst [vmem:[#allocation81_spill] sm:$0xff] %v8309_v63 }
 0x33d   : > { %v8311_v31 = vld.sshfl [vmem:[#allocation1] sm:$0xff pattern:$0x73625140]  ;;  %10756 = vst [vmem:[#allocation82_spill] sm:$0xff] %v8314_v6 }
 0x33e   : > { %2202 = vst [vmem:[#allocation1] ss:$4 sm:$0xff] %v8305_v23  ;;  %v8332_v23 = vld [vmem:[#allocation2 + $0x91] sm:$0xff] }
 0x33f   : > { %10757 = vst [vmem:[#allocation83_spill] sm:$0xff] %v8318_v29 }
 0x340   : > { %2203 = vst [vmem:[#allocation1 + $0x1] ss:$4 sm:$0xff] %v8309_v63  ;;  %v1397_v63 = vpop.permute.xlu2 %1396 }
 0x341   : > { %2204 = vst [vmem:[#allocation1 + $0x2] ss:$4 sm:$0xff] %v8314_v6  ;;  %v8337_v6 = vrot.slane %v8332_v23, 6 }
 0x342   : > { %2205 = vst [vmem:[#allocation1 + $0x3] ss:$4 sm:$0xff] %v8318_v29  ;;  %v8326_v30 = vld.sshfl [vmem:[#allocation1 + $0x20] sm:$0xff pattern:$0x73625140]  ;;  %v8339_v29 = vld [vmem:[#allocation2 + $0xa1] sm:$0xff] }
 0x343   : > { %2186 = vst [vmem:[#allocation1 + $0x20] ss:$4 sm:$0xff] %v8322_v54  ;;  %v8345_v54 = vrot.slane %v8339_v29, 2 }
 0x344   : > { %2187 = vst [vmem:[#allocation1 + $0x21] ss:$4 sm:$0xff] %v2044_v37  ;;  %v8348_v37 = vrot.slane %v8288_v15, 2 }
 0x345   : > { %10760 = vst [vmem:[#allocation86_spill] sm:$0xff] %v8332_v23 }
 0x346   : > { %2188 = vst [vmem:[#allocation1 + $0x22] ss:$4 sm:$0xff] %v8273_v62 }
 0x347   : > { %2189 = vst [vmem:[#allocation1 + $0x23] ss:$4 sm:$0xff] %v8330_v39  ;;  %v8352_v39 = vrot.slane %v8288_v15, 4 }
 0x348   : > { %10761 = vst [vmem:[#allocation87_spill] sm:$0xff] %v8337_v6  ;;  %v1481_v57 = vpop.permute.xlu2 %1480 }
 0x349   : > { %10762 = vst [vmem:[#allocation88_spill] sm:$0xff] %v8339_v29  ;;  %v8341_v19 = vld.sshfl [vmem:[#allocation1] sm:$0xff pattern:$0x73625140] }
 0x34a   : > { %2212 = vst [vmem:[#allocation1] ss:$4 sm:$0xff] %v8337_v6  ;;  %v1358_v6 = vmul.f32 %v8170_v4, %v8201_v9  ;;  %v8373_v4 = vrot.slane %v8364_v25, 4 }
 0x34b   : > { %10763 = vst [vmem:[#allocation89_spill] sm:$0xff] %v8345_v54 }
 0x34c   : > { %2213 = vst [vmem:[#allocation1 + $0x1] ss:$4 sm:$0xff] %v2052_v10  ;;  %v1403_v10 = vpop.permute.xlu0 %1402 }
 0x34d   : > { %10764 = vst [vmem:[#allocation90_spill] sm:$0xff] %v8348_v37  ;;  %v1437_v15 = vmul.f32 %v8179_v44, %v1403_v10  ;;  %v1475_v10 = vpop.permute.xlu1 %1474 }
 0x34e   : > { %2214 = vst [vmem:[#allocation1 + $0x2] ss:$4 sm:$0xff] %v8339_v29  ;;  %v8355_v62 = vld.sshfl [vmem:[#allocation1 + $0x20] sm:$0xff pattern:$0x73625140] }
 0x34f   : > { %10765 = vst [vmem:[#allocation91_spill] sm:$0xff] %v8352_v39 }
 0x350   : > { %2215 = vst [vmem:[#allocation1 + $0x3] ss:$4 sm:$0xff] %v8345_v54  ;;  %v1390_v54 = vadd.f32 %v1358_v6, %v8164_v3  ;;  %v2050_v6 = vld [vmem:[#allocation2 + $0x89] sm:$0x3] }
 0x351   : > { %10766 = vst [vmem:[#allocation92_spill] sm:$0xff] %v8358_v35 }
 0x352   : > { %2196 = vst [vmem:[#allocation1 + $0x20] ss:$4 sm:$0xff] %v8348_v37  ;;  %v1515_v37 = vmul.f32 %v8196_v53, %v1481_v57  ;;  %v1469_v3 = vadd.f32 %v1437_v15, %v1390_v54  ;;  %v6530_v57 = vld [vmem:[%s10666_s1 + $0xa] ss:$0 sm:$0xff]  ;;  %v2031_v15 = vpack.c.bf16 %v8240_v8, %v8205_v38  ;;  %v8395_v54 = vrot.slane %v8332_v23, 4  ;;  %s349_s1 = scalar_lea.vmem [#allocation4], %s6163_s24 }
 0x353   : > { %2197 = vst [vmem:[#allocation1 + $0x21] ss:$4 sm:$0xff] %v8352_v39  ;;  %v8379_v39 = vrot.slane %v8364_v25, 6  ;;  %v6531_v38 = vld [vmem:[%s10670_s2] ss:$0 sm:$0xff]  ;;  %s6074_s13 = sshll.u32 %s349_s1, 4  ;;  %s6075_s13 = int_to_ptr.vmem [resolvable:$true] %s6074_s13 }
 0x354   : > { %2198 = vst [vmem:[#allocation1 + $0x22] ss:$4 sm:$0xff] %v8358_v35  ;;  %v1559_v35 = vpop.permute.xlu2 %1558  ;;  %v1547_v27 = vadd.f32 %v1515_v37, %v1469_v3  ;;  %6192 = vmatmul.msk.bf16.gmra.mxu1 %vm1743_vm0, %v2031_v15  ;;  %v8403_v3 = vld [vmem:[#allocation2 + $0xd1] sm:$0xff] }
 0x355   : > { %2199 = vst [vmem:[#allocation1 + $0x23] ss:$4 sm:$0xff] %v2048_v18  ;;  %v2056_v18 = vld [vmem:[#allocation2 + $0xb9] sm:$0x3]  ;;  %v1593_v52 = vmul.f32 %v6530_v57, %v1559_v35  ;;  %v1514_v35 = vmul.f32 %v8196_v53, %v1475_v10  ;;  %v8415_v53 = vrot.slane %v8403_v3, 4 }
 0x356   : > { %10768 = vst [vmem:[#allocation94_spill] sm:$0xff] %v8370_v61 }
 0x357   : > { %10769 = vst [vmem:[#allocation95_spill] sm:$0xff] %v8373_v4  ;;  %v8375_v9 = vld.sshfl [vmem:[#allocation1] sm:$0xff pattern:$0x73625140]  ;;  %v1625_v37 = vadd.f32 %v1593_v52, %v1547_v27  ;;  %v1553_v52 = vpop.permute.xlu1 %1552  ;;  %v8412_v27 = vrot.slane %v8403_v3, 2 }
 0x358   : > { %10770 = vst [vmem:[#allocation96_spill] sm:$0xff] %v8379_v39 }
 0x359   : > { %2222 = vst [vmem:[#allocation1] ss:$4 sm:$0xff] %v8370_v61  ;;  %v8390_v61 = vrot.slane %v8332_v23, 2  ;;  %v1661_v8 = vadd.f32 %v6531_v38, %v1625_v37  ;;  %v8419_v37 = vrot.slane %v8339_v29, 4 }
 0x35a   : > { %2223 = vst [vmem:[#allocation1 + $0x1] ss:$4 sm:$0xff] %v8373_v4  ;;  %v8472_v4 = vrot.slane %v8403_v3, 6 }
 0x35b   : > { %2224 = vst [vmem:[#allocation1 + $0x2] ss:$4 sm:$0xff] %v8379_v39  ;;  %v1592_v39 = vmul.f32 %v6530_v57, %v1553_v52  ;;  %v1693_v10 = vmax.f32 %v1661_v8, 0.0 }
 0x35c   : > { %2225 = vst [vmem:[#allocation1 + $0x3] ss:$4 sm:$0xff] %v2056_v18  ;;  %v8384_v46 = vld.sshfl [vmem:[#allocation1 + $0x20] sm:$0xff pattern:$0x73625140]  ;;  %v1436_v18 = vmul.f32 %v8179_v44, %v1397_v63 }
 0x35d   : > { %10771 = vst [vmem:[#allocation97_spill] sm:$0xff] %v8390_v61  ;;  %v2058_v63 = vld [vmem:[#allocation2 + $0xc9] sm:$0x3]  ;;  %v1742_v8 = vsel %vm7022_vm4, %v1693_v10, 0.0  ;;  %v8447_v10 = vld [vmem:[#allocation2 + $0xc1] sm:$0xff]  ;;  %vm6057_vm4 = vcmask 261120  }
 0x35e   : > { %2206 = vst [vmem:[#allocation1 + $0x20] ss:$4 sm:$0xff] %v2050_v6  ;;  %v1468_v44 = vadd.f32 %v1436_v18, %v8151_v51  ;;  %v8423_v18 = vrot.slane %v8339_v29, 6  ;;  %v8480_v29 = vld [vmem:[#allocation2 + $0x12] sm:$0xff] }
 0x35f   : > { %10772 = vst [vmem:[#allocation98_spill] sm:$0xff] %v8395_v54 }
 0x360   : > { %2207 = vst [vmem:[#allocation1 + $0x21] ss:$4 sm:$0xff] %v8332_v23  ;;  %v1546_v15 = vadd.f32 %v1514_v35, %v1468_v44  ;;  %v2054_v35 = vld [vmem:[#allocation2 + $0xa9] sm:$0x3]  ;;  %v8432_v44 = vld [vmem:[#allocation2 + $0xe1] sm:$0xff] }
 0x361   : > { %2208 = vst [vmem:[#allocation1 + $0x22] ss:$4 sm:$0xff] %v8390_v61 }
 0x362   : > { %2209 = vst [vmem:[#allocation1 + $0x23] ss:$4 sm:$0xff] %v8395_v54  ;;  %v1624_v51 = vadd.f32 %v1592_v39, %v1546_v15  ;;  %v8439_v15 = vrot.slane %v8432_v44, 4  ;;  %v8569_v54 = vld [vmem:[#allocation2 + $0x42] sm:$0xff] }
 0x363   : > { %10773 = vst [vmem:[#allocation99_spill] sm:$0xff] %v8403_v3  ;;  %v8409_v6 = vld.sshfl [vmem:[#allocation1] sm:$0xff pattern:$0x73625140] }
 0x364   : > { %10774 = vst [vmem:[#allocation100_spill] sm:$0xff] %v8412_v27  ;;  %v1660_v57 = vadd.f32 %v6531_v38, %v1624_v51  ;;  %v8443_v38 = vrot.slane %v8432_v44, 6  ;;  %v2062_v51 = vld [vmem:[#allocation2 + $0xe9] sm:$0x3] }
 0x365   : > { %2232 = vst [vmem:[#allocation1] ss:$4 sm:$0xff] %v2058_v63 }
 0x366   : > { %10775 = vst [vmem:[#allocation101_spill] sm:$0xff] %v8415_v53  ;;  %v1692_v39 = vmax.f32 %v1660_v57, 0.0  ;;  %v8454_v57 = vrot.slane %v8447_v10, 2 }
 0x367   : > { %2233 = vst [vmem:[#allocation1 + $0x1] ss:$4 sm:$0xff] %v8403_v3  ;;  %v8499_v3 = vrot.slane %v8451_v43, 4 }
 0x368   : > { %10776 = vst [vmem:[#allocation102_spill] sm:$0xff] %v8419_v37  ;;  %v1741_v52 = vsel %vm7150_vm7, %v1692_v39, 0.0  ;;  %v2469_v39 = vld [vmem:[#allocation2 + $0x2] sm:$0xff] }
 0x369   : > { %2234 = vst [vmem:[#allocation1 + $0x2] ss:$4 sm:$0xff] %v8412_v27  ;;  %v8426_v63 = vld.sshfl [vmem:[#allocation1 + $0x20] sm:$0xff pattern:$0x73625140] }
 0x36a   : > { %10777 = vst [vmem:[#allocation103_spill] sm:$0xff] %v8423_v18 }
 0x36b   : > { %2235 = vst [vmem:[#allocation1 + $0x3] ss:$4 sm:$0xff] %v8415_v53  ;;  %v2535_v53 = vrot.slane %v2469_v39, 6 }
 0x36c   : > { %2216 = vst [vmem:[#allocation1 + $0x20] ss:$4 sm:$0xff] %v8419_v37  ;;  %v8478_v37 = vrot.slane %v8432_v44, 2 }
 0x36d   : > { %2217 = vst [vmem:[#allocation1 + $0x21] ss:$4 sm:$0xff] %v8423_v18 }
 0x36e   : > { %10778 = vst [vmem:[#allocation104_spill] sm:$0xff] %v8432_v44 }
 0x36f   : > { %2218 = vst [vmem:[#allocation1 + $0x22] ss:$4 sm:$0xff] %v2054_v35 }
 0x370   : > { %2219 = vst [vmem:[#allocation1 + $0x23] ss:$4 sm:$0xff] %v8364_v25 }
 0x371   : > { %1782 = vst.msk [vmem:[#allocation2 + $0x108] sm:$0xf] %vm1745_vm1, %v1742_v8  ;;  %v8460_v8 = vrot.slane %v8447_v10, 4 }
 0x372   : > { %10779 = vst [vmem:[#allocation105_spill] sm:$0xff] %v8439_v15  ;;  %v8445_v11 = vld.sshfl [vmem:[#allocation1] sm:$0xff pattern:$0x73625140] }
 0x373   : > { %1781 = vst.msk [vmem:[#allocation2 + $0x100] sm:$0xff] %vm1743_vm0, %v1741_v52  ;;  %v8464_v52 = vrot.slane %v8447_v10, 6 }
 0x374   : > { %10780 = vst [vmem:[#allocation106_spill] sm:$0xff] %v8443_v38 }
 0x375   : > { %10781 = vst [vmem:[#allocation107_spill] sm:$0xff] %v8447_v10 }
 0x376   : > { %2242 = vst [vmem:[#allocation1] ss:$4 sm:$0xff] %v8439_v15 }
 0x377   : > { %2243 = vst [vmem:[#allocation1 + $0x1] ss:$4 sm:$0xff] %v8443_v38  ;;  %v8456_v35 = vld.sshfl [vmem:[#allocation1 + $0x20] sm:$0xff pattern:$0x73625140]  ;;  %v2534_v38 = vrot.slane %v2469_v39, 4 }
 0x378   : > { %2244 = vst [vmem:[#allocation1 + $0x2] ss:$4 sm:$0xff] %v2062_v51  ;;  %v2533_v51 = vrot.slane %v2469_v39, 2 }
 0x379   : > { %10783 = vst [vmem:[#allocation109_spill] sm:$0xff] %v8454_v57 }
 0x37a   : > { %2245 = vst [vmem:[#allocation1 + $0x3] ss:$4 sm:$0xff] %v8451_v43 }
 0x37b   : > { %10784 = vst [vmem:[#allocation110_spill] sm:$0xff] %v8460_v8 }
 0x37c   : > { %2226 = vst [vmem:[#allocation1 + $0x20] ss:$4 sm:$0xff] %v8447_v10  ;;  %v2060_v10 = vld [vmem:[#allocation2 + $0xd9] sm:$0x3] }
 0x37d   : > { %10785 = vst [vmem:[#allocation111_spill] sm:$0xff] %v8464_v52 }
 0x37e   : > { %2227 = vst [vmem:[#allocation1 + $0x21] ss:$4 sm:$0xff] %v8454_v57  ;;  %v10512_v57 = vrot.slane %v8480_v29, 4 }
 0x37f   : > { %2228 = vst [vmem:[#allocation1 + $0x22] ss:$4 sm:$0xff] %v8460_v8 }
 0x380   : > { %2229 = vst [vmem:[#allocation1 + $0x23] ss:$4 sm:$0xff] %v8464_v52 }
 0x381   : > { %v8469_v27 = vld.sshfl [vmem:[#allocation1] sm:$0xff pattern:$0x73625140]  ;;  %10786 = vst [vmem:[#allocation112_spill] sm:$0xff] %v8472_v4 }
 0x382   : > { %2581 = vst [vmem:[#allocation1] ss:$4 sm:$0xff] %v2469_v39  ;;  %v10487_v39 = vrot.slane %v8480_v29, 6 }
 0x383   : > { %2583 = vst [vmem:[#allocation1 + $0x1] ss:$4 sm:$0xff] %v2533_v51  ;;  %v8485_v51 = vld [vmem:[#allocation2 + $0x22] sm:$0xff] }
 0x384   : > { %2585 = vst [vmem:[#allocation1 + $0x2] ss:$4 sm:$0xff] %v2534_v38  ;;  %v8547_v25 = vrot.slane %v8485_v51, 4 }
 0x385   : > { %2587 = vst [vmem:[#allocation1 + $0x3] ss:$4 sm:$0xff] %v2535_v53  ;;  %v2472_v53 = vld [vmem:[#allocation2 + $0x1a] sm:$0x3] }
 0x386   : > { %10787 = vst [vmem:[#allocation113_spill] sm:$0xff] %v8478_v37 }
 0x387   : > { %v8474_v15 = vld.sshfl [vmem:[#allocation1 + $0x20] sm:$0xff pattern:$0x73625140]  ;;  %10788 = vst [vmem:[#allocation114_spill] sm:$0xff] %v8480_v29 }
 0x388   : > { %2236 = vst [vmem:[#allocation1 + $0x20] ss:$4 sm:$0xff] %v8472_v4  ;;  %v8492_v4 = vrot.slane %v8485_v51, 2 }
 0x389   : > { %2237 = vst [vmem:[#allocation1 + $0x21] ss:$4 sm:$0xff] %v2060_v10  ;;  %v8495_v10 = vrot.slane %v8451_v43, 2 }
 0x38a   : > { %2238 = vst [vmem:[#allocation1 + $0x22] ss:$4 sm:$0xff] %v8432_v44  ;;  %v8505_v44 = vrot.slane %v8451_v43, 6 }
 0x38b   : > { %2239 = vst [vmem:[#allocation1 + $0x23] ss:$4 sm:$0xff] %v8478_v37 }
 0x38c   : > { %10789 = vst [vmem:[#allocation115_spill] sm:$0xff] %v8485_v51  ;;  %v8487_v38 = vld.sshfl [vmem:[#allocation1] sm:$0xff pattern:$0x73625140] }
 0x38d   : > { %2598 = vst [vmem:[#allocation1] ss:$4 sm:$0xff] %v10487_v39  ;;  %v2064_v39 = vld [vmem:[#allocation2 + $0xf9] sm:$0x3] }
 0x38e   : > { %10790 = vst [vmem:[#allocation116_spill] sm:$0xff] %v8492_v4 }
 0x38f   : > { %2599 = vst [vmem:[#allocation1 + $0x1] ss:$4 sm:$0xff] %v2472_v53  ;;  %v8509_v53 = vld [vmem:[#allocation2 + $0x32] sm:$0xff] }
 0x390   : > { %10791 = vst [vmem:[#allocation117_spill] sm:$0xff] %v8495_v10  ;;  %v8513_v52 = vrot.slane %v8509_v53, 2  ;;  %v8516_v8 = vrot.slane %v8509_v53, 4  ;;  %v8521_v43 = vrot.slane %v8509_v53, 6 }
 0x391   : > { %2600 = vst [vmem:[#allocation1 + $0x2] ss:$4 sm:$0xff] %v8485_v51 }
 0x392   : > { %10792 = vst [vmem:[#allocation118_spill] sm:$0xff] %v8499_v3  ;;  %v8501_v37 = vld.sshfl [vmem:[#allocation1 + $0x20] sm:$0xff pattern:$0x73625140] }
 0x393   : > { %2601 = vst [vmem:[#allocation1 + $0x3] ss:$4 sm:$0xff] %v8492_v4 }
 0x394   : > { %10793 = vst [vmem:[#allocation119_spill] sm:$0xff] %v8505_v44 }
 0x395   : > { %2246 = vst [vmem:[#allocation1 + $0x20] ss:$4 sm:$0xff] %v8495_v10  ;;  %v2470_v10 = vld [vmem:[#allocation2 + $0xa] sm:$0x3] }
 0x396   : > { %2247 = vst [vmem:[#allocation1 + $0x21] ss:$4 sm:$0xff] %v8499_v3  ;;  %v2476_v3 = vld [vmem:[#allocation2 + $0x3a] sm:$0x3] }
 0x397   : > { %10794 = vst [vmem:[#allocation120_spill] sm:$0xff] %v8509_v53 }
 0x398   : > { %2248 = vst [vmem:[#allocation1 + $0x22] ss:$4 sm:$0xff] %v8505_v44  ;;  %v10513_v44 = vrot.slane %v8480_v29, 2 }
 0x399   : > { %2249 = vst [vmem:[#allocation1 + $0x23] ss:$4 sm:$0xff] %v2064_v39 }
 0x39a   : > { %10795 = vst [vmem:[#allocation121_spill] sm:$0xff] %v8513_v52  ;;  %v8518_v4 = vld.sshfl [vmem:[#allocation1] sm:$0xff pattern:$0x73625140] }
 0x39b   : > { %10796 = vst [vmem:[#allocation122_spill] sm:$0xff] %v8516_v8 }
 0x39c   : > { %10797 = vst [vmem:[#allocation123_spill] sm:$0xff] %v8521_v43 }
 0x39d   : > { %2608 = vst [vmem:[#allocation1] ss:$4 sm:$0xff] %v8513_v52  ;;  %v2478_v52 = vld [vmem:[#allocation2 + $0x4a] sm:$0x3] }
 0x39e   : > { %2609 = vst [vmem:[#allocation1 + $0x1] ss:$4 sm:$0xff] %v8516_v8  ;;  %v8535_v8 = vld [vmem:[#allocation2 + $0x52] sm:$0xff] }
 0x39f   : > { %2610 = vst [vmem:[#allocation1 + $0x2] ss:$4 sm:$0xff] %v8521_v43 }
 0x3a0   : > { %v8526_v39 = vld.sshfl [vmem:[#allocation1 + $0x20] sm:$0xff pattern:$0x73625140]  ;;  %2611 = vst [vmem:[#allocation1 + $0x3] ss:$4 sm:$0xff] %v2476_v3  ;;  %v8540_v3 = vrot.slane %v8535_v8, 2 }
 0x3a1   : > { %2589 = vst [vmem:[#allocation1 + $0x20] ss:$4 sm:$0xff] %v2470_v10  ;;  %v8543_v10 = vrot.slane %v8535_v8, 4 }
 0x3a2   : > { %2591 = vst [vmem:[#allocation1 + $0x21] ss:$4 sm:$0xff] %v8480_v29  ;;  %v8558_v29 = vld [vmem:[#allocation2 + $0x62] sm:$0xff] }
 0x3a3   : > { %2593 = vst [vmem:[#allocation1 + $0x22] ss:$4 sm:$0xff] %v10513_v44  ;;  %v8562_v18 = vrot.slane %v8558_v29, 4  ;;  %v8615_v33 = vrot.slane %v8558_v29, 2 }
 0x3a4   : > { %2595 = vst [vmem:[#allocation1 + $0x23] ss:$4 sm:$0xff] %v10512_v57  ;;  %v8551_v57 = vrot.slane %v8485_v51, 6 }
 0x3a5   : > { %10798 = vst [vmem:[#allocation124_spill] sm:$0xff] %v8535_v8 }
 0x3a6   : > { %10799 = vst [vmem:[#allocation125_spill] sm:$0xff] %v8540_v3 }
 0x3a7   : > { %v8537_v43 = vld.sshfl [vmem:[#allocation1] sm:$0xff pattern:$0x73625140]  ;;  %10800 = vst [vmem:[#allocation126_spill] sm:$0xff] %v8543_v10 }
 0x3a8   : > { %2618 = vst [vmem:[#allocation1] ss:$4 sm:$0xff] %v2478_v52  ;;  %v2474_v52 = vld [vmem:[#allocation2 + $0x2a] sm:$0x3] }
 0x3a9   : > { %2619 = vst [vmem:[#allocation1 + $0x1] ss:$4 sm:$0xff] %v8535_v8 }
 0x3aa   : > { %10801 = vst [vmem:[#allocation127_spill] sm:$0xff] %v8547_v25 }
 0x3ab   : > { %2620 = vst [vmem:[#allocation1 + $0x2] ss:$4 sm:$0xff] %v8540_v3  ;;  %v8553_v44 = vld.sshfl [vmem:[#allocation1 + $0x20] sm:$0xff pattern:$0x73625140]  ;;  %v8565_v3 = vrot.slane %v8558_v29, 6 }
 0x3ac   : > { %10802 = vst [vmem:[#allocation128_spill] sm:$0xff] %v8551_v57 }
 0x3ad   : > { %2621 = vst [vmem:[#allocation1 + $0x3] ss:$4 sm:$0xff] %v8543_v10  ;;  %v2482_v10 = vld [vmem:[#allocation2 + $0x6a] sm:$0x3] }
 0x3ae   : > { %2602 = vst [vmem:[#allocation1 + $0x20] ss:$4 sm:$0xff] %v8547_v25  ;;  %v8573_v25 = vld [vmem:[#allocation2 + $0x72] sm:$0xff] }
 0x3af   : > { %2603 = vst [vmem:[#allocation1 + $0x21] ss:$4 sm:$0xff] %v8551_v57  ;;  %v8582_v57 = vrot.slane %v8569_v54, 4 }
 0x3b0   : > { %10803 = vst [vmem:[#allocation129_spill] sm:$0xff] %v8558_v29 }
 0x3b1   : > { %2604 = vst [vmem:[#allocation1 + $0x22] ss:$4 sm:$0xff] %v2474_v52  ;;  %v8576_v52 = vrot.slane %v8569_v54, 2 }
 0x3b2   : > { %2605 = vst [vmem:[#allocation1 + $0x23] ss:$4 sm:$0xff] %v8509_v53 }
 0x3b3   : > { %10804 = vst [vmem:[#allocation130_spill] sm:$0xff] %v8562_v18 }
 0x3b4   : > { %10805 = vst [vmem:[#allocation131_spill] sm:$0xff] %v8565_v3  ;;  %v8567_v51 = vld.sshfl [vmem:[#allocation1] sm:$0xff pattern:$0x73625140] }
 0x3b5   : > { %10806 = vst [vmem:[#allocation132_spill] sm:$0xff] %v8569_v54 }
 0x3b6   : > { %2628 = vst [vmem:[#allocation1] ss:$4 sm:$0xff] %v8562_v18  ;;  %v8586_v18 = vrot.slane %v8569_v54, 6 }
 0x3b7   : > { %2629 = vst [vmem:[#allocation1 + $0x1] ss:$4 sm:$0xff] %v8565_v3 }
 0x3b8   : > { %10807 = vst [vmem:[#allocation133_spill] sm:$0xff] %v8573_v25 }
 0x3b9   : > { %2630 = vst [vmem:[#allocation1 + $0x2] ss:$4 sm:$0xff] %v2482_v10  ;;  %v8578_v53 = vld.sshfl [vmem:[#allocation1 + $0x20] sm:$0xff pattern:$0x73625140]  ;;  %v8590_v10 = vld [vmem:[#allocation2 + $0x82] sm:$0xff] }
 0x3ba   : > { %10808 = vst [vmem:[#allocation134_spill] sm:$0xff] %v8576_v52  ;;  %v8594_v3 = vrot.slane %v8590_v10, 2  ;;  %v8599_v23 = vrot.slane %v8590_v10, 4 }
 0x3bb   : > { %2631 = vst [vmem:[#allocation1 + $0x3] ss:$4 sm:$0xff] %v8573_v25 }
 0x3bc   : > { %10809 = vst [vmem:[#allocation135_spill] sm:$0xff] %v8582_v57 }
 0x3bd   : > { %2612 = vst [vmem:[#allocation1 + $0x20] ss:$4 sm:$0xff] %v8569_v54  ;;  %v8603_v54 = vrot.slane %v8590_v10, 6 }
 0x3be   : > { %10810 = vst [vmem:[#allocation136_spill] sm:$0xff] %v8586_v18 }
 0x3bf   : > { %2613 = vst [vmem:[#allocation1 + $0x21] ss:$4 sm:$0xff] %v8576_v52  ;;  %v2480_v52 = vld [vmem:[#allocation2 + $0x5a] sm:$0x3] }
 0x3c0   : > { %2614 = vst [vmem:[#allocation1 + $0x22] ss:$4 sm:$0xff] %v8582_v57  ;;  %v8607_v57 = vrot.slane %v8535_v8, 6 }
 0x3c1   : > { %10811 = vst [vmem:[#allocation137_spill] sm:$0xff] %v8590_v10 }
 0x3c2   : > { %2615 = vst [vmem:[#allocation1 + $0x23] ss:$4 sm:$0xff] %v8586_v18  ;;  %v8596_v61 = vld.sshfl [vmem:[#allocation1] sm:$0xff pattern:$0x73625140] }
 0x3c3   : > { %10812 = vst [vmem:[#allocation138_spill] sm:$0xff] %v8594_v3 }
 0x3c4   : > { %10813 = vst [vmem:[#allocation139_spill] sm:$0xff] %v8596_v61  ;;  %v2316_v61 = vsel %vm2314_vm8, %v6172_v48, 0  ;;  %v2486_v48 = vld [vmem:[#allocation2 + $0x8a] sm:$0x3] }
 0x3c5   : > { %10814 = vst [vmem:[#allocation140_spill] sm:$0xff] %v8599_v23  ;;  %2325 = vmatpush.bf16.msra.mxu0 %v2316_v61  ;;  %v2492_v61 = vld [vmem:[#allocation2 + $0xba] sm:$0x3] }
 0x3c6   : > { %2638 = vst [vmem:[#allocation1] ss:$4 sm:$0xff] %v8590_v10  ;;  %v8617_v10 = vld [vmem:[#allocation2 + $0x92] sm:$0xff] }
 0x3c7   : > { %10815 = vst [vmem:[#allocation141_spill] sm:$0xff] %v8603_v54 }
 0x3c8   : > { %2639 = vst [vmem:[#allocation1 + $0x1] ss:$4 sm:$0xff] %v8594_v3  ;;  %v8622_v3 = vrot.slane %v8617_v10, 6 }
 0x3c9   : > { %10816 = vst [vmem:[#allocation142_spill] sm:$0xff] %v8607_v57  ;;  %v8610_v18 = vld.sshfl [vmem:[#allocation1 + $0x20] sm:$0xff pattern:$0x73625140] }
 0x3ca   : > { %2640 = vst [vmem:[#allocation1 + $0x2] ss:$4 sm:$0xff] %v8599_v23  ;;  %v8624_v23 = vld [vmem:[#allocation2 + $0xa2] sm:$0xff] }
 0x3cb   : > { %2641 = vst [vmem:[#allocation1 + $0x3] ss:$4 sm:$0xff] %v8603_v54  ;;  %v2488_v54 = vld [vmem:[#allocation2 + $0x9a] sm:$0x3] }
 0x3cc   : > { %2622 = vst [vmem:[#allocation1 + $0x20] ss:$4 sm:$0xff] %v8607_v57  ;;  %v8630_v57 = vrot.slane %v8624_v23, 2 }
 0x3cd   : > { %10817 = vst [vmem:[#allocation143_spill] sm:$0xff] %v8615_v33 }
 0x3ce   : > { %2623 = vst [vmem:[#allocation1 + $0x21] ss:$4 sm:$0xff] %v2480_v52  ;;  %v8633_v52 = vrot.slane %v8573_v25, 2 }
 0x3cf   : > { %10818 = vst [vmem:[#allocation144_spill] sm:$0xff] %v8617_v10 }
 0x3d0   : > { %2624 = vst [vmem:[#allocation1 + $0x22] ss:$4 sm:$0xff] %v8558_v29 }
 0x3d1   : > { %2625 = vst [vmem:[#allocation1 + $0x23] ss:$4 sm:$0xff] %v8615_v33  ;;  %v8637_v33 = vrot.slane %v8573_v25, 4 }
 0x3d2   : > { %10819 = vst [vmem:[#allocation145_spill] sm:$0xff] %v8622_v3  ;;  %v8626_v8 = vld.sshfl [vmem:[#allocation1] sm:$0xff pattern:$0x73625140] }
 0x3d3   : > { %10820 = vst [vmem:[#allocation146_spill] sm:$0xff] %v8624_v23 }
 0x3d4   : > { %10821 = vst [vmem:[#allocation147_spill] sm:$0xff] %v8626_v8  ;;  %v8643_v8 = vrot.slane %v8573_v25, 6 }
 0x3d5   : > { %2648 = vst [vmem:[#allocation1] ss:$4 sm:$0xff] %v8622_v3  ;;  %v2484_v3 = vld [vmem:[#allocation2 + $0x7a] sm:$0x3] }
 0x3d6   : > { %10822 = vst [vmem:[#allocation148_spill] sm:$0xff] %v8630_v57 }
 0x3d7   : > { %2649 = vst [vmem:[#allocation1 + $0x1] ss:$4 sm:$0xff] %v2488_v54  ;;  %v8647_v54 = vld [vmem:[#allocation2 + $0xb2] sm:$0xff] }
 0x3d8   : > { %10823 = vst [vmem:[#allocation149_spill] sm:$0xff] %v8633_v52  ;;  %v8639_v29 = vld.sshfl [vmem:[#allocation1 + $0x20] sm:$0xff pattern:$0x73625140]  ;;  %v8660_v25 = vrot.slane %v8647_v54, 4 }
 0x3d9   : > { %2650 = vst [vmem:[#allocation1 + $0x2] ss:$4 sm:$0xff] %v8624_v23 }
 0x3da   : > { %10824 = vst [vmem:[#allocation150_spill] sm:$0xff] %v8637_v33 }
 0x3db   : > { %2651 = vst [vmem:[#allocation1 + $0x3] ss:$4 sm:$0xff] %v8630_v57  ;;  %v8655_v57 = vrot.slane %v8647_v54, 2 }
 0x3dc   : > { %10825 = vst [vmem:[#allocation151_spill] sm:$0xff] %v8643_v8 }
 0x3dd   : > { %2632 = vst [vmem:[#allocation1 + $0x20] ss:$4 sm:$0xff] %v8633_v52  ;;  %v2272_v52 = vpack.c.bf16 %v8269_v60, %v8216_v2  ;;  %v8674_v2 = vrot.slane %v8617_v10, 2  ;;  %v8677_v60 = vrot.slane %v8617_v10, 4 }
 0x3de   : > { %2633 = vst [vmem:[#allocation1 + $0x21] ss:$4 sm:$0xff] %v8637_v33 }
 0x3df   : > { %10826 = vst [vmem:[#allocation152_spill] sm:$0xff] %v8647_v54  ;;  %6173 = vmatmul.msk.bf16.vlgmr.msra.gmra.mxu0 %vm1743_vm0, %v2272_v52  ;;  %v8682_v52 = vld [vmem:[#allocation2 + $0xd2] sm:$0xff] }
 0x3e0   : > { %2634 = vst [vmem:[#allocation1 + $0x22] ss:$4 sm:$0xff] %v8643_v8  ;;  %v8665_v8 = vrot.slane %v8647_v54, 6 }
 0x3e1   : > { %2635 = vst [vmem:[#allocation1 + $0x23] ss:$4 sm:$0xff] %v2484_v3 }
 0x3e2   : > { %10827 = vst [vmem:[#allocation153_spill] sm:$0xff] %v8655_v57  ;;  %v8662_v33 = vld.sshfl [vmem:[#allocation1] sm:$0xff pattern:$0x73625140] }
 0x3e3   : > { %10828 = vst [vmem:[#allocation154_spill] sm:$0xff] %v8660_v25 }
 0x3e4   : > { %10829 = vst [vmem:[#allocation155_spill] sm:$0xff] %v8665_v8 }
 0x3e5   : > { %2658 = vst [vmem:[#allocation1] ss:$4 sm:$0xff] %v8655_v57  ;;  %v8694_v57 = vrot.slane %v8624_v23, 4 }
 0x3e6   : > { %2659 = vst [vmem:[#allocation1 + $0x1] ss:$4 sm:$0xff] %v8660_v25  ;;  %v2494_v25 = vld [vmem:[#allocation2 + $0xca] sm:$0x3] }
 0x3e7   : > { %2660 = vst [vmem:[#allocation1 + $0x2] ss:$4 sm:$0xff] %v8665_v8 }
 0x3e8   : > { %v8671_v3 = vld.sshfl [vmem:[#allocation1 + $0x20] sm:$0xff pattern:$0x73625140]  ;;  %2661 = vst [vmem:[#allocation1 + $0x3] ss:$4 sm:$0xff] %v2492_v61  ;;  %v8687_v61 = vrot.slane %v8682_v52, 2 }
 0x3e9   : > { %10830 = vst [vmem:[#allocation156_spill] sm:$0xff] %v8674_v2 }
 0x3ea   : > { %2642 = vst [vmem:[#allocation1 + $0x20] ss:$4 sm:$0xff] %v2486_v48  ;;  %v8690_v48 = vrot.slane %v8682_v52, 4 }
 0x3eb   : > { %10831 = vst [vmem:[#allocation157_spill] sm:$0xff] %v8677_v60 }
 0x3ec   : > { %2643 = vst [vmem:[#allocation1 + $0x21] ss:$4 sm:$0xff] %v8617_v10  ;;  %v2490_v10 = vld [vmem:[#allocation2 + $0xaa] sm:$0x3] }
 0x3ed   : > { %2644 = vst [vmem:[#allocation1 + $0x22] ss:$4 sm:$0xff] %v8674_v2 }
 0x3ee   : > { %2645 = vst [vmem:[#allocation1 + $0x23] ss:$4 sm:$0xff] %v8677_v60  ;;  %v8698_v60 = vrot.slane %v8624_v23, 6 }
 0x3ef   : > { %v8684_v8 = vld.sshfl [vmem:[#allocation1] sm:$0xff pattern:$0x73625140]  ;;  %10833 = vst [vmem:[#allocation159_spill] sm:$0xff] %v8687_v61 }
 0x3f0   : > { %10832 = vst [vmem:[#allocation158_spill] sm:$0xff] %v8684_v8  ;;  %v8708_v8 = vld [vmem:[#allocation2 + $0xe2] sm:$0xff] }
 0x3f1   : > { %2668 = vst [vmem:[#allocation1] ss:$4 sm:$0xff] %v2494_v25  ;;  %v2273_v25 = vpack.c.bf16 %v8294_v0, %v8233_v49  ;;  %v8719_v49 = vld [vmem:[#allocation2 + $0xc2] sm:$0xff]  ;;  %v2498_v0 = vld [vmem:[#allocation2 + $0xea] sm:$0x3] }
 0x3f2   : > { %10834 = vst [vmem:[#allocation160_spill] sm:$0xff] %v8690_v48 }
 0x3f3   : > { %2669 = vst [vmem:[#allocation1 + $0x1] ss:$4 sm:$0xff] %v8682_v52  ;;  %6174 = vmatmul.msk.bf16.gmra.mxu0 %vm1743_vm0, %v2273_v25  ;;  %v8723_v25 = vld [vmem:[#allocation2 + $0xf2] sm:$0xff] }
 0x3f4   : > { %10835 = vst [vmem:[#allocation161_spill] sm:$0xff] %v8694_v57 }
 0x3f5   : > { %2670 = vst [vmem:[#allocation1 + $0x2] ss:$4 sm:$0xff] %v8687_v61  ;;  %v8700_v2 = vld.sshfl [vmem:[#allocation1 + $0x20] sm:$0xff pattern:$0x73625140]  ;;  %v8712_v61 = vrot.slane %v8708_v8, 4 }
 0x3f6   : > { %10836 = vst [vmem:[#allocation162_spill] sm:$0xff] %v8698_v60 }
 0x3f7   : > { %2671 = vst [vmem:[#allocation1 + $0x3] ss:$4 sm:$0xff] %v8690_v48  ;;  %v8715_v48 = vrot.slane %v8708_v8, 6 }
 0x3f8   : > { %2652 = vst [vmem:[#allocation1 + $0x20] ss:$4 sm:$0xff] %v8694_v57 }
 0x3f9   : > { %2653 = vst [vmem:[#allocation1 + $0x21] ss:$4 sm:$0xff] %v8698_v60  ;;  %v10845_v60 = vrot.slane %v7193_v22, 2 }
 0x3fa   : > { %10837 = vst [vmem:[#allocation163_spill] sm:$0xff] %v8708_v8 }
 0x3fb   : > { %2654 = vst [vmem:[#allocation1 + $0x22] ss:$4 sm:$0xff] %v2490_v10  ;;  %v8726_v10 = vrot.slane %v8719_v49, 2 }
 0x3fc   : > { %2655 = vst [vmem:[#allocation1 + $0x23] ss:$4 sm:$0xff] %v8647_v54  ;;  %v8732_v54 = vrot.slane %v8719_v49, 4 }
 0x3fd   : > { %10838 = vst [vmem:[#allocation164_spill] sm:$0xff] %v8712_v61 }
 0x3fe   : > { %10839 = vst [vmem:[#allocation165_spill] sm:$0xff] %v8715_v48  ;;  %v8717_v23 = vld.sshfl [vmem:[#allocation1] sm:$0xff pattern:$0x73625140] }
 0x3ff   : > { %10840 = vst [vmem:[#allocation166_spill] sm:$0xff] %v8719_v49 }
 0x400   : > { %2678 = vst [vmem:[#allocation1] ss:$4 sm:$0xff] %v8712_v61  ;;  %v8736_v61 = vrot.slane %v8719_v49, 6 }
 0x401   : > { %2679 = vst [vmem:[#allocation1 + $0x1] ss:$4 sm:$0xff] %v8715_v48 }
 0x402   : > { %10841 = vst [vmem:[#allocation167_spill] sm:$0xff] %v8723_v25 }
 0x403   : > { %2680 = vst [vmem:[#allocation1 + $0x2] ss:$4 sm:$0xff] %v2498_v0  ;;  %v8728_v57 = vld.sshfl [vmem:[#allocation1 + $0x20] sm:$0xff pattern:$0x73625140]  ;;  %v2274_v0 = vpack.c.bf16 %v8326_v30, %v8252_v16  ;;  %v8760_v30 = vrot.slane %v8708_v8, 2 }
 0x404   : > { %10842 = vst [vmem:[#allocation168_spill] sm:$0xff] %v8726_v10  ;;  %v2496_v16 = vld [vmem:[#allocation2 + $0xda] sm:$0x3] }
 0x405   : > { %2681 = vst [vmem:[#allocation1 + $0x3] ss:$4 sm:$0xff] %v8723_v25  ;;  %6175 = vmatmul.msk.bf16.gmra.mxu0 %vm1743_vm0, %v2274_v0  ;;  %v2835_v0 = vld [vmem:[#allocation2 + $0x28] sm:$0x3] }
 0x406   : > { %10843 = vst [vmem:[#allocation169_spill] sm:$0xff] %v8732_v54 }
 0x407   : > { %2662 = vst [vmem:[#allocation1 + $0x20] ss:$4 sm:$0xff] %v8719_v49  ;;  %v8750_v49 = vrot.slane %v8682_v52, 6 }
 0x408   : > { %10844 = vst [vmem:[#allocation170_spill] sm:$0xff] %v8736_v61 }
 0x409   : > { %2663 = vst [vmem:[#allocation1 + $0x21] ss:$4 sm:$0xff] %v8726_v10  ;;  %v10847_v10 = vrot.slane %v7193_v22, 4 }
 0x40a   : > { %2664 = vst [vmem:[#allocation1 + $0x22] ss:$4 sm:$0xff] %v8732_v54 }
 0x40b   : > { %2665 = vst [vmem:[#allocation1 + $0x23] ss:$4 sm:$0xff] %v8736_v61  ;;  %v10848_v61 = vrot.slane %v7193_v22, 6 }
 0x40c   : > { %v8743_v48 = vld.sshfl [vmem:[#allocation1] sm:$0xff pattern:$0x73625140]  ;;  %10846 = vst [vmem:[#allocation171_spill] sm:$0xff] %v8750_v49 }
 0x40d   : > { %2944 = vst [vmem:[#allocation1] ss:$4 sm:$0xff] %v7193_v22  ;;  %v8768_v22 = vrot.slane %v8723_v25, 2 }
 0x40e   : > { %2946 = vst [vmem:[#allocation1 + $0x1] ss:$4 sm:$0xff] %v10845_v60 }
 0x40f   : > { %2948 = vst [vmem:[#allocation1 + $0x2] ss:$4 sm:$0xff] %v10847_v10  ;;  %v8774_v10 = vrot.slane %v8723_v25, 4 }
 0x410   : > { %2950 = vst [vmem:[#allocation1 + $0x3] ss:$4 sm:$0xff] %v10848_v61  ;;  %v2275_v61 = vpack.c.bf16 %v8355_v62, %v8282_v1  ;;  %v2833_v1 = vld [vmem:[#allocation2 + $0x18] sm:$0x3] }
 0x411   : > { %10849 = vst [vmem:[#allocation172_spill] sm:$0xff] %v8760_v30 }
 0x412   : > { %v8754_v54 = vld.sshfl [vmem:[#allocation1 + $0x20] sm:$0xff pattern:$0x73625140]  ;;  %10850 = vst [vmem:[#allocation173_spill] sm:$0xff] %v8768_v22 }
 0x413   : > { %2672 = vst [vmem:[#allocation1 + $0x20] ss:$4 sm:$0xff] %v8750_v49  ;;  %v8780_v49 = vrot.slane %v8723_v25, 6  ;;  %v10855_v25 = vld [vmem:[#allocation18_spill] sm:$0xff] }
 0x414   : > { %2673 = vst [vmem:[#allocation1 + $0x21] ss:$4 sm:$0xff] %v2496_v16 }
 0x415   : > { %2674 = vst [vmem:[#allocation1 + $0x22] ss:$4 sm:$0xff] %v8708_v8  ;;  %6176 = vmatmul.msk.bf16.gmra.mxu0 %vm1743_vm0, %v2275_v61  ;;  %v2276_v61 = vpack.c.bf16 %v8384_v46, %v8311_v31  ;;  %v10856_v31 = vld [vmem:[#allocation20_spill] sm:$0xff]  ;;  %v6193_v46 = vld [vmem:[%s10310_s3 + $0x2] sm:$0x1] }
 0x416   : > { %2675 = vst [vmem:[#allocation1 + $0x23] ss:$4 sm:$0xff] %v8760_v30 }
 0x417   : > { %v8764_v60 = vld.sshfl [vmem:[#allocation1] sm:$0xff pattern:$0x73625140]  ;;  %10851 = vst [vmem:[#allocation174_spill] sm:$0xff] %v8780_v49 }
 0x418   : > { %2961 = vst [vmem:[#allocation1] ss:$4 sm:$0xff] %v7238_v42 }
 0x419   : > { %2962 = vst [vmem:[#allocation1 + $0x1] ss:$4 sm:$0xff] %v2835_v0  ;;  %v2500_v0 = vld [vmem:[#allocation2 + $0xfa] sm:$0x3] }
 0x41a   : > { %2963 = vst [vmem:[#allocation1 + $0x2] ss:$4 sm:$0xff] %v7220_v17 }
 0x41b   : > { %2964 = vst [vmem:[#allocation1 + $0x3] ss:$4 sm:$0xff] %v7231_v55  ;;  %v2839_v55 = vld [vmem:[#allocation2 + $0x48] sm:$0x3] }
 0x41d   : > { %v8776_v16 = vld.sshfl [vmem:[#allocation1 + $0x20] sm:$0xff pattern:$0x73625140] }
 0x41e   : > { %2682 = vst [vmem:[#allocation1 + $0x20] ss:$4 sm:$0xff] %v8768_v22  ;;  %v2837_v22 = vld [vmem:[#allocation2 + $0x38] sm:$0x3] }
 0x41f   : > { %2683 = vst [vmem:[#allocation1 + $0x21] ss:$4 sm:$0xff] %v8774_v10 }
 0x420   : > { %2684 = vst [vmem:[#allocation1 + $0x22] ss:$4 sm:$0xff] %v8780_v49 }
 0x421   : > { %2685 = vst [vmem:[#allocation1 + $0x23] ss:$4 sm:$0xff] %v2500_v0  ;;  %v2841_v0 = vld [vmem:[#allocation2 + $0x58] sm:$0x3] }
 0x422   : > { %v8786_v62 = vld.sshfl [vmem:[#allocation1] sm:$0xff pattern:$0x73625140] }
 0x423   : > { %2971 = vst [vmem:[#allocation1] ss:$4 sm:$0xff] %v7307_v32  ;;  %v10854_v32 = vld [vmem:[#allocation19_spill] sm:$0xff] }
 0x424   : > { %2972 = vst [vmem:[#allocation1 + $0x1] ss:$4 sm:$0xff] %v7310_v13 }
 0x425   : > { %2973 = vst [vmem:[#allocation1 + $0x2] ss:$4 sm:$0xff] %v7313_v45  ;;  %6177 = vmatmul.msk.bf16.gmra.mxu0 %vm1743_vm0, %v2276_v61  ;;  %v10852_v45 = vld [vmem:[#allocation29_spill] sm:$0xff] }
 0x426   : > { %2974 = vst [vmem:[#allocation1 + $0x3] ss:$4 sm:$0xff] %v2839_v55 }
 0x428   : > { %v8791_v17 = vld.sshfl [vmem:[#allocation1 + $0x20] sm:$0xff pattern:$0x73625140] }
 0x429   : > { %2952 = vst [vmem:[#allocation1 + $0x20] ss:$4 sm:$0xff] %v2833_v1  ;;  %v10853_v1 = vld [vmem:[#allocation30_spill] sm:$0xff] }
 0x42a   : > { %2954 = vst [vmem:[#allocation1 + $0x21] ss:$4 sm:$0xff] %v7179_v36 }
 0x42b   : > { %2956 = vst [vmem:[#allocation1 + $0x22] ss:$4 sm:$0xff] %v7182_v12 }
 0x42c   : > { %2958 = vst [vmem:[#allocation1 + $0x23] ss:$4 sm:$0xff] %v7255_v26 }
 0x42d   : > { %v8799_v13 = vld.sshfl [vmem:[#allocation1] sm:$0xff pattern:$0x73625140] }
 0x42e   : > { %2981 = vst [vmem:[#allocation1] ss:$4 sm:$0xff] %v2841_v0  ;;  %v2751_v0 = vsel %vm2314_vm8, %v6193_v46, 0  ;;  %v10860_v46 = vld [vmem:[#allocation24_spill] sm:$0xff] }
 0x42f   : > { %2982 = vst [vmem:[#allocation1 + $0x1] ss:$4 sm:$0xff] %v7424_v47  ;;  %2760 = vmatpush.bf16.msra.mxu2 %v2751_v0  ;;  %v10858_v47 = vld [vmem:[#allocation34_spill] sm:$0xff]  ;;  %v10861_v0 = vld [vmem:[#allocation25_spill] sm:$0xff] }
 0x430   : > { %2983 = vst [vmem:[#allocation1 + $0x2] ss:$4 sm:$0xff] %v10852_v45  ;;  %v10857_v45 = vld [vmem:[#allocation33_spill] sm:$0xff] }
 0x431   : > { %2984 = vst [vmem:[#allocation1 + $0x3] ss:$4 sm:$0xff] %v10853_v1  ;;  %v2845_v1 = vld [vmem:[#allocation2 + $0x78] sm:$0x3] }
 0x433   : > { %v8803_v55 = vld.sshfl [vmem:[#allocation1 + $0x20] sm:$0xff pattern:$0x73625140] }
 0x434   : > { %2965 = vst [vmem:[#allocation1 + $0x20] ss:$4 sm:$0xff] %v10854_v32  ;;  %v2277_v32 = vpack.c.bf16 %v8426_v63, %v8341_v19  ;;  %v10864_v63 = vld [vmem:[#allocation12_spill] sm:$0xff] }
 0x435   : > { %2966 = vst [vmem:[#allocation1 + $0x21] ss:$4 sm:$0xff] %v10855_v25  ;;  %v10859_v25 = vld [vmem:[#allocation14_spill] sm:$0xff] }
 0x436   : > { %2967 = vst [vmem:[#allocation1 + $0x22] ss:$4 sm:$0xff] %v2837_v22  ;;  %v2708_v22 = vpack.c.bf16 %v8553_v44, %v8487_v38  ;;  %6178 = vmatmul.msk.bf16.gmra.mxu0 %vm1743_vm0, %v2277_v32  ;;  %v10865_v44 = vld [vmem:[#allocation37_spill] sm:$0xff]  ;;  %v10866_v38 = vld [vmem:[#allocation38_spill] sm:$0xff]  ;;  %v10867_v32 = vld [vmem:[#allocation39_spill] sm:$0xff] }
 0x437   : > { %2968 = vst [vmem:[#allocation1 + $0x23] ss:$4 sm:$0xff] %v10856_v31 }
 0x438   : > { %v8812_v61 = vld.sshfl [vmem:[#allocation1] sm:$0xff pattern:$0x73625140]  ;;  %6194 = vmatmul.msk.bf16.vlgmr.msra.gmra.mxu2 %vm1743_vm0, %v2708_v22  ;;  %v2843_v22 = vld [vmem:[#allocation2 + $0x68] sm:$0x3] }
 0x439   : > { %2991 = vst [vmem:[#allocation1] ss:$4 sm:$0xff] %v10857_v45  ;;  %v10863_v45 = vld [vmem:[#allocation27_spill] sm:$0xff] }
 0x43a   : > { %2992 = vst [vmem:[#allocation1 + $0x1] ss:$4 sm:$0xff] %v10858_v47  ;;  %v10862_v47 = vld [vmem:[#allocation26_spill] sm:$0xff] }
 0x43b   : > { %2993 = vst [vmem:[#allocation1 + $0x2] ss:$4 sm:$0xff] %v2845_v1 }
 0x43c   : > { %2994 = vst [vmem:[#allocation1 + $0x3] ss:$4 sm:$0xff] %v10859_v25  ;;  %v10868_v25 = vld [vmem:[#allocation31_spill] sm:$0xff] }
 0x43e   : > { %v8821_v31 = vld.sshfl [vmem:[#allocation1 + $0x20] sm:$0xff pattern:$0x73625140] }
 0x43f   : > { %2975 = vst [vmem:[#allocation1 + $0x20] ss:$4 sm:$0xff] %v10860_v46  ;;  %v10869_v46 = vld [vmem:[#allocation10_spill] sm:$0xff] }
 0x440   : > { %2976 = vst [vmem:[#allocation1 + $0x21] ss:$4 sm:$0xff] %v10861_v0 }
 0x441   : > { %2977 = vst [vmem:[#allocation1 + $0x22] ss:$4 sm:$0xff] %v10862_v47  ;;  %v10870_v47 = vld [vmem:[#allocation32_spill] sm:$0xff] }
 0x442   : > { %2978 = vst [vmem:[#allocation1 + $0x23] ss:$4 sm:$0xff] %v10863_v45  ;;  %v2278_v45 = vpack.c.bf16 %v8456_v35, %v8375_v9  ;;  %v10872_v9 = vld [vmem:[#allocation11_spill] sm:$0xff] }
 0x443   : > { %v8830_v19 = vld.sshfl [vmem:[#allocation1] sm:$0xff pattern:$0x73625140]  ;;  %v2847_v35 = vld [vmem:[#allocation2 + $0x88] sm:$0x3] }
 0x444   : > { %3001 = vst [vmem:[#allocation1] ss:$4 sm:$0xff] %v10864_v63  ;;  %v2709_v63 = vpack.c.bf16 %v8578_v53, %v8518_v4  ;;  %v10873_v4 = vld [vmem:[#allocation35_spill] sm:$0xff] }
 0x445   : > { %3002 = vst [vmem:[#allocation1 + $0x1] ss:$4 sm:$0xff] %v10865_v44  ;;  %v10871_v44 = vld [vmem:[#allocation42_spill] sm:$0xff] }
 0x446   : > { %3003 = vst [vmem:[#allocation1 + $0x2] ss:$4 sm:$0xff] %v10866_v38  ;;  %6179 = vmatmul.msk.bf16.gmra.mxu0 %vm1743_vm0, %v2278_v45  ;;  %v10874_v45 = vld [vmem:[#allocation36_spill] sm:$0xff] }
 0x447   : > { %3004 = vst [vmem:[#allocation1 + $0x3] ss:$4 sm:$0xff] %v10867_v32  ;;  %v2851_v32 = vld [vmem:[#allocation2 + $0xa8] sm:$0x3] }
 0x448   : > { %6195 = vmatmul.msk.bf16.gmra.mxu2 %vm1743_vm0, %v2709_v63  ;;  %v2279_v63 = vpack.c.bf16 %v8474_v15, %v8409_v6  ;;  %v10876_v6 = vld [vmem:[#allocation40_spill] sm:$0xff]  ;;  %v10877_v15 = vld [vmem:[#allocation41_spill] sm:$0xff] }
 0x449   : > { %v8835_v1 = vld.sshfl [vmem:[#allocation1 + $0x20] sm:$0xff pattern:$0x73625140] }
 0x44a   : > { %2985 = vst [vmem:[#allocation1 + $0x20] ss:$4 sm:$0xff] %v10868_v25 }
 0x44b   : > { %2986 = vst [vmem:[#allocation1 + $0x21] ss:$4 sm:$0xff] %v2843_v22 }
 0x44c   : > { %2987 = vst [vmem:[#allocation1 + $0x22] ss:$4 sm:$0xff] %v10869_v46 }
 0x44d   : > { %2988 = vst [vmem:[#allocation1 + $0x23] ss:$4 sm:$0xff] %v10870_v47 }
 0x44e   : > { %v8847_v38 = vld.sshfl [vmem:[#allocation1] sm:$0xff pattern:$0x73625140] }
 0x44f   : > { %3011 = vst [vmem:[#allocation1] ss:$4 sm:$0xff] %v10871_v44 }
 0x450   : > { %3012 = vst [vmem:[#allocation1 + $0x1] ss:$4 sm:$0xff] %v2851_v32  ;;  %v2710_v32 = vpack.c.bf16 %v8610_v18, %v8537_v43  ;;  %v2857_v18 = vld [vmem:[#allocation2 + $0xd8] sm:$0x3] }
 0x451   : > { %3013 = vst [vmem:[#allocation1 + $0x2] ss:$4 sm:$0xff] %v7924_v56  ;;  %v2855_v56 = vld [vmem:[#allocation2 + $0xc8] sm:$0x3] }
 0x452   : > { %3014 = vst [vmem:[#allocation1 + $0x3] ss:$4 sm:$0xff] %v7932_v24  ;;  %v2849_v24 = vld [vmem:[#allocation2 + $0x98] sm:$0x3] }
 0x454   : > { %v8851_v22 = vld.sshfl [vmem:[#allocation1 + $0x20] sm:$0xff pattern:$0x73625140] }
 0x455   : > { %2995 = vst [vmem:[#allocation1 + $0x20] ss:$4 sm:$0xff] %v10872_v9 }
 0x456   : > { %2996 = vst [vmem:[#allocation1 + $0x21] ss:$4 sm:$0xff] %v10873_v4  ;;  %6180 = vmatmul.msk.bf16.gmra.mxu0 %vm1743_vm0, %v2279_v63 }
 0x457   : > { %2997 = vst [vmem:[#allocation1 + $0x22] ss:$4 sm:$0xff] %v10874_v45 }
 0x458   : > { %2998 = vst [vmem:[#allocation1 + $0x23] ss:$4 sm:$0xff] %v2847_v35  ;;  %6196 = vmatmul.msk.bf16.gmra.mxu2 %vm1743_vm0, %v2710_v32  ;;  %v2711_v32 = vpack.c.bf16 %v8639_v29, %v8567_v51  ;;  %v10879_v29 = vld [vmem:[#allocation50_spill] sm:$0xff]  ;;  %v10881_v51 = vld [vmem:[#allocation49_spill] sm:$0xff] }
 0x459   : > { %v8857_v53 = vld.sshfl [vmem:[#allocation1] sm:$0xff pattern:$0x73625140] }
 0x45a   : > { %3021 = vst [vmem:[#allocation1] ss:$4 sm:$0xff] %v7960_v59  ;;  %v10875_v59 = vld [vmem:[#allocation13_spill] sm:$0xff] }
 0x45b   : > { %3022 = vst [vmem:[#allocation1 + $0x1] ss:$4 sm:$0xff] %v7963_v20 }
 0x45c   : > { %3023 = vst [vmem:[#allocation1 + $0x2] ss:$4 sm:$0xff] %v7966_v5 }
 0x45d   : > { %3024 = vst [vmem:[#allocation1 + $0x3] ss:$4 sm:$0xff] %v2855_v56  ;;  %v2853_v56 = vld [vmem:[#allocation2 + $0xb8] sm:$0x3] }
 0x45f   : > { %v8868_v35 = vld.sshfl [vmem:[#allocation1 + $0x20] sm:$0xff pattern:$0x73625140] }
 0x460   : > { %3005 = vst [vmem:[#allocation1 + $0x20] ss:$4 sm:$0xff] %v2849_v24  ;;  %v2280_v24 = vpack.c.bf16 %v8501_v37, %v8445_v11  ;;  %v10880_v11 = vld [vmem:[#allocation51_spill] sm:$0xff] }
 0x461   : > { %3006 = vst [vmem:[#allocation1 + $0x21] ss:$4 sm:$0xff] %v10875_v59 }
 0x462   : > { %3007 = vst [vmem:[#allocation1 + $0x22] ss:$4 sm:$0xff] %v10876_v6 }
 0x463   : > { %3008 = vst [vmem:[#allocation1 + $0x23] ss:$4 sm:$0xff] %v10877_v15 }
 0x464   : > { %v8873_v43 = vld.sshfl [vmem:[#allocation1] sm:$0xff pattern:$0x73625140] }
 0x465   : > { %3031 = vst [vmem:[#allocation1] ss:$4 sm:$0xff] %v2857_v18  ;;  %v2861_v18 = vld [vmem:[#allocation2 + $0xf8] sm:$0x3] }
 0x466   : > { %3032 = vst [vmem:[#allocation1 + $0x1] ss:$4 sm:$0xff] %v8076_v50  ;;  %6181 = vmatmul.msk.bf16.gmra.mxu0 %vm1743_vm0, %v2280_v24  ;;  %v2281_v24 = vpack.c.bf16 %v8526_v39, %v8469_v27  ;;  %v2859_v27 = vld [vmem:[#allocation2 + $0xe8] sm:$0x3] }
 0x467   : > { %3033 = vst [vmem:[#allocation1 + $0x2] ss:$4 sm:$0xff] %v8081_v7  ;;  %v8893_v7 = vld [vmem:[#allocation2 + $0x100] sm:$0xff]  ;;  %v10887_v39 = vld [vmem:[#allocation55_spill] sm:$0xff] }
 0x468   : > { %3034 = vst [vmem:[#allocation1 + $0x3] ss:$4 sm:$0xff] %v8114_v40  ;;  %6197 = vmatmul.msk.bf16.gmra.mxu2 %vm1743_vm0, %v2711_v32  ;;  %v10882_v32 = vld [vmem:[#allocation139_spill] sm:$0xff] }
 0x469   : > { %10878 = vst [vmem:[#allocation25_spill] sm:$0xff] %v8893_v7 }
 0x46a   : > { %v8878_v63 = vld.sshfl [vmem:[#allocation1 + $0x20] sm:$0xff pattern:$0x73625140] }
 0x46b   : > { %3015 = vst [vmem:[#allocation1 + $0x20] ss:$4 sm:$0xff] %v7935_v21  ;;  %v3071_v21 = vpack.c.bf16 %v8803_v55, %v8764_v60  ;;  %v10895_v60 = vld [vmem:[#allocation78_spill] sm:$0xff]  ;;  %v8952_v55 = vpop.f32.mrf.mxu0 }
 0x46c   : > { %3016 = vst [vmem:[#allocation1 + $0x21] ss:$4 sm:$0xff] %v7938_v41 }
 0x46d   : > { %3017 = vst [vmem:[#allocation1 + $0x22] ss:$4 sm:$0xff] %v2853_v56 }
 0x46e   : > { %3018 = vst [vmem:[#allocation1 + $0x23] ss:$4 sm:$0xff] %v7955_v28 }
 0x46f   : > { %v8889_v40 = vld.sshfl [vmem:[#allocation1] sm:$0xff pattern:$0x73625140] }
 0x470   : > { %3043 = vst [vmem:[#allocation1 + $0x2] ss:$4 sm:$0xff] %v2861_v18  ;;  %v2712_v18 = vpack.c.bf16 %v8671_v3, %v10882_v32  ;;  %v10888_v3 = vld [vmem:[#allocation56_spill] sm:$0xff]  ;;  %v10889_v32 = vld [vmem:[#allocation57_spill] sm:$0xff] }
 0x471   : > { %3041 = vst [vmem:[#allocation1] ss:$4 sm:$0xff] %v8186_v14  ;;  %v10640_v14 = vrot.slane %v8893_v7, 2 }
 0x472   : > { %3042 = vst [vmem:[#allocation1 + $0x1] ss:$4 sm:$0xff] %v8189_v34  ;;  %v10883_v34 = vld [vmem:[#allocation60_spill] sm:$0xff] }
 0x473   : > { %3044 = vst [vmem:[#allocation1 + $0x3] ss:$4 sm:$0xff] %v8893_v7  ;;  %v10884_v50 = vrot.slane %v10883_v34, 2  ;;  %v10886_v20 = vrot.slane %v10883_v34, 6 }
 0x475   : > { %v8895_v37 = vld.sshfl [vmem:[#allocation1 + $0x20] sm:$0xff pattern:$0x73625140] }
 0x476   : > { %3025 = vst [vmem:[#allocation1 + $0x20] ss:$4 sm:$0xff] %v7988_v58  ;;  %6182 = vmatmul.msk.bf16.gmra.mxu0 %vm1743_vm0, %v2281_v24  ;;  %v10885_v58 = vrot.slane %v10883_v34, 4  ;;  %v3198_v24 = vld [vmem:[#allocation2 + $0x29] sm:$0x3] }
 0x477   : > { %3026 = vst [vmem:[#allocation1 + $0x21] ss:$4 sm:$0xff] %v10879_v29 }
 0x478   : > { %3027 = vst [vmem:[#allocation1 + $0x22] ss:$4 sm:$0xff] %v10880_v11  ;;  %6198 = vmatmul.msk.bf16.gmra.mxu2 %vm1743_vm0, %v2712_v18  ;;  %v10890_v18 = vld [vmem:[#allocation71_spill] sm:$0xff] }
 0x479   : > { %3028 = vst [vmem:[#allocation1 + $0x23] ss:$4 sm:$0xff] %v10881_v51 }
 0x47a   : > { %v8902_v56 = vld.sshfl [vmem:[#allocation1] sm:$0xff pattern:$0x73625140] }
 0x47b   : > { %3307 = vst [vmem:[#allocation1] ss:$4 sm:$0xff] %v10883_v34  ;;  %v2863_v34 = vld [vmem:[#allocation2 + $0x108] sm:$0x3] }
 0x47c   : > { %3309 = vst [vmem:[#allocation1 + $0x1] ss:$4 sm:$0xff] %v10884_v50 }
 0x47d   : > { %3311 = vst [vmem:[#allocation1 + $0x2] ss:$4 sm:$0xff] %v10885_v58  ;;  %v6204_v58 = vld [vmem:[%s10310_s3 + $0x3] sm:$0x1] }
 0x47e   : > { %3313 = vst [vmem:[#allocation1 + $0x3] ss:$4 sm:$0xff] %v10886_v20  ;;  %v10891_v20 = vld [vmem:[#allocation63_spill] sm:$0xff] }
 0x480   : > { %v8915_v5 = vld.sshfl [vmem:[#allocation1 + $0x20] sm:$0xff pattern:$0x73625140] }
 0x481   : > { %3035 = vst [vmem:[#allocation1 + $0x20] ss:$4 sm:$0xff] %v10887_v39  ;;  %v3114_v39 = vsel %vm2314_vm8, %v6204_v58, 0  ;;  %v3196_v58 = vld [vmem:[#allocation2 + $0x19] sm:$0x3] }
 0x482   : > { %3036 = vst [vmem:[#allocation1 + $0x21] ss:$4 sm:$0xff] %v2859_v27  ;;  %3123 = vmatpush.bf16.msra.mxu3 %v3114_v39 }
 0x483   : > { %3037 = vst [vmem:[#allocation1 + $0x22] ss:$4 sm:$0xff] %v10888_v3 }
 0x484   : > { %3038 = vst [vmem:[#allocation1 + $0x23] ss:$4 sm:$0xff] %v10889_v32  ;;  %v10892_v32 = vld [vmem:[#allocation64_spill] sm:$0xff] }
 0x485   : > { %v8922_v50 = vld.sshfl [vmem:[#allocation1] sm:$0xff pattern:$0x73625140]  ;;  %6205 = vmatmul.msk.bf16.vlgmr.msra.gmra.mxu3 %vm1743_vm0, %v3071_v21 }
 0x486   : > { %3324 = vst [vmem:[#allocation1] ss:$4 sm:$0xff] %v10890_v18  ;;  %v10642_v18 = vrot.slane %v8893_v7, 4  ;;  %v10897_v21 = vld [vmem:[#allocation61_spill] sm:$0xff] }
 0x487   : > { %3325 = vst [vmem:[#allocation1 + $0x1] ss:$4 sm:$0xff] %v3198_v24  ;;  %v10893_v24 = vld [vmem:[#allocation147_spill] sm:$0xff] }
 0x488   : > { %3326 = vst [vmem:[#allocation1 + $0x2] ss:$4 sm:$0xff] %v10891_v20  ;;  %v2713_v3 = vpack.c.bf16 %v8700_v2, %v10893_v24  ;;  %v10641_v20 = vrot.slane %v8893_v7, 6  ;;  %v10894_v2 = vld [vmem:[#allocation77_spill] sm:$0xff]  ;;  %v10896_v24 = vld [vmem:[#allocation79_spill] sm:$0xff]  ;;  %v10912_v7 = vld [vmem:[#allocation68_spill] sm:$0xff] }
 0x489   : > { %3327 = vst [vmem:[#allocation1 + $0x3] ss:$4 sm:$0xff] %v10892_v32  ;;  %v3204_v32 = vld [vmem:[#allocation2 + $0x59] sm:$0x3] }
 0x48a   : > { %6199 = vmatmul.msk.bf16.gmra.mxu2 %vm1743_vm0, %v2713_v3  ;;  %v10898_v3 = vld [vmem:[#allocation62_spill] sm:$0xff] }
 0x48b   : > { %v8930_v27 = vld.sshfl [vmem:[#allocation1 + $0x20] sm:$0xff pattern:$0x73625140] }
 0x48c   : > { %3048 = vst [vmem:[#allocation1 + $0x23] ss:$4 sm:$0xff] %v2863_v34  ;;  %v3202_v34 = vld [vmem:[#allocation2 + $0x49] sm:$0x3] }
 0x48d   : > { %3045 = vst [vmem:[#allocation1 + $0x20] ss:$4 sm:$0xff] %v10640_v14 }
 0x48e   : > { %3046 = vst [vmem:[#allocation1 + $0x21] ss:$4 sm:$0xff] %v10642_v18  ;;  %v2714_v18 = vpack.c.bf16 %v8728_v57, %v8662_v33  ;;  %v10903_v33 = vld [vmem:[#allocation73_spill] sm:$0xff] }
 0x48f   : > { %3047 = vst [vmem:[#allocation1 + $0x22] ss:$4 sm:$0xff] %v10641_v20  ;;  %v10899_v20 = vld [vmem:[#allocation70_spill] sm:$0xff]  ;;  %v10904_v57 = vld [vmem:[#allocation65_spill] sm:$0xff] }
 0x490   : > { %v8948_v39 = vld.sshfl [vmem:[#allocation1] sm:$0xff pattern:$0x73625140] }
 0x491   : > { %3334 = vst [vmem:[#allocation1] ss:$4 sm:$0xff] %v10894_v2 }
 0x492   : > { %3335 = vst [vmem:[#allocation1 + $0x1] ss:$4 sm:$0xff] %v10895_v60  ;;  %v3072_v60 = vpack.c.bf16 %v8821_v31, %v8786_v62  ;;  %v3200_v62 = vld [vmem:[#allocation2 + $0x39] sm:$0x3]  ;;  %v10905_v31 = vld [vmem:[#allocation66_spill] sm:$0xff] }
 0x493   : > { %3336 = vst [vmem:[#allocation1 + $0x2] ss:$4 sm:$0xff] %v10896_v24  ;;  %v8966_v24 = vpop.f32.mrf.mxu0 }
 0x494   : > { %3337 = vst [vmem:[#allocation1 + $0x3] ss:$4 sm:$0xff] %v3202_v34  ;;  %v10902_v34 = vld [vmem:[#allocation85_spill] sm:$0xff] }
 0x495   : > { %10900 = vst [vmem:[#allocation31_spill] sm:$0xff] %v8966_v24  ;;  %6206 = vmatmul.msk.bf16.gmra.mxu3 %vm1743_vm0, %v3072_v60  ;;  %v2419_v24 = vpop.f32.mrf.mxu1 }
 0x496   : > { %v8955_v14 = vld.sshfl [vmem:[#allocation1 + $0x20] sm:$0xff pattern:$0x73625140] }
 0x497   : > { %3315 = vst [vmem:[#allocation1 + $0x20] ss:$4 sm:$0xff] %v3196_v58  ;;  %v10901_v58 = vld [vmem:[#allocation72_spill] sm:$0xff] }
 0x498   : > { %3317 = vst [vmem:[#allocation1 + $0x21] ss:$4 sm:$0xff] %v10897_v21  ;;  %v10910_v21 = vld [vmem:[#allocation158_spill] sm:$0xff] }
 0x499   : > { %3319 = vst [vmem:[#allocation1 + $0x22] ss:$4 sm:$0xff] %v10898_v3  ;;  %v10908_v3 = vld [vmem:[#allocation92_spill] sm:$0xff] }
 0x49a   : > { %3321 = vst [vmem:[#allocation1 + $0x23] ss:$4 sm:$0xff] %v10899_v20  ;;  %6200 = vmatmul.msk.bf16.gmra.mxu2 %vm1743_vm0, %v2714_v18 }
 0x49b   : > { %v8964_v2 = vld.sshfl [vmem:[#allocation1] sm:$0xff pattern:$0x73625140]  ;;  %v8980_v60 = vpop.f32.mrf.mxu0 }
 0x49c   : > { %3344 = vst [vmem:[#allocation1] ss:$4 sm:$0xff] %v3204_v32  ;;  %v10906_v32 = vld [vmem:[#allocation75_spill] sm:$0xff] }
 0x49d   : > { %3345 = vst [vmem:[#allocation1 + $0x1] ss:$4 sm:$0xff] %v10901_v58  ;;  %v10907_v58 = vld [vmem:[#allocation91_spill] sm:$0xff] }
 0x49e   : > { %3346 = vst [vmem:[#allocation1 + $0x2] ss:$4 sm:$0xff] %v10902_v34  ;;  %v3208_v34 = vld [vmem:[#allocation2 + $0x79] sm:$0x3] }
 0x49f   : > { %3347 = vst [vmem:[#allocation1 + $0x3] ss:$4 sm:$0xff] %v10903_v33 }
 0x4a1   : > { %v8972_v20 = vld.sshfl [vmem:[#allocation1 + $0x20] sm:$0xff pattern:$0x73625140] }
 0x4a2   : > { %3328 = vst [vmem:[#allocation1 + $0x20] ss:$4 sm:$0xff] %v10904_v57  ;;  %v10909_v57 = vld [vmem:[#allocation80_spill] sm:$0xff] }
 0x4a3   : > { %3329 = vst [vmem:[#allocation1 + $0x21] ss:$4 sm:$0xff] %v10905_v31  ;;  %v10911_v31 = vld [vmem:[#allocation67_spill] sm:$0xff] }
 0x4a4   : > { %3330 = vst [vmem:[#allocation1 + $0x22] ss:$4 sm:$0xff] %v3200_v62  ;;  %v2715_v62 = vpack.c.bf16 %v8754_v54, %v10910_v21  ;;  %v10917_v21 = vld [vmem:[#allocation86_spill] sm:$0xff] }
 0x4a5   : > { %3331 = vst [vmem:[#allocation1 + $0x23] ss:$4 sm:$0xff] %v10906_v32  ;;  %v3073_v32 = vpack.c.bf16 %v8835_v1, %v8799_v13  ;;  %v10918_v13 = vld [vmem:[#allocation97_spill] sm:$0xff]  ;;  %v10919_v1 = vld [vmem:[#allocation98_spill] sm:$0xff] }
 0x4a6   : > { %v8978_v18 = vld.sshfl [vmem:[#allocation1] sm:$0xff pattern:$0x73625140] }
 0x4a7   : > { %3354 = vst [vmem:[#allocation1] ss:$4 sm:$0xff] %v10907_v58  ;;  %6207 = vmatmul.msk.bf16.gmra.mxu3 %vm1743_vm0, %v3073_v32  ;;  %v8997_v58 = vpop.f32.mrf.mxu1  ;;  %v3206_v32 = vld [vmem:[#allocation2 + $0x69] sm:$0x3] }
 0x4a8   : > { %3355 = vst [vmem:[#allocation1 + $0x1] ss:$4 sm:$0xff] %v10908_v3  ;;  %v10913_v3 = vld [vmem:[#allocation69_spill] sm:$0xff] }
 0x4a9   : > { %3356 = vst [vmem:[#allocation1 + $0x2] ss:$4 sm:$0xff] %v3208_v34  ;;  %v10914_v34 = vld [vmem:[#allocation84_spill] sm:$0xff] }
 0x4aa   : > { %3357 = vst [vmem:[#allocation1 + $0x3] ss:$4 sm:$0xff] %v10909_v57  ;;  %6201 = vmatmul.msk.bf16.gmra.mxu2 %vm1743_vm0, %v2715_v62  ;;  %v8999_v57 = vpop.f32.mrf.mxu0  ;;  %v10920_v62 = vld [vmem:[#allocation87_spill] sm:$0xff] }
 0x4ab   : > { %10915 = vst [vmem:[#allocation10_spill] sm:$0xff] %v8997_v58  ;;  %v10923_v58 = vld [vmem:[#allocation90_spill] sm:$0xff] }
 0x4ac   : > { %v8984_v33 = vld.sshfl [vmem:[#allocation1 + $0x20] sm:$0xff pattern:$0x73625140]  ;;  %10916 = vst [vmem:[#allocation32_spill] sm:$0xff] %v8999_v57 }
 0x4ad   : > { %3338 = vst [vmem:[#allocation1 + $0x20] ss:$4 sm:$0xff] %v10911_v31 }
 0x4ae   : > { %3339 = vst [vmem:[#allocation1 + $0x21] ss:$4 sm:$0xff] %v10912_v7 }
 0x4af   : > { %3340 = vst [vmem:[#allocation1 + $0x22] ss:$4 sm:$0xff] %v10913_v3  ;;  %v10921_v3 = vld [vmem:[#allocation74_spill] sm:$0xff]  ;;  %v2424_v57 = vpop.f32.mrf.mxu1 }
 0x4b0   : > { %3341 = vst [vmem:[#allocation1 + $0x23] ss:$4 sm:$0xff] %v10914_v34  ;;  %v10922_v34 = vld [vmem:[#allocation76_spill] sm:$0xff] }
 0x4b1   : > { %v9001_v54 = vld.sshfl [vmem:[#allocation1] sm:$0xff pattern:$0x73625140] }
 0x4b2   : > { %3364 = vst [vmem:[#allocation1] ss:$4 sm:$0xff] %v10917_v21  ;;  %v9012_v7 = vpop.f32.mrf.mxu0 }
 0x4b3   : > { %3365 = vst [vmem:[#allocation1 + $0x1] ss:$4 sm:$0xff] %v10918_v13  ;;  %v2716_v13 = vpack.c.bf16 %v8776_v16, %v8717_v23  ;;  %v10926_v23 = vld [vmem:[#allocation94_spill] sm:$0xff] }
 0x4b4   : > { %3366 = vst [vmem:[#allocation1 + $0x2] ss:$4 sm:$0xff] %v10919_v1  ;;  %v3074_v1 = vpack.c.bf16 %v8851_v22, %v8812_v61  ;;  %v10927_v61 = vld [vmem:[#allocation81_spill] sm:$0xff]  ;;  %v10928_v22 = vld [vmem:[#allocation82_spill] sm:$0xff] }
 0x4b5   : > { %3367 = vst [vmem:[#allocation1 + $0x3] ss:$4 sm:$0xff] %v10920_v62  ;;  %v10924_v62 = vld [vmem:[#allocation103_spill] sm:$0xff] }
 0x4b7   : > { %v9006_v31 = vld.sshfl [vmem:[#allocation1 + $0x20] sm:$0xff pattern:$0x73625140]  ;;  %6208 = vmatmul.msk.bf16.gmra.mxu3 %vm1743_vm0, %v3074_v1  ;;  %v10929_v1 = vld [vmem:[#allocation83_spill] sm:$0xff] }
 0x4b8   : > { %3348 = vst [vmem:[#allocation1 + $0x20] ss:$4 sm:$0xff] %v10921_v3  ;;  %v2420_v3 = vadd.f32 %v2419_v24, %v8952_v55 }
 0x4b9   : > { %3349 = vst [vmem:[#allocation1 + $0x21] ss:$4 sm:$0xff] %v3206_v32  ;;  %v3214_v32 = vld [vmem:[#allocation2 + $0xa9] sm:$0x3] }
 0x4ba   : > { %3350 = vst [vmem:[#allocation1 + $0x22] ss:$4 sm:$0xff] %v10922_v34  ;;  %6202 = vmatmul.msk.bf16.gmra.mxu2 %vm1743_vm0, %v2716_v13  ;;  %v3210_v13 = vld [vmem:[#allocation2 + $0x89] sm:$0x3]  ;;  %v9035_v55 = vpop.f32.mrf.mxu0 }
 0x4bb   : > { %3351 = vst [vmem:[#allocation1 + $0x23] ss:$4 sm:$0xff] %v10923_v58  ;;  %v10925_v58 = vld [vmem:[#allocation93_spill] sm:$0xff]  ;;  %v2762_v34 = vpop.f32.mrf.mxu2 }
 0x4bc   : > { %v9018_v21 = vld.sshfl [vmem:[#allocation1] sm:$0xff pattern:$0x73625140]  ;;  %v9028_v16 = vadd.f32 %v2762_v34, %v2420_v3  ;;  %10931 = vst [vmem:[#allocation11_spill] sm:$0xff] %v9035_v55  ;;  %v10934_v3 = vld [vmem:[#allocation110_spill] sm:$0xff]  ;;  %v10936_v55 = vld [vmem:[#allocation88_spill] sm:$0xff] }
 0x4bd   : > { %3374 = vst [vmem:[#allocation1] ss:$4 sm:$0xff] %v10924_v62  ;;  %v9033_v62 = vpop.f32.mrf.mxu1  ;;  %v3212_v34 = vld [vmem:[#allocation2 + $0x99] sm:$0x3] }
 0x4be   : > { %3375 = vst [vmem:[#allocation1 + $0x1] ss:$4 sm:$0xff] %v3214_v32 }
 0x4bf   : > { %3376 = vst [vmem:[#allocation1 + $0x2] ss:$4 sm:$0xff] %v10925_v58  ;;  %v10933_v58 = vld [vmem:[#allocation109_spill] sm:$0xff] }
 0x4c0   : > { %3377 = vst [vmem:[#allocation1 + $0x3] ss:$4 sm:$0xff] %v10926_v23  ;;  %v3218_v23 = vld [vmem:[#allocation2 + $0xc9] sm:$0x3] }
 0x4c1   : > { %10930 = vst [vmem:[#allocation42_spill] sm:$0xff] %v9033_v62 }
 0x4c2   : > { %v9025_v51 = vld.sshfl [vmem:[#allocation1 + $0x20] sm:$0xff pattern:$0x73625140] }
 0x4c3   : > { %3358 = vst [vmem:[#allocation1 + $0x20] ss:$4 sm:$0xff] %v10927_v61  ;;  %v9039_v32 = vpop.f32.mrf.mxu2  ;;  %v10935_v61 = vld [vmem:[#allocation111_spill] sm:$0xff] }
 0x4c4   : > { %3359 = vst [vmem:[#allocation1 + $0x21] ss:$4 sm:$0xff] %v10928_v22  ;;  %v10965_v22 = vld [vmem:[#allocation128_spill] sm:$0xff] }
 0x4c5   : > { %3360 = vst [vmem:[#allocation1 + $0x22] ss:$4 sm:$0xff] %v10929_v1  ;;  %v2717_v1 = vpack.c.bf16 %v8791_v17, %v8743_v48  ;;  %v10938_v17 = vld [vmem:[#allocation102_spill] sm:$0xff] }
 0x4c6   : > { %3361 = vst [vmem:[#allocation1 + $0x23] ss:$4 sm:$0xff] %v3210_v13  ;;  %v3075_v13 = vpack.c.bf16 %v8868_v35, %v8830_v19  ;;  %v3220_v35 = vld [vmem:[#allocation2 + $0xd9] sm:$0x3] }
 0x4c7   : > { %v9037_v24 = vld.sshfl [vmem:[#allocation1] sm:$0xff pattern:$0x73625140]  ;;  %10932 = vst [vmem:[#allocation35_spill] sm:$0xff] %v9039_v32  ;;  %v2429_v32 = vpop.f32.mrf.mxu1 }
 0x4c8   : > { %3384 = vst [vmem:[#allocation1] ss:$4 sm:$0xff] %v10933_v58  ;;  %6209 = vmatmul.msk.bf16.gmra.mxu3 %vm1743_vm0, %v3075_v13  ;;  %v2342_v58 = vpop.f32.mrf.mxu0 }
 0x4c9   : > { %3385 = vst [vmem:[#allocation1 + $0x1] ss:$4 sm:$0xff] %v10934_v3  ;;  %v10937_v3 = vld [vmem:[#allocation89_spill] sm:$0xff] }
 0x4ca   : > { %3386 = vst [vmem:[#allocation1 + $0x2] ss:$4 sm:$0xff] %v10935_v61  ;;  %6203 = vmatmul.msk.bf16.gmra.mxu2 %vm1743_vm0, %v2717_v1  ;;  %v2425_v61 = vadd.f32 %v2424_v57, %v8980_v60  ;;  %v10939_v1 = vld [vmem:[#allocation104_spill] sm:$0xff]  ;;  %v6215_v60 = vld [vmem:[%s10310_s3 + $0x4] sm:$0x1] }
 0x4cb   : > { %3387 = vst [vmem:[#allocation1 + $0x3] ss:$4 sm:$0xff] %v3218_v23  ;;  %v2767_v48 = vpop.f32.mrf.mxu2 }
 0x4cc   : > { %v9056_v19 = vadd.f32 %v2767_v48, %v2425_v61  ;;  %v3216_v48 = vld [vmem:[#allocation2 + $0xb9] sm:$0x3] }
 0x4cd   : > { %v9048_v62 = vld.sshfl [vmem:[#allocation1 + $0x20] sm:$0xff pattern:$0x73625140] }
 0x4ce   : > { %3368 = vst [vmem:[#allocation1 + $0x20] ss:$4 sm:$0xff] %v3212_v34  ;;  %v10940_v34 = vld [vmem:[#allocation113_spill] sm:$0xff] }
 0x4cf   : > { %3369 = vst [vmem:[#allocation1 + $0x21] ss:$4 sm:$0xff] %v10936_v55  ;;  %v10941_v55 = vld [vmem:[#allocation105_spill] sm:$0xff]  ;;  %v9071_v61 = vpop.f32.mrf.mxu1 }
 0x4d0   : > { %3370 = vst [vmem:[#allocation1 + $0x22] ss:$4 sm:$0xff] %v10937_v3  ;;  %v10942_v3 = vld [vmem:[#allocation95_spill] sm:$0xff] }
 0x4d1   : > { %3371 = vst [vmem:[#allocation1 + $0x23] ss:$4 sm:$0xff] %v10938_v17  ;;  %v9089_v17 = vld [vmem:[#allocation2 + $0x101] sm:$0xff] }
 0x4d2   : > { %v9058_v23 = vld.sshfl [vmem:[#allocation1] sm:$0xff pattern:$0x73625140]  ;;  %10944 = vst [vmem:[#allocation13_spill] sm:$0xff] %v9071_v61 }
 0x4d3   : > { %3394 = vst [vmem:[#allocation1] ss:$4 sm:$0xff] %v3220_v35  ;;  %v9066_v57 = vpop.f32.mrf.mxu2  ;;  %v10945_v35 = vld [vmem:[#allocation96_spill] sm:$0xff] }
 0x4d4   : > { %3395 = vst [vmem:[#allocation1 + $0x1] ss:$4 sm:$0xff] %v10939_v1  ;;  %v9074_v1 = vpop.f32.mrf.mxu0 }
 0x4d5   : > { %3396 = vst [vmem:[#allocation1 + $0x2] ss:$4 sm:$0xff] %v10940_v34  ;;  %v3477_v34 = vsel %vm2314_vm8, %v6215_v60, 0  ;;  %v2430_v60 = vadd.f32 %v2429_v32, %v9012_v7  ;;  %v10953_v7 = vld [vmem:[#allocation101_spill] sm:$0xff]  ;;  %v10954_v32 = vld [vmem:[#allocation112_spill] sm:$0xff] }
 0x4d6   : > { %3397 = vst [vmem:[#allocation1 + $0x3] ss:$4 sm:$0xff] %v10941_v55  ;;  %3486 = vmatpush.bf16.msrb.mxu0 %v3477_v34  ;;  %v10947_v55 = vld [vmem:[#allocation107_spill] sm:$0xff] }
 0x4d7   : > { %10943 = vst [vmem:[#allocation36_spill] sm:$0xff] %v9066_v57  ;;  %v3076_v57 = vpack.c.bf16 %v8878_v63, %v8847_v38  ;;  %v10949_v34 = vld [vmem:[#allocation119_spill] sm:$0xff] }
 0x4d8   : > { %v9062_v13 = vld.sshfl [vmem:[#allocation1 + $0x20] sm:$0xff pattern:$0x73625140]  ;;  %10946 = vst [vmem:[#allocation40_spill] sm:$0xff] %v9074_v1 }
 0x4d9   : > { %3378 = vst [vmem:[#allocation1 + $0x20] ss:$4 sm:$0xff] %v10942_v3  ;;  %v3434_v3 = vpack.c.bf16 %v8972_v20, %v8922_v50  ;;  %6210 = vmatmul.msk.bf16.gmra.mxu3 %vm1743_vm0, %v3076_v57  ;;  %v10951_v50 = vld [vmem:[#allocation99_spill] sm:$0xff] }
 0x4da   : > { %3379 = vst [vmem:[#allocation1 + $0x21] ss:$4 sm:$0xff] %v10945_v35  ;;  %v10948_v35 = vld [vmem:[#allocation118_spill] sm:$0xff] }
 0x4db   : > { %3380 = vst [vmem:[#allocation1 + $0x22] ss:$4 sm:$0xff] %v3216_v48  ;;  %6216 = vmatmul.msk.bf16.vlgmr.msrb.gmra.mxu0 %vm1743_vm0, %v3434_v3  ;;  %v3224_v48 = vld [vmem:[#allocation2 + $0xf9] sm:$0x3]  ;;  %v2772_v1 = vpop.f32.mrf.mxu2  ;;  %v10952_v3 = vld [vmem:[#allocation100_spill] sm:$0xff] }
 0x4dc   : > { %3381 = vst [vmem:[#allocation1 + $0x23] ss:$4 sm:$0xff] %v10947_v55  ;;  %v2434_v55 = vpop.f32.mrf.mxu1  ;;  %v9091_v38 = vadd.f32 %v2772_v1, %v2430_v60  ;;  %v2347_v20 = vpop.f32.mrf.mxu0 }
 0x4dd   : > { %v9084_v61 = vld.sshfl [vmem:[#allocation1] sm:$0xff pattern:$0x73625140]  ;;  %10950 = vst [vmem:[#allocation41_spill] sm:$0xff] %v9089_v17 }
 0x4de   : > { %3404 = vst [vmem:[#allocation1] ss:$4 sm:$0xff] %v10948_v35  ;;  %v3435_v35 = vpack.c.bf16 %v8984_v33, %v8948_v39  ;;  %v10964_v33 = vld [vmem:[#allocation117_spill] sm:$0xff] }
 0x4df   : > { %3405 = vst [vmem:[#allocation1 + $0x1] ss:$4 sm:$0xff] %v10949_v34 }
 0x4e0   : > { %3406 = vst [vmem:[#allocation1 + $0x2] ss:$4 sm:$0xff] %v3224_v48  ;;  %v10956_v48 = vld [vmem:[#allocation114_spill] sm:$0xff] }
 0x4e1   : > { %3407 = vst [vmem:[#allocation1 + $0x3] ss:$4 sm:$0xff] %v9089_v17  ;;  %v10958_v60 = vrot.slane %v10956_v48, 2 }
 0x4e3   : > { %v9093_v63 = vld.sshfl [vmem:[#allocation1 + $0x20] sm:$0xff pattern:$0x73625140]  ;;  %v9100_v57 = vpop.f32.mrf.mxu2 }
 0x4e4   : > { %3388 = vst [vmem:[#allocation1 + $0x20] ss:$4 sm:$0xff] %v10951_v50  ;;  %v9105_v1 = vpop.f32.mrf.mxu1  ;;  %v3077_v50 = vpack.c.bf16 %v8895_v37, %v8857_v53  ;;  %v2435_v53 = vadd.f32 %v2434_v55, %v2342_v58  ;;  %v10963_v37 = vld [vmem:[#allocation108_spill] sm:$0xff]  ;;  %v10646_v58 = vrot.slane %v9089_v17, 4 }
 0x4e5   : > { %3389 = vst [vmem:[#allocation1 + $0x21] ss:$4 sm:$0xff] %v10952_v3  ;;  %v9119_v3 = vpop.f32.mrf.mxu0 }
 0x4e6   : > { %3390 = vst [vmem:[#allocation1 + $0x22] ss:$4 sm:$0xff] %v10953_v7  ;;  %v10959_v7 = vrot.slane %v10956_v48, 4 }
 0x4e7   : > { %3391 = vst [vmem:[#allocation1 + $0x23] ss:$4 sm:$0xff] %v10954_v32 }
 0x4e8   : > { %10955 = vst [vmem:[#allocation50_spill] sm:$0xff] %v9100_v57  ;;  %v9102_v34 = vld.sshfl [vmem:[#allocation1] sm:$0xff pattern:$0x73625140]  ;;  %v10960_v57 = vrot.slane %v10956_v48, 6 }
 0x4e9   : > { %3670 = vst [vmem:[#allocation1] ss:$4 sm:$0xff] %v10956_v48  ;;  %6211 = vmatmul.msk.bf16.gmra.mxu3 %vm1743_vm0, %v3077_v50  ;;  %v10966_v50 = vld [vmem:[#allocation120_spill] sm:$0xff] }
 0x4ea   : > { %10957 = vst [vmem:[#allocation51_spill] sm:$0xff] %v9105_v1  ;;  %v10962_v1 = vld [vmem:[#allocation106_spill] sm:$0xff] }
 0x4eb   : > { %3672 = vst [vmem:[#allocation1 + $0x1] ss:$4 sm:$0xff] %v10958_v60  ;;  %6217 = vmatmul.msk.bf16.gmra.mxu0 %vm1743_vm0, %v3435_v35  ;;  %v3222_v60 = vld [vmem:[#allocation2 + $0xe9] sm:$0x3]  ;;  %v2777_v39 = vpop.f32.mrf.mxu2  ;;  %v10645_v35 = vrot.slane %v9089_v17, 2 }
 0x4ec   : > { %3674 = vst [vmem:[#allocation1 + $0x2] ss:$4 sm:$0xff] %v10959_v7  ;;  %v9126_v7 = vadd.f32 %v2777_v39, %v2435_v53  ;;  %v2439_v48 = vpop.f32.mrf.mxu1  ;;  %v10649_v39 = vrot.slane %v9089_v17, 6 }
 0x4ed   : > { %3676 = vst [vmem:[#allocation1 + $0x3] ss:$4 sm:$0xff] %v10960_v57 }
 0x4ee   : > { %v9115_v32 = vld.sshfl [vmem:[#allocation1 + $0x20] sm:$0xff pattern:$0x73625140]  ;;  %10961 = vst [vmem:[#allocation139_spill] sm:$0xff] %v9119_v3  ;;  %v3561_v3 = vld [vmem:[#allocation2 + $0x2a] sm:$0x3] }
 0x4ef   : > { %3398 = vst [vmem:[#allocation1 + $0x20] ss:$4 sm:$0xff] %v10962_v1  ;;  %v10967_v1 = vld [vmem:[#allocation121_spill] sm:$0xff] }
 0x4f0   : > { %3399 = vst [vmem:[#allocation1 + $0x21] ss:$4 sm:$0xff] %v3222_v60  ;;  %v2352_v60 = vpop.f32.mrf.mxu0 }
 0x4f1   : > { %3400 = vst [vmem:[#allocation1 + $0x22] ss:$4 sm:$0xff] %v10963_v37 }
 0x4f2   : > { %3401 = vst [vmem:[#allocation1 + $0x23] ss:$4 sm:$0xff] %v10964_v33 }
 0x4f3   : > { %v9137_v53 = vpop.f32.mrf.mxu2 }
 0x4f4   : > { %v9128_v57 = vld.sshfl [vmem:[#allocation1] sm:$0xff pattern:$0x73625140]  ;;  %10968 = vst [vmem:[#allocation60_spill] sm:$0xff] %v9137_v53  ;;  %v9150_v53 = vpop.f32.mrf.mxu1 }
 0x4f5   : > { %3687 = vst [vmem:[#allocation1] ss:$4 sm:$0xff] %v10965_v22  ;;  %v10970_v22 = vld [vmem:[#allocation134_spill] sm:$0xff] }
 0x4f6   : > { %3688 = vst [vmem:[#allocation1 + $0x1] ss:$4 sm:$0xff] %v3561_v3  ;;  %v3226_v3 = vld [vmem:[#allocation2 + $0x109] sm:$0x3] }
 0x4f7   : > { %3689 = vst [vmem:[#allocation1 + $0x2] ss:$4 sm:$0xff] %v10966_v50  ;;  %v3078_v50 = vpack.c.bf16 %v8915_v5, %v8873_v43  ;;  %v3559_v43 = vld [vmem:[#allocation2 + $0x1a] sm:$0x3] }
 0x4f8   : > { %3690 = vst [vmem:[#allocation1 + $0x3] ss:$4 sm:$0xff] %v10967_v1  ;;  %v3436_v1 = vpack.c.bf16 %v9006_v31, %v8964_v2  ;;  %v9158_v33 = vpop.f32.mrf.mxu0  ;;  %v3565_v2 = vld [vmem:[#allocation2 + $0x4a] sm:$0x3]  ;;  %v10973_v31 = vld [vmem:[#allocation136_spill] sm:$0xff] }
 0x4f9   : > { %v9134_v55 = vld.sshfl [vmem:[#allocation1 + $0x20] sm:$0xff pattern:$0x73625140]  ;;  %10969 = vst [vmem:[#allocation147_spill] sm:$0xff] %v9150_v53  ;;  %6212 = vmatmul.msk.bf16.gmra.mxu3 %vm1743_vm0, %v3078_v50  ;;  %v10974_v50 = vld [vmem:[#allocation115_spill] sm:$0xff] }
 0x4fa   : > { %3408 = vst [vmem:[#allocation1 + $0x20] ss:$4 sm:$0xff] %v10645_v35 }
 0x4fb   : > { %3409 = vst [vmem:[#allocation1 + $0x21] ss:$4 sm:$0xff] %v10646_v58  ;;  %6218 = vmatmul.msk.bf16.gmra.mxu0 %vm1743_vm0, %v3436_v1  ;;  %v2440_v58 = vadd.f32 %v2439_v48, %v2347_v20  ;;  %v2782_v17 = vpop.f32.mrf.mxu2  ;;  %v10975_v20 = vld [vmem:[#allocation116_spill] sm:$0xff]  ;;  %v10976_v48 = vld [vmem:[#allocation127_spill] sm:$0xff] }
 0x4fc   : > { %3410 = vst [vmem:[#allocation1 + $0x22] ss:$4 sm:$0xff] %v10649_v39  ;;  %v10971_v39 = vld [vmem:[#allocation135_spill] sm:$0xff]  ;;  %v2444_v1 = vpop.f32.mrf.mxu1 }
 0x4fd   : > { %3411 = vst [vmem:[#allocation1 + $0x23] ss:$4 sm:$0xff] %v3226_v3  ;;  %v9160_v5 = vadd.f32 %v2782_v17, %v2440_v58 }
 0x4fe   : > { %10972 = vst [vmem:[#allocation158_spill] sm:$0xff] %v9158_v33  ;;  %v3567_v33 = vld [vmem:[#allocation2 + $0x5a] sm:$0x3] }
 0x4ff   : > { %v9154_v35 = vld.sshfl [vmem:[#allocation1] sm:$0xff pattern:$0x73625140] }
 0x500   : > { %3697 = vst [vmem:[#allocation1] ss:$4 sm:$0xff] %v10970_v22  ;;  %v2357_v58 = vpop.f32.mrf.mxu0  ;;  %v10980_v22 = vld [vmem:[#allocation130_spill] sm:$0xff] }
 0x501   : > { %3698 = vst [vmem:[#allocation1 + $0x1] ss:$4 sm:$0xff] %v10971_v39  ;;  %v10979_v39 = vld [vmem:[#allocation143_spill] sm:$0xff] }
 0x502   : > { %3699 = vst [vmem:[#allocation1 + $0x2] ss:$4 sm:$0xff] %v10973_v31  ;;  %v3079_v31 = vpack.c.bf16 %v8930_v27, %v8889_v40  ;;  %v2445_v40 = vadd.f32 %v2444_v1, %v2352_v60  ;;  %v3563_v27 = vld [vmem:[#allocation2 + $0x3a] sm:$0x3] }
 0x503   : > { %3700 = vst [vmem:[#allocation1 + $0x3] ss:$4 sm:$0xff] %v3565_v2  ;;  %v9168_v53 = vpop.f32.mrf.mxu2  ;;  %v10978_v2 = vld [vmem:[#allocation129_spill] sm:$0xff] }
 0x504   : > { %v9163_v3 = vld.sshfl [vmem:[#allocation1 + $0x20] sm:$0xff pattern:$0x73625140]  ;;  %10977 = vst [vmem:[#allocation114_spill] sm:$0xff] %v9168_v53 }
 0x505   : > { %3678 = vst [vmem:[#allocation1 + $0x20] ss:$4 sm:$0xff] %v3559_v43  ;;  %v3437_v43 = vpack.c.bf16 %v9025_v51, %v8978_v18  ;;  %v3571_v60 = vld [vmem:[#allocation2 + $0x7a] sm:$0x3] }
 0x506   : > { %3680 = vst [vmem:[#allocation1 + $0x21] ss:$4 sm:$0xff] %v10974_v50 }
 0x507   : > { %3682 = vst [vmem:[#allocation1 + $0x22] ss:$4 sm:$0xff] %v10975_v20  ;;  %v10983_v20 = vld [vmem:[#allocation123_spill] sm:$0xff] }
 0x508   : > { %3684 = vst [vmem:[#allocation1 + $0x23] ss:$4 sm:$0xff] %v10976_v48  ;;  %v10982_v48 = vld [vmem:[#allocation122_spill] sm:$0xff]  ;;  %v3125_v18 = vpop.f32.mrf.mxu3 }
 0x509   : > { %6213 = vmatmul.msk.bf16.gmra.mxu3 %vm1743_vm0, %v3079_v31  ;;  %v9190_v31 = vadd.f32 %v3125_v18, %v9028_v16  ;;  %v10990_v16 = vld [vmem:[#allocation137_spill] sm:$0xff] }
 0x50a   : > { %v9170_v17 = vld.sshfl [vmem:[#allocation1] sm:$0xff pattern:$0x73625140] }
 0x50b   : > { %3707 = vst [vmem:[#allocation1] ss:$4 sm:$0xff] %v3567_v33  ;;  %6219 = vmatmul.msk.bf16.gmra.mxu0 %vm1743_vm0, %v3437_v43  ;;  %v9183_v33 = vpop.f32.mrf.mxu1  ;;  %v10984_v43 = vld [vmem:[#allocation132_spill] sm:$0xff]  ;;  %v10992_v18 = vld [vmem:[#allocation125_spill] sm:$0xff] }
 0x50c   : > { %3708 = vst [vmem:[#allocation1 + $0x1] ss:$4 sm:$0xff] %v10978_v2 }
 0x50d   : > { %3709 = vst [vmem:[#allocation1 + $0x2] ss:$4 sm:$0xff] %v10979_v39  ;;  %v2787_v51 = vpop.f32.mrf.mxu2 }
 0x50e   : > { %3710 = vst [vmem:[#allocation1 + $0x3] ss:$4 sm:$0xff] %v10980_v22  ;;  %v9187_v39 = vadd.f32 %v2787_v51, %v2445_v40  ;;  %v9195_v22 = vpop.f32.mrf.mxu0  ;;  %v10991_v51 = vld [vmem:[#allocation124_spill] sm:$0xff] }
 0x50f   : > { %v9180_v53 = vld.sshfl [vmem:[#allocation1 + $0x20] sm:$0xff pattern:$0x73625140]  ;;  %10981 = vst [vmem:[#allocation108_spill] sm:$0xff] %v9183_v33  ;;  %v10986_v33 = vld [vmem:[#allocation150_spill] sm:$0xff] }
 0x510   : > { %3691 = vst [vmem:[#allocation1 + $0x20] ss:$4 sm:$0xff] %v10982_v48  ;;  %v10987_v48 = vld [vmem:[#allocation151_spill] sm:$0xff]  ;;  %v9201_v40 = vpop.f32.mrf.mxu3 }
 0x511   : > { %3692 = vst [vmem:[#allocation1 + $0x21] ss:$4 sm:$0xff] %v10983_v20 }
 0x512   : > { %3693 = vst [vmem:[#allocation1 + $0x22] ss:$4 sm:$0xff] %v3563_v27 }
 0x513   : > { %3694 = vst [vmem:[#allocation1 + $0x23] ss:$4 sm:$0xff] %v10984_v43  ;;  %v2449_v1 = vpop.f32.mrf.mxu1  ;;  %v10995_v43 = vld [vmem:[#allocation144_spill] sm:$0xff] }
 0x514   : > { %10985 = vst [vmem:[#allocation115_spill] sm:$0xff] %v9195_v22  ;;  %v3080_v22 = vpack.c.bf16 %v8955_v14, %v8902_v56 }
 0x515   : > { %v9193_v2 = vld.sshfl [vmem:[#allocation1] sm:$0xff pattern:$0x73625140]  ;;  %v9199_v20 = vpop.f32.mrf.mxu2  ;;  %10989 = vst [vmem:[#allocation176_spill] sm:$0xff] %v9201_v40 }
 0x516   : > { %3717 = vst [vmem:[#allocation1] ss:$4 sm:$0xff] %v10986_v33  ;;  %v3438_v33 = vpack.c.bf16 %v9048_v62, %v9001_v54  ;;  %v2362_v40 = vpop.f32.mrf.mxu0  ;;  %v10997_v62 = vld [vmem:[#allocation156_spill] sm:$0xff] }
 0x517   : > { %3718 = vst [vmem:[#allocation1 + $0x1] ss:$4 sm:$0xff] %v10987_v48  ;;  %v10993_v48 = vld [vmem:[#allocation126_spill] sm:$0xff] }
 0x518   : > { %3719 = vst [vmem:[#allocation1 + $0x2] ss:$4 sm:$0xff] %v3571_v60  ;;  %v10994_v60 = vld [vmem:[#allocation142_spill] sm:$0xff] }
 0x519   : > { %10988 = vst [vmem:[#allocation175_spill] sm:$0xff] %v9199_v20  ;;  %6214 = vmatmul.msk.bf16.gmra.mxu3 %vm1743_vm0, %v3080_v22  ;;  %v2450_v20 = vadd.f32 %v2449_v1, %v2357_v58  ;;  %v10998_v22 = vld [vmem:[#allocation157_spill] sm:$0xff]  ;;  %v3569_v1 = vld [vmem:[#allocation2 + $0x6a] sm:$0x3] }
 0x51a   : > { %v9203_v27 = vld.sshfl [vmem:[#allocation1 + $0x20] sm:$0xff pattern:$0x73625140]  ;;  %3720 = vst [vmem:[#allocation1 + $0x3] ss:$4 sm:$0xff] %v10990_v16 }
 0x51b   : > { %3701 = vst [vmem:[#allocation1 + $0x20] ss:$4 sm:$0xff] %v10991_v51  ;;  %6220 = vmatmul.msk.bf16.gmra.mxu0 %vm1743_vm0, %v3438_v33  ;;  %v9224_v54 = vpop.f32.mrf.mxu1  ;;  %v10999_v58 = vld [vmem:[#allocation145_spill] sm:$0xff] }
 0x51c   : > { %3702 = vst [vmem:[#allocation1 + $0x21] ss:$4 sm:$0xff] %v10992_v18  ;;  %v3130_v18 = vpop.f32.mrf.mxu3 }
 0x51d   : > { %3703 = vst [vmem:[#allocation1 + $0x22] ss:$4 sm:$0xff] %v10993_v48  ;;  %v2792_v51 = vpop.f32.mrf.mxu2  ;;  %v9222_v56 = vadd.f32 %v3130_v18, %v9056_v19  ;;  %v6226_v18 = vld [vmem:[%s10310_s3 + $0x5] sm:$0x1] }
 0x51e   : > { %3704 = vst [vmem:[#allocation1 + $0x23] ss:$4 sm:$0xff] %v10994_v60  ;;  %v9219_v14 = vadd.f32 %v2792_v51, %v2450_v20  ;;  %v11000_v60 = vld [vmem:[#allocation131_spill] sm:$0xff]  ;;  %v11002_v20 = vld [vmem:[#allocation149_spill] sm:$0xff] }
 0x51f   : > { %10996 = vst [vmem:[#allocation126_spill] sm:$0xff] %v9224_v54  ;;  %v9241_v54 = vpop.f32.mrf.mxu0 }
 0x520   : > { %11005 = vst [vmem:[#allocation179_spill] sm:$0xff] %v9241_v54  ;;  %v11007_v54 = vld [vmem:[#allocation152_spill] sm:$0xff] }
 0x521   : > { %v9216_v16 = vld.sshfl [vmem:[#allocation1] sm:$0xff pattern:$0x73625140] }
 0x522   : > { %3727 = vst [vmem:[#allocation1] ss:$4 sm:$0xff] %v10995_v43  ;;  %v11001_v43 = vld [vmem:[#allocation133_spill] sm:$0xff] }
 0x523   : > { %3728 = vst [vmem:[#allocation1 + $0x1] ss:$4 sm:$0xff] %v10997_v62 }
 0x524   : > { %3729 = vst [vmem:[#allocation1 + $0x2] ss:$4 sm:$0xff] %v10998_v22  ;;  %v9236_v51 = vpop.f32.mrf.mxu3  ;;  %v2454_v22 = vpop.f32.mrf.mxu1 }
 0x525   : > { %v9228_v33 = vld.sshfl [vmem:[#allocation1 + $0x20] sm:$0xff pattern:$0x73625140]  ;;  %3730 = vst [vmem:[#allocation1 + $0x3] ss:$4 sm:$0xff] %v10999_v58  ;;  %v9234_v19 = vpop.f32.mrf.mxu2  ;;  %v3840_v58 = vsel %vm2314_vm8, %v6226_v18, 0 }
 0x526   : > { %3711 = vst [vmem:[#allocation1 + $0x20] ss:$4 sm:$0xff] %v11000_v60  ;;  %3849 = vmatpush.bf16.msrb.mxu1 %v3840_v58  ;;  %v3577_v60 = vld [vmem:[#allocation2 + $0xaa] sm:$0x3]  ;;  %v11008_v58 = vld [vmem:[#allocation153_spill] sm:$0xff] }
 0x527   : > { %3712 = vst [vmem:[#allocation1 + $0x21] ss:$4 sm:$0xff] %v3569_v1  ;;  %v3439_v1 = vpack.c.bf16 %v9062_v13, %v9018_v21 }
 0x528   : > { %3713 = vst [vmem:[#allocation1 + $0x22] ss:$4 sm:$0xff] %v11001_v43  ;;  %v11009_v43 = vld [vmem:[#allocation138_spill] sm:$0xff] }
 0x529   : > { %3714 = vst [vmem:[#allocation1 + $0x23] ss:$4 sm:$0xff] %v11002_v20  ;;  %v2455_v20 = vadd.f32 %v2454_v22, %v2362_v40  ;;  %v11013_v40 = vld [vmem:[#allocation168_spill] sm:$0xff]  ;;  %v11014_v22 = vld [vmem:[#allocation169_spill] sm:$0xff] }
 0x52a   : > { %11003 = vst [vmem:[#allocation177_spill] sm:$0xff] %v9234_v19  ;;  %v3797_v19 = vpack.c.bf16 %v9180_v53, %v9128_v57  ;;  %v11010_v57 = vld [vmem:[#allocation140_spill] sm:$0xff] }
 0x52b   : > { %11004 = vst [vmem:[#allocation178_spill] sm:$0xff] %v9236_v51  ;;  %v11006_v51 = vld [vmem:[#allocation162_spill] sm:$0xff]  ;;  %6221 = vmatmul.msk.bf16.gmra.mxu0 %vm1743_vm0, %v3439_v1  ;;  %v3573_v1 = vld [vmem:[#allocation2 + $0x8a] sm:$0x3] }
 0x52c   : > { %v9244_v62 = vld.sshfl [vmem:[#allocation1] sm:$0xff pattern:$0x73625140]  ;;  %6227 = vmatmul.msk.bf16.vlgmr.msrb.gmra.mxu1 %vm1743_vm0, %v3797_v19  ;;  %v3135_v13 = vpop.f32.mrf.mxu3 }
 0x52d   : > { %3737 = vst [vmem:[#allocation1] ss:$4 sm:$0xff] %v11006_v51  ;;  %v2797_v21 = vpop.f32.mrf.mxu2  ;;  %v11011_v19 = vld [vmem:[#allocation141_spill] sm:$0xff]  ;;  %v9265_v51 = vpop.f32.mrf.mxu1 }
 0x52e   : > { %3738 = vst [vmem:[#allocation1 + $0x1] ss:$4 sm:$0xff] %v3577_v60  ;;  %v9259_v53 = vadd.f32 %v2797_v21, %v2455_v20  ;;  %v9262_v60 = vadd.f32 %v3135_v13, %v9091_v38  ;;  %v3575_v21 = vld [vmem:[#allocation2 + $0x9a] sm:$0x3]  ;;  %v3581_v38 = vld [vmem:[#allocation2 + $0xca] sm:$0x3] }
 0x52f   : > { %3739 = vst [vmem:[#allocation1 + $0x2] ss:$4 sm:$0xff] %v11007_v54  ;;  %v2367_v54 = vpop.f32.mrf.mxu0  ;;  %v11017_v13 = vld [vmem:[#allocation170_spill] sm:$0xff] }
 0x530   : > { %v9254_v18 = vld.sshfl [vmem:[#allocation1 + $0x20] sm:$0xff pattern:$0x73625140]  ;;  %3740 = vst [vmem:[#allocation1 + $0x3] ss:$4 sm:$0xff] %v11008_v58 }
 0x531   : > { %3721 = vst [vmem:[#allocation1 + $0x20] ss:$4 sm:$0xff] %v11009_v43 }
 0x532   : > { %3722 = vst [vmem:[#allocation1 + $0x21] ss:$4 sm:$0xff] %v11010_v57 }
 0x533   : > { %3723 = vst [vmem:[#allocation1 + $0x22] ss:$4 sm:$0xff] %v11011_v19 }
 0x534   : > { %3724 = vst [vmem:[#allocation1 + $0x23] ss:$4 sm:$0xff] %v3573_v1  ;;  %v9273_v20 = vpop.f32.mrf.mxu3  ;;  %v3440_v1 = vpack.c.bf16 %v9093_v63, %v9037_v24  ;;  %v3583_v24 = vld [vmem:[#allocation2 + $0xda] sm:$0x3] }
 0x535   : > { %11012 = vst [vmem:[#allocation180_spill] sm:$0xff] %v9265_v51  ;;  %v9271_v43 = vpop.f32.mrf.mxu2  ;;  %v3798_v51 = vpack.c.bf16 %v9203_v27, %v9154_v35 }
 0x536   : > { %11015 = vst [vmem:[#allocation181_spill] sm:$0xff] %v9271_v43  ;;  %v11019_v43 = vld [vmem:[#allocation148_spill] sm:$0xff] }
 0x537   : > { %v9267_v58 = vld.sshfl [vmem:[#allocation1] sm:$0xff pattern:$0x73625140]  ;;  %11016 = vst [vmem:[#allocation182_spill] sm:$0xff] %v9273_v20  ;;  %v9284_v20 = vpop.f32.mrf.mxu0 }
 0x538   : > { %3747 = vst [vmem:[#allocation1] ss:$4 sm:$0xff] %v11013_v40  ;;  %v11018_v40 = vld [vmem:[#allocation146_spill] sm:$0xff] }
 0x539   : > { %3748 = vst [vmem:[#allocation1 + $0x1] ss:$4 sm:$0xff] %v11014_v22  ;;  %v2459_v22 = vpop.f32.mrf.mxu1 }
 0x53a   : > { %3749 = vst [vmem:[#allocation1 + $0x2] ss:$4 sm:$0xff] %v11017_v13  ;;  %v11021_v13 = vld [vmem:[#allocation161_spill] sm:$0xff] }
 0x53b   : > { %v9276_v57 = vld.sshfl [vmem:[#allocation1 + $0x20] sm:$0xff pattern:$0x73625140]  ;;  %3750 = vst [vmem:[#allocation1 + $0x3] ss:$4 sm:$0xff] %v3581_v38  ;;  %6222 = vmatmul.msk.bf16.gmra.mxu0 %vm1743_vm0, %v3440_v1 }
 0x53c   : > { %3731 = vst [vmem:[#allocation1 + $0x20] ss:$4 sm:$0xff] %v3575_v21  ;;  %6228 = vmatmul.msk.bf16.gmra.mxu1 %vm1743_vm0, %v3798_v51  ;;  %v2460_v21 = vadd.f32 %v2459_v22, %v2367_v54  ;;  %v3140_v19 = vpop.f32.mrf.mxu3  ;;  %v11022_v51 = vld [vmem:[#allocation164_spill] sm:$0xff]  ;;  %v11023_v54 = vld [vmem:[#allocation154_spill] sm:$0xff] }
 0x53d   : > { %3732 = vst [vmem:[#allocation1 + $0x21] ss:$4 sm:$0xff] %v11018_v40  ;;  %v2802_v38 = vpop.f32.mrf.mxu2  ;;  %v9294_v27 = vadd.f32 %v3140_v19, %v9126_v7 }
 0x53e   : > { %3733 = vst [vmem:[#allocation1 + $0x22] ss:$4 sm:$0xff] %v11019_v43  ;;  %v9291_v35 = vadd.f32 %v2802_v38, %v2460_v21  ;;  %v11028_v38 = vld [vmem:[#allocation166_spill] sm:$0xff] }
 0x53f   : > { %11020 = vst [vmem:[#allocation146_spill] sm:$0xff] %v9284_v20  ;;  %v3579_v20 = vld [vmem:[#allocation2 + $0xba] sm:$0x3]  ;;  %v2372_v21 = vpop.f32.mrf.mxu0 }
 0x540   : > { %3734 = vst [vmem:[#allocation1 + $0x23] ss:$4 sm:$0xff] %v11021_v13  ;;  %v11025_v13 = vld [vmem:[#allocation155_spill] sm:$0xff] }
 0x541   : > { %v9302_v22 = vpop.f32.mrf.mxu1 }
 0x542   : > { %v9289_v63 = vld.sshfl [vmem:[#allocation1] sm:$0xff pattern:$0x73625140]  ;;  %11024 = vst [vmem:[#allocation148_spill] sm:$0xff] %v9302_v22  ;;  %v9320_v22 = vld [vmem:[#allocation2 + $0x102] sm:$0xff] }
 0x543   : > { %3757 = vst [vmem:[#allocation1] ss:$4 sm:$0xff] %v3583_v24  ;;  %v3441_v24 = vpack.c.bf16 %v9115_v32, %v9058_v23 }
 0x544   : > { %3758 = vst [vmem:[#allocation1 + $0x1] ss:$4 sm:$0xff] %v8708_v8  ;;  %v9307_v19 = vpop.f32.mrf.mxu3  ;;  %v11031_v8 = vld [vmem:[#allocation160_spill] sm:$0xff] }
 0x545   : > { %3759 = vst [vmem:[#allocation1 + $0x2] ss:$4 sm:$0xff] %v8760_v30  ;;  %v9305_v7 = vpop.f32.mrf.mxu2 }
 0x546   : > { %3760 = vst [vmem:[#allocation1 + $0x3] ss:$4 sm:$0xff] %v11022_v51  ;;  %v3799_v51 = vpack.c.bf16 %v9228_v33, %v9170_v17 }
 0x547   : > { %v9298_v1 = vld.sshfl [vmem:[#allocation1 + $0x20] sm:$0xff pattern:$0x73625140]  ;;  %11026 = vst [vmem:[#allocation154_spill] sm:$0xff] %v9305_v7 }
 0x548   : > { %3741 = vst [vmem:[#allocation1 + $0x20] ss:$4 sm:$0xff] %v11023_v54 }
 0x549   : > { %3742 = vst [vmem:[#allocation1 + $0x21] ss:$4 sm:$0xff] %v11025_v13  ;;  %v2464_v7 = vpop.f32.mrf.mxu1 }
 0x54a   : > { %3743 = vst [vmem:[#allocation1 + $0x22] ss:$4 sm:$0xff] %v3579_v20  ;;  %v3587_v20 = vld [vmem:[#allocation2 + $0xfa] sm:$0x3] }
 0x54b   : > { %11027 = vst [vmem:[#allocation155_spill] sm:$0xff] %v9307_v19  ;;  %6223 = vmatmul.msk.bf16.gmra.mxu0 %vm1743_vm0, %v3441_v24  ;;  %v2465_v19 = vadd.f32 %v2464_v7, %v2372_v21  ;;  %v11029_v24 = vld [vmem:[#allocation159_spill] sm:$0xff] }
 0x54c   : > { %3744 = vst [vmem:[#allocation1 + $0x23] ss:$4 sm:$0xff] %v11028_v38  ;;  %6229 = vmatmul.msk.bf16.gmra.mxu1 %vm1743_vm0, %v3799_v51  ;;  %v3145_v17 = vpop.f32.mrf.mxu3  ;;  %v11032_v21 = vld [vmem:[#allocation171_spill] sm:$0xff] }
 0x54d   : > { %v9314_v30 = vld.sshfl [vmem:[#allocation1] sm:$0xff pattern:$0x73625140]  ;;  %v2807_v32 = vpop.f32.mrf.mxu2  ;;  %v9329_v51 = vadd.f32 %v3145_v17, %v9160_v5  ;;  %v3442_v17 = vpack.c.bf16 %v9134_v55, %v9084_v61 }
 0x54e   : > { %3767 = vst [vmem:[#allocation1] ss:$4 sm:$0xff] %v8774_v10  ;;  %v9326_v33 = vadd.f32 %v2807_v32, %v2465_v19 }
 0x54f   : > { %3768 = vst [vmem:[#allocation1 + $0x1] ss:$4 sm:$0xff] %v8780_v49  ;;  %v9332_v49 = vpop.f32.mrf.mxu0 }
 0x550   : > { %3769 = vst [vmem:[#allocation1 + $0x2] ss:$4 sm:$0xff] %v3587_v20 }
 0x551   : > { %3770 = vst [vmem:[#allocation1 + $0x3] ss:$4 sm:$0xff] %v9320_v22 }
 0x552   : > { %11030 = vst [vmem:[#allocation166_spill] sm:$0xff] %v9332_v49  ;;  %v3585_v49 = vld [vmem:[#allocation2 + $0xea] sm:$0x3] }
 0x553   : > { %v9322_v23 = vld.sshfl [vmem:[#allocation1 + $0x20] sm:$0xff pattern:$0x73625140] }
 0x554   : > { %3751 = vst [vmem:[#allocation1 + $0x20] ss:$4 sm:$0xff] %v8682_v52  ;;  %v9339_v20 = vpop.f32.mrf.mxu3 }
 0x555   : > { %3752 = vst [vmem:[#allocation1 + $0x21] ss:$4 sm:$0xff] %v11029_v24 }
 0x556   : > { %3753 = vst [vmem:[#allocation1 + $0x22] ss:$4 sm:$0xff] %v11031_v8 }
 0x557   : > { %3754 = vst [vmem:[#allocation1 + $0x23] ss:$4 sm:$0xff] %v11032_v21 }
 0x558   : > { %v9336_v7 = vld.sshfl [vmem:[#allocation1] sm:$0xff pattern:$0x73625140]  ;;  %11033 = vst [vmem:[#allocation159_spill] sm:$0xff] %v9339_v20  ;;  %v3488_v5 = vpop.f32.mrf.mxu0 }
 0x559   : > { %4034 = vst [vmem:[#allocation1] ss:$4 sm:$0xff] %v7179_v36  ;;  %v9347_v32 = vadd.f32 %v3488_v5, %v9190_v31  ;;  %v3800_v36 = vpack.c.bf16 %v9254_v18, %v9193_v2  ;;  %v11035_v20 = vld [vmem:[#allocation165_spill] sm:$0xff]  ;;  %v11039_v18 = vld [vmem:[#allocation18_spill] sm:$0xff]  ;;  %v11040_v5 = vld [vmem:[#allocation20_spill] sm:$0xff] }
 0x55a   : > { %4036 = vst [vmem:[#allocation1 + $0x1] ss:$4 sm:$0xff] %v7182_v12  ;;  %v11036_v12 = vld [vmem:[#allocation167_spill] sm:$0xff]  ;;  %v3925_v2 = vld [vmem:[#allocation2 + $0x38] sm:$0x3] }
 0x55b   : > { %4038 = vst [vmem:[#allocation1 + $0x2] ss:$4 sm:$0xff] %v7255_v26  ;;  %6224 = vmatmul.msk.bf16.gmra.mxu0 %vm1743_vm0, %v3442_v17  ;;  %v10654_v17 = vrot.slane %v9320_v22, 4 }
 0x55c   : > { %4040 = vst [vmem:[#allocation1 + $0x3] ss:$4 sm:$0xff] %v7238_v42  ;;  %6230 = vmatmul.msk.bf16.gmra.mxu1 %vm1743_vm0, %v3800_v36  ;;  %v11037_v42 = vld [vmem:[#allocation173_spill] sm:$0xff]  ;;  %v3150_v26 = vpop.f32.mrf.mxu3 }
 0x55d   : > { %11034 = vst [vmem:[#allocation160_spill] sm:$0xff] %v9347_v32  ;;  %v9359_v31 = vadd.f32 %v3150_v26, %v9187_v39  ;;  %v11041_v32 = vld [vmem:[#allocation21_spill] sm:$0xff]  ;;  %v10655_v39 = vrot.slane %v9320_v22, 6 }
 0x55e   : > { %v9343_v19 = vld.sshfl [vmem:[#allocation1 + $0x20] sm:$0xff pattern:$0x73625140] }
 0x55f   : > { %3761 = vst [vmem:[#allocation1 + $0x20] ss:$4 sm:$0xff] %v11035_v20 }
 0x560   : > { %3762 = vst [vmem:[#allocation1 + $0x21] ss:$4 sm:$0xff] %v3585_v49  ;;  %v9361_v55 = vpop.f32.mrf.mxu0  ;;  %v10653_v49 = vrot.slane %v9320_v22, 2 }
 0x561   : > { %3763 = vst [vmem:[#allocation1 + $0x22] ss:$4 sm:$0xff] %v11036_v12 }
 0x562   : > { %3764 = vst [vmem:[#allocation1 + $0x23] ss:$4 sm:$0xff] %v11037_v42 }
 0x563   : > { %v4049_v61 = vld.sshfl [vmem:[#allocation1] sm:$0xff pattern:$0x73625140]  ;;  %11038 = vst [vmem:[#allocation171_spill] sm:$0xff] %v9361_v55 }
 0x564   : > { %4051 = vst [vmem:[#allocation1] ss:$4 sm:$0xff] %v11039_v18  ;;  %v9375_v26 = vpop.f32.mrf.mxu3 }
 0x565   : > { %4052 = vst [vmem:[#allocation1 + $0x1] ss:$4 sm:$0xff] %v3925_v2  ;;  %v3589_v2 = vld [vmem:[#allocation2 + $0x10a] sm:$0x3] }
 0x566   : > { %4053 = vst [vmem:[#allocation1 + $0x2] ss:$4 sm:$0xff] %v11040_v5 }
 0x567   : > { %4054 = vst [vmem:[#allocation1 + $0x3] ss:$4 sm:$0xff] %v11041_v32  ;;  %v3443_v32 = vpack.c.bf16 %v9163_v3, %v9102_v34 }
 0x568   : > { %11042 = vst [vmem:[#allocation165_spill] sm:$0xff] %v9375_v26  ;;  %v3493_v18 = vpop.f32.mrf.mxu0  ;;  %v11044_v26 = vld [vmem:[#allocation27_spill] sm:$0xff] }
 0x569   : > { %v9367_v36 = vld.sshfl [vmem:[#allocation1 + $0x20] sm:$0xff pattern:$0x73625140]  ;;  %v9380_v5 = vadd.f32 %v3493_v18, %v9222_v56 }
 0x56a   : > { %3771 = vst [vmem:[#allocation1 + $0x20] ss:$4 sm:$0xff] %v10653_v49  ;;  %v3801_v49 = vpack.c.bf16 %v9276_v57, %v9216_v16  ;;  %v11045_v16 = vld [vmem:[#allocation16_spill] sm:$0xff]  ;;  %v11046_v57 = vld [vmem:[#allocation17_spill] sm:$0xff] }
 0x56b   : > { %3772 = vst [vmem:[#allocation1 + $0x21] ss:$4 sm:$0xff] %v10654_v17  ;;  %6225 = vmatmul.msk.bf16.gmra.mxu0 %vm1743_vm0, %v3443_v32  ;;  %v11043_v17 = vld [vmem:[#allocation26_spill] sm:$0xff] }
 0x56c   : > { %3773 = vst [vmem:[#allocation1 + $0x22] ss:$4 sm:$0xff] %v10655_v39  ;;  %6231 = vmatmul.msk.bf16.gmra.mxu1 %vm1743_vm0, %v3801_v49  ;;  %v3929_v39 = vld [vmem:[#allocation2 + $0x58] sm:$0x3]  ;;  %v3155_v56 = vpop.f32.mrf.mxu3  ;;  %v3931_v49 = vld [vmem:[#allocation2 + $0x68] sm:$0x3] }
 0x56d   : > { %3774 = vst [vmem:[#allocation1 + $0x23] ss:$4 sm:$0xff] %v3589_v2  ;;  %v3923_v2 = vld [vmem:[#allocation2 + $0x28] sm:$0x3]  ;;  %v9394_v34 = vadd.f32 %v3155_v56, %v9219_v14  ;;  %v3802_v56 = vpack.c.bf16 %v9298_v1, %v9244_v62 }
 0x56e   : > { %v4059_v55 = vld.sshfl [vmem:[#allocation1] sm:$0xff pattern:$0x73625140] }
 0x56f   : > { %4061 = vst [vmem:[#allocation1] ss:$4 sm:$0xff] %v10861_v0  ;;  %v11047_v0 = vld [vmem:[#allocation19_spill] sm:$0xff] }
 0x570   : > { %4062 = vst [vmem:[#allocation1 + $0x1] ss:$4 sm:$0xff] %v11043_v17  ;;  %v9396_v3 = vpop.f32.mrf.mxu0 }
 0x571   : > { %4063 = vst [vmem:[#allocation1 + $0x2] ss:$4 sm:$0xff] %v11044_v26  ;;  %v6237_v26 = vld [vmem:[%s10310_s3 + $0x6] sm:$0x1] }
 0x572   : > { %4064 = vst [vmem:[#allocation1 + $0x3] ss:$4 sm:$0xff] %v3929_v39  ;;  %v4204_v14 = vsel %vm2314_vm8, %v6237_v26, 0  ;;  %v3927_v26 = vld [vmem:[#allocation2 + $0x48] sm:$0x3] }
 0x573   : > { %4213 = vmatpush.bf16.msrb.mxu2 %v4204_v14 }
 0x574   : > { %v9391_v18 = vld.sshfl [vmem:[#allocation1 + $0x20] sm:$0xff pattern:$0x73625140]  ;;  %v9406_v39 = vpop.f32.mrf.mxu3 }
 0x575   : > { %4042 = vst [vmem:[#allocation1 + $0x20] ss:$4 sm:$0xff] %v3923_v2 }
 0x576   : > { %4044 = vst [vmem:[#allocation1 + $0x21] ss:$4 sm:$0xff] %v11045_v16 }
 0x577   : > { %4046 = vst [vmem:[#allocation1 + $0x22] ss:$4 sm:$0xff] %v11046_v57  ;;  %v11048_v57 = vld [vmem:[#allocation33_spill] sm:$0xff] }
 0x578   : > { %4048 = vst [vmem:[#allocation1 + $0x23] ss:$4 sm:$0xff] %v11047_v0  ;;  %v3498_v32 = vpop.f32.mrf.mxu0  ;;  %v11049_v0 = vld [vmem:[#allocation22_spill] sm:$0xff] }
 0x579   : > { %v9401_v17 = vld.sshfl [vmem:[#allocation1] sm:$0xff pattern:$0x73625140]  ;;  %v9412_v2 = vadd.f32 %v3498_v32, %v9262_v60  ;;  %v3935_v32 = vld [vmem:[#allocation2 + $0x88] sm:$0x3] }
 0x57a   : > { %4071 = vst [vmem:[#allocation1] ss:$4 sm:$0xff] %v3931_v49 }
 0x57b   : > { %4072 = vst [vmem:[#allocation1 + $0x1] ss:$4 sm:$0xff] %v10869_v46  ;;  %v11050_v46 = vld [vmem:[#allocation23_spill] sm:$0xff] }
 0x57c   : > { %4073 = vst [vmem:[#allocation1 + $0x2] ss:$4 sm:$0xff] %v10870_v47  ;;  %6232 = vmatmul.msk.bf16.gmra.mxu1 %vm1743_vm0, %v3802_v56  ;;  %v11051_v47 = vld [vmem:[#allocation24_spill] sm:$0xff]  ;;  %v3160_v60 = vpop.f32.mrf.mxu3 }
 0x57d   : > { %4074 = vst [vmem:[#allocation1 + $0x3] ss:$4 sm:$0xff] %v11048_v57  ;;  %v9423_v14 = vadd.f32 %v3160_v60, %v9259_v53  ;;  %v11052_v56 = vld [vmem:[#allocation12_spill] sm:$0xff]  ;;  %v11055_v53 = vld [vmem:[#allocation30_spill] sm:$0xff] }
 0x57f   : > { %v4050_v16 = vld.sshfl [vmem:[#allocation1 + $0x20] sm:$0xff pattern:$0x73625140] }
 0x580   : > { %4055 = vst [vmem:[#allocation1 + $0x20] ss:$4 sm:$0xff] %v11049_v0  ;;  %v4161_v49 = vpack.c.bf16 %v4050_v16, %v4049_v61  ;;  %v9425_v62 = vpop.f32.mrf.mxu0  ;;  %v11053_v16 = vld [vmem:[#allocation28_spill] sm:$0xff]  ;;  %v11054_v0 = vld [vmem:[#allocation29_spill] sm:$0xff] }
 0x581   : > { %4056 = vst [vmem:[#allocation1 + $0x21] ss:$4 sm:$0xff] %v11050_v46 }
 0x582   : > { %4057 = vst [vmem:[#allocation1 + $0x22] ss:$4 sm:$0xff] %v3927_v26  ;;  %6238 = vmatmul.msk.bf16.vlgmr.msrb.gmra.mxu2 %vm1743_vm0, %v4161_v49 }
 0x583   : > { %4058 = vst [vmem:[#allocation1 + $0x23] ss:$4 sm:$0xff] %v11051_v47 }
 0x584   : > { %v9427_v1 = vld.sshfl [vmem:[#allocation1] sm:$0xff pattern:$0x73625140]  ;;  %v9433_v57 = vpop.f32.mrf.mxu3 }
 0x585   : > { %4081 = vst [vmem:[#allocation1] ss:$4 sm:$0xff] %v10873_v4 }
 0x586   : > { %4082 = vst [vmem:[#allocation1 + $0x1] ss:$4 sm:$0xff] %v10874_v45  ;;  %v3803_v45 = vpack.c.bf16 %v9322_v23, %v9267_v58  ;;  %v3933_v23 = vld [vmem:[#allocation2 + $0x78] sm:$0x3] }
 0x587   : > { %4083 = vst [vmem:[#allocation1 + $0x2] ss:$4 sm:$0xff] %v3935_v32  ;;  %v3804_v32 = vpack.c.bf16 %v9343_v19, %v9289_v63 }
 0x588   : > { %4084 = vst [vmem:[#allocation1 + $0x3] ss:$4 sm:$0xff] %v11052_v56  ;;  %v3503_v49 = vpop.f32.mrf.mxu0  ;;  %v11058_v56 = vld [vmem:[#allocation45_spill] sm:$0xff] }
 0x589   : > { %v9439_v4 = vadd.f32 %v3503_v49, %v9294_v27  ;;  %v3945_v49 = vld [vmem:[#allocation2 + $0xd8] sm:$0x3] }
 0x58a   : > { %v4060_v61 = vld.sshfl [vmem:[#allocation1 + $0x20] sm:$0xff pattern:$0x73625140] }
 0x58b   : > { %4065 = vst [vmem:[#allocation1 + $0x20] ss:$4 sm:$0xff] %v11053_v16  ;;  %v4162_v26 = vpack.c.bf16 %v4060_v61, %v4059_v55  ;;  %v11056_v55 = vld [vmem:[#allocation34_spill] sm:$0xff]  ;;  %v11059_v16 = vld [vmem:[#allocation37_spill] sm:$0xff] }
 0x58c   : > { %4066 = vst [vmem:[#allocation1 + $0x21] ss:$4 sm:$0xff] %v11054_v0  ;;  %6233 = vmatmul.msk.bf16.gmra.mxu1 %vm1743_vm0, %v3803_v45  ;;  %v3165_v47 = vpop.f32.mrf.mxu3  ;;  %v11061_v0 = vld [vmem:[#allocation39_spill] sm:$0xff]  ;;  %v11062_v45 = vld [vmem:[#allocation49_spill] sm:$0xff] }
 0x58d   : > { %4067 = vst [vmem:[#allocation1 + $0x22] ss:$4 sm:$0xff] %v11055_v53 }
 0x58e   : > { %4068 = vst [vmem:[#allocation1 + $0x23] ss:$4 sm:$0xff] %v10868_v25  ;;  %v9451_v25 = vadd.f32 %v3165_v47, %v9291_v35  ;;  %v11063_v47 = vld [vmem:[#allocation15_spill] sm:$0xff] }
 0x58f   : > { %v9444_v46 = vld.sshfl [vmem:[#allocation1] sm:$0xff pattern:$0x73625140] }
 0x590   : > { %4091 = vst [vmem:[#allocation1] ss:$4 sm:$0xff] %v10875_v59  ;;  %v9454_v58 = vpop.f32.mrf.mxu0  ;;  %v11057_v59 = vld [vmem:[#allocation14_spill] sm:$0xff] }
 0x591   : > { %4092 = vst [vmem:[#allocation1 + $0x1] ss:$4 sm:$0xff] %v10876_v6 }
 0x592   : > { %6239 = vmatmul.msk.bf16.gmra.mxu2 %vm1743_vm0, %v4162_v26  ;;  %4093 = vst [vmem:[#allocation1 + $0x2] ss:$4 sm:$0xff] %v10877_v15  ;;  %v3941_v15 = vld [vmem:[#allocation2 + $0xb8] sm:$0x3] }
 0x593   : > { %4094 = vst [vmem:[#allocation1 + $0x3] ss:$4 sm:$0xff] %v10871_v44 }
 0x594   : > { %v9459_v6 = vpop.f32.mrf.mxu3 }
 0x595   : > { %v4070_v27 = vld.sshfl [vmem:[#allocation1 + $0x20] sm:$0xff pattern:$0x73625140] }
 0x596   : > { %4075 = vst [vmem:[#allocation1 + $0x20] ss:$4 sm:$0xff] %v11056_v55  ;;  %v11065_v55 = vld [vmem:[#allocation44_spill] sm:$0xff] }
 0x597   : > { %4076 = vst [vmem:[#allocation1 + $0x21] ss:$4 sm:$0xff] %v3933_v23 }
 0x598   : > { %4077 = vst [vmem:[#allocation1 + $0x22] ss:$4 sm:$0xff] %v11057_v59  ;;  %v3508_v35 = vpop.f32.mrf.mxu0  ;;  %v3947_v59 = vld [vmem:[#allocation2 + $0xe8] sm:$0x3] }
 0x599   : > { %4078 = vst [vmem:[#allocation1 + $0x23] ss:$4 sm:$0xff] %v10872_v9  ;;  %v9465_v44 = vadd.f32 %v3508_v35, %v9329_v51  ;;  %v4163_v9 = vpack.c.bf16 %v4070_v27, %v9401_v17  ;;  %v3937_v51 = vld [vmem:[#allocation2 + $0x98] sm:$0x3]  ;;  %v3939_v17 = vld [vmem:[#allocation2 + $0xa8] sm:$0x3] }
 0x59a   : > { %v9461_v60 = vld.sshfl [vmem:[#allocation1] sm:$0xff pattern:$0x73625140]  ;;  %v11066_v35 = vld [vmem:[#allocation56_spill] sm:$0xff] }
 0x59b   : > { %4101 = vst [vmem:[#allocation1] ss:$4 sm:$0xff] %v7938_v41  ;;  %v11060_v41 = vld [vmem:[#allocation38_spill] sm:$0xff] }
 0x59c   : > { %4102 = vst [vmem:[#allocation1 + $0x1] ss:$4 sm:$0xff] %v3941_v15  ;;  %6234 = vmatmul.msk.bf16.gmra.mxu1 %vm1743_vm0, %v3804_v32  ;;  %v3170_v53 = vpop.f32.mrf.mxu3  ;;  %v11067_v32 = vld [vmem:[#allocation57_spill] sm:$0xff] }
 0x59d   : > { %4103 = vst [vmem:[#allocation1 + $0x2] ss:$4 sm:$0xff] %v7955_v28  ;;  %v9478_v28 = vadd.f32 %v3170_v53, %v9326_v33  ;;  %v11064_v33 = vld [vmem:[#allocation43_spill] sm:$0xff] }
 0x59e   : > { %4104 = vst [vmem:[#allocation1 + $0x3] ss:$4 sm:$0xff] %v11058_v56 }
 0x5a0   : > { %v4080_v61 = vld.sshfl [vmem:[#allocation1 + $0x20] sm:$0xff pattern:$0x73625140]  ;;  %v9480_v63 = vpop.f32.mrf.mxu0 }
 0x5a1   : > { %4085 = vst [vmem:[#allocation1 + $0x20] ss:$4 sm:$0xff] %v11059_v16  ;;  %v11070_v16 = vld [vmem:[#allocation47_spill] sm:$0xff] }
 0x5a2   : > { %4086 = vst [vmem:[#allocation1 + $0x21] ss:$4 sm:$0xff] %v11060_v41  ;;  %6240 = vmatmul.msk.bf16.gmra.mxu2 %vm1743_vm0, %v4163_v9  ;;  %v3943_v9 = vld [vmem:[#allocation2 + $0xc8] sm:$0x3] }
 0x5a3   : > { %4087 = vst [vmem:[#allocation1 + $0x22] ss:$4 sm:$0xff] %v11061_v0  ;;  %v11072_v0 = vld [vmem:[#allocation25_spill] sm:$0xff] }
 0x5a4   : > { %4088 = vst [vmem:[#allocation1 + $0x23] ss:$4 sm:$0xff] %v3937_v51  ;;  %v3952_v51 = vld [vmem:[#allocation2 + $0x110] sm:$0xff]  ;;  %v11073_v53 = vrot.slane %v11072_v0, 4 }
 0x5a5   : > { %v9482_v19 = vld.sshfl [vmem:[#allocation1] sm:$0xff pattern:$0x73625140] }
 0x5a6   : > { %4111 = vst [vmem:[#allocation1] ss:$4 sm:$0xff] %v10879_v29  ;;  %v3805_v29 = vpack.c.bf16 %v9367_v36, %v9314_v30  ;;  %v11068_v30 = vld [vmem:[#allocation58_spill] sm:$0xff] }
 0x5a7   : > { %4112 = vst [vmem:[#allocation1 + $0x1] ss:$4 sm:$0xff] %v10880_v11  ;;  %v4164_v11 = vpack.c.bf16 %v4080_v61, %v9427_v1  ;;  %v11069_v36 = vld [vmem:[#allocation46_spill] sm:$0xff]  ;;  %v11071_v1 = vld [vmem:[#allocation48_spill] sm:$0xff] }
 0x5a8   : > { %4113 = vst [vmem:[#allocation1 + $0x2] ss:$4 sm:$0xff] %v11062_v45  ;;  %v3513_v27 = vpop.f32.mrf.mxu0  ;;  %v3951_v45 = vld [vmem:[#allocation2 + $0x108] sm:$0x3] }
 0x5a9   : > { %4114 = vst [vmem:[#allocation1 + $0x3] ss:$4 sm:$0xff] %v3945_v49  ;;  %v9490_v23 = vadd.f32 %v3513_v27, %v9359_v31  ;;  %v3806_v49 = vpack.c.bf16 %v9391_v18, %v9336_v7  ;;  %v11078_v7 = vld [vmem:[#allocation55_spill] sm:$0xff] }
 0x5ab   : > { %v4090_v26 = vld.sshfl [vmem:[#allocation1 + $0x20] sm:$0xff pattern:$0x73625140] }
 0x5ac   : > { %4095 = vst [vmem:[#allocation1 + $0x20] ss:$4 sm:$0xff] %v3939_v17  ;;  %6235 = vmatmul.msk.bf16.gmra.mxu1 %vm1743_vm0, %v3805_v29  ;;  %v4165_v27 = vpack.c.bf16 %v4090_v26, %v9444_v46  ;;  %v11075_v29 = vld [vmem:[#allocation52_spill] sm:$0xff]  ;;  %v6259_v46 = vld [vmem:[%s10310_s3 + $0x8] sm:$0x1] }
 0x5ad   : > { %4096 = vst [vmem:[#allocation1 + $0x21] ss:$4 sm:$0xff] %v11063_v47  ;;  %v11074_v47 = vrot.slane %v11072_v0, 6 }
 0x5ae   : > { %4097 = vst [vmem:[#allocation1 + $0x22] ss:$4 sm:$0xff] %v11064_v33 }
 0x5af   : > { %4098 = vst [vmem:[#allocation1 + $0x23] ss:$4 sm:$0xff] %v11065_v55  ;;  %v11077_v55 = vld [vmem:[#allocation54_spill] sm:$0xff] }
 0x5b0   : > { %v9497_v15 = vld.sshfl [vmem:[#allocation1] sm:$0xff pattern:$0x73625140]  ;;  %v9502_v31 = vpop.f32.mrf.mxu0 }
 0x5b1   : > { %4121 = vst [vmem:[#allocation1] ss:$4 sm:$0xff] %v3947_v59  ;;  %v4930_v59 = vsel %vm2314_vm8, %v6259_v46, 0  ;;  %v11086_v46 = vld [vmem:[#allocation75_spill] sm:$0xff] }
 0x5b2   : > { %6241 = vmatmul.msk.bf16.gmra.mxu2 %vm1743_vm0, %v4164_v11  ;;  %4122 = vst [vmem:[#allocation1 + $0x1] ss:$4 sm:$0xff] %v11066_v35  ;;  %v6248_v11 = vld [vmem:[%s10310_s3 + $0x7] sm:$0x1]  ;;  %4939 = vmatpush.bf16.msra.mxu0 %v4930_v59 }
 0x5b3   : > { %4123 = vst [vmem:[#allocation1 + $0x2] ss:$4 sm:$0xff] %v11067_v32  ;;  %v4567_v26 = vsel %vm2314_vm8, %v6248_v11, 0  ;;  %v11079_v32 = vld [vmem:[#allocation61_spill] sm:$0xff] }
 0x5b4   : > { %4124 = vst [vmem:[#allocation1 + $0x3] ss:$4 sm:$0xff] %v11068_v30  ;;  %4576 = vmatpush.bf16.msrb.mxu3 %v4567_v26  ;;  %v11080_v30 = vld [vmem:[#allocation62_spill] sm:$0xff]  ;;  %v11087_v59 = vld [vmem:[#allocation77_spill] sm:$0xff] }
 0x5b6   : > { %v4100_v56 = vld.sshfl [vmem:[#allocation1 + $0x20] sm:$0xff pattern:$0x73625140] }
 0x5b7   : > { %4105 = vst [vmem:[#allocation1 + $0x20] ss:$4 sm:$0xff] %v11069_v36  ;;  %v11081_v36 = vld [vmem:[#allocation70_spill] sm:$0xff] }
 0x5b8   : > { %4106 = vst [vmem:[#allocation1 + $0x21] ss:$4 sm:$0xff] %v11070_v16  ;;  %v3518_v41 = vpop.f32.mrf.mxu0  ;;  %v11082_v16 = vld [vmem:[#allocation71_spill] sm:$0xff] }
 0x5b9   : > { %4107 = vst [vmem:[#allocation1 + $0x22] ss:$4 sm:$0xff] %v3943_v9  ;;  %v9513_v17 = vadd.f32 %v3518_v41, %v9394_v34  ;;  %v11076_v34 = vld [vmem:[#allocation53_spill] sm:$0xff]  ;;  %v11083_v41 = vld [vmem:[#allocation59_spill] sm:$0xff] }
 0x5ba   : > { %4108 = vst [vmem:[#allocation1 + $0x23] ss:$4 sm:$0xff] %v11071_v1  ;;  %v3949_v1 = vld [vmem:[#allocation2 + $0xf8] sm:$0x3] }
 0x5bb   : > { %v9508_v61 = vld.sshfl [vmem:[#allocation1] sm:$0xff pattern:$0x73625140] }
 0x5bc   : > { %4131 = vst [vmem:[#allocation1] ss:$4 sm:$0xff] %v11073_v53  ;;  %6236 = vmatmul.msk.bf16.gmra.mxu1 %vm1743_vm0, %v3806_v49 }
 0x5bd   : > { %4132 = vst [vmem:[#allocation1 + $0x1] ss:$4 sm:$0xff] %v11074_v47  ;;  %v4166_v47 = vpack.c.bf16 %v4100_v56, %v9461_v60 }
 0x5be   : > { %4133 = vst [vmem:[#allocation1 + $0x2] ss:$4 sm:$0xff] %v3951_v45  ;;  %v11084_v45 = vrot.slane %v11072_v0, 2 }
 0x5bf   : > { %4134 = vst [vmem:[#allocation1 + $0x3] ss:$4 sm:$0xff] %v3952_v51 }
 0x5c0   : > { %v9526_v18 = vpop.f32.mrf.mxu0 }
 0x5c1   : > { %v4110_v33 = vld.sshfl [vmem:[#allocation1 + $0x20] sm:$0xff pattern:$0x73625140] }
 0x5c2   : > { %4115 = vst [vmem:[#allocation1 + $0x20] ss:$4 sm:$0xff] %v11075_v29  ;;  %6242 = vmatmul.msk.bf16.gmra.mxu2 %vm1743_vm0, %v4165_v27  ;;  %v4031_v29 = vrot.slane %v3952_v51, 2 }
 0x5c3   : > { %4116 = vst [vmem:[#allocation1 + $0x21] ss:$4 sm:$0xff] %v11076_v34  ;;  %v4288_v34 = vld [vmem:[#allocation2 + $0x39] sm:$0x3] }
 0x5c4   : > { %4117 = vst [vmem:[#allocation1 + $0x22] ss:$4 sm:$0xff] %v11077_v55  ;;  %v11085_v55 = vld [vmem:[#allocation66_spill] sm:$0xff] }
 0x5c5   : > { %4118 = vst [vmem:[#allocation1 + $0x23] ss:$4 sm:$0xff] %v11078_v7  ;;  %v4032_v7 = vrot.slane %v3952_v51, 4 }
 0x5c6   : > { %v9536_v35 = vld.sshfl [vmem:[#allocation1] sm:$0xff pattern:$0x73625140] }
 0x5c7   : > { %4397 = vst [vmem:[#allocation1] ss:$4 sm:$0xff] %v11079_v32 }
 0x5c8   : > { %4399 = vst [vmem:[#allocation1 + $0x1] ss:$4 sm:$0xff] %v11080_v30  ;;  %v3523_v53 = vpop.f32.mrf.mxu0  ;;  %v11088_v30 = vld [vmem:[#allocation68_spill] sm:$0xff] }
 0x5c9   : > { %4401 = vst [vmem:[#allocation1 + $0x2] ss:$4 sm:$0xff] %v11081_v36  ;;  %v9544_v49 = vadd.f32 %v3523_v53, %v9423_v14  ;;  %v4033_v14 = vrot.slane %v3952_v51, 6  ;;  %v4167_v36 = vpack.c.bf16 %v4110_v33, %v9482_v19  ;;  %v11089_v51 = vld [vmem:[#allocation69_spill] sm:$0xff]  ;;  %v4294_v19 = vld [vmem:[#allocation2 + $0x69] sm:$0x3] }
 0x5ca   : > { %4403 = vst [vmem:[#allocation1 + $0x3] ss:$4 sm:$0xff] %v11082_v16  ;;  %v4286_v16 = vld [vmem:[#allocation2 + $0x29] sm:$0x3] }
 0x5cc   : > { %v4120_v9 = vld.sshfl [vmem:[#allocation1 + $0x20] sm:$0xff pattern:$0x73625140] }
 0x5cd   : > { %4125 = vst [vmem:[#allocation1 + $0x20] ss:$4 sm:$0xff] %v11083_v41  ;;  %v11090_v41 = vld [vmem:[#allocation84_spill] sm:$0xff] }
 0x5ce   : > { %4126 = vst [vmem:[#allocation1 + $0x21] ss:$4 sm:$0xff] %v3949_v1  ;;  %v4292_v1 = vld [vmem:[#allocation2 + $0x59] sm:$0x3] }
 0x5cf   : > { %4127 = vst [vmem:[#allocation1 + $0x22] ss:$4 sm:$0xff] %v11072_v0  ;;  %v3953_v0 = vld [vmem:[#allocation2 + $0x118] sm:$0x3] }
 0x5d0   : > { %4128 = vst [vmem:[#allocation1 + $0x23] ss:$4 sm:$0xff] %v11084_v45  ;;  %v9552_v11 = vpop.f32.mrf.mxu0  ;;  %v11091_v45 = vld [vmem:[#allocation63_spill] sm:$0xff] }
 0x5d1   : > { %v4412_v27 = vld.sshfl [vmem:[#allocation1] sm:$0xff pattern:$0x73625140] }
 0x5d2   : > { %6243 = vmatmul.msk.bf16.gmra.mxu2 %vm1743_vm0, %v4166_v47  ;;  %4414 = vst [vmem:[#allocation1] ss:$4 sm:$0xff] %v11085_v55  ;;  %v11095_v55 = vld [vmem:[#allocation90_spill] sm:$0xff] }
 0x5d3   : > { %4415 = vst [vmem:[#allocation1 + $0x1] ss:$4 sm:$0xff] %v4288_v34  ;;  %v11094_v34 = vld [vmem:[#allocation76_spill] sm:$0xff] }
 0x5d4   : > { %4416 = vst [vmem:[#allocation1 + $0x2] ss:$4 sm:$0xff] %v11086_v46  ;;  %v11096_v46 = vld [vmem:[#allocation91_spill] sm:$0xff] }
 0x5d5   : > { %4417 = vst [vmem:[#allocation1 + $0x3] ss:$4 sm:$0xff] %v11087_v59 }
 0x5d7   : > { %v4130_v26 = vld.sshfl [vmem:[#allocation1 + $0x20] sm:$0xff pattern:$0x73625140] }
 0x5d8   : > { %4135 = vst [vmem:[#allocation1 + $0x20] ss:$4 sm:$0xff] %v4031_v29  ;;  %v3528_v60 = vpop.f32.mrf.mxu0  ;;  %v11093_v29 = vld [vmem:[#allocation65_spill] sm:$0xff] }
 0x5d9   : > { %4136 = vst [vmem:[#allocation1 + $0x21] ss:$4 sm:$0xff] %v4032_v7  ;;  %v9557_v56 = vadd.f32 %v3528_v60, %v9451_v25  ;;  %v11092_v25 = vld [vmem:[#allocation64_spill] sm:$0xff] }
 0x5da   : > { %4137 = vst [vmem:[#allocation1 + $0x22] ss:$4 sm:$0xff] %v4033_v14 }
 0x5db   : > { %4138 = vst [vmem:[#allocation1 + $0x23] ss:$4 sm:$0xff] %v3953_v0  ;;  %v11097_v0 = vld [vmem:[#allocation78_spill] sm:$0xff] }
 0x5dc   : > { %v4422_v32 = vld.sshfl [vmem:[#allocation1] sm:$0xff pattern:$0x73625140] }
 0x5dd   : > { %4424 = vst [vmem:[#allocation1] ss:$4 sm:$0xff] %v11088_v30  ;;  %v4290_v30 = vld [vmem:[#allocation2 + $0x49] sm:$0x3] }
 0x5de   : > { %4425 = vst [vmem:[#allocation1 + $0x1] ss:$4 sm:$0xff] %v11089_v51  ;;  %v4168_v51 = vpack.c.bf16 %v4120_v9, %v9497_v15  ;;  %v11106_v15 = vld [vmem:[#allocation74_spill] sm:$0xff] }
 0x5df   : > { %4426 = vst [vmem:[#allocation1 + $0x2] ss:$4 sm:$0xff] %v11090_v41  ;;  %v11100_v41 = vld [vmem:[#allocation82_spill] sm:$0xff] }
 0x5e0   : > { %4427 = vst [vmem:[#allocation1 + $0x3] ss:$4 sm:$0xff] %v4292_v1  ;;  %v9568_v47 = vpop.f32.mrf.mxu0 }
 0x5e2   : > { %v9563_v53 = vld.sshfl [vmem:[#allocation1 + $0x20] sm:$0xff pattern:$0x73625140]  ;;  %6244 = vmatmul.msk.bf16.gmra.mxu2 %vm1743_vm0, %v4167_v36  ;;  %v11098_v36 = vld [vmem:[#allocation79_spill] sm:$0xff] }
 0x5e3   : > { %4405 = vst [vmem:[#allocation1 + $0x20] ss:$4 sm:$0xff] %v4286_v16  ;;  %v11099_v16 = vld [vmem:[#allocation67_spill] sm:$0xff] }
 0x5e4   : > { %4407 = vst [vmem:[#allocation1 + $0x21] ss:$4 sm:$0xff] %v11091_v45  ;;  %v11101_v45 = vld [vmem:[#allocation83_spill] sm:$0xff] }
 0x5e5   : > { %4409 = vst [vmem:[#allocation1 + $0x22] ss:$4 sm:$0xff] %v11092_v25  ;;  %v11102_v25 = vld [vmem:[#allocation86_spill] sm:$0xff] }
 0x5e6   : > { %4411 = vst [vmem:[#allocation1 + $0x23] ss:$4 sm:$0xff] %v11093_v29  ;;  %v11103_v29 = vld [vmem:[#allocation72_spill] sm:$0xff] }
 0x5e7   : > { %v4432_v33 = vld.sshfl [vmem:[#allocation1] sm:$0xff pattern:$0x73625140] }
 0x5e8   : > { %4434 = vst [vmem:[#allocation1] ss:$4 sm:$0xff] %v4294_v19  ;;  %v3533_v14 = vpop.f32.mrf.mxu0  ;;  %v11104_v19 = vld [vmem:[#allocation85_spill] sm:$0xff] }
 0x5e9   : > { %4435 = vst [vmem:[#allocation1 + $0x1] ss:$4 sm:$0xff] %v11094_v34  ;;  %v9576_v60 = vadd.f32 %v3533_v14, %v9478_v28  ;;  %v11105_v34 = vld [vmem:[#allocation73_spill] sm:$0xff]  ;;  %v11107_v14 = vld [vmem:[#allocation88_spill] sm:$0xff] }
 0x5ea   : > { %4436 = vst [vmem:[#allocation1 + $0x2] ss:$4 sm:$0xff] %v11095_v55 }
 0x5eb   : > { %4437 = vst [vmem:[#allocation1 + $0x3] ss:$4 sm:$0xff] %v11096_v46  ;;  %v11108_v46 = vld [vmem:[#allocation89_spill] sm:$0xff] }
 0x5ed   : > { %v4413_v7 = vld.sshfl [vmem:[#allocation1 + $0x20] sm:$0xff pattern:$0x73625140] }
 0x5ee   : > { %v4524_v59 = vpack.c.bf16 %v4413_v7, %v4412_v27  ;;  %4418 = vst [vmem:[#allocation1 + $0x20] ss:$4 sm:$0xff] %v11097_v0  ;;  %v4298_v27 = vld [vmem:[#allocation2 + $0x89] sm:$0x3]  ;;  %v4169_v7 = vpack.c.bf16 %v4130_v26, %v9508_v61  ;;  %v4304_v26 = vld [vmem:[#allocation2 + $0xb9] sm:$0x3] }
 0x5ef   : > { %4419 = vst [vmem:[#allocation1 + $0x21] ss:$4 sm:$0xff] %v11098_v36  ;;  %v4296_v36 = vld [vmem:[#allocation2 + $0x79] sm:$0x3] }
 0x5f0   : > { %6249 = vmatmul.msk.bf16.vlgmr.msrb.gmra.mxu3 %vm1743_vm0, %v4524_v59  ;;  %4420 = vst [vmem:[#allocation1 + $0x22] ss:$4 sm:$0xff] %v4290_v30  ;;  %v11109_v59 = vld [vmem:[#allocation102_spill] sm:$0xff]  ;;  %v11110_v30 = vld [vmem:[#allocation103_spill] sm:$0xff] }
 0x5f1   : > { %4421 = vst [vmem:[#allocation1 + $0x23] ss:$4 sm:$0xff] %v11099_v16  ;;  %v11113_v16 = vld [vmem:[#allocation81_spill] sm:$0xff] }
 0x5f2   : > { %6245 = vmatmul.msk.bf16.gmra.mxu2 %vm1743_vm0, %v4168_v51  ;;  %v4442_v1 = vld.sshfl [vmem:[#allocation1] sm:$0xff pattern:$0x73625140]  ;;  %v11111_v51 = vld [vmem:[#allocation92_spill] sm:$0xff] }
 0x5f3   : > { %4444 = vst [vmem:[#allocation1] ss:$4 sm:$0xff] %v11100_v41  ;;  %v11114_v41 = vld [vmem:[#allocation96_spill] sm:$0xff] }
 0x5f4   : > { %4445 = vst [vmem:[#allocation1 + $0x1] ss:$4 sm:$0xff] %v11101_v45 }
 0x5f5   : > { %4446 = vst [vmem:[#allocation1 + $0x2] ss:$4 sm:$0xff] %v4298_v27  ;;  %v11115_v27 = vld [vmem:[#allocation107_spill] sm:$0xff] }
 0x5f6   : > { %4447 = vst [vmem:[#allocation1 + $0x3] ss:$4 sm:$0xff] %v11102_v25  ;;  %v11116_v25 = vld [vmem:[#allocation109_spill] sm:$0xff] }
 0x5f8   : > { %v4423_v28 = vld.sshfl [vmem:[#allocation1 + $0x20] sm:$0xff pattern:$0x73625140] }
 0x5f9   : > { %4428 = vst [vmem:[#allocation1 + $0x20] ss:$4 sm:$0xff] %v11103_v29  ;;  %v4525_v9 = vpack.c.bf16 %v4423_v28, %v4422_v32  ;;  %v11112_v32 = vld [vmem:[#allocation80_spill] sm:$0xff]  ;;  %v11117_v29 = vld [vmem:[#allocation97_spill] sm:$0xff] }
 0x5fa   : > { %4429 = vst [vmem:[#allocation1 + $0x21] ss:$4 sm:$0xff] %v11104_v19  ;;  %v11118_v19 = vld [vmem:[#allocation98_spill] sm:$0xff] }
 0x5fb   : > { %4430 = vst [vmem:[#allocation1 + $0x22] ss:$4 sm:$0xff] %v11105_v34  ;;  %v4170_v34 = vpack.c.bf16 %v9563_v53, %v9536_v35  ;;  %v11123_v35 = vld [vmem:[#allocation93_spill] sm:$0xff]  ;;  %v11124_v53 = vld [vmem:[#allocation94_spill] sm:$0xff] }
 0x5fc   : > { %4431 = vst [vmem:[#allocation1 + $0x23] ss:$4 sm:$0xff] %v11106_v15  ;;  %v4300_v15 = vld [vmem:[#allocation2 + $0x99] sm:$0x3] }
 0x5fd   : > { %v9590_v55 = vld.sshfl [vmem:[#allocation1] sm:$0xff pattern:$0x73625140] }
 0x5fe   : > { %4454 = vst [vmem:[#allocation1] ss:$4 sm:$0xff] %v11107_v14  ;;  %v11121_v14 = vld [vmem:[#allocation101_spill] sm:$0xff] }
 0x5ff   : > { %4455 = vst [vmem:[#allocation1 + $0x1] ss:$4 sm:$0xff] %v11108_v46  ;;  %v4302_v46 = vld [vmem:[#allocation2 + $0xa9] sm:$0x3] }
 0x600   : > { %6250 = vmatmul.msk.bf16.gmra.mxu3 %vm1743_vm0, %v4525_v9  ;;  %4456 = vst [vmem:[#allocation1 + $0x2] ss:$4 sm:$0xff] %v11109_v59  ;;  %v11119_v9 = vld [vmem:[#allocation87_spill] sm:$0xff]  ;;  %v4308_v59 = vld [vmem:[#allocation2 + $0xd9] sm:$0x3] }
 0x601   : > { %4457 = vst [vmem:[#allocation1 + $0x3] ss:$4 sm:$0xff] %v11110_v30 }
 0x602   : > { %6246 = vmatmul.msk.bf16.gmra.mxu2 %vm1743_vm0, %v4169_v7 }
 0x603   : > { %v4433_v0 = vld.sshfl [vmem:[#allocation1 + $0x20] sm:$0xff pattern:$0x73625140] }
 0x604   : > { %4438 = vst [vmem:[#allocation1 + $0x20] ss:$4 sm:$0xff] %v11111_v51  ;;  %v4526_v45 = vpack.c.bf16 %v4433_v0, %v4432_v33  ;;  %v11120_v33 = vld [vmem:[#allocation100_spill] sm:$0xff] }
 0x605   : > { %4439 = vst [vmem:[#allocation1 + $0x21] ss:$4 sm:$0xff] %v4296_v36  ;;  %v11122_v0 = vld [vmem:[#allocation112_spill] sm:$0xff]  ;;  %v11125_v36 = vld [vmem:[#allocation95_spill] sm:$0xff] }
 0x606   : > { %4440 = vst [vmem:[#allocation1 + $0x22] ss:$4 sm:$0xff] %v11112_v32  ;;  %v4310_v32 = vld [vmem:[#allocation2 + $0xe9] sm:$0x3] }
 0x607   : > { %4441 = vst [vmem:[#allocation1 + $0x23] ss:$4 sm:$0xff] %v11113_v16 }
 0x608   : > { %v9602_v61 = vld.sshfl [vmem:[#allocation1] sm:$0xff pattern:$0x73625140] }
 0x609   : > { %4464 = vst [vmem:[#allocation1] ss:$4 sm:$0xff] %v11114_v41 }
 0x60a   : > { %4465 = vst [vmem:[#allocation1 + $0x1] ss:$4 sm:$0xff] %v4304_v26  ;;  %v11126_v26 = vld [vmem:[#allocation117_spill] sm:$0xff] }
 0x60b   : > { %4466 = vst [vmem:[#allocation1 + $0x2] ss:$4 sm:$0xff] %v11115_v27  ;;  %v11127_v27 = vld [vmem:[#allocation118_spill] sm:$0xff] }
 0x60c   : > { %4467 = vst [vmem:[#allocation1 + $0x3] ss:$4 sm:$0xff] %v11116_v25  ;;  %v4306_v25 = vld [vmem:[#allocation2 + $0xc9] sm:$0x3] }
 0x60e   : > { %v4443_v28 = vld.sshfl [vmem:[#allocation1 + $0x20] sm:$0xff pattern:$0x73625140] }
 0x60f   : > { %4448 = vst [vmem:[#allocation1 + $0x20] ss:$4 sm:$0xff] %v11117_v29  ;;  %v4527_v51 = vpack.c.bf16 %v4443_v28, %v4442_v1  ;;  %v11129_v29 = vld [vmem:[#allocation111_spill] sm:$0xff] }
 0x610   : > { %6251 = vmatmul.msk.bf16.gmra.mxu3 %vm1743_vm0, %v4526_v45  ;;  %4449 = vst [vmem:[#allocation1 + $0x21] ss:$4 sm:$0xff] %v11118_v19  ;;  %v11128_v45 = vld [vmem:[#allocation110_spill] sm:$0xff]  ;;  %v11130_v1 = vld [vmem:[#allocation99_spill] sm:$0xff]  ;;  %v4315_v19 = vld [vmem:[#allocation2 + $0x111] sm:$0xff] }
 0x611   : > { %4450 = vst [vmem:[#allocation1 + $0x22] ss:$4 sm:$0xff] %v11119_v9 }
 0x612   : > { %4451 = vst [vmem:[#allocation1 + $0x23] ss:$4 sm:$0xff] %v4300_v15  ;;  %6247 = vmatmul.msk.bf16.gmra.mxu2 %vm1743_vm0, %v4170_v34  ;;  %v11131_v34 = vld [vmem:[#allocation41_spill] sm:$0xff] }
 0x613   : > { %v9614_v7 = vld.sshfl [vmem:[#allocation1] sm:$0xff pattern:$0x73625140]  ;;  %v11132_v15 = vrot.slane %v11131_v34, 4  ;;  %v11133_v9 = vrot.slane %v11131_v34, 6 }
 0x614   : > { %4474 = vst [vmem:[#allocation1] ss:$4 sm:$0xff] %v11120_v33 }
 0x615   : > { %4475 = vst [vmem:[#allocation1 + $0x1] ss:$4 sm:$0xff] %v11121_v14 }
 0x616   : > { %4476 = vst [vmem:[#allocation1 + $0x2] ss:$4 sm:$0xff] %v11122_v0  ;;  %v11136_v0 = vld [vmem:[#allocation105_spill] sm:$0xff] }
 0x617   : > { %4477 = vst [vmem:[#allocation1 + $0x3] ss:$4 sm:$0xff] %v4308_v59  ;;  %v11135_v59 = vld [vmem:[#allocation113_spill] sm:$0xff] }
 0x619   : > { %v4453_v30 = vld.sshfl [vmem:[#allocation1 + $0x20] sm:$0xff pattern:$0x73625140] }
 0x61a   : > { %4458 = vst [vmem:[#allocation1 + $0x20] ss:$4 sm:$0xff] %v4302_v46  ;;  %v4528_v33 = vpack.c.bf16 %v4453_v30, %v9590_v55  ;;  %v11134_v46 = vld [vmem:[#allocation104_spill] sm:$0xff]  ;;  %v11139_v55 = vld [vmem:[#allocation127_spill] sm:$0xff] }
 0x61b   : > { %4459 = vst [vmem:[#allocation1 + $0x21] ss:$4 sm:$0xff] %v11123_v35  ;;  %v11137_v35 = vld [vmem:[#allocation106_spill] sm:$0xff] }
 0x61c   : > { %4460 = vst [vmem:[#allocation1 + $0x22] ss:$4 sm:$0xff] %v11124_v53 }
 0x61d   : > { %4461 = vst [vmem:[#allocation1 + $0x23] ss:$4 sm:$0xff] %v11125_v36  ;;  %v11138_v36 = vld [vmem:[#allocation116_spill] sm:$0xff] }
 0x61e   : > { %v9623_v16 = vld.sshfl [vmem:[#allocation1] sm:$0xff pattern:$0x73625140] }
 0x61f   : > { %4484 = vst [vmem:[#allocation1] ss:$4 sm:$0xff] %v4310_v32  ;;  %v4312_v32 = vld [vmem:[#allocation2 + $0xf9] sm:$0x3] }
 0x620   : > { %6252 = vmatmul.msk.bf16.gmra.mxu3 %vm1743_vm0, %v4527_v51  ;;  %4485 = vst [vmem:[#allocation1 + $0x1] ss:$4 sm:$0xff] %v10963_v37  ;;  %v4314_v37 = vld [vmem:[#allocation2 + $0x109] sm:$0x3]  ;;  %v11140_v51 = vld [vmem:[#allocation128_spill] sm:$0xff] }
 0x621   : > { %4486 = vst [vmem:[#allocation1 + $0x2] ss:$4 sm:$0xff] %v11126_v26  ;;  %v11141_v26 = vld [vmem:[#allocation119_spill] sm:$0xff] }
 0x622   : > { %4487 = vst [vmem:[#allocation1 + $0x3] ss:$4 sm:$0xff] %v11127_v27 }
 0x624   : > { %v4463_v41 = vld.sshfl [vmem:[#allocation1 + $0x20] sm:$0xff pattern:$0x73625140] }
 0x625   : > { %4468 = vst [vmem:[#allocation1 + $0x20] ss:$4 sm:$0xff] %v11128_v45  ;;  %v4529_v27 = vpack.c.bf16 %v4463_v41, %v9602_v61  ;;  %v11142_v45 = vrot.slane %v11131_v34, 2  ;;  %v11146_v41 = vld [vmem:[#allocation125_spill] sm:$0xff] }
 0x626   : > { %4469 = vst [vmem:[#allocation1 + $0x21] ss:$4 sm:$0xff] %v11129_v29  ;;  %v4651_v29 = vld [vmem:[#allocation2 + $0x3a] sm:$0x3] }
 0x627   : > { %4470 = vst [vmem:[#allocation1 + $0x22] ss:$4 sm:$0xff] %v4306_v25  ;;  %v4394_v25 = vrot.slane %v4315_v19, 2 }
 0x628   : > { %4471 = vst [vmem:[#allocation1 + $0x23] ss:$4 sm:$0xff] %v11130_v1  ;;  %v11143_v1 = vld [vmem:[#allocation123_spill] sm:$0xff] }
 0x629   : > { %v9631_v28 = vld.sshfl [vmem:[#allocation1] sm:$0xff pattern:$0x73625140] }
 0x62a   : > { %4494 = vst [vmem:[#allocation1] ss:$4 sm:$0xff] %v11132_v15  ;;  %v4395_v15 = vrot.slane %v4315_v19, 4 }
 0x62b   : > { %4495 = vst [vmem:[#allocation1 + $0x1] ss:$4 sm:$0xff] %v11133_v9  ;;  %v11144_v9 = vld [vmem:[#allocation132_spill] sm:$0xff] }
 0x62c   : > { %4496 = vst [vmem:[#allocation1 + $0x2] ss:$4 sm:$0xff] %v4314_v37  ;;  %v4396_v37 = vrot.slane %v4315_v19, 6 }
 0x62d   : > { %4497 = vst [vmem:[#allocation1 + $0x3] ss:$4 sm:$0xff] %v4315_v19  ;;  %v11147_v19 = vld [vmem:[#allocation142_spill] sm:$0xff] }
 0x62f   : > { %v4473_v14 = vld.sshfl [vmem:[#allocation1 + $0x20] sm:$0xff pattern:$0x73625140] }
 0x630   : > { %6253 = vmatmul.msk.bf16.gmra.mxu3 %vm1743_vm0, %v4528_v33  ;;  %4478 = vst [vmem:[#allocation1 + $0x20] ss:$4 sm:$0xff] %v11134_v46  ;;  %v11145_v46 = vld [vmem:[#allocation134_spill] sm:$0xff] }
 0x631   : > { %4479 = vst [vmem:[#allocation1 + $0x21] ss:$4 sm:$0xff] %v11135_v59  ;;  %v4316_v59 = vld [vmem:[#allocation2 + $0x119] sm:$0x3] }
 0x632   : > { %4480 = vst [vmem:[#allocation1 + $0x22] ss:$4 sm:$0xff] %v11136_v0  ;;  %v4649_v0 = vld [vmem:[#allocation2 + $0x2a] sm:$0x3] }
 0x633   : > { %4481 = vst [vmem:[#allocation1 + $0x23] ss:$4 sm:$0xff] %v11137_v35  ;;  %v4655_v35 = vld [vmem:[#allocation2 + $0x5a] sm:$0x3] }
 0x634   : > { %v9643_v53 = vld.sshfl [vmem:[#allocation1] sm:$0xff pattern:$0x73625140] }
 0x635   : > { %4760 = vst [vmem:[#allocation1] ss:$4 sm:$0xff] %v10974_v50 }
 0x636   : > { %4762 = vst [vmem:[#allocation1 + $0x1] ss:$4 sm:$0xff] %v11138_v36 }
 0x637   : > { %4764 = vst [vmem:[#allocation1 + $0x2] ss:$4 sm:$0xff] %v11139_v55  ;;  %v11148_v55 = vld [vmem:[#allocation120_spill] sm:$0xff] }
 0x638   : > { %4766 = vst [vmem:[#allocation1 + $0x3] ss:$4 sm:$0xff] %v11140_v51  ;;  %v11149_v51 = vld [vmem:[#allocation121_spill] sm:$0xff] }
 0x63a   : > { %v4483_v30 = vld.sshfl [vmem:[#allocation1 + $0x20] sm:$0xff pattern:$0x73625140] }
 0x63b   : > { %4488 = vst [vmem:[#allocation1 + $0x20] ss:$4 sm:$0xff] %v11141_v26  ;;  %v4657_v26 = vld [vmem:[#allocation2 + $0x6a] sm:$0x3] }
 0x63c   : > { %4489 = vst [vmem:[#allocation1 + $0x21] ss:$4 sm:$0xff] %v4312_v32  ;;  %v11150_v32 = vld [vmem:[#allocation122_spill] sm:$0xff] }
 0x63d   : > { %4490 = vst [vmem:[#allocation1 + $0x22] ss:$4 sm:$0xff] %v11131_v34  ;;  %v4530_v34 = vpack.c.bf16 %v4473_v14, %v9614_v7  ;;  %v11152_v14 = vld [vmem:[#allocation149_spill] sm:$0xff] }
 0x63e   : > { %4491 = vst [vmem:[#allocation1 + $0x23] ss:$4 sm:$0xff] %v11142_v45  ;;  %v11153_v45 = vld [vmem:[#allocation150_spill] sm:$0xff] }
 0x63f   : > { %v4775_v50 = vld.sshfl [vmem:[#allocation1] sm:$0xff pattern:$0x73625140] }
 0x640   : > { %6254 = vmatmul.msk.bf16.gmra.mxu3 %vm1743_vm0, %v4529_v27  ;;  %4777 = vst [vmem:[#allocation1] ss:$4 sm:$0xff] %v11143_v1  ;;  %v4653_v1 = vld [vmem:[#allocation2 + $0x4a] sm:$0x3] }
 0x641   : > { %4778 = vst [vmem:[#allocation1 + $0x1] ss:$4 sm:$0xff] %v4651_v29  ;;  %v11154_v29 = vld [vmem:[#allocation135_spill] sm:$0xff] }
 0x642   : > { %4779 = vst [vmem:[#allocation1 + $0x2] ss:$4 sm:$0xff] %v11144_v9  ;;  %v11156_v9 = vld [vmem:[#allocation124_spill] sm:$0xff] }
 0x643   : > { %4780 = vst [vmem:[#allocation1 + $0x3] ss:$4 sm:$0xff] %v11145_v46 }
 0x645   : > { %v4493_v33 = vld.sshfl [vmem:[#allocation1 + $0x20] sm:$0xff pattern:$0x73625140] }
 0x646   : > { %4498 = vst [vmem:[#allocation1 + $0x20] ss:$4 sm:$0xff] %v4394_v25 }
 0x647   : > { %4499 = vst [vmem:[#allocation1 + $0x21] ss:$4 sm:$0xff] %v4395_v15  ;;  %v11155_v15 = vld [vmem:[#allocation136_spill] sm:$0xff] }
 0x648   : > { %4500 = vst [vmem:[#allocation1 + $0x22] ss:$4 sm:$0xff] %v4396_v37  ;;  %v4531_v37 = vpack.c.bf16 %v4483_v30, %v9623_v16  ;;  %v11163_v16 = vld [vmem:[#allocation131_spill] sm:$0xff] }
 0x649   : > { %4501 = vst [vmem:[#allocation1 + $0x23] ss:$4 sm:$0xff] %v4316_v59  ;;  %v11157_v59 = vld [vmem:[#allocation140_spill] sm:$0xff] }
 0x64a   : > { %v4785_v61 = vld.sshfl [vmem:[#allocation1] sm:$0xff pattern:$0x73625140] }
 0x64b   : > { %4787 = vst [vmem:[#allocation1] ss:$4 sm:$0xff] %v11146_v41  ;;  %v4661_v41 = vld [vmem:[#allocation2 + $0x8a] sm:$0x3] }
 0x64c   : > { %4788 = vst [vmem:[#allocation1 + $0x1] ss:$4 sm:$0xff] %v10993_v48  ;;  %v11151_v48 = vld [vmem:[#allocation133_spill] sm:$0xff] }
 0x64d   : > { %4789 = vst [vmem:[#allocation1 + $0x2] ss:$4 sm:$0xff] %v11147_v19  ;;  %v11161_v19 = vld [vmem:[#allocation143_spill] sm:$0xff] }
 0x64e   : > { %4790 = vst [vmem:[#allocation1 + $0x3] ss:$4 sm:$0xff] %v4655_v35  ;;  %v11160_v35 = vld [vmem:[#allocation129_spill] sm:$0xff] }
 0x650   : > { %v9662_v36 = vld.sshfl [vmem:[#allocation1 + $0x20] sm:$0xff pattern:$0x73625140]  ;;  %6255 = vmatmul.msk.bf16.gmra.mxu3 %vm1743_vm0, %v4530_v34 }
 0x651   : > { %4768 = vst [vmem:[#allocation1 + $0x20] ss:$4 sm:$0xff] %v4649_v0  ;;  %v11158_v34 = vld [vmem:[#allocation141_spill] sm:$0xff]  ;;  %v11159_v0 = vld [vmem:[#allocation144_spill] sm:$0xff] }
 0x652   : > { %4770 = vst [vmem:[#allocation1 + $0x21] ss:$4 sm:$0xff] %v11148_v55  ;;  %v11162_v55 = vld [vmem:[#allocation130_spill] sm:$0xff] }
 0x653   : > { %4772 = vst [vmem:[#allocation1 + $0x22] ss:$4 sm:$0xff] %v11149_v51 }
 0x654   : > { %4774 = vst [vmem:[#allocation1 + $0x23] ss:$4 sm:$0xff] %v11150_v32  ;;  %v4532_v32 = vpack.c.bf16 %v4493_v33, %v9631_v28 }
 0x655   : > { %v4795_v7 = vld.sshfl [vmem:[#allocation1] sm:$0xff pattern:$0x73625140] }
 0x656   : > { %4797 = vst [vmem:[#allocation1] ss:$4 sm:$0xff] %v4657_v26  ;;  %v11164_v26 = vld [vmem:[#allocation161_spill] sm:$0xff] }
 0x657   : > { %4798 = vst [vmem:[#allocation1 + $0x1] ss:$4 sm:$0xff] %v11151_v48 }
 0x658   : > { %4799 = vst [vmem:[#allocation1 + $0x2] ss:$4 sm:$0xff] %v11152_v14  ;;  %v11165_v14 = vld [vmem:[#allocation162_spill] sm:$0xff] }
 0x659   : > { %4800 = vst [vmem:[#allocation1 + $0x3] ss:$4 sm:$0xff] %v11153_v45  ;;  %v11166_v45 = vld [vmem:[#allocation151_spill] sm:$0xff] }
 0x65b   : > { %v4776_v27 = vld.sshfl [vmem:[#allocation1 + $0x20] sm:$0xff pattern:$0x73625140] }
 0x65c   : > { %v4887_v25 = vpack.c.bf16 %v4776_v27, %v4775_v50  ;;  %4781 = vst [vmem:[#allocation1 + $0x20] ss:$4 sm:$0xff] %v11154_v29  ;;  %v4659_v27 = vld [vmem:[#allocation2 + $0x7a] sm:$0x3]  ;;  %v11169_v29 = vld [vmem:[#allocation168_spill] sm:$0xff] }
 0x65d   : > { %4782 = vst [vmem:[#allocation1 + $0x21] ss:$4 sm:$0xff] %v11155_v15  ;;  %v11171_v15 = vld [vmem:[#allocation157_spill] sm:$0xff] }
 0x65e   : > { %6260 = vmatmul.msk.bf16.vlgmr.msra.gmra.mxu0 %vm1743_vm0, %v4887_v25  ;;  %4783 = vst [vmem:[#allocation1 + $0x22] ss:$4 sm:$0xff] %v4653_v1  ;;  %v11168_v25 = vld [vmem:[#allocation138_spill] sm:$0xff]  ;;  %v11170_v1 = vld [vmem:[#allocation156_spill] sm:$0xff] }
 0x65f   : > { %4784 = vst [vmem:[#allocation1 + $0x23] ss:$4 sm:$0xff] %v11156_v9  ;;  %v4663_v9 = vld [vmem:[#allocation2 + $0x9a] sm:$0x3] }
 0x660   : > { %6256 = vmatmul.msk.bf16.gmra.mxu3 %vm1743_vm0, %v4531_v37  ;;  %v4805_v46 = vld.sshfl [vmem:[#allocation1] sm:$0xff pattern:$0x73625140]  ;;  %v4533_v37 = vpack.c.bf16 %v9662_v36, %v9643_v53  ;;  %v11173_v53 = vld [vmem:[#allocation152_spill] sm:$0xff] }
 0x661   : > { %4807 = vst [vmem:[#allocation1] ss:$4 sm:$0xff] %v11157_v59  ;;  %v11172_v59 = vld [vmem:[#allocation145_spill] sm:$0xff] }
 0x662   : > { %4808 = vst [vmem:[#allocation1 + $0x1] ss:$4 sm:$0xff] %v11158_v34  ;;  %v11174_v36 = vld [vmem:[#allocation153_spill] sm:$0xff] }
 0x663   : > { %4809 = vst [vmem:[#allocation1 + $0x2] ss:$4 sm:$0xff] %v4661_v41 }
 0x664   : > { %4810 = vst [vmem:[#allocation1 + $0x3] ss:$4 sm:$0xff] %v11159_v0 }
 0x666   : > { %v4786_v50 = vld.sshfl [vmem:[#allocation1 + $0x20] sm:$0xff pattern:$0x73625140] }
 0x667   : > { %4791 = vst [vmem:[#allocation1 + $0x20] ss:$4 sm:$0xff] %v11160_v35  ;;  %v4888_v30 = vpack.c.bf16 %v4786_v50, %v4785_v61  ;;  %v11167_v61 = vld [vmem:[#allocation137_spill] sm:$0xff]  ;;  %v4673_v50 = vld [vmem:[#allocation2 + $0xea] sm:$0x3] }
 0x668   : > { %4792 = vst [vmem:[#allocation1 + $0x21] ss:$4 sm:$0xff] %v11161_v19 }
 0x669   : > { %4793 = vst [vmem:[#allocation1 + $0x22] ss:$4 sm:$0xff] %v11162_v55  ;;  %v11175_v55 = vld [vmem:[#allocation169_spill] sm:$0xff] }
 0x66a   : > { %4794 = vst [vmem:[#allocation1 + $0x23] ss:$4 sm:$0xff] %v11163_v16  ;;  %v4669_v16 = vld [vmem:[#allocation2 + $0xca] sm:$0x3] }
 0x66b   : > { %v9684_v51 = vld.sshfl [vmem:[#allocation1] sm:$0xff pattern:$0x73625140] }
 0x66c   : > { %4817 = vst [vmem:[#allocation1] ss:$4 sm:$0xff] %v11018_v40  ;;  %v4667_v40 = vld [vmem:[#allocation2 + $0xba] sm:$0x3] }
 0x66d   : > { %4818 = vst [vmem:[#allocation1 + $0x1] ss:$4 sm:$0xff] %v11019_v43 }
 0x66e   : > { %6261 = vmatmul.msk.bf16.gmra.mxu0 %vm1743_vm0, %v4888_v30  ;;  %4819 = vst [vmem:[#allocation1 + $0x2] ss:$4 sm:$0xff] %v11164_v26  ;;  %v11176_v30 = vld [vmem:[#allocation170_spill] sm:$0xff] }
 0x66f   : > { %4820 = vst [vmem:[#allocation1 + $0x3] ss:$4 sm:$0xff] %v11165_v14  ;;  %v11179_v14 = vld [vmem:[#allocation164_spill] sm:$0xff] }
 0x670   : > { %6257 = vmatmul.msk.bf16.gmra.mxu3 %vm1743_vm0, %v4532_v32 }
 0x671   : > { %v4796_v48 = vld.sshfl [vmem:[#allocation1 + $0x20] sm:$0xff pattern:$0x73625140] }
 0x672   : > { %4801 = vst [vmem:[#allocation1 + $0x20] ss:$4 sm:$0xff] %v11166_v45  ;;  %v4889_v43 = vpack.c.bf16 %v4796_v48, %v4795_v7  ;;  %v4671_v7 = vld [vmem:[#allocation2 + $0xda] sm:$0x3]  ;;  %v11177_v48 = vld [vmem:[#allocation163_spill] sm:$0xff]  ;;  %v11180_v45 = vrot.slane %v9320_v22, 4 }
 0x673   : > { %4802 = vst [vmem:[#allocation1 + $0x21] ss:$4 sm:$0xff] %v4659_v27  ;;  %v4678_v27 = vld [vmem:[#allocation2 + $0x112] sm:$0xff] }
 0x674   : > { %4803 = vst [vmem:[#allocation1 + $0x22] ss:$4 sm:$0xff] %v11167_v61  ;;  %v9749_v61 = vpop.f32.mrf.mxu2 }
 0x675   : > { %4804 = vst [vmem:[#allocation1 + $0x23] ss:$4 sm:$0xff] %v11168_v25 }
 0x676   : > { %v9696_v28 = vld.sshfl [vmem:[#allocation1] sm:$0xff pattern:$0x73625140] }
 0x677   : > { %4827 = vst [vmem:[#allocation1] ss:$4 sm:$0xff] %v11025_v13 }
 0x678   : > { %4828 = vst [vmem:[#allocation1 + $0x1] ss:$4 sm:$0xff] %v4667_v40  ;;  %v4675_v40 = vld [vmem:[#allocation2 + $0xfa] sm:$0x3] }
 0x679   : > { %4829 = vst [vmem:[#allocation1 + $0x2] ss:$4 sm:$0xff] %v11028_v38  ;;  %v4665_v38 = vld [vmem:[#allocation2 + $0xaa] sm:$0x3] }
 0x67a   : > { %4830 = vst [vmem:[#allocation1 + $0x3] ss:$4 sm:$0xff] %v11169_v29  ;;  %v11183_v29 = vrot.slane %v9320_v22, 2 }
 0x67c   : > { %v4806_v33 = vld.sshfl [vmem:[#allocation1 + $0x20] sm:$0xff pattern:$0x73625140] }
 0x67d   : > { %4811 = vst [vmem:[#allocation1 + $0x20] ss:$4 sm:$0xff] %v11170_v1  ;;  %v4890_v34 = vpack.c.bf16 %v4806_v33, %v4805_v46  ;;  %v11182_v33 = vld [vmem:[#allocation174_spill] sm:$0xff] }
 0x67e   : > { %6262 = vmatmul.msk.bf16.gmra.mxu0 %vm1743_vm0, %v4889_v43  ;;  %4812 = vst [vmem:[#allocation1 + $0x21] ss:$4 sm:$0xff] %v11171_v15  ;;  %v9751_v43 = vpop.f32.mrf.mxu3  ;;  %v4215_v15 = vpop.f32.mrf.mxu2 }
 0x67f   : > { %4813 = vst [vmem:[#allocation1 + $0x22] ss:$4 sm:$0xff] %v11172_v59 }
 0x680   : > { %4814 = vst [vmem:[#allocation1 + $0x23] ss:$4 sm:$0xff] %v4663_v9  ;;  %6258 = vmatmul.msk.bf16.gmra.mxu3 %vm1743_vm0, %v4533_v37  ;;  %v4757_v37 = vrot.slane %v4678_v27, 2  ;;  %v4758_v9 = vrot.slane %v4678_v27, 4 }
 0x681   : > { %v9708_v13 = vld.sshfl [vmem:[#allocation1] sm:$0xff pattern:$0x73625140] }
 0x682   : > { %4837 = vst [vmem:[#allocation1] ss:$4 sm:$0xff] %v11029_v24  ;;  %v6287_v24 = vld [vmem:[%s10312_s5 + $0x2] sm:$0x1] }
 0x683   : > { %4838 = vst [vmem:[#allocation1 + $0x1] ss:$4 sm:$0xff] %v11031_v8  ;;  %v5372_v8 = vld [vmem:[%s10312_s5] sm:$0x1] }
 0x684   : > { %4839 = vst [vmem:[#allocation1 + $0x2] ss:$4 sm:$0xff] %v11032_v21  ;;  %v6278_v21 = vld [vmem:[%s10312_s5 + $0x1] sm:$0x1]  ;;  %v5444_v0 = vsel %vm2314_vm8, %v5372_v8, 0 }
 0x685   : > { %4840 = vst [vmem:[#allocation1 + $0x3] ss:$4 sm:$0xff] %v4671_v7  ;;  %v5400_v46 = vsel %vm2314_vm8, %v6278_v21, 0  ;;  %5453 = vmatpush.bf16.msra.mxu2 %v5444_v0 }
 0x686   : > { %5409 = vmatpush.bf16.msra.mxu1 %v5400_v46  ;;  %v4578_v59 = vpop.f32.mrf.mxu3  ;;  %v9763_v46 = vpop.f32.mrf.mxu0 }
 0x687   : > { %v4816_v41 = vld.sshfl [vmem:[#allocation1 + $0x20] sm:$0xff pattern:$0x73625140] }
 0x688   : > { %4821 = vst [vmem:[#allocation1 + $0x20] ss:$4 sm:$0xff] %v4665_v38  ;;  %v4891_v32 = vpack.c.bf16 %v4816_v41, %v9684_v51  ;;  %v9747_v51 = vpop.f32.mrf.mxu1  ;;  %v4759_v38 = vrot.slane %v4678_v27, 6  ;;  %v4679_v41 = vld [vmem:[#allocation2 + $0x11a] sm:$0x3] }
 0x689   : > { %4822 = vst [vmem:[#allocation1 + $0x21] ss:$4 sm:$0xff] %v11173_v53 }
 0x68a   : > { %4823 = vst [vmem:[#allocation1 + $0x22] ss:$4 sm:$0xff] %v11174_v36  ;;  %v4217_v36 = vpop.f32.mrf.mxu2 }
 0x68b   : > { %4824 = vst [vmem:[#allocation1 + $0x23] ss:$4 sm:$0xff] %v11023_v54  ;;  %v5502_v54 = vsel %vm2314_vm8, %v6287_v24, 0 }
 0x68c   : > { %v9729_v35 = vld.sshfl [vmem:[#allocation1] sm:$0xff pattern:$0x73625140]  ;;  %5511 = vmatpush.bf16.msra.mxu3 %v5502_v54 }
 0x68d   : > { %4847 = vst [vmem:[#allocation1] ss:$4 sm:$0xff] %v4673_v50 }
 0x68e   : > { %6263 = vmatmul.msk.bf16.gmra.mxu0 %vm1743_vm0, %v4890_v34  ;;  %4848 = vst [vmem:[#allocation1 + $0x1] ss:$4 sm:$0xff] %v11036_v12  ;;  %v11178_v12 = vld [vmem:[#allocation172_spill] sm:$0xff] }
 0x68f   : > { %4849 = vst [vmem:[#allocation1 + $0x2] ss:$4 sm:$0xff] %v11037_v42 }
 0x690   : > { %4850 = vst [vmem:[#allocation1 + $0x3] ss:$4 sm:$0xff] %v8774_v10  ;;  %v11181_v10 = vrot.slane %v9320_v22, 6  ;;  %v3851_v1 = vpop.f32.mrf.mxu1 }
 0x692   : > { %v4826_v19 = vld.sshfl [vmem:[#allocation1 + $0x20] sm:$0xff pattern:$0x73625140]  ;;  %v4220_v50 = vpop.f32.mrf.mxu2 }
 0x693   : > { %4831 = vst [vmem:[#allocation1 + $0x20] ss:$4 sm:$0xff] %v11175_v55  ;;  %v11184_v55 = vld [vmem:[#allocation31_spill] sm:$0xff] }
 0x694   : > { %4832 = vst [vmem:[#allocation1 + $0x21] ss:$4 sm:$0xff] %v11176_v30 }
 0x695   : > { %4833 = vst [vmem:[#allocation1 + $0x22] ss:$4 sm:$0xff] %v4669_v16  ;;  %v11185_v16 = vld [vmem:[#allocation10_spill] sm:$0xff] }
 0x696   : > { %4834 = vst [vmem:[#allocation1 + $0x23] ss:$4 sm:$0xff] %v8682_v52  ;;  %v4677_v52 = vld [vmem:[#allocation2 + $0x10a] sm:$0x3]  ;;  %v2422_v30 = vadd.f32 %v11185_v16, %v11184_v55  ;;  %v11192_v16 = vld [vmem:[#allocation36_spill] sm:$0xff] }
 0x697   : > { %v4855_v42 = vld.sshfl [vmem:[#allocation1] sm:$0xff pattern:$0x73625140] }
 0x698   : > { %4857 = vst [vmem:[#allocation1] ss:$4 sm:$0xff] %v11180_v45  ;;  %v3853_v53 = vpop.f32.mrf.mxu1 }
 0x699   : > { %4858 = vst [vmem:[#allocation1 + $0x1] ss:$4 sm:$0xff] %v11181_v10 }
 0x69a   : > { %4859 = vst [vmem:[#allocation1 + $0x2] ss:$4 sm:$0xff] %v4677_v52  ;;  %v4222_v0 = vpop.f32.mrf.mxu2 }
 0x69b   : > { %4860 = vst [vmem:[#allocation1 + $0x3] ss:$4 sm:$0xff] %v4678_v27  ;;  %v11188_v27 = vld [vmem:[#allocation171_spill] sm:$0xff] }
 0x69d   : > { %v4836_v26 = vld.sshfl [vmem:[#allocation1 + $0x20] sm:$0xff pattern:$0x73625140] }
 0x69e   : > { %6264 = vmatmul.msk.bf16.gmra.mxu0 %vm1743_vm0, %v4891_v32  ;;  %4841 = vst [vmem:[#allocation1 + $0x20] ss:$4 sm:$0xff] %v11177_v48  ;;  %v11186_v32 = vld [vmem:[#allocation35_spill] sm:$0xff] }
 0x69f   : > { %4842 = vst [vmem:[#allocation1 + $0x21] ss:$4 sm:$0xff] %v11178_v12  ;;  %v11187_v12 = vld [vmem:[#allocation176_spill] sm:$0xff] }
 0x6a0   : > { %4843 = vst [vmem:[#allocation1 + $0x22] ss:$4 sm:$0xff] %v11179_v14  ;;  %v3856_v34 = vpop.f32.mrf.mxu1 }
 0x6a1   : > { %4844 = vst [vmem:[#allocation1 + $0x23] ss:$4 sm:$0xff] %v11035_v20  ;;  %v4892_v20 = vpack.c.bf16 %v4826_v19, %v9696_v28  ;;  %v4580_v28 = vpop.f32.mrf.mxu3 }
 0x6a8   : > { %v4846_v25 = vld.sshfl [vmem:[#allocation1 + $0x20] sm:$0xff pattern:$0x73625140]  ;;  %v3858_v24 = vpop.f32.mrf.mxu1 }
 0x6a9   : > { %4851 = vst [vmem:[#allocation1 + $0x20] ss:$4 sm:$0xff] %v11182_v33  ;;  %v4583_v8 = vpop.f32.mrf.mxu3  ;;  %v4894_v21 = vpack.c.bf16 %v4846_v25, %v9729_v35  ;;  %v11189_v25 = vld [vmem:[#allocation160_spill] sm:$0xff] }
 0x6aa   : > { %4852 = vst [vmem:[#allocation1 + $0x21] ss:$4 sm:$0xff] %v4675_v40  ;;  %v3901_v40 = vadd.f32 %v3851_v1, %v11189_v25 }
 0x6ab   : > { %4853 = vst [vmem:[#allocation1 + $0x22] ss:$4 sm:$0xff] %v9320_v22  ;;  %v4893_v22 = vpack.c.bf16 %v4836_v26, %v9708_v13  ;;  %v9769_v13 = vpop.f32.mrf.mxu2  ;;  %v2813_v26 = vadd.f32 %v11186_v32, %v2422_v30  ;;  %v11193_v32 = vld [vmem:[#allocation178_spill] sm:$0xff] }
 0x6ac   : > { %4854 = vst [vmem:[#allocation1 + $0x23] ss:$4 sm:$0xff] %v11183_v29  ;;  %v4265_v29 = vadd.f32 %v4215_v15, %v3901_v40 }
 0x6ad   : > { %v3176_v14 = vadd.f32 %v11187_v12, %v2813_v26 }
 0x6ae   : > { %6265 = vmatmul.msk.bf16.gmra.mxu0 %vm1743_vm0, %v4892_v20 }
 0x6af   : > { %v3539_v45 = vadd.f32 %v11188_v27, %v3176_v14 }
 0x6b0   : > { %v9765_v19 = vpop.f32.mrf.mxu1 }
 0x6b1   : > { %v4585_v54 = vpop.f32.mrf.mxu3  ;;  %v3902_v10 = vadd.f32 %v3853_v53, %v3539_v45  ;;  %v11190_v53 = vld [vmem:[#allocation32_spill] sm:$0xff] }
 0x6b3   : > { %v4856_v7 = vld.sshfl [vmem:[#allocation1 + $0x20] sm:$0xff pattern:$0x73625140]  ;;  %v4266_v20 = vadd.f32 %v4217_v36, %v3902_v10  ;;  %v3903_v36 = vadd.f32 %v3856_v34, %v9380_v5 }
 0x6b4   : > { %4861 = vst [vmem:[#allocation1 + $0x20] ss:$4 sm:$0xff] %v4757_v37  ;;  %v4895_v52 = vpack.c.bf16 %v4856_v7, %v4855_v42  ;;  %v9780_v37 = vpop.f32.mrf.mxu2  ;;  %v9787_v42 = vld [vmem:[%s10311_s4] ss:$0 sm:$0xff] }
 0x6b5   : > { %4862 = vst [vmem:[#allocation1 + $0x21] ss:$4 sm:$0xff] %v4758_v9  ;;  %v4629_v9 = vadd.f32 %v4580_v28, %v4266_v20  ;;  %v4865_v10 = vld.sshfl [vmem:[#allocation1] sm:$0xff pattern:$0x73625140] }
 0x6b6   : > { %4863 = vst [vmem:[#allocation1 + $0x22] ss:$4 sm:$0xff] %v4759_v38  ;;  %v4628_v38 = vadd.f32 %v4578_v59, %v4265_v29  ;;  %v4267_v59 = vadd.f32 %v4220_v50, %v3903_v36 }
 0x6b7   : > { %4864 = vst [vmem:[#allocation1 + $0x23] ss:$4 sm:$0xff] %v4679_v41 }
 0x6b8   : > { %v9778_v33 = vpop.f32.mrf.mxu1  ;;  %v4630_v45 = vadd.f32 %v4583_v8, %v4267_v59 }
 0x6b9   : > { %v9772_v48 = vpop.f32.mrf.mxu3 }
 0x6bc   : > { %v9799_v5 = vpop.f32.mrf.mxu2 }
 0x6be   : > { %6266 = vmatmul.msk.bf16.gmra.mxu0 %vm1743_vm0, %v4893_v22  ;;  %v4866_v27 = vld.sshfl [vmem:[#allocation1 + $0x20] sm:$0xff pattern:$0x73625140] }
 0x6bf   : > { %v4896_v29 = vpack.c.bf16 %v4866_v27, %v4865_v10 }
 0x6c0   : > { %v9795_v12 = vpop.f32.mrf.mxu1 }
 0x6c1   : > { %v9782_v41 = vpop.f32.mrf.mxu3 }
 0x6ce   : > { %6267 = vmatmul.msk.bf16.gmra.mxu0 %vm1743_vm0, %v4894_v21  ;;  %v11191_v21 = vld [vmem:[#allocation42_spill] sm:$0xff] }
 0x6cf   : > { %v2427_v1 = vadd.f32 %v11191_v21, %v11190_v53 }
 0x6d1   : > { %v2815_v28 = vadd.f32 %v11192_v16, %v2427_v1  ;;  %v9814_v16 = vpop.f32.mrf.mxu1 }
 0x6d3   : > { %v3178_v26 = vadd.f32 %v11193_v32, %v2815_v28 }
 0x6db   : > { %v4941_v35 = vpop.f32.mrf.mxu0 }
 0x6dc   : > { %v4991_v55 = vadd.f32 %v4941_v35, %v4628_v38  ;;  %v3541_v35 = vadd.f32 %v9396_v3, %v3178_v26 }
 0x6de   : > { %6268 = vmatmul.msk.bf16.gmra.mxu0 %vm1743_vm0, %v4895_v52  ;;  %v5015_v14 = vadd.f32 %v9787_v42, %v4991_v55  ;;  %v3904_v38 = vadd.f32 %v3858_v24, %v3541_v35  ;;  %v11197_v35 = vld [vmem:[#allocation9_spill] sm:$0xff] }
 0x6e0   : > { %v5035_v8 = vmax.f32 %v5015_v14, 0.0  ;;  %v4268_v53 = vadd.f32 %v4222_v0, %v3904_v38  ;;  %v9818_v14 = vpop.f32.mrf.mxu2 }
 0x6e2   : > { %v4631_v1 = vadd.f32 %v4585_v54, %v4268_v53  ;;  %v5075_v24 = vrot.slane %v5035_v8, 4  ;;  %v3905_v54 = vadd.f32 %v9765_v19, %v9412_v2  ;;  %v11198_v2 = vmov 0.0   ;;  %v11204_v53 = vld [vmem:[#allocation13_spill] sm:$0xff] }
 0x6e3   : > { %v4943_v22 = vpop.f32.mrf.mxu0  ;;  %5339 = vst.msk [vmem:[#allocation3 + $0x8] sm:$0x3] %vm5338_vm14, %v11198_v2 }
 0x6e4   : > { %v4992_v7 = vadd.f32 %v4943_v22, %v4629_v9  ;;  %v9806_v9 = vpop.f32.mrf.mxu3  ;;  %5342 = vst.msk [vmem:[#allocation3 + $0x98] sm:$0x3] %vm5338_vm14, %v11198_v2 }
 0x6e6   : > { %v5016_v15 = vadd.f32 %v9787_v42, %v4992_v7 }
 0x6e8   : > { %v5036_v30 = vmax.f32 %v5016_v15, 0.0  ;;  %v5223_v15 = vstv %s5222_s25  ;;  %s6331_s25 = sshll.u32 %s6070_s18, 3 }
 0x6e9   : > { %s6072_s20 = scalar_lea.hbm %s10316_s9, %s6331_s25  ;;  %s6552_s25 = scalar_lea.hbm %s10316_s9, 32 }
 0x6ea   : > { %v5076_v52 = vrot.slane %v5036_v30, 4  ;;  %v6270_v25 = vrot.slane %v5036_v30, 10  ;;  %s6076_s2 = sshll.u32 %s6072_s20, 4  ;;  %s6077_s2 = int_to_ptr.hbm [resolvable:$true] %s6076_s2 }
 0x6eb   : > { %v4946_v50 = vpop.f32.mrf.mxu0  ;;  %s6546_s29 = sshra.s32 %s6077_s2, 4  ;;  %s6547_s29 = int_to_ptr.hbm [resolvable:$true] %s6546_s29 }
 0x6ec   : > { %v5112_v40 = vrot.slane %v5076_v52, 6  ;;  %v4993_v20 = vadd.f32 %v4946_v50, %v4630_v45  ;;  %v11196_v45 = vld [vmem:[#allocation8_spill] sm:$0xff]  ;;  %v5225_v50 = vadd.s32 %v5223_v15, %v11197_v35  ;;  %s6548_s18 = scalar_lea.hbm %s6547_s29, 8  ;;  %p6553_p4 = scmp.lt.s32.totalorder %s6547_s29, %s10316_s9 }
 0x6ed   : > { %v5224_v0 = vadd.s32 %v5223_v15, %v11196_v45  ;;  %p6549_p0 = scmp.ne.s32.totalorder %s6547_s29, %s6548_s18  ;;  %p6554_p5 = scmp.lt.s32.totalorder %s6552_s25, %s6548_s18 }
 0x6ee   : > { %v5113_v3 = vsel %vm9802_vm11, %v6270_v25, %v5112_v40  ;;  %v5017_v22 = vadd.f32 %v9787_v42, %v4993_v20  ;;  %6269 = vmatmul.msk.bf16.gmra.mxu0 %vm1743_vm0, %v4896_v29  ;;  %v5114_v55 = vrot.slane %v5112_v40, 4  ;;  %v9825_v25 = vpop.f32.mrf.mxu3  ;;  %v4269_v40 = vadd.f32 %v9769_v13, %v3905_v54  ;;  %v9837_v13 = vpop.f32.mrf.mxu1  ;;  %v11206_v54 = vld [vmem:[#allocation182_spill] sm:$0xff] }
 0x6ef   : > { %v5198_v7 = vmax.f32 %v5035_v8, %v5113_v3  ;;  %vm5226_vm12 = vcmp.ge.s32.totalorder %v5224_v0, 0  ;;  %vm5228_vm13 = vcmp.lt.s32.totalorder %v5224_v0, 16  ;;  %vm5227_vm15 = vcmp.ge.s32.totalorder %v5225_v50, 0  ;;  %p6550_p1 = pnand %p6549_p0, %p6730_p3  ;;  %p6555_p6 = por %p6554_p5, %p6553_p4 }
 0x6f0   : > { %v5037_v21 = vmax.f32 %v5017_v22, 0.0  ;;  %v4632_v20 = vadd.f32 %v9772_v48, %v4269_v40  ;;  %vm5229_vm1 = vcmp.lt.s32.totalorder %v5225_v50, 16  ;;  %vm9833_vm2 = vmand %vm5226_vm12, %vm5228_vm13 }
 0x6f1   : > { %5260 = vst [vmem:[#allocation1] ss:$2 sm:$0xff] %v5198_v7  ;;  %vm9839_vm3 = vmand %vm5227_vm15, %vm5229_vm1  ;;  %v11203_v7 = vld [vmem:[#allocation11_spill] sm:$0xff]  ;;  %p6551_p2 = pneg %p6550_p1 }
 0x6f2   : > { %v5115_v36 = vrot.slane %v5037_v21, 6  ;;  %v5077_v35 = vrot.slane %v5037_v21, 4 }
 0x6f3   : > { %v4948_v28 = vpop.f32.mrf.mxu0  ;;  %p6556_p7 = pnand %p6555_p6, %p6551_p2 }
 0x6f4   : > { %v5116_v59 = vsel %vm9802_vm11, %v5114_v55, %v5115_v36  ;;  %v5117_v32 = vrot.slane %v5115_v36, 4  ;;  %v4994_v26 = vadd.f32 %v4948_v28, %v4631_v1  ;;  %v2432_v1 = vadd.f32 %v11204_v53, %v11203_v7  ;;  %v9846_v55 = vpop.f32.mrf.mxu2 }
 0x6f5   : > { %v5199_v27 = vmax.f32 %v5075_v24, %v5116_v59  ;;  %v11205_v59 = vld [vmem:[#allocation50_spill] sm:$0xff]  ;;  %v3907_v53 = vadd.f32 %v9795_v12, %v9439_v4 }
 0x6f6   : > { %v5200_v52 = vmax.f32 %v5036_v30, %v5117_v32  ;;  %v5018_v10 = vadd.f32 %v9787_v42, %v4994_v26  ;;  %v2817_v32 = vadd.f32 %v11205_v59, %v2432_v1  ;;  %v9854_v26 = vpop.f32.mrf.mxu3 }
 0x6f7   : > { %5262 = vst [vmem:[#allocation1 + $0x1] ss:$2 sm:$0xff] %v5199_v27 }
 0x6f8   : > { %5264 = vst [vmem:[#allocation1 + $0x10] ss:$2 sm:$0xff] %v5200_v52  ;;  %v5038_v29 = vmax.f32 %v5018_v10, 0.0  ;;  %v3180_v52 = vadd.f32 %v11206_v54, %v2817_v32  ;;  %v11209_v32 = vld [vmem:[#allocation60_spill] sm:$0xff] }
 0x6fa   : > { %v5078_v48 = vrot.slane %v5038_v29, 4  ;;  %v3543_v2 = vadd.f32 %v9425_v62, %v3180_v52 }
 0x6fb   : > { %v4951_v19 = vpop.f32.mrf.mxu0 }
 0x6fc   : > { %v4995_v30 = vadd.f32 %v4951_v19, %v4632_v20  ;;  %v6271_v27 = vrot.slane %v5078_v48, 10 }
 0x6fe   : > { %v5019_v3 = vadd.f32 %v9787_v42, %v4995_v30  ;;  %v5265_v22 = vld.sshfl [vmem:[#allocation1] sm:$0xff pattern:$0x75316420]  ;;  %v5360_v30 = vld [vmem:[#allocation3] sm:$0xff] }
 0x6ff   : > { %v5266_v36 = vld.sshfl [vmem:[#allocation1 + $0x10] sm:$0xff pattern:$0x75316420]  ;;  %v5321_v15 = vsel %vm9833_vm2, %v5265_v22, 0.0 }
 0x700   : > { %v5322_v24 = vsel %vm9839_vm3, %v5266_v36, 0.0  ;;  %v5039_v28 = vmax.f32 %v5019_v3, 0.0  ;;  %5344 = vst.msk [vmem:[#allocation3 + $0x10] sm:$0xff] %vm1743_vm0, %v5321_v15  ;;  %v11207_v3 = vld [vmem:[#allocation40_spill] sm:$0xff]  ;;  %v11208_v22 = vld [vmem:[#allocation51_spill] sm:$0xff] }
 0x701   : > { %5345 = vst.msk [vmem:[#allocation3 + $0x18] sm:$0x3] %vm5338_vm14, %v5322_v24  ;;  %v2437_v7 = vadd.f32 %v11208_v22, %v11207_v3  ;;  %v5373_v36 = vld [vmem:[#allocation3 + $0x1] sm:$0xff]  ;;  %v3906_v24 = vadd.f32 %v9778_v33, %v3543_v2  ;;  %v9880_v33 = vpop.f32.mrf.mxu2 }
 0x702   : > { %v5079_v45 = vrot.slane %v5039_v28, 4  ;;  %v5120_v0 = vrot.slane %v5039_v28, 6  ;;  %v5475_v15 = vld [vmem:[#allocation3 + $0x2] sm:$0xff]  ;;  %v9868_v28 = vpop.f32.mrf.mxu1 }
 0x703   : > { %v4953_v50 = vpop.f32.mrf.mxu0  ;;  %v4270_v52 = vadd.f32 %v9780_v37, %v3906_v24 }
 0x704   : > { %v5121_v10 = vsel %vm9802_vm11, %v6271_v27, %v5120_v0  ;;  %v5122_v40 = vrot.slane %v5120_v0, 4  ;;  %v5123_v20 = vrot.slane %v5079_v45, 6  ;;  %v2819_v27 = vadd.f32 %v11209_v32, %v2437_v7 }
 0x705   : > { %v5201_v19 = vmax.f32 %v5077_v35, %v5121_v10  ;;  %v4271_v45 = vadd.f32 %v9799_v5, %v3907_v53  ;;  %v11210_v10 = vld [vmem:[#allocation155_spill] sm:$0xff] }
 0x706   : > { %v5124_v1 = vsel %vm9802_vm11, %v5122_v40, %v5123_v20  ;;  %v5125_v21 = vrot.slane %v5123_v20, 4  ;;  %v3182_v40 = vadd.f32 %v11210_v10, %v2819_v27  ;;  %v9888_v20 = vpop.f32.mrf.mxu3  ;;  %v11211_v27 = vld [vmem:[#allocation139_spill] sm:$0xff]  ;;  %v11213_v10 = vld [vmem:[#allocation114_spill] sm:$0xff] }
 0x707   : > { %v5202_v59 = vmax.f32 %v5038_v29, %v5124_v1  ;;  %5268 = vst [vmem:[#allocation1 + $0x20] ss:$2 sm:$0xff] %v5201_v19  ;;  %v9870_v62 = vld [vmem:[#allocation3 + $0x10] sm:$0xff]  ;;  %v4634_v5 = vadd.f32 %v9806_v9, %v4271_v45  ;;  %v11212_v45 = vld [vmem:[#allocation147_spill] sm:$0xff] }
 0x708   : > { %v5203_v0 = vmax.f32 %v5078_v48, %v5125_v21  ;;  %v5368_v4 = vpack.c.bf16 %v9870_v62, %v5360_v30  ;;  %v9875_v12 = vld [vmem:[#allocation3 + $0x11] sm:$0xff]  ;;  %v4633_v48 = vadd.f32 %v9782_v41, %v4270_v52  ;;  %v3545_v37 = vadd.f32 %v9454_v58, %v3182_v40 }
 0x709   : > { %v9877_v54 = vld [vmem:[#allocation3 + $0x12] sm:$0xff]  ;;  %5270 = vst [vmem:[#allocation1 + $0x21] ss:$2 sm:$0xff] %v5202_v59  ;;  %v5381_v29 = vpack.c.bf16 %v9875_v12, %v5373_v36  ;;  %v3909_v52 = vadd.f32 %v9837_v13, %v9465_v44 }
 0x70a   : > { %v5483_v35 = vpack.c.bf16 %v9877_v54, %v5475_v15  ;;  %5272 = vst [vmem:[#allocation1 + $0x30] ss:$2 sm:$0xff] %v5203_v0  ;;  %6283 = vmatmul.msk.bf16.vlgmr.msra.gmra.mxu2 %vm1743_vm0, %v5368_v4  ;;  %v4996_v30 = vadd.f32 %v4953_v50, %v4633_v48  ;;  %v3908_v3 = vadd.f32 %v9814_v16, %v3545_v37  ;;  %v9896_v41 = vpop.f32.mrf.mxu1  ;;  %v9905_v50 = vpop.f32.mrf.mxu2  ;;  %v11214_v37 = vld [vmem:[#allocation159_spill] sm:$0xff] }
 0x70b   : > { %v4956_v2 = vpop.f32.mrf.mxu0  ;;  %6279 = vmatmul.msk.bf16.vlgmr.msra.gmra.mxu1 %vm1743_vm0, %v5381_v29  ;;  %v2442_v0 = vadd.f32 %v11212_v45, %v11211_v27  ;;  %v4273_v48 = vadd.f32 %v9846_v55, %v3909_v52 }
 0x70c   : > { %6288 = vmatmul.msk.bf16.vlgmr.msra.gmra.mxu3 %vm1743_vm0, %v5483_v35  ;;  %v4997_v19 = vadd.f32 %v4956_v2, %v4634_v5  ;;  %v4272_v22 = vadd.f32 %v9818_v14, %v3908_v3  ;;  %v5020_v1 = vadd.f32 %v9787_v42, %v4996_v30 }
 0x70d   : > { %v2821_v40 = vadd.f32 %v11213_v10, %v2442_v0  ;;  %v4636_v3 = vadd.f32 %v9854_v26, %v4273_v48 }
 0x70e   : > { %v5021_v9 = vadd.f32 %v9787_v42, %v4997_v19  ;;  %v4635_v58 = vadd.f32 %v9825_v25, %v4272_v22  ;;  %v9910_v4 = vpop.f32.mrf.mxu3  ;;  %v5040_v25 = vmax.f32 %v5020_v1, 0.0 }
 0x70f   : > { %v3184_v19 = vadd.f32 %v11214_v37, %v2821_v40  ;;  %v11215_v40 = vld [vmem:[#allocation158_spill] sm:$0xff] }
 0x710   : > { %v5041_v7 = vmax.f32 %v5021_v9, 0.0  ;;  %v5273_v53 = vld.sshfl [vmem:[#allocation1 + $0x20] sm:$0xff pattern:$0x75316420] }
 0x711   : > { %v5274_v21 = vld.sshfl [vmem:[#allocation1 + $0x30] sm:$0xff pattern:$0x75316420]  ;;  %v5323_v36 = vsel %vm9833_vm2, %v5273_v53, 0.0  ;;  %v3547_v26 = vadd.f32 %v9480_v63, %v3184_v19 }
 0x712   : > { %v5081_v15 = vrot.slane %v5041_v7, 4  ;;  %v5324_v16 = vsel %vm9839_vm3, %v5274_v21, 0.0  ;;  %5346 = vst.msk [vmem:[#allocation3 + $0x20] sm:$0xff] %vm1743_vm0, %v5323_v36  ;;  %v6272_v24 = vrot.slane %v5041_v7, 10  ;;  %v3878_v1 = vpop.f32.mrf.mxu1  ;;  %v5080_v21 = vrot.slane %v5040_v25, 4 }
 0x713   : > { %v4958_v14 = vpop.f32.mrf.mxu0  ;;  %5347 = vst.msk [vmem:[#allocation3 + $0x28] sm:$0x3] %vm5338_vm14, %v5324_v16 }
 0x714   : > { %v5128_v59 = vrot.slane %v5081_v15, 6  ;;  %v4998_v32 = vadd.f32 %v4958_v14, %v4635_v58 }
 0x716   : > { %v5129_v29 = vsel %vm9802_vm11, %v6272_v24, %v5128_v59  ;;  %v5022_v35 = vadd.f32 %v9787_v42, %v4998_v32  ;;  %v5130_v9 = vrot.slane %v5128_v59, 4  ;;  %v4242_v24 = vpop.f32.mrf.mxu2  ;;  %v3910_v32 = vadd.f32 %v9868_v28, %v3547_v26  ;;  %v4605_v0 = vpop.f32.mrf.mxu3  ;;  %v11218_v26 = vld [vmem:[#allocation165_spill] sm:$0xff] }
 0x717   : > { %v5204_v5 = vmax.f32 %v5040_v25, %v5129_v29 }
 0x718   : > { %v5042_v2 = vmax.f32 %v5022_v35, 0.0  ;;  %v4274_v25 = vadd.f32 %v9880_v33, %v3910_v32  ;;  %v11217_v33 = vld [vmem:[#allocation175_spill] sm:$0xff] }
 0x719   : > { %5275 = vst [vmem:[#allocation1] ss:$2 sm:$0xff] %v5204_v5  ;;  %v9920_v30 = vld [vmem:[#allocation3 + $0x20] sm:$0xff]  ;;  %v11216_v5 = vld [vmem:[#allocation108_spill] sm:$0xff] }
 0x71a   : > { %v5131_v44 = vrot.slane %v5042_v2, 6  ;;  %v9923_v13 = vld [vmem:[#allocation3 + $0x21] sm:$0xff]  ;;  %v5549_v53 = vpack.c.bf16 %v9920_v30, %v9870_v62  ;;  %v4637_v52 = vadd.f32 %v9888_v20, %v4274_v25  ;;  %v3881_v10 = vpop.f32.mrf.mxu1  ;;  %v2447_v48 = vadd.f32 %v11216_v5, %v11215_v40 }
 0x71b   : > { %v9925_v22 = vld [vmem:[#allocation3 + $0x22] sm:$0xff]  ;;  %v4961_v55 = vpop.f32.mrf.mxu0  ;;  %v5615_v36 = vpack.c.bf16 %v9923_v13, %v9875_v12  ;;  %v5082_v32 = vrot.slane %v5042_v2, 4 }
 0x71c   : > { %v5681_v58 = vpack.c.bf16 %v9925_v22, %v9877_v54  ;;  %v5132_v15 = vsel %vm9802_vm11, %v5130_v9, %v5131_v44  ;;  %v5133_v16 = vrot.slane %v5131_v44, 4  ;;  %v4999_v14 = vadd.f32 %v4961_v55, %v4636_v3 }
 0x71d   : > { %v5205_v59 = vmax.f32 %v5080_v21, %v5132_v15  ;;  %v2823_v44 = vadd.f32 %v11217_v33, %v2447_v48 }
 0x71e   : > { %v5206_v27 = vmax.f32 %v5041_v7, %v5133_v16  ;;  %v5023_v45 = vadd.f32 %v9787_v42, %v4999_v14  ;;  %v4245_v19 = vpop.f32.mrf.mxu2  ;;  %v4608_v55 = vpop.f32.mrf.mxu3 }
 0x71f   : > { %5276 = vst [vmem:[#allocation1 + $0x1] ss:$2 sm:$0xff] %v5205_v59  ;;  %v3186_v15 = vadd.f32 %v11218_v26, %v2823_v44 }
 0x720   : > { %5277 = vst [vmem:[#allocation1 + $0x10] ss:$2 sm:$0xff] %v5206_v27  ;;  %v5043_v63 = vmax.f32 %v5023_v45, 0.0 }
 0x721   : > { %v3549_v45 = vadd.f32 %v9502_v31, %v3186_v15  ;;  %v11219_v15 = vld [vmem:[#allocation115_spill] sm:$0xff] }
 0x722   : > { %v5083_v37 = vrot.slane %v5043_v63, 4 }
 0x723   : > { %v4963_v29 = vpop.f32.mrf.mxu0  ;;  %v3912_v40 = vadd.f32 %v3878_v1, %v3549_v45  ;;  %v11221_v45 = vld [vmem:[#allocation177_spill] sm:$0xff] }
 0x724   : > { %v5000_v35 = vadd.f32 %v4963_v29, %v4637_v52  ;;  %v6273_v16 = vrot.slane %v5083_v37, 10 }
 0x725   : > { %v4276_v31 = vadd.f32 %v4242_v24, %v3912_v40 }
 0x726   : > { %v5024_v28 = vadd.f32 %v9787_v42, %v5000_v35  ;;  %v5278_v7 = vld.sshfl [vmem:[#allocation1] sm:$0xff pattern:$0x75316420] }
 0x727   : > { %v5325_v3 = vsel %vm9833_vm2, %v5278_v7, 0.0  ;;  %v5279_v9 = vld.sshfl [vmem:[#allocation1 + $0x10] sm:$0xff pattern:$0x75316420]  ;;  %v3883_v7 = vpop.f32.mrf.mxu1  ;;  %v4639_v24 = vadd.f32 %v4605_v0, %v4276_v31  ;;  %v3913_v0 = vadd.f32 %v3881_v10, %v9513_v17  ;;  %v6297_v10 = vld [vmem:[%s10312_s5 + $0x4] sm:$0x1] }
 0x728   : > { %v5044_v21 = vmax.f32 %v5024_v28, 0.0  ;;  %5348 = vst.msk [vmem:[#allocation3 + $0x30] sm:$0xff] %vm1743_vm0, %v5325_v3  ;;  %v5326_v20 = vsel %vm9839_vm3, %v5279_v9, 0.0  ;;  %v3911_v28 = vadd.f32 %v9896_v41, %v9490_v23 }
 0x729   : > { %5349 = vst.msk [vmem:[#allocation3 + $0x38] sm:$0x3] %vm5338_vm14, %v5326_v20  ;;  %v4247_v20 = vpop.f32.mrf.mxu2 }
 0x72a   : > { %v5084_v14 = vrot.slane %v5044_v21, 4  ;;  %v5136_v59 = vrot.slane %v5044_v21, 6  ;;  %v4275_v21 = vadd.f32 %v9905_v50, %v3911_v28 }
 0x72b   : > { %v4966_v27 = vpop.f32.mrf.mxu0 }
 0x72c   : > { %v5137_v25 = vsel %vm9802_vm11, %v6273_v16, %v5136_v59  ;;  %v5138_v52 = vrot.slane %v5136_v59, 4  ;;  %v5139_v29 = vrot.slane %v5084_v14, 6  ;;  %v11220_v16 = vld [vmem:[#allocation126_spill] sm:$0xff] }
 0x72d   : > { %v5207_v35 = vmax.f32 %v5082_v32, %v5137_v25  ;;  %v2452_v14 = vadd.f32 %v11220_v16, %v11219_v15 }
 0x72e   : > { %v5140_v5 = vsel %vm9802_vm11, %v5138_v52, %v5139_v29  ;;  %v5141_v48 = vrot.slane %v5139_v29, 4 }
 0x72f   : > { %v5208_v3 = vmax.f32 %v5043_v63, %v5140_v5  ;;  %v9958_v2 = vld [vmem:[#allocation3 + $0x30] sm:$0xff]  ;;  %5280 = vst [vmem:[#allocation1 + $0x20] ss:$2 sm:$0xff] %v5207_v35  ;;  %v4638_v63 = vadd.f32 %v9910_v4, %v4275_v21  ;;  %v2825_v25 = vadd.f32 %v11221_v45, %v2452_v14  ;;  %v4277_v4 = vadd.f32 %v4245_v19, %v3913_v0  ;;  %v3886_v40 = vpop.f32.mrf.mxu1 }
 0x730   : > { %v5209_v9 = vmax.f32 %v5083_v37, %v5141_v48  ;;  %v9962_v33 = vpack.c.bf16 %v9958_v2, %v9920_v30  ;;  %v9964_v44 = vld [vmem:[#allocation3 + $0x31] sm:$0xff]  ;;  %v4610_v37 = vpop.f32.mrf.mxu3 }
 0x731   : > { %v9966_v1 = vld [vmem:[#allocation3 + $0x32] sm:$0xff]  ;;  %5281 = vst [vmem:[#allocation1 + $0x21] ss:$2 sm:$0xff] %v5208_v3  ;;  %v9971_v23 = vpack.c.bf16 %v9964_v44, %v9923_v13  ;;  %v5001_v59 = vadd.f32 %v4966_v27, %v4638_v63  ;;  %v3188_v35 = vadd.f32 %v9406_v39, %v2825_v25  ;;  %v4640_v3 = vadd.f32 %v4608_v55, %v4277_v4  ;;  %v4250_v19 = vpop.f32.mrf.mxu2  ;;  %v6302_v55 = vld [vmem:[%s10312_s5 + $0x5] sm:$0x1] }
 0x732   : > { %v9975_v41 = vpack.c.bf16 %v9966_v1, %v9925_v22  ;;  %5282 = vst [vmem:[#allocation1 + $0x30] ss:$2 sm:$0xff] %v5209_v9  ;;  %6284 = vmatmul.msk.bf16.gmra.mxu2 %vm1743_vm0, %v9962_v33  ;;  %v5634_v9 = vsel %vm2314_vm8, %v6297_v10, 0 }
 0x733   : > { %v4968_v26 = vpop.f32.mrf.mxu0  ;;  %6280 = vmatmul.msk.bf16.gmra.mxu1 %vm1743_vm0, %v9971_v23  ;;  %v5025_v5 = vadd.f32 %v9787_v42, %v5001_v59  ;;  %v3551_v39 = vadd.f32 %v9526_v18, %v3188_v35  ;;  %5643 = vmatpush.bf16.msrb.mxu2 %v5634_v9  ;;  %v6292_v18 = vld [vmem:[%s10312_s5 + $0x3] sm:$0x1] }
 0x734   : > { %6289 = vmatmul.msk.bf16.gmra.mxu3 %vm1743_vm0, %v9975_v41  ;;  %v5002_v50 = vadd.f32 %v4968_v26, %v4639_v24  ;;  %v5700_v26 = vsel %vm2314_vm8, %v6302_v55, 0  ;;  %v5568_v16 = vsel %vm2314_vm8, %v6292_v18, 0 }
 0x735   : > { %v5045_v15 = vmax.f32 %v5025_v5, 0.0  ;;  %5709 = vmatpush.bf16.msrb.mxu3 %v5700_v26  ;;  %v3914_v14 = vadd.f32 %v3883_v7, %v3551_v39  ;;  %5577 = vmatpush.bf16.msrb.mxu1 %v5568_v16 }
 0x736   : > { %v5026_v32 = vadd.f32 %v9787_v42, %v5002_v50 }
 0x737   : > { %v4278_v45 = vadd.f32 %v4247_v20, %v3914_v14 }
 0x738   : > { %v5046_v52 = vmax.f32 %v5026_v32, 0.0  ;;  %v5283_v29 = vld.sshfl [vmem:[#allocation1 + $0x20] sm:$0xff pattern:$0x75316420]  ;;  %v4613_v50 = vpop.f32.mrf.mxu3 }
 0x739   : > { %v5284_v48 = vld.sshfl [vmem:[#allocation1 + $0x30] sm:$0xff pattern:$0x75316420]  ;;  %v5327_v28 = vsel %vm9833_vm2, %v5283_v29, 0.0  ;;  %v4641_v29 = vadd.f32 %v4610_v37, %v4278_v45  ;;  %v4252_v9 = vpop.f32.mrf.mxu2 }
 0x73a   : > { %v5086_v27 = vrot.slane %v5046_v52, 4  ;;  %v5328_v17 = vsel %vm9839_vm3, %v5284_v48, 0.0  ;;  %5350 = vst.msk [vmem:[#allocation3 + $0x40] sm:$0xff] %vm1743_vm0, %v5327_v28  ;;  %v6274_v21 = vrot.slane %v5046_v52, 10 }
 0x73b   : > { %v4971_v31 = vpop.f32.mrf.mxu0  ;;  %5351 = vst.msk [vmem:[#allocation3 + $0x48] sm:$0x3] %vm5338_vm14, %v5328_v17 }
 0x73c   : > { %v5144_v24 = vrot.slane %v5086_v27, 6  ;;  %v5003_v63 = vadd.f32 %v4971_v31, %v4640_v3  ;;  %v3888_v3 = vpop.f32.mrf.mxu1  ;;  %v5085_v27 = vrot.slane %v5045_v15, 4 }
 0x73e   : > { %v5145_v59 = vsel %vm9802_vm11, %v6274_v21, %v5144_v24  ;;  %v5027_v0 = vadd.f32 %v9787_v42, %v5003_v63  ;;  %v5146_v35 = vrot.slane %v5144_v24, 4  ;;  %v3915_v21 = vadd.f32 %v3886_v40, %v9544_v49 }
 0x73f   : > { %v5210_v32 = vmax.f32 %v5045_v15, %v5145_v59 }
 0x740   : > { %v5047_v25 = vmax.f32 %v5027_v0, 0.0  ;;  %v4615_v26 = vpop.f32.mrf.mxu3  ;;  %v4279_v18 = vadd.f32 %v4250_v19, %v3915_v21 }
 0x741   : > { %5285 = vst [vmem:[#allocation1] ss:$2 sm:$0xff] %v5210_v32  ;;  %v10013_v4 = vld [vmem:[#allocation3 + $0x40] sm:$0xff]  ;;  %v4255_v49 = vpop.f32.mrf.mxu2 }
 0x742   : > { %v5147_v48 = vrot.slane %v5047_v25, 6  ;;  %v10015_v5 = vld [vmem:[#allocation3 + $0x41] sm:$0xff]  ;;  %v5550_v7 = vpack.c.bf16 %v10013_v4, %v9958_v2  ;;  %v4642_v15 = vadd.f32 %v4613_v50, %v4279_v18  ;;  %v11224_v50 = vld [vmem:[#allocation181_spill] sm:$0xff] }
 0x743   : > { %v10017_v28 = vld [vmem:[#allocation3 + $0x42] sm:$0xff]  ;;  %v4973_v17 = vpop.f32.mrf.mxu0  ;;  %v5616_v20 = vpack.c.bf16 %v10015_v5, %v9964_v44 }
 0x744   : > { %v5682_v10 = vpack.c.bf16 %v10017_v28, %v9966_v1  ;;  %v5148_v37 = vsel %vm9802_vm11, %v5146_v35, %v5147_v48  ;;  %v5149_v39 = vrot.slane %v5147_v48, 4  ;;  %v5004_v31 = vadd.f32 %v4973_v17, %v4641_v29  ;;  %v3891_v0 = vpop.f32.mrf.mxu1  ;;  %v11222_v35 = vld [vmem:[#allocation179_spill] sm:$0xff]  ;;  %v11223_v48 = vld [vmem:[#allocation180_spill] sm:$0xff] }
 0x745   : > { %v5211_v55 = vmax.f32 %v5085_v27, %v5148_v37  ;;  %v2457_v27 = vadd.f32 %v11223_v48, %v11222_v35  ;;  %v11225_v35 = vld [vmem:[#allocation146_spill] sm:$0xff]  ;;  %v11226_v48 = vld [vmem:[#allocation148_spill] sm:$0xff] }
 0x746   : > { %v5212_v24 = vmax.f32 %v5046_v52, %v5149_v39  ;;  %v5028_v63 = vadd.f32 %v9787_v42, %v5004_v31 }
 0x747   : > { %5286 = vst [vmem:[#allocation1 + $0x1] ss:$2 sm:$0xff] %v5211_v55  ;;  %v2827_v37 = vadd.f32 %v11224_v50, %v2457_v27  ;;  %v2462_v27 = vadd.f32 %v11226_v48, %v11225_v35 }
 0x748   : > { %5287 = vst [vmem:[#allocation1 + $0x10] ss:$2 sm:$0xff] %v5212_v24  ;;  %v5048_v16 = vmax.f32 %v5028_v63, 0.0  ;;  %v4618_v39 = vpop.f32.mrf.mxu3  ;;  %v5087_v63 = vrot.slane %v5047_v25, 4 }
 0x749   : > { %v3190_v24 = vadd.f32 %v9433_v57, %v2827_v37  ;;  %v11227_v37 = vld [vmem:[#allocation154_spill] sm:$0xff] }
 0x74a   : > { %v5088_v32 = vrot.slane %v5048_v16, 4 }
 0x74b   : > { %v4976_v14 = vpop.f32.mrf.mxu0 }
 0x74c   : > { %v5005_v59 = vadd.f32 %v4976_v14, %v4642_v15  ;;  %v6275_v31 = vrot.slane %v5088_v32, 10  ;;  %v3893_v25 = vpop.f32.mrf.mxu1 }
 0x74e   : > { %v5029_v45 = vadd.f32 %v9787_v42, %v5005_v59  ;;  %v5288_v29 = vld.sshfl [vmem:[#allocation1] sm:$0xff pattern:$0x75316420] }
 0x74f   : > { %v5329_v52 = vsel %vm9833_vm2, %v5288_v29, 0.0  ;;  %v5289_v40 = vld.sshfl [vmem:[#allocation1 + $0x10] sm:$0xff pattern:$0x75316420] }
 0x750   : > { %v5049_v17 = vmax.f32 %v5029_v45, 0.0  ;;  %5352 = vst.msk [vmem:[#allocation3 + $0x50] sm:$0xff] %vm1743_vm0, %v5329_v52  ;;  %v5330_v19 = vsel %vm9839_vm3, %v5289_v40, 0.0  ;;  %v3553_v45 = vadd.f32 %v9552_v11, %v3190_v24  ;;  %v3917_v52 = vadd.f32 %v3891_v0, %v9557_v56 }
 0x751   : > { %5353 = vst.msk [vmem:[#allocation3 + $0x58] sm:$0x3] %vm5338_vm14, %v5330_v19 }
 0x752   : > { %v5089_v55 = vrot.slane %v5049_v17, 4  ;;  %v5152_v21 = vrot.slane %v5049_v17, 6  ;;  %v3916_v57 = vadd.f32 %v3888_v3, %v3553_v45 }
 0x753   : > { %v4978_v18 = vpop.f32.mrf.mxu0 }
 0x754   : > { %v5153_v15 = vsel %vm9802_vm11, %v6275_v31, %v5152_v21  ;;  %v5154_v14 = vrot.slane %v5152_v21, 4  ;;  %v5155_v59 = vrot.slane %v5089_v55, 6  ;;  %v2829_v31 = vadd.f32 %v11227_v37, %v2462_v27 }
 0x755   : > { %v5213_v29 = vmax.f32 %v5087_v63, %v5153_v15  ;;  %v4281_v55 = vadd.f32 %v4255_v49, %v3917_v52  ;;  %v4280_v0 = vadd.f32 %v4252_v9, %v3916_v57  ;;  %v4257_v63 = vpop.f32.mrf.mxu2  ;;  %v3896_v52 = vpop.f32.mrf.mxu1 }
 0x756   : > { %v5156_v40 = vsel %vm9802_vm11, %v5154_v14, %v5155_v59  ;;  %v5157_v17 = vrot.slane %v5155_v59, 4  ;;  %v4620_v14 = vpop.f32.mrf.mxu3 }
 0x757   : > { %v5214_v19 = vmax.f32 %v5048_v16, %v5156_v40  ;;  %v10048_v50 = vld [vmem:[#allocation3 + $0x50] sm:$0xff]  ;;  %5290 = vst [vmem:[#allocation1 + $0x20] ss:$2 sm:$0xff] %v5213_v29  ;;  %v4644_v49 = vadd.f32 %v4618_v39, %v4281_v55  ;;  %v4643_v15 = vadd.f32 %v4615_v26, %v4280_v0 }
 0x758   : > { %v5215_v11 = vmax.f32 %v5088_v32, %v5157_v17  ;;  %v10053_v21 = vpack.c.bf16 %v10048_v50, %v10013_v4  ;;  %v10055_v24 = vld [vmem:[#allocation3 + $0x51] sm:$0xff]  ;;  %v3192_v32 = vadd.f32 %v9459_v6, %v2829_v31 }
 0x759   : > { %v10057_v56 = vld [vmem:[#allocation3 + $0x52] sm:$0xff]  ;;  %5291 = vst [vmem:[#allocation1 + $0x21] ss:$2 sm:$0xff] %v5214_v19  ;;  %v10061_v3 = vpack.c.bf16 %v10055_v24, %v10015_v5  ;;  %v5006_v29 = vadd.f32 %v4978_v18, %v4643_v15 }
 0x75a   : > { %v10065_v16 = vpack.c.bf16 %v10057_v56, %v10017_v28  ;;  %5292 = vst [vmem:[#allocation1 + $0x30] ss:$2 sm:$0xff] %v5215_v11  ;;  %6285 = vmatmul.msk.bf16.gmra.mxu2 %vm1743_vm0, %v10053_v21  ;;  %v3555_v59 = vadd.f32 %v9568_v47, %v3192_v32 }
 0x75b   : > { %v4981_v9 = vpop.f32.mrf.mxu0  ;;  %6281 = vmatmul.msk.bf16.gmra.mxu1 %vm1743_vm0, %v10061_v3  ;;  %v5030_v26 = vadd.f32 %v9787_v42, %v5006_v29 }
 0x75c   : > { %6290 = vmatmul.msk.bf16.gmra.mxu3 %vm1743_vm0, %v10065_v16  ;;  %v5007_v45 = vadd.f32 %v4981_v9, %v4644_v49  ;;  %v3918_v35 = vadd.f32 %v3893_v25, %v3555_v59  ;;  %v3919_v49 = vadd.f32 %v3896_v52, %v9576_v60 }
 0x75d   : > { %v4260_v18 = vpop.f32.mrf.mxu2  ;;  %v5050_v0 = vmax.f32 %v5030_v26, 0.0  ;;  %v3898_v26 = vpop.f32.mrf.mxu1 }
 0x75e   : > { %v5031_v6 = vadd.f32 %v9787_v42, %v5007_v45  ;;  %v4282_v39 = vadd.f32 %v4257_v63, %v3918_v35  ;;  %v4623_v11 = vpop.f32.mrf.mxu3  ;;  %v11228_v63 = vld [vmem:[#allocation166_spill] sm:$0xff]  ;;  %v4283_v45 = vadd.f32 %v4260_v18, %v3919_v49 }
 0x75f   : > { %v2467_v32 = vadd.f32 %v9747_v51, %v11228_v63  ;;  %v5090_v51 = vrot.slane %v5050_v0, 4  ;;  %v6317_v63 = vld [vmem:[%s10312_s5 + $0x8] sm:$0x1] }
 0x760   : > { %v5051_v48 = vmax.f32 %v5031_v6, 0.0  ;;  %v5293_v27 = vld.sshfl [vmem:[#allocation1 + $0x20] sm:$0xff pattern:$0x75316420]  ;;  %v4645_v57 = vadd.f32 %v4620_v14, %v4282_v39  ;;  %v4646_v6 = vadd.f32 %v4623_v11, %v4283_v45 }
 0x761   : > { %v5294_v40 = vld.sshfl [vmem:[#allocation1 + $0x30] sm:$0xff pattern:$0x75316420]  ;;  %v5331_v17 = vsel %vm9833_vm2, %v5293_v27, 0.0  ;;  %v2831_v59 = vadd.f32 %v9749_v61, %v2467_v32  ;;  %v5899_v32 = vsel %vm2314_vm8, %v6317_v63, 0 }
 0x762   : > { %v5091_v19 = vrot.slane %v5051_v48, 4  ;;  %v5332_v47 = vsel %vm9839_vm3, %v5294_v40, 0.0  ;;  %5354 = vst.msk [vmem:[#allocation3 + $0x60] sm:$0xff] %vm1743_vm0, %v5331_v17  ;;  %v6276_v37 = vrot.slane %v5051_v48, 10  ;;  %5908 = vmatpush.bf16.msra.mxu3 %v5899_v32 }
 0x763   : > { %v4983_v25 = vpop.f32.mrf.mxu0  ;;  %5355 = vst.msk [vmem:[#allocation3 + $0x68] sm:$0x3] %vm5338_vm14, %v5332_v47  ;;  %v3194_v35 = vadd.f32 %v9751_v43, %v2831_v59 }
 0x764   : > { %v5160_v31 = vrot.slane %v5091_v19, 6  ;;  %v5008_v55 = vadd.f32 %v4983_v25, %v4645_v57 }
 0x765   : > { %v3557_v60 = vadd.f32 %v9763_v46, %v3194_v35  ;;  %v4262_v19 = vpop.f32.mrf.mxu2  ;;  %v6312_v46 = vld [vmem:[%s10312_s5 + $0x7] sm:$0x1] }
 0x766   : > { %v5161_v15 = vsel %vm9802_vm11, %v6276_v37, %v5160_v31  ;;  %v5032_v14 = vadd.f32 %v9787_v42, %v5008_v55  ;;  %v5162_v39 = vrot.slane %v5160_v31, 4  ;;  %v4625_v43 = vpop.f32.mrf.mxu3 }
 0x767   : > { %v5216_v9 = vmax.f32 %v5050_v0, %v5161_v15  ;;  %v3920_v47 = vadd.f32 %v3898_v26, %v3557_v60  ;;  %v5833_v0 = vsel %vm2314_vm8, %v6312_v46, 0 }
 0x768   : > { %v5052_v29 = vmax.f32 %v5032_v14, 0.0  ;;  %5842 = vmatpush.bf16.msra.mxu2 %v5833_v0 }
 0x769   : > { %5295 = vst [vmem:[#allocation1] ss:$2 sm:$0xff] %v5216_v9  ;;  %v4284_v37 = vadd.f32 %v4262_v19, %v3920_v47  ;;  %v5366_v47 = vld [vmem:[#allocation3 + $0x60] sm:$0xff] }
 0x76a   : > { %v5163_v27 = vrot.slane %v5052_v29, 6  ;;  %v5551_v12 = vpack.c.bf16 %v5366_v47, %v10048_v50 }
 0x76b   : > { %v4986_v40 = vpop.f32.mrf.mxu0  ;;  %v4647_v31 = vadd.f32 %v4625_v43, %v4284_v37 }
 0x76c   : > { %v5164_v52 = vsel %vm9802_vm11, %v5162_v39, %v5163_v27  ;;  %v5165_v17 = vrot.slane %v5163_v27, 4  ;;  %v5009_v57 = vadd.f32 %v4986_v40, %v4646_v6  ;;  %v6307_v6 = vld [vmem:[%s10312_s5 + $0x6] sm:$0x1] }
 0x76d   : > { %v5217_v61 = vmax.f32 %v5090_v51, %v5164_v52  ;;  %v5767_v39 = vsel %vm2314_vm8, %v6307_v6, 0  ;;  %v5092_v51 = vrot.slane %v5052_v29, 4 }
 0x76e   : > { %v5218_v18 = vmax.f32 %v5051_v48, %v5165_v17  ;;  %v5033_v25 = vadd.f32 %v9787_v42, %v5009_v57  ;;  %5776 = vmatpush.bf16.msra.mxu1 %v5767_v39 }
 0x76f   : > { %5296 = vst [vmem:[#allocation1 + $0x1] ss:$2 sm:$0xff] %v5217_v61 }
 0x770   : > { %5297 = vst [vmem:[#allocation1 + $0x10] ss:$2 sm:$0xff] %v5218_v18  ;;  %v5053_v55 = vmax.f32 %v5033_v25, 0.0  ;;  %v5379_v25 = vld [vmem:[#allocation3 + $0x61] sm:$0xff] }
 0x771   : > { %v5617_v62 = vpack.c.bf16 %v5379_v25, %v10055_v24 }
 0x772   : > { %v5093_v49 = vrot.slane %v5053_v55, 4 }
 0x773   : > { %v4988_v11 = vpop.f32.mrf.mxu0 }
 0x774   : > { %v5010_v48 = vadd.f32 %v4988_v11, %v4647_v31  ;;  %v5481_v31 = vld [vmem:[#allocation3 + $0x62] sm:$0xff] }
 0x775   : > { %v5683_v54 = vpack.c.bf16 %v5481_v31, %v10057_v56 }
 0x776   : > { %v5034_v15 = vadd.f32 %v9787_v42, %v5010_v48  ;;  %v5298_v14 = vld.sshfl [vmem:[#allocation1] sm:$0xff pattern:$0x75316420]  ;;  %v6277_v42 = vrot.slane %v5093_v49, 10 }
 0x777   : > { %v5333_v9 = vsel %vm9833_vm2, %v5298_v14, 0.0  ;;  %v5299_v59 = vld.sshfl [vmem:[#allocation1 + $0x10] sm:$0xff pattern:$0x75316420] }
 0x778   : > { %v5054_v45 = vmax.f32 %v5034_v15, 0.0  ;;  %5356 = vst.msk [vmem:[#allocation3 + $0x70] sm:$0xff] %vm1743_vm0, %v5333_v9  ;;  %v5334_v35 = vsel %vm9839_vm3, %v5299_v59, 0.0 }
 0x779   : > { %5357 = vst.msk [vmem:[#allocation3 + $0x78] sm:$0x3] %vm5338_vm14, %v5334_v35 }
 0x77a   : > { %v5094_v27 = vrot.slane %v5054_v45, 4  ;;  %v5168_v26 = vrot.slane %v5054_v45, 6 }
 0x77c   : > { %v5169_v40 = vsel %vm9802_vm11, %v6277_v42, %v5168_v26  ;;  %v5170_v60 = vrot.slane %v5168_v26, 4  ;;  %v5171_v52 = vrot.slane %v5094_v27, 6 }
 0x77d   : > { %v5219_v17 = vmax.f32 %v5092_v51, %v5169_v40 }
 0x77e   : > { %v5172_v57 = vsel %vm9802_vm11, %v5170_v60, %v5171_v52  ;;  %v5173_v19 = vrot.slane %v5171_v52, 4 }
 0x77f   : > { %v5220_v61 = vmax.f32 %v5053_v55, %v5172_v57  ;;  %v10118_v18 = vld [vmem:[#allocation3 + $0x70] sm:$0xff]  ;;  %5300 = vst [vmem:[#allocation1 + $0x20] ss:$2 sm:$0xff] %v5219_v17 }
 0x780   : > { %v5221_v43 = vmax.f32 %v5093_v49, %v5173_v19  ;;  %v10121_v37 = vpack.c.bf16 %v10118_v18, %v5366_v47  ;;  %v5380_v29 = vld [vmem:[#allocation3 + $0x71] sm:$0xff] }
 0x781   : > { %v5482_v46 = vld [vmem:[#allocation3 + $0x72] sm:$0xff]  ;;  %5301 = vst [vmem:[#allocation1 + $0x21] ss:$2 sm:$0xff] %v5220_v61  ;;  %v10123_v11 = vpack.c.bf16 %v5380_v29, %v5379_v25 }
 0x782   : > { %v10125_v0 = vpack.c.bf16 %v5482_v46, %v5481_v31  ;;  %5302 = vst [vmem:[#allocation1 + $0x30] ss:$2 sm:$0xff] %v5221_v43  ;;  %6286 = vmatmul.msk.bf16.gmra.mxu2 %vm1743_vm0, %v10121_v37 }
 0x783   : > { %6282 = vmatmul.msk.bf16.gmra.mxu1 %vm1743_vm0, %v10123_v11 }
 0x784   : > { %6291 = vmatmul.msk.bf16.gmra.mxu3 %vm1743_vm0, %v10125_v0 }
 0x788   : > { %v5303_v34 = vld.sshfl [vmem:[#allocation1 + $0x20] sm:$0xff pattern:$0x75316420]  ;;  %v5411_v32 = vpop.f32.mrf.mxu1 }
 0x789   : > { %v5304_v55 = vld.sshfl [vmem:[#allocation1 + $0x30] sm:$0xff pattern:$0x75316420]  ;;  %v5335_v63 = vsel %vm9833_vm2, %v5303_v34, 0.0 }
 0x78a   : > { %v5336_v48 = vsel %vm9839_vm3, %v5304_v55, 0.0  ;;  %5358 = vst.msk [vmem:[#allocation3 + $0x80] sm:$0xff] %vm1743_vm0, %v5335_v63 }
 0x78b   : > { %5359 = vst.msk [vmem:[#allocation3 + $0x88] sm:$0x3] %vm5338_vm14, %v5336_v48 }
 0x78d   : > { %v5455_v49 = vpop.f32.mrf.mxu2 }
 0x78e   : > { %v5456_v15 = vadd.f32 %v5455_v49, %v5411_v32 }
 0x78f   : > { %v5513_v14 = vpop.f32.mrf.mxu3 }
 0x790   : > { %v10139_v9 = vadd.f32 %v5513_v14, %v5456_v15  ;;  %v5413_v8 = vpop.f32.mrf.mxu1 }
 0x792   : > { %6298 = vmatmul.msk.bf16.vlgmr.msrb.gmra.mxu2 %vm1743_vm0, %v5615_v36  ;;  %v5614_v4 = vld [vmem:[#allocation3 + $0x81] sm:$0xff] }
 0x793   : > { %6293 = vmatmul.msk.bf16.vlgmr.msrb.gmra.mxu1 %vm1743_vm0, %v5549_v53  ;;  %v5618_v50 = vpack.c.bf16 %v5614_v4, %v5380_v29 }
 0x794   : > { %6303 = vmatmul.msk.bf16.vlgmr.msrb.gmra.mxu3 %vm1743_vm0, %v5681_v58  ;;  %v6322_v58 = vld [vmem:[%s10314_s7 + $0x2] sm:$0x3] }
 0x795   : > { %v5457_v38 = vpop.f32.mrf.mxu2  ;;  %v5974_v2 = vsel %vm5107_vm9, %v6322_v58, 0 }
 0x796   : > { %v5458_v59 = vadd.f32 %v5457_v38, %v5413_v8  ;;  %5983 = vmatpush.bf16.msrb.mxu0 %v5974_v2 }
 0x797   : > { %v5515_v45 = vpop.f32.mrf.mxu3 }
 0x798   : > { %v10153_v35 = vadd.f32 %v5515_v45, %v5458_v59 }
 0x7a2   : > { %6299 = vmatmul.msk.bf16.gmra.mxu2 %vm1743_vm0, %v5616_v20  ;;  %v5680_v20 = vld [vmem:[#allocation3 + $0x82] sm:$0xff] }
 0x7a3   : > { %6294 = vmatmul.msk.bf16.gmra.mxu1 %vm1743_vm0, %v5550_v7  ;;  %v5548_v7 = vld [vmem:[#allocation3 + $0x80] sm:$0xff]  ;;  %v5684_v56 = vpack.c.bf16 %v5680_v20, %v5482_v46 }
 0x7a4   : > { %6304 = vmatmul.msk.bf16.gmra.mxu3 %vm1743_vm0, %v5682_v10  ;;  %v5552_v24 = vpack.c.bf16 %v5548_v7, %v10118_v18 }
 0x7b0   : > { %v5416_v30 = vpop.f32.mrf.mxu1 }
 0x7b2   : > { %6300 = vmatmul.msk.bf16.gmra.mxu2 %vm1743_vm0, %v5617_v62 }
 0x7b3   : > { %6295 = vmatmul.msk.bf16.gmra.mxu1 %vm1743_vm0, %v5551_v12 }
 0x7b4   : > { %6305 = vmatmul.msk.bf16.gmra.mxu3 %vm1743_vm0, %v5683_v54 }
 0x7b5   : > { %v5460_v13 = vpop.f32.mrf.mxu2 }
 0x7b6   : > { %v5461_v22 = vadd.f32 %v5460_v13, %v5416_v30 }
 0x7b7   : > { %v5518_v53 = vpop.f32.mrf.mxu3 }
 0x7b8   : > { %v10173_v36 = vadd.f32 %v5518_v53, %v5461_v22  ;;  %v5418_v44 = vpop.f32.mrf.mxu1 }
 0x7bd   : > { %v5462_v1 = vpop.f32.mrf.mxu2 }
 0x7be   : > { %v5463_v5 = vadd.f32 %v5462_v1, %v5418_v44 }
 0x7bf   : > { %v5520_v28 = vpop.f32.mrf.mxu3 }
 0x7c0   : > { %v10179_v10 = vadd.f32 %v5520_v28, %v5463_v5 }
 0x7c2   : > { %6301 = vmatmul.msk.bf16.gmra.mxu2 %vm1743_vm0, %v5618_v50 }
 0x7c3   : > { %6296 = vmatmul.msk.bf16.gmra.mxu1 %vm1743_vm0, %v5552_v24 }
 0x7c4   : > { %6306 = vmatmul.msk.bf16.gmra.mxu3 %vm1743_vm0, %v5684_v56 }
 0x7d2   : > { %6313 = vmatmul.msk.bf16.vlgmr.msra.gmra.mxu2 %vm1743_vm0, %v9971_v23 }
 0x7d3   : > { %6308 = vmatmul.msk.bf16.vlgmr.msra.gmra.mxu1 %vm1743_vm0, %v9962_v33 }
 0x7d4   : > { %6318 = vmatmul.msk.bf16.vlgmr.msra.gmra.mxu3 %vm1743_vm0, %v9975_v41  ;;  %v5813_v41 = vld [vmem:[#allocation3 + $0x91] sm:$0xff] }
 0x7d5   : > { %v5817_v17 = vpack.c.bf16 %v5813_v41, %v5614_v4 }
 0x7d8   : > { %v5421_v6 = vpop.f32.mrf.mxu1 }
 0x7dd   : > { %v5465_v39 = vpop.f32.mrf.mxu2 }
 0x7de   : > { %v5466_v42 = vadd.f32 %v5465_v39, %v5421_v6 }
 0x7df   : > { %v5523_v27 = vpop.f32.mrf.mxu3 }
 0x7e0   : > { %v5537_v26 = vadd.f32 %v5523_v27, %v5466_v42  ;;  %v5423_v23 = vpop.f32.mrf.mxu1 }
 0x7e2   : > { %6314 = vmatmul.msk.bf16.gmra.mxu2 %vm1743_vm0, %v10061_v3  ;;  %v5747_v3 = vld [vmem:[#allocation3 + $0x90] sm:$0xff] }
 0x7e3   : > { %6309 = vmatmul.msk.bf16.gmra.mxu1 %vm1743_vm0, %v10053_v21  ;;  %v5879_v21 = vld [vmem:[#allocation3 + $0x92] sm:$0xff] }
 0x7e4   : > { %6319 = vmatmul.msk.bf16.gmra.mxu3 %vm1743_vm0, %v10065_v16  ;;  %v5751_v16 = vpack.c.bf16 %v5747_v3, %v5548_v7  ;;  %v5883_v57 = vpack.c.bf16 %v5879_v21, %v5680_v20 }
 0x7e5   : > { %v5467_v51 = vpop.f32.mrf.mxu2 }
 0x7e6   : > { %v5468_v33 = vadd.f32 %v5467_v51, %v5423_v23 }
 0x7e7   : > { %v5525_v40 = vpop.f32.mrf.mxu3 }
 0x7e8   : > { %v5538_v60 = vadd.f32 %v5525_v40, %v5468_v33 }
 0x7f2   : > { %6315 = vmatmul.msk.bf16.gmra.mxu2 %vm1743_vm0, %v10123_v11 }
 0x7f3   : > { %6310 = vmatmul.msk.bf16.gmra.mxu1 %vm1743_vm0, %v10121_v37 }
 0x7f4   : > { %6320 = vmatmul.msk.bf16.gmra.mxu3 %vm1743_vm0, %v10125_v0 }
 0x800   : > { %v5426_v52 = vpop.f32.mrf.mxu1 }
 0x802   : > { %6316 = vmatmul.msk.bf16.gmra.mxu2 %vm1743_vm0, %v5817_v17  ;;  %v10230_v17 = vld [vmem:[%s10313_s6] ss:$0 sm:$0xff] }
 0x803   : > { %6311 = vmatmul.msk.bf16.gmra.mxu1 %vm1743_vm0, %v5751_v16 }
 0x804   : > { %6321 = vmatmul.msk.bf16.gmra.mxu3 %vm1743_vm0, %v5883_v57  ;;  %v5966_v57 = vld [vmem:[%s10314_s7] sm:$0x3]  ;;  %vm5969_vm0 = vcmask 31744  }
 0x805   : > { %v5470_v19 = vpop.f32.mrf.mxu2 }
 0x806   : > { %v5471_v61 = vadd.f32 %v5470_v19, %v5426_v52 }
 0x807   : > { %v5528_v47 = vpop.f32.mrf.mxu3 }
 0x808   : > { %v5539_v18 = vadd.f32 %v5528_v47, %v5471_v61  ;;  %v5428_v25 = vpop.f32.mrf.mxu1  ;;  %v5993_v61 = vsel %vm5107_vm9, %v5966_v57, 0 }
 0x809   : > { %6002 = vmatpush.bf16.msra.mxu0 %v5993_v61 }
 0x80d   : > { %v5472_v43 = vpop.f32.mrf.mxu2 }
 0x80e   : > { %v5473_v37 = vadd.f32 %v5472_v43, %v5428_v25 }
 0x80f   : > { %v5530_v29 = vpop.f32.mrf.mxu3 }
 0x810   : > { %v10206_v31 = vadd.f32 %v5530_v29, %v5473_v37  ;;  %v5579_v46 = vpop.f32.mrf.mxu1 }
 0x811   : > { %v5599_v11 = vadd.f32 %v5579_v46, %v10139_v9 }
 0x815   : > { %v5645_v0 = vpop.f32.mrf.mxu2 }
 0x816   : > { %v5665_v34 = vadd.f32 %v5645_v0, %v5599_v11 }
 0x817   : > { %v5711_v55 = vpop.f32.mrf.mxu3 }
 0x818   : > { %v5731_v63 = vadd.f32 %v5711_v55, %v5665_v34  ;;  %v5581_v48 = vpop.f32.mrf.mxu1 }
 0x819   : > { %v5600_v32 = vadd.f32 %v5581_v48, %v10153_v35 }
 0x81d   : > { %v5647_v49 = vpop.f32.mrf.mxu2 }
 0x81e   : > { %v5666_v15 = vadd.f32 %v5647_v49, %v5600_v32 }
 0x81f   : > { %v5713_v14 = vpop.f32.mrf.mxu3 }
 0x820   : > { %v5732_v8 = vadd.f32 %v5713_v14, %v5666_v15  ;;  %v5584_v38 = vpop.f32.mrf.mxu1 }
 0x821   : > { %v5601_v59 = vadd.f32 %v5584_v38, %v10173_v36  ;;  %v6327_v36 = vld [vmem:[%s10314_s7 + $0x6] sm:$0x3] }
 0x822   : > { %v6036_v28 = vsel %vm5107_vm9, %v6327_v36, 0 }
 0x823   : > { %6045 = vmatpush.bf16.msrb.mxu1 %v6036_v28 }
 0x825   : > { %v5650_v45 = vpop.f32.mrf.mxu2 }
 0x826   : > { %v5667_v62 = vadd.f32 %v5650_v45, %v5601_v59 }
 0x827   : > { %v5716_v12 = vpop.f32.mrf.mxu3 }
 0x828   : > { %v5733_v54 = vadd.f32 %v5716_v12, %v5667_v62  ;;  %v5586_v30 = vpop.f32.mrf.mxu1 }
 0x829   : > { %v5602_v46 = vadd.f32 %v5586_v30, %v10179_v10 }
 0x82d   : > { %v5652_v9 = vpop.f32.mrf.mxu2 }
 0x82e   : > { %v5668_v55 = vadd.f32 %v5652_v9, %v5602_v46 }
 0x82f   : > { %v5718_v13 = vpop.f32.mrf.mxu3 }
 0x830   : > { %v5589_v22 = vpop.f32.mrf.mxu1  ;;  %v5734_v14 = vadd.f32 %v5718_v13, %v5668_v55 }
 0x831   : > { %v5603_v53 = vadd.f32 %v5589_v22, %v5537_v26 }
 0x835   : > { %v5655_v58 = vpop.f32.mrf.mxu2 }
 0x836   : > { %v5669_v2 = vadd.f32 %v5655_v58, %v5603_v53 }
 0x837   : > { %v5721_v44 = vpop.f32.mrf.mxu3 }
 0x838   : > { %v10211_v35 = vadd.f32 %v5721_v44, %v5669_v2  ;;  %v5591_v1 = vpop.f32.mrf.mxu1 }
 0x839   : > { %v5604_v4 = vadd.f32 %v5591_v1, %v5538_v60 }
 0x83d   : > { %v5657_v5 = vpop.f32.mrf.mxu2 }
 0x83e   : > { %v5670_v7 = vadd.f32 %v5657_v5, %v5604_v4 }
 0x83f   : > { %v5723_v20 = vpop.f32.mrf.mxu3 }
 0x840   : > { %v10217_v50 = vadd.f32 %v5723_v20, %v5670_v7  ;;  %v5594_v24 = vpop.f32.mrf.mxu1 }
 0x841   : > { %v5605_v56 = vadd.f32 %v5594_v24, %v5539_v18 }
 0x845   : > { %v5660_v6 = vpop.f32.mrf.mxu2 }
 0x846   : > { %v5671_v39 = vadd.f32 %v5660_v6, %v5605_v56 }
 0x847   : > { %v5726_v42 = vpop.f32.mrf.mxu3 }
 0x848   : > { %v10219_v27 = vadd.f32 %v5726_v42, %v5671_v39  ;;  %v10221_v26 = vpop.f32.mrf.mxu1 }
 0x84d   : > { %v10223_v23 = vpop.f32.mrf.mxu2 }
 0x84f   : > { %v10225_v51 = vpop.f32.mrf.mxu3 }
 0x850   : > { %v5778_v33 = vpop.f32.mrf.mxu1 }
 0x851   : > { %v5798_v60 = vadd.f32 %v5778_v33, %v5731_v63  ;;  %v5606_v33 = vadd.f32 %v10221_v26, %v10206_v31 }
 0x855   : > { %v5844_v40 = vpop.f32.mrf.mxu2 }
 0x856   : > { %v5864_v3 = vadd.f32 %v5844_v40, %v5798_v60 }
 0x857   : > { %v5910_v41 = vpop.f32.mrf.mxu3 }
 0x858   : > { %v5780_v21 = vpop.f32.mrf.mxu1  ;;  %v5930_v52 = vadd.f32 %v5910_v41, %v5864_v3  ;;  %v5672_v3 = vadd.f32 %v10223_v23, %v5606_v33 }
 0x859   : > { %v5799_v16 = vadd.f32 %v5780_v21, %v5732_v8 }
 0x85a   : > { %v5942_v25 = vadd.f32 %v10230_v17, %v5930_v52  ;;  %v5738_v61 = vadd.f32 %v10225_v51, %v5672_v3 }
 0x85c   : > { %v5950_v11 = vmax.f32 %v5942_v25, 0.0 }
 0x85d   : > { %v5846_v19 = vpop.f32.mrf.mxu2 }
 0x85e   : > { %v5865_v47 = vadd.f32 %v5846_v19, %v5799_v16 }
 0x85f   : > { %v5912_v18 = vpop.f32.mrf.mxu3 }
 0x860   : > { %v5931_v43 = vadd.f32 %v5912_v18, %v5865_v47  ;;  %v5783_v37 = vpop.f32.mrf.mxu1 }
 0x861   : > { %v5800_v48 = vadd.f32 %v5783_v37, %v5733_v54  ;;  %v6325_v54 = vld [vmem:[%s10314_s7 + $0x4] sm:$0x3] }
 0x862   : > { %v5943_v29 = vadd.f32 %v10230_v17, %v5931_v43  ;;  %v6014_v5 = vsel %vm5107_vm9, %v6325_v54, 0 }
 0x864   : > { %v5951_v0 = vmax.f32 %v5943_v29, 0.0 }
 0x865   : > { %v5849_v34 = vpop.f32.mrf.mxu2 }
 0x866   : > { %v5958_v63 = vmax.f32 %v5950_v11, %v5951_v0  ;;  %v5866_v49 = vadd.f32 %v5849_v34, %v5800_v48 }
 0x867   : > { %v5915_v32 = vpop.f32.mrf.mxu3 }
 0x868   : > { %v5785_v15 = vpop.f32.mrf.mxu1  ;;  %v5932_v8 = vadd.f32 %v5915_v32, %v5866_v49  ;;  %v5962_v16 = vpack.c.bf16 %v5958_v63, %v5958_v63 }
 0x869   : > { %v5801_v38 = vadd.f32 %v5785_v15, %v5734_v14  ;;  %v6513_v15 = vld [vmem:[%s10315_s8] ss:$0 sm:$0xff] }
 0x86a   : > { %v5944_v12 = vadd.f32 %v10230_v17, %v5932_v8 }
 0x86c   : > { %v5952_v30 = vmax.f32 %v5944_v12, 0.0 }
 0x86d   : > { %v5851_v59 = vpop.f32.mrf.mxu2 }
 0x86e   : > { %v5867_v45 = vadd.f32 %v5851_v59, %v5801_v38 }
 0x86f   : > { %v5917_v62 = vpop.f32.mrf.mxu3 }
 0x870   : > { %v5933_v22 = vadd.f32 %v5917_v62, %v5867_v45  ;;  %v5788_v53 = vpop.f32.mrf.mxu1 }
 0x871   : > { %v5802_v13 = vadd.f32 %v5788_v53, %v10211_v35 }
 0x872   : > { %v5945_v10 = vadd.f32 %v10230_v17, %v5933_v22 }
 0x874   : > { %v5953_v58 = vmax.f32 %v5945_v10, 0.0 }
 0x875   : > { %v5854_v9 = vpop.f32.mrf.mxu2 }
 0x876   : > { %v5959_v2 = vmax.f32 %v5952_v30, %v5953_v58  ;;  %v5868_v4 = vadd.f32 %v5854_v9, %v5802_v13 }
 0x877   : > { %v5920_v44 = vpop.f32.mrf.mxu3 }
 0x878   : > { %v5963_v1 = vpack.c.bf16 %v5959_v2, %v5959_v2  ;;  %v5790_v36 = vpop.f32.mrf.mxu1  ;;  %v5934_v28 = vadd.f32 %v5920_v44, %v5868_v4 }
 0x879   : > { %v5803_v7 = vadd.f32 %v5790_v36, %v10217_v50 }
 0x87a   : > { %6323 = vmatmul.msk.bf16.vlgmr.msrb.gmra.mxu0 %vm5969_vm0, %v5963_v1  ;;  %v5946_v6 = vadd.f32 %v10230_v17, %v5934_v28 }
 0x87b   : > { %6023 = vmatpush.bf16.msrb.mxu0 %v6014_v5 }
 0x87c   : > { %v5954_v40 = vmax.f32 %v5946_v6, 0.0 }
 0x87d   : > { %v5856_v20 = vpop.f32.mrf.mxu2 }
 0x87e   : > { %v5869_v24 = vadd.f32 %v5856_v20, %v5803_v7 }
 0x87f   : > { %v5922_v56 = vpop.f32.mrf.mxu3 }
 0x880   : > { %v5935_v39 = vadd.f32 %v5922_v56, %v5869_v24  ;;  %v5793_v35 = vpop.f32.mrf.mxu1 }
 0x881   : > { %v5804_v50 = vadd.f32 %v5793_v35, %v10219_v27 }
 0x882   : > { %v5947_v42 = vadd.f32 %v10230_v17, %v5935_v39 }
 0x884   : > { %v5955_v60 = vmax.f32 %v5947_v42, 0.0 }
 0x885   : > { %v5859_v41 = vpop.f32.mrf.mxu2 }
 0x886   : > { %v5960_v21 = vmax.f32 %v5954_v40, %v5955_v60  ;;  %v5870_v57 = vadd.f32 %v5859_v41, %v5804_v50 }
 0x887   : > { %v5925_v52 = vpop.f32.mrf.mxu3 }
 0x888   : > { %v5795_v19 = vpop.f32.mrf.mxu1  ;;  %v5936_v47 = vadd.f32 %v5925_v52, %v5870_v57  ;;  %v5964_v11 = vpack.c.bf16 %v5960_v21, %v5960_v21 }
 0x889   : > { %v5805_v18 = vadd.f32 %v5795_v19, %v5738_v61 }
 0x88a   : > { %6324 = vmatmul.msk.bf16.vlgmr.msra.gmra.mxu0 %vm5969_vm0, %v5962_v16  ;;  %v5948_v23 = vadd.f32 %v10230_v17, %v5936_v47 }
 0x88c   : > { %v5956_v37 = vmax.f32 %v5948_v23, 0.0 }
 0x88d   : > { %v5861_v25 = vpop.f32.mrf.mxu2 }
 0x88e   : > { %v5871_v31 = vadd.f32 %v5861_v25, %v5805_v18 }
 0x88f   : > { %v5927_v26 = vpop.f32.mrf.mxu3 }
 0x890   : > { %v5937_v43 = vadd.f32 %v5927_v26, %v5871_v31 }
 0x892   : > { %v5949_v27 = vadd.f32 %v10230_v17, %v5937_v43 }
 0x894   : > { %v5957_v29 = vmax.f32 %v5949_v27, 0.0 }
 0x896   : > { %v5961_v46 = vmax.f32 %v5956_v37, %v5957_v29 }
 0x898   : > { %v5965_v51 = vpack.c.bf16 %v5961_v46, %v5961_v46 }
 0x89a   : > { %6326 = vmatmul.msk.bf16.vlgmr.msrb.gmra.mxu0 %vm5969_vm0, %v5964_v11  ;;  %6328 = vmatmul.msk.bf16.vlgmr.msrb.gmra.mxu1 %vm5969_vm0, %v5965_v51 }
 0x8f7   : > { %v5985_v0 = vpop.f32.mrf.mxu0 }
 0x8ff   : > { %v5987_v34 = vpop.f32.mrf.mxu0 }
 0x907   : > { %v6004_v55 = vpop.f32.mrf.mxu0 }
 0x908   : > { %v6005_v48 = vadd.f32 %v6004_v55, %v5985_v0 }
 0x90f   : > { %v6006_v63 = vpop.f32.mrf.mxu0 }
 0x917   : > { %v6025_v17 = vpop.f32.mrf.mxu0  ;;  %v6047_v32 = vpop.f32.mrf.mxu1 }
 0x918   : > { %v6029_v49 = vadd.f32 %v6025_v17, %v6005_v48 }
 0x91a   : > { %v6051_v14 = vadd.f32 %v6047_v32, %v6029_v49 }
 0x91c   : > { %v6056_v8 = vadd.f32 %v6513_v15, %v6051_v14 }
 0x91e   : > { %6058 = vst.msk [vmem:[%s349_s1] sm:$0xff] %vm6057_vm4, %v6056_v8 }
 0x91f   : > { %v6027_v38 = vpop.f32.mrf.mxu0  ;;  %v6049_v59 = vpop.f32.mrf.mxu1 }
 0x920   : > { %6559 = shalt.err (!%p6556_p7)
}
 0x921   : > { %6336 = dma.vmem_to_hbm [thread:$0]  (%p6730_p3), %s6075_s13, 128, %s6077_s2, %s6060_s12  }
 0x922 PF: > { %p6342_p9 = scmp.ge.s32.totalorder %s6626_s16, 2  ;;  %s6088_s1 = sand.u32 1, %s6598_s30  }
 0x923   : > { %s6089_s17 = scalar_lea.sflag [#allocation5], %s6088_s1 }
 0x924   : > { %p6339_p10 = pnand %p6342_p9, %p6739_p8 }
 0x926   : > { %p6340_p11 = pneg %p6339_p10 }
 0x928   : > { %6593 = dma.done.wait (%p6340_p11), %s6089_s17, 128  }
 0x929   : > { %6595 = vsyncadd (%p6340_p11), %s6089_s17, 4294967168  ;;  %s22_s16 = sadd.s32 1, %s6626_s16   ;;  %s11229_s2 = sld [smem:[#allocation7_spill]] }
 0x92a   : > { %p19_p12 = scmp.ge.s32.totalorder %s22_s16, 6   ;;  %s11230_s30 = smov %s6602_s10 }
 0x92b   : > { %s11231_s10 = smov %s6606_s11  ;;  %s11232_s11 = smov %s6748_s27 }
 0x92c   : > { %s11233_s12 = smov %s6618_s14  ;;  %s11234_s13 = smov %s6622_s15 }
 0x92d   : > { %s11235_s14 = smov %s11238_s19  ;;  %21 = sbr.rel (!%p19_p12) target bundleno = 9 (0x9), region = 186 }
 0x92f   : > { %s11236_s15 = smov %s11229_s2 }
 0x932   :  { %6095 = vsyncpa [#allocation5], 1 }
 0x933   :  { %6097 = vsyncpa [#allocation5 + $0x1], 1 }

</bundles_post_ra>
